<compile_context>
chip_gen: v7x
topology: tpu7x:2x2x1
jax: 0.10.0
libtpu: 0.0.40
codegen_flags: <defaults>
</compile_context>

<pallas_src>
import jax
import jax.numpy as jnp
from jax import lax
from jax.experimental import pallas as pl
from jax.experimental.pallas import tpu as pltpu


def _make_kernel(H, W):
    HW = H * W

    def kernel(x_ref, w1_ref, b1_ref, w2_ref, b2_ref, o_ref):
        # x_ref: (1, H*W, C) f32.  w*_ref: (9*C, C) bf16 (BN-scale folded).
        # b*_ref: (1, C) f32.  o_ref: (1, H*W, C) f32.

        # Flat row index -> image column, for the left/right boundary masks.
        r = lax.broadcasted_iota(jnp.int32, (HW, 1), 0)
        col = r % W

        def conv3x3(t_f32, w_ref):
            """3x3 same-conv as one K=9C MXU matmul (bf16 in, f32 accumulate)."""
            C = t_f32.shape[-1]
            t = t_f32.astype(jnp.bfloat16)
            # Zero-pad the flat (H*W, C) buffer with PADR rows on each side.
            # PADR >= W+1 covers every (dy, dx) offset; W+8 keeps the body
            # 8-row (sublane) aligned.
            PADR = W + 8
            pad = jnp.zeros((PADR, C), jnp.bfloat16)
            tp = jnp.concatenate([pad, t, pad], axis=0)   # (HW + 2*PADR, C)

            pieces = []
            for dy in (-1, 0, 1):
                for dx in (-1, 0, 1):
                    start = PADR + dy * W + dx            # static offset
                    tap = tp[start:start + HW]            # (HW, C)
                    # Top/bottom (dy) boundaries are handled by the zero pad;
                    # only the column wrap for dx = +/-1 needs masking.
                    if dx == 1:
                        tap = jnp.where(col < W - 1, tap, 0.0)
                    elif dx == -1:
                        tap = jnp.where(col >= 1, tap, 0.0)
                    pieces.append(tap)
            im2col = jnp.concatenate(pieces, axis=-1)     # (HW, 9C) bf16
            return jnp.dot(im2col, w_ref[...],
                           preferred_element_type=jnp.float32)   # (HW, Cout) f32

        # conv1 + bn1 (scale folded into w1) + relu
        y1 = jnp.maximum(conv3x3(x_ref[0], w1_ref) + b1_ref[...], 0.0)
        # conv2 + bn2 (scale folded into w2)
        y2 = conv3x3(y1, w2_ref) + b2_ref[...]
        # residual add (re-read x from the resident VMEM block) + relu
        o_ref[0] = jnp.maximum(y2 + x_ref[0], 0.0)

    return kernel


def basicblock_forward(x_nchw, params):
    w1, b1, w2, b2 = params
    N, Cin, H, W = x_nchw.shape
    P = w1.shape[1]
    assert Cin == P, "downsample=None requires inplanes == planes"

    # NCHW -> NHWC -> (N, H*W, C): channels on the lane axis, spatial rows on
    # sublanes.  (In a full NHWC network these wrapper transposes disappear.)
    x = jnp.transpose(x_nchw, (0, 2, 3, 1)).reshape(N, H * W, Cin)

    out = pl.pallas_call(
        _make_kernel(H, W),
        out_shape=jax.ShapeDtypeStruct((N, H * W, P), jnp.float32),
        grid=(N,),
        in_specs=[
            pl.BlockSpec((1, H * W, Cin), lambda n: (n, 0, 0)),
            pl.BlockSpec(w1.shape, lambda n: (0, 0)),
            pl.BlockSpec(b1.shape, lambda n: (0, 0)),
            pl.BlockSpec(w2.shape, lambda n: (0, 0)),
            pl.BlockSpec(b2.shape, lambda n: (0, 0)),
        ],
        out_specs=pl.BlockSpec((1, H * W, P), lambda n: (n, 0, 0)),
        compiler_params=pltpu.CompilerParams(
            dimension_semantics=("parallel",)),
    )(x, w1, b1, w2, b2)

    return jnp.transpose(out.reshape(N, H, W, P), (0, 3, 1, 2))   # back to NCHW


def make_params(key, inplanes, planes):
    """Deterministic synthetic parameters (no checkpoint load)."""
    assert inplanes == planes, "downsample=None requires inplanes == planes"
    eps = 1e-5
    ks = jax.random.split(key, 10)

    def bn_fold(kg, kb, km, kv, c):
        gamma = 1.0 + 0.1 * jax.random.normal(kg, (c,), jnp.float32)
        beta = 0.1 * jax.random.normal(kb, (c,), jnp.float32)
        mean = 0.1 * jax.random.normal(km, (c,), jnp.float32)
        var = jnp.abs(jax.random.normal(kv, (c,), jnp.float32)) + 0.5
        scale = gamma / jnp.sqrt(var + eps)
        bias = beta - mean * scale
        return scale, bias

    w1_hwio = 0.1 * jax.random.normal(ks[0], (3, 3, inplanes, planes), jnp.float32)
    w2_hwio = 0.1 * jax.random.normal(ks[1], (3, 3, planes, planes), jnp.float32)
    s1, b1 = bn_fold(ks[2], ks[3], ks[4], ks[5], planes)
    s2, b2 = bn_fold(ks[6], ks[7], ks[8], ks[9], planes)

    # Fold BN scale into the conv weights (per output channel), flatten to the
    # im2col K-order ((ky, kx, cin) row-major) and cast to bf16 for the MXU.
    w1_mm = (w1_hwio * s1).reshape(9 * inplanes, planes).astype(jnp.bfloat16)
    w2_mm = (w2_hwio * s2).reshape(9 * planes, planes).astype(jnp.bfloat16)

    kernel_params = (w1_mm, b1.reshape(1, planes), w2_mm, b2.reshape(1, planes))
    ref_params = (w1_hwio, s1, b1, w2_hwio, s2, b2)
    return kernel_params, ref_params


def reference_forward(x_nchw, ref_params):
    """Pure-JAX f32 reference (lax.conv) for correctness checking."""
    w1_hwio, s1, b1, w2_hwio, s2, b2 = ref_params
    x = jnp.transpose(x_nchw, (0, 2, 3, 1))        # NHWC
    dn = ("NHWC", "HWIO", "NHWC")

    y = lax.conv_general_dilated(x, w1_hwio, (1, 1), ((1, 1), (1, 1)),
                                 dimension_numbers=dn)
    y = jnp.maximum(y * s1 + b1, 0.0)
    y = lax.conv_general_dilated(y, w2_hwio, (1, 1), ((1, 1), (1, 1)),
                                 dimension_numbers=dn)
    y = y * s2 + b2
    y = jnp.maximum(y + x, 0.0)
    return jnp.transpose(y, (0, 3, 1, 2))          # NCHW


if __name__ == "__main__":
    # BasicBlock with downsample=None => inplanes == planes, stride = 1.
    # planes = 128 keeps the channel (lane) axis dense on the 128-wide vreg.
    N, planes, H, W = 2, 128, 16, 16

    key = jax.random.PRNGKey(0)
    kx, kp = jax.random.split(key)
    x = jax.random.normal(kx, (N, planes, H, W), jnp.float32)   # NCHW like PyTorch

    kernel_params, ref_params = make_params(kp, planes, planes)

    out = jax.block_until_ready(basicblock_forward(x, kernel_params))
    ref = jax.block_until_ready(reference_forward(x, ref_params))

    assert out.shape == (N, planes, H, W)
    rel_err = float(jnp.max(jnp.abs(out - ref)) / (jnp.max(jnp.abs(ref)) + 1e-6))
    # bf16 MXU inputs vs f32 reference -> loose-ish tolerance.
    assert rel_err < 5e-2, rel_err

    print("KERNEL_OK")
</pallas_src>

<mosaic_0001>
module attributes {stable_mosaic.version = 11 : i64} {
  func.func @kernel(%arg0: i32, %arg1: memref<1x256x128xf32, #tpu.memory_space<vmem>>, %arg2: memref<1152x128xbf16, #tpu.memory_space<vmem>>, %arg3: memref<1x128xf32, #tpu.memory_space<vmem>>, %arg4: memref<1152x128xbf16, #tpu.memory_space<vmem>>, %arg5: memref<1x128xf32, #tpu.memory_space<vmem>>, %arg6: memref<1x256x128xf32, #tpu.memory_space<vmem>>) attributes {dimension_semantics = [#tpu.dimension_semantics<parallel>], iteration_bounds = array<i64: 2>, scalar_prefetch = 0 : i64, scratch_operands = 0 : i64, tpu.core_type = #tpu.core_type<tc>, window_params = [{transform_indices = @transform_0, window_bounds = array<i64: 1, 256, 128>}, {pipeline_mode = #tpu.pipeline_mode<synchronous>, transform_indices = @transform_1, window_bounds = array<i64: 1152, 128>}, {pipeline_mode = #tpu.pipeline_mode<synchronous>, transform_indices = @transform_2, window_bounds = array<i64: 1, 128>}, {pipeline_mode = #tpu.pipeline_mode<synchronous>, transform_indices = @transform_3, window_bounds = array<i64: 1152, 128>}, {pipeline_mode = #tpu.pipeline_mode<synchronous>, transform_indices = @transform_4, window_bounds = array<i64: 1, 128>}, {transform_indices = @transform_5, window_bounds = array<i64: 1, 256, 128>}]} {
    %0 = tpu.iota {dimensions = array<i32: 0>} : vector<256x1xi32>
    %c16_i32 = arith.constant 16 : i32
    %c0_i32 = arith.constant 0 : i32
    %1 = arith.cmpi eq, %c16_i32, %c0_i32 : i32
    %c1_i32 = arith.constant 1 : i32
    %2 = arith.select %1, %c1_i32, %c16_i32 : i32
    %3 = vector.broadcast %2 : i32 to vector<256x1xi32>
    %4 = arith.remsi %0, %3 : vector<256x1xi32>
    %c0_i32_0 = arith.constant 0 : i32
    %5 = vector.broadcast %c0_i32_0 : i32 to vector<256x1xi32>
    %6 = arith.cmpi ne, %4, %5 : vector<256x1xi32>
    %c0_i32_1 = arith.constant 0 : i32
    %7 = vector.broadcast %c0_i32_1 : i32 to vector<256x1xi32>
    %8 = arith.cmpi slt, %4, %7 : vector<256x1xi32>
    %c0_i32_2 = arith.constant 0 : i32
    %9 = arith.cmpi slt, %2, %c0_i32_2 : i32
    %10 = vector.broadcast %9 : i1 to vector<256x1xi1>
    %11 = vector.broadcast %10 : vector<256x1xi1> to vector<256x1xi1>
    %12 = arith.xori %8, %11 : vector<256x1xi1>
    %13 = arith.andi %12, %6 : vector<256x1xi1>
    %14 = vector.broadcast %2 : i32 to vector<256x1xi32>
    %15 = arith.addi %4, %14 : vector<256x1xi32>
    %16 = arith.select %13, %15, %4 : vector<256x1xi1>, vector<256x1xi32>
    %c0 = arith.constant 0 : index
    %c0_3 = arith.constant 0 : index
    %c0_4 = arith.constant 0 : index
    %17 = vector.load %arg1[%c0, %c0_3, %c0_4] : memref<1x256x128xf32, #tpu.memory_space<vmem>>, vector<1x256x128xf32>
    %18 = vector.shape_cast %17 : vector<1x256x128xf32> to vector<256x128xf32>
    %19 = arith.truncf %18 : vector<256x128xf32> to vector<256x128xbf16>
    %cst = arith.constant 0.000000e+00 : bf16
    %20 = vector.broadcast %cst : bf16 to vector<24x128xbf16>
    %21 = tpu.concatenate %20, %19, %20 in 0 : vector<24x128xbf16>, vector<256x128xbf16>, vector<24x128xbf16> -> vector<304x128xbf16>
    %22 = vector.extract_strided_slice %21 {offsets = [7, 0], sizes = [256, 128], strides = [1, 1]} : vector<304x128xbf16> to vector<256x128xbf16>
    %c1_i32_5 = arith.constant 1 : i32
    %23 = vector.broadcast %c1_i32_5 : i32 to vector<256x1xi32>
    %24 = arith.cmpi sge, %16, %23 : vector<256x1xi32>
    %cst_6 = arith.constant 0.000000e+00 : f32
    %25 = arith.truncf %cst_6 : f32 to bf16
    %26 = vector.shape_cast %24 : vector<256x1xi1> to vector<256x1xi1>
    %27 = vector.broadcast %26 : vector<256x1xi1> to vector<256x128xi1>
    %28 = vector.broadcast %25 : bf16 to vector<256x128xbf16>
    %29 = arith.select %27, %22, %28 : vector<256x128xi1>, vector<256x128xbf16>
    %30 = vector.extract_strided_slice %21 {offsets = [8, 0], sizes = [256, 128], strides = [1, 1]} : vector<304x128xbf16> to vector<256x128xbf16>
    %31 = vector.extract_strided_slice %21 {offsets = [9, 0], sizes = [256, 128], strides = [1, 1]} : vector<304x128xbf16> to vector<256x128xbf16>
    %c15_i32 = arith.constant 15 : i32
    %32 = vector.broadcast %c15_i32 : i32 to vector<256x1xi32>
    %33 = arith.cmpi slt, %16, %32 : vector<256x1xi32>
    %cst_7 = arith.constant 0.000000e+00 : f32
    %34 = arith.truncf %cst_7 : f32 to bf16
    %35 = vector.shape_cast %33 : vector<256x1xi1> to vector<256x1xi1>
    %36 = vector.broadcast %35 : vector<256x1xi1> to vector<256x128xi1>
    %37 = vector.broadcast %34 : bf16 to vector<256x128xbf16>
    %38 = arith.select %36, %31, %37 : vector<256x128xi1>, vector<256x128xbf16>
    %39 = vector.extract_strided_slice %21 {offsets = [23, 0], sizes = [256, 128], strides = [1, 1]} : vector<304x128xbf16> to vector<256x128xbf16>
    %c1_i32_8 = arith.constant 1 : i32
    %40 = vector.broadcast %c1_i32_8 : i32 to vector<256x1xi32>
    %41 = arith.cmpi sge, %16, %40 : vector<256x1xi32>
    %cst_9 = arith.constant 0.000000e+00 : f32
    %42 = arith.truncf %cst_9 : f32 to bf16
    %43 = vector.shape_cast %41 : vector<256x1xi1> to vector<256x1xi1>
    %44 = vector.broadcast %43 : vector<256x1xi1> to vector<256x128xi1>
    %45 = vector.broadcast %42 : bf16 to vector<256x128xbf16>
    %46 = arith.select %44, %39, %45 : vector<256x128xi1>, vector<256x128xbf16>
    %47 = vector.extract_strided_slice %21 {offsets = [24, 0], sizes = [256, 128], strides = [1, 1]} : vector<304x128xbf16> to vector<256x128xbf16>
    %48 = vector.extract_strided_slice %21 {offsets = [25, 0], sizes = [256, 128], strides = [1, 1]} : vector<304x128xbf16> to vector<256x128xbf16>
    %c15_i32_10 = arith.constant 15 : i32
    %49 = vector.broadcast %c15_i32_10 : i32 to vector<256x1xi32>
    %50 = arith.cmpi slt, %16, %49 : vector<256x1xi32>
    %cst_11 = arith.constant 0.000000e+00 : f32
    %51 = arith.truncf %cst_11 : f32 to bf16
    %52 = vector.shape_cast %50 : vector<256x1xi1> to vector<256x1xi1>
    %53 = vector.broadcast %52 : vector<256x1xi1> to vector<256x128xi1>
    %54 = vector.broadcast %51 : bf16 to vector<256x128xbf16>
    %55 = arith.select %53, %48, %54 : vector<256x128xi1>, vector<256x128xbf16>
    %56 = vector.extract_strided_slice %21 {offsets = [39, 0], sizes = [256, 128], strides = [1, 1]} : vector<304x128xbf16> to vector<256x128xbf16>
    %c1_i32_12 = arith.constant 1 : i32
    %57 = vector.broadcast %c1_i32_12 : i32 to vector<256x1xi32>
    %58 = arith.cmpi sge, %16, %57 : vector<256x1xi32>
    %cst_13 = arith.constant 0.000000e+00 : f32
    %59 = arith.truncf %cst_13 : f32 to bf16
    %60 = vector.shape_cast %58 : vector<256x1xi1> to vector<256x1xi1>
    %61 = vector.broadcast %60 : vector<256x1xi1> to vector<256x128xi1>
    %62 = vector.broadcast %59 : bf16 to vector<256x128xbf16>
    %63 = arith.select %61, %56, %62 : vector<256x128xi1>, vector<256x128xbf16>
    %64 = vector.extract_strided_slice %21 {offsets = [40, 0], sizes = [256, 128], strides = [1, 1]} : vector<304x128xbf16> to vector<256x128xbf16>
    %65 = vector.extract_strided_slice %21 {offsets = [41, 0], sizes = [256, 128], strides = [1, 1]} : vector<304x128xbf16> to vector<256x128xbf16>
    %c15_i32_14 = arith.constant 15 : i32
    %66 = vector.broadcast %c15_i32_14 : i32 to vector<256x1xi32>
    %67 = arith.cmpi slt, %16, %66 : vector<256x1xi32>
    %cst_15 = arith.constant 0.000000e+00 : f32
    %68 = arith.truncf %cst_15 : f32 to bf16
    %69 = vector.shape_cast %67 : vector<256x1xi1> to vector<256x1xi1>
    %70 = vector.broadcast %69 : vector<256x1xi1> to vector<256x128xi1>
    %71 = vector.broadcast %68 : bf16 to vector<256x128xbf16>
    %72 = arith.select %70, %65, %71 : vector<256x128xi1>, vector<256x128xbf16>
    %73 = tpu.concatenate %29, %30, %38, %46, %47, %55, %63, %64, %72 in 1 : vector<256x128xbf16>, vector<256x128xbf16>, vector<256x128xbf16>, vector<256x128xbf16>, vector<256x128xbf16>, vector<256x128xbf16>, vector<256x128xbf16>, vector<256x128xbf16>, vector<256x128xbf16> -> vector<256x1152xbf16>
    %c0_16 = arith.constant 0 : index
    %c0_17 = arith.constant 0 : index
    %74 = vector.load %arg2[%c0_16, %c0_17] : memref<1152x128xbf16, #tpu.memory_space<vmem>>, vector<1152x128xbf16>
    %cst_18 = arith.constant dense<0.000000e+00> : vector<256x128xf32>
    %75 = tpu.matmul %73, %74, %cst_18 {dimension_numbers = #tpu.dot_dimension_numbers<[1], [0], [0], [1], [0, 0, 1, 1], [], []>} : vector<256x1152xbf16>, vector<1152x128xbf16>, vector<256x128xf32> -> vector<256x128xf32>
    %c0_19 = arith.constant 0 : index
    %c0_20 = arith.constant 0 : index
    %76 = vector.load %arg3[%c0_19, %c0_20] : memref<1x128xf32, #tpu.memory_space<vmem>>, vector<1x128xf32>
    %77 = vector.broadcast %76 : vector<1x128xf32> to vector<256x128xf32>
    %78 = arith.addf %75, %77 : vector<256x128xf32>
    %cst_21 = arith.constant 0.000000e+00 : f32
    %79 = vector.broadcast %cst_21 : f32 to vector<256x128xf32>
    %80 = arith.maximumf %78, %79 : vector<256x128xf32>
    %81 = arith.truncf %80 : vector<256x128xf32> to vector<256x128xbf16>
    %cst_22 = arith.constant 0.000000e+00 : bf16
    %82 = vector.broadcast %cst_22 : bf16 to vector<24x128xbf16>
    %83 = tpu.concatenate %82, %81, %82 in 0 : vector<24x128xbf16>, vector<256x128xbf16>, vector<24x128xbf16> -> vector<304x128xbf16>
    %84 = vector.extract_strided_slice %83 {offsets = [7, 0], sizes = [256, 128], strides = [1, 1]} : vector<304x128xbf16> to vector<256x128xbf16>
    %c1_i32_23 = arith.constant 1 : i32
    %85 = vector.broadcast %c1_i32_23 : i32 to vector<256x1xi32>
    %86 = arith.cmpi sge, %16, %85 : vector<256x1xi32>
    %cst_24 = arith.constant 0.000000e+00 : f32
    %87 = arith.truncf %cst_24 : f32 to bf16
    %88 = vector.shape_cast %86 : vector<256x1xi1> to vector<256x1xi1>
    %89 = vector.broadcast %88 : vector<256x1xi1> to vector<256x128xi1>
    %90 = vector.broadcast %87 : bf16 to vector<256x128xbf16>
    %91 = arith.select %89, %84, %90 : vector<256x128xi1>, vector<256x128xbf16>
    %92 = vector.extract_strided_slice %83 {offsets = [8, 0], sizes = [256, 128], strides = [1, 1]} : vector<304x128xbf16> to vector<256x128xbf16>
    %93 = vector.extract_strided_slice %83 {offsets = [9, 0], sizes = [256, 128], strides = [1, 1]} : vector<304x128xbf16> to vector<256x128xbf16>
    %c15_i32_25 = arith.constant 15 : i32
    %94 = vector.broadcast %c15_i32_25 : i32 to vector<256x1xi32>
    %95 = arith.cmpi slt, %16, %94 : vector<256x1xi32>
    %cst_26 = arith.constant 0.000000e+00 : f32
    %96 = arith.truncf %cst_26 : f32 to bf16
    %97 = vector.shape_cast %95 : vector<256x1xi1> to vector<256x1xi1>
    %98 = vector.broadcast %97 : vector<256x1xi1> to vector<256x128xi1>
    %99 = vector.broadcast %96 : bf16 to vector<256x128xbf16>
    %100 = arith.select %98, %93, %99 : vector<256x128xi1>, vector<256x128xbf16>
    %101 = vector.extract_strided_slice %83 {offsets = [23, 0], sizes = [256, 128], strides = [1, 1]} : vector<304x128xbf16> to vector<256x128xbf16>
    %c1_i32_27 = arith.constant 1 : i32
    %102 = vector.broadcast %c1_i32_27 : i32 to vector<256x1xi32>
    %103 = arith.cmpi sge, %16, %102 : vector<256x1xi32>
    %cst_28 = arith.constant 0.000000e+00 : f32
    %104 = arith.truncf %cst_28 : f32 to bf16
    %105 = vector.shape_cast %103 : vector<256x1xi1> to vector<256x1xi1>
    %106 = vector.broadcast %105 : vector<256x1xi1> to vector<256x128xi1>
    %107 = vector.broadcast %104 : bf16 to vector<256x128xbf16>
    %108 = arith.select %106, %101, %107 : vector<256x128xi1>, vector<256x128xbf16>
    %109 = vector.extract_strided_slice %83 {offsets = [24, 0], sizes = [256, 128], strides = [1, 1]} : vector<304x128xbf16> to vector<256x128xbf16>
    %110 = vector.extract_strided_slice %83 {offsets = [25, 0], sizes = [256, 128], strides = [1, 1]} : vector<304x128xbf16> to vector<256x128xbf16>
    %c15_i32_29 = arith.constant 15 : i32
    %111 = vector.broadcast %c15_i32_29 : i32 to vector<256x1xi32>
    %112 = arith.cmpi slt, %16, %111 : vector<256x1xi32>
    %cst_30 = arith.constant 0.000000e+00 : f32
    %113 = arith.truncf %cst_30 : f32 to bf16
    %114 = vector.shape_cast %112 : vector<256x1xi1> to vector<256x1xi1>
    %115 = vector.broadcast %114 : vector<256x1xi1> to vector<256x128xi1>
    %116 = vector.broadcast %113 : bf16 to vector<256x128xbf16>
    %117 = arith.select %115, %110, %116 : vector<256x128xi1>, vector<256x128xbf16>
    %118 = vector.extract_strided_slice %83 {offsets = [39, 0], sizes = [256, 128], strides = [1, 1]} : vector<304x128xbf16> to vector<256x128xbf16>
    %c1_i32_31 = arith.constant 1 : i32
    %119 = vector.broadcast %c1_i32_31 : i32 to vector<256x1xi32>
    %120 = arith.cmpi sge, %16, %119 : vector<256x1xi32>
    %cst_32 = arith.constant 0.000000e+00 : f32
    %121 = arith.truncf %cst_32 : f32 to bf16
    %122 = vector.shape_cast %120 : vector<256x1xi1> to vector<256x1xi1>
    %123 = vector.broadcast %122 : vector<256x1xi1> to vector<256x128xi1>
    %124 = vector.broadcast %121 : bf16 to vector<256x128xbf16>
    %125 = arith.select %123, %118, %124 : vector<256x128xi1>, vector<256x128xbf16>
    %126 = vector.extract_strided_slice %83 {offsets = [40, 0], sizes = [256, 128], strides = [1, 1]} : vector<304x128xbf16> to vector<256x128xbf16>
    %127 = vector.extract_strided_slice %83 {offsets = [41, 0], sizes = [256, 128], strides = [1, 1]} : vector<304x128xbf16> to vector<256x128xbf16>
    %c15_i32_33 = arith.constant 15 : i32
    %128 = vector.broadcast %c15_i32_33 : i32 to vector<256x1xi32>
    %129 = arith.cmpi slt, %16, %128 : vector<256x1xi32>
    %cst_34 = arith.constant 0.000000e+00 : f32
    %130 = arith.truncf %cst_34 : f32 to bf16
    %131 = vector.shape_cast %129 : vector<256x1xi1> to vector<256x1xi1>
    %132 = vector.broadcast %131 : vector<256x1xi1> to vector<256x128xi1>
    %133 = vector.broadcast %130 : bf16 to vector<256x128xbf16>
    %134 = arith.select %132, %127, %133 : vector<256x128xi1>, vector<256x128xbf16>
    %135 = tpu.concatenate %91, %92, %100, %108, %109, %117, %125, %126, %134 in 1 : vector<256x128xbf16>, vector<256x128xbf16>, vector<256x128xbf16>, vector<256x128xbf16>, vector<256x128xbf16>, vector<256x128xbf16>, vector<256x128xbf16>, vector<256x128xbf16>, vector<256x128xbf16> -> vector<256x1152xbf16>
    %c0_35 = arith.constant 0 : index
    %c0_36 = arith.constant 0 : index
    %136 = vector.load %arg4[%c0_35, %c0_36] : memref<1152x128xbf16, #tpu.memory_space<vmem>>, vector<1152x128xbf16>
    %cst_37 = arith.constant dense<0.000000e+00> : vector<256x128xf32>
    %137 = tpu.matmul %135, %136, %cst_37 {dimension_numbers = #tpu.dot_dimension_numbers<[1], [0], [0], [1], [0, 0, 1, 1], [], []>} : vector<256x1152xbf16>, vector<1152x128xbf16>, vector<256x128xf32> -> vector<256x128xf32>
    %c0_38 = arith.constant 0 : index
    %c0_39 = arith.constant 0 : index
    %138 = vector.load %arg5[%c0_38, %c0_39] : memref<1x128xf32, #tpu.memory_space<vmem>>, vector<1x128xf32>
    %139 = vector.broadcast %138 : vector<1x128xf32> to vector<256x128xf32>
    %140 = arith.addf %137, %139 : vector<256x128xf32>
    %c0_40 = arith.constant 0 : index
    %c0_41 = arith.constant 0 : index
    %c0_42 = arith.constant 0 : index
    %141 = vector.load %arg1[%c0_40, %c0_41, %c0_42] : memref<1x256x128xf32, #tpu.memory_space<vmem>>, vector<1x256x128xf32>
    %142 = vector.shape_cast %141 : vector<1x256x128xf32> to vector<256x128xf32>
    %143 = arith.addf %140, %142 : vector<256x128xf32>
    %cst_43 = arith.constant 0.000000e+00 : f32
    %144 = vector.broadcast %cst_43 : f32 to vector<256x128xf32>
    %145 = arith.maximumf %143, %144 : vector<256x128xf32>
    %c0_44 = arith.constant 0 : index
    %c0_45 = arith.constant 0 : index
    %c0_46 = arith.constant 0 : index
    %146 = vector.load %arg6[%c0_44, %c0_45, %c0_46] : memref<1x256x128xf32, #tpu.memory_space<vmem>>, vector<1x256x128xf32>
    %147 = vector.shape_cast %146 : vector<1x256x128xf32> to vector<256x128xf32>
    %148 = vector.shape_cast %145 : vector<256x128xf32> to vector<1x256x128xf32>
    tpu.vector_store %arg6[%c0_44, %c0_45, %c0_46], %148 {strides = array<i32>} : memref<1x256x128xf32, #tpu.memory_space<vmem>>, vector<1x256x128xf32>,
    return
  }
  func.func @transform_0(%arg0: i32) -> (i32, i32, i32) {
    %c0_i32 = arith.constant 0 : i32
    %c0_i32_0 = arith.constant 0 : i32
    %c0_i32_1 = arith.constant 0 : i32
    return %arg0, %c0_i32, %c0_i32_0 : i32, i32, i32
  }
  func.func @transform_1(%arg0: i32) -> (i32, i32) {
    %c0_i32 = arith.constant 0 : i32
    %c0_i32_0 = arith.constant 0 : i32
    %c0_i32_1 = arith.constant 0 : i32
    return %c0_i32, %c0_i32_0 : i32, i32
  }
  func.func @transform_2(%arg0: i32) -> (i32, i32) {
    %c0_i32 = arith.constant 0 : i32
    %c0_i32_0 = arith.constant 0 : i32
    %c0_i32_1 = arith.constant 0 : i32
    return %c0_i32, %c0_i32_0 : i32, i32
  }
  func.func @transform_3(%arg0: i32) -> (i32, i32) {
    %c0_i32 = arith.constant 0 : i32
    %c0_i32_0 = arith.constant 0 : i32
    %c0_i32_1 = arith.constant 0 : i32
    return %c0_i32, %c0_i32_0 : i32, i32
  }
  func.func @transform_4(%arg0: i32) -> (i32, i32) {
    %c0_i32 = arith.constant 0 : i32
    %c0_i32_0 = arith.constant 0 : i32
    %c0_i32_1 = arith.constant 0 : i32
    return %c0_i32, %c0_i32_0 : i32, i32
  }
  func.func @transform_5(%arg0: i32) -> (i32, i32, i32) {
    %c0_i32 = arith.constant 0 : i32
    %c0_i32_0 = arith.constant 0 : i32
    %c0_i32_1 = arith.constant 0 : i32
    return %arg0, %c0_i32, %c0_i32_0 : i32, i32, i32
  }
}

</mosaic_0001>

<bundles_post_ra>
// kernel: tpu_custom_call.1
= control target key start
LH: loop header
LB: loop body
LE: loop exit
PB: predicated region body
PF: predicated region fallthrough
CT: control target
= control target key end

     0   :  { %10 = vsyncpa [#allocation3], 0  ;;  %s13002_s0 = inlined_call_operand.hbm [shape: f32[2,256,128], index: 0, kind: input, shape index: {}]   ;;  %s13003_s1 = inlined_call_operand.hbm [shape: bf16[1152,128], index: 1, kind: input, shape index: {}]   ;;  %s13004_s2 = inlined_call_operand.vmem [shape: f32[1,128], index: 2, kind: input, shape index: {}]   ;;  %s13005_s3 = inlined_call_operand.hbm [shape: bf16[1152,128], index: 3, kind: input, shape index: {}]   ;;  %s13006_s4 = inlined_call_operand.vmem [shape: f32[1,128], index: 4, kind: input, shape index: {}]   ;;  %s13007_s5 = inlined_call_operand.hbm [shape: f32[2,256,128], index: 5, kind: output, shape index: {}]  }
   0x1   :  { %12 = vsyncpa [#allocation3 + $0x1], 0 }
   0x2   :  { %13 = vsyncpa [#allocation6], 0 }
   0x3   :  { %14 = vsyncpa [#allocation4], 0 }
   0x4   :  { %16 = vsyncpa [#allocation4 + $0x1], 0  ;;  %s9489_s18 = smov 0   ;;  %s9491_s19 = smov 0  }
   0x5   :  { %s9493_s20 = smov 0   ;;  %s9495_s21 = smov 0  }
   0x6 LB: > { %s9510_s22 = sadd.s32 4294967295, %s9445_s21   ;;  %s7798_s23 = sadd.s32 4294967294, %s9445_s21   ;;  %s9445_s21 = sphi %s9495_s21, %s13602_s21   ;;  %s9441_s20 = sphi %s9493_s20, %s13601_s20   ;;  %s9437_s19 = sphi %s9491_s19, %s13600_s19   ;;  %s9433_s18 = sphi %s9489_s18, %s13599_s18  }
   0x7   : > { %p42_p0 = scmp.ne.s32.totalorder %s9437_s19, %s9433_s18  ;;  %p13008_p1 = scmp.eq.s32.totalorder %s9510_s22, 0 }
   0x8   : > { %p156_p3 = scmp.eq.s32.totalorder %s7798_s23, 1  ;;  %p7799_p5 = scmp.ge.s32.totalorder %s9445_s21, 1 }
   0x9   : > { %p9519_p4 = por %p13008_p1, %p42_p0  ;;  %p163_p7 = scmp.lt.s32.totalorder %s9445_s21, 3 }
   0xa   : > { %p9524_p6 = por %p156_p3, %p42_p0  ;;  %s9447_s27 = smov [#allocation5]  }
   0xb   : > { %s13199_s24 = scalar_select %p9519_p4, 1, 0 }
   0xc   : > { %s13200_s25 = scalar_select %p9524_p6, 1, 0 }
   0xd   : > { %p9529_p8 = pnand %p7799_p5, %p163_p7  ;;  %s175_s28 = sshll.u32 %s9447_s27, 4  ;;  %s9533_s28 = int_to_ptr.vmem [resolvable:$true] %s175_s28 }
   0xe   : > { %s9448_s30 = smov [#allocation7]   ;;  %s9289_s9 = scalar_lea.hbm %s13003_s1, 9216 }
   0xf   : > { %p9048_p9 = pneg %p9529_p8  ;;  %s191_s6 = sshll.u32 %s9448_s30, 4  ;;  %s9544_s6 = int_to_ptr.vmem [resolvable:$true] %s191_s6 }
  0x10   : > { %p9290_p12 = scmp.ne.s32.totalorder %s13003_s1, %s9289_s9  ;;  %p9296_p5 = scmp.lt.u32.totalorder %s9289_s9, %s13003_s1 }
  0x11   : > { %p9540_p11 = pnand %p9048_p9, %p13008_p1 }
  0x13   : > { %p9291_p13 = pneg %p9540_p11 }
  0x15   : > { %p9292_p0 = pnand %p9291_p13, %p9290_p12 }
  0x17   : > { %p9293_p3 = pneg %p9292_p0 }
  0x19   : > { %p9298_p7 = pnand %p9296_p5, %p9293_p3 }
  0x1b   : > { %9301 = shalt.err (!%p9298_p7)
}
  0x1c   : > { %s9302_s14 = scalar_lea.vmem %s9533_s28, 9216  ;;  %p9310_p2 = scmp.lt.s32.totalorder %s9533_s28, %s9533_s28 }
  0x1d   : > { %p9303_p9 = scmp.ne.s32.totalorder %s9533_s28, %s9302_s14  ;;  %p9311_p12 = scmp.lt.s32.totalorder %s9302_s14, %s9302_s14 }
  0x1f   : > { %p9305_p10 = pnand %p9303_p9, %p9291_p13  ;;  %p9312_p0 = por %p9311_p12, %p9310_p2 }
  0x21   : > { %p9306_p1 = pneg %p9305_p10 }
  0x23   : > { %p9313_p6 = pnand %p9312_p0, %p9306_p1 }
  0x25   : > { %9316 = shalt.err (!%p9313_p6)
}
  0x26   : > { %s9449_s15 = smov 64   ;;  %s9450_s16 = smov 4  }
  0x27   : > { %9051 = dma.hbm_to_vmem [thread:$0]  (!%p9540_p11), %s13003_s1, 9216, %s9533_s28, [#allocation6], %s9449_s15, %s9449_s15, %s9450_s16  }
  0x28   : > { %s9317_s7 = scalar_lea.hbm %s13005_s3, 9216 }
  0x29   : > { %p9318_p2 = scmp.ne.s32.totalorder %s13005_s3, %s9317_s7  ;;  %p9324_p10 = scmp.lt.u32.totalorder %s9317_s7, %s13005_s3 }
  0x2b   : > { %p9320_p1 = pnand %p9318_p2, %p9291_p13 }
  0x2d   : > { %p9321_p6 = pneg %p9320_p1 }
  0x2f   : > { %p9326_p3 = pnand %p9324_p10, %p9321_p6 }
  0x31   : > { %9329 = shalt.err (!%p9326_p3)
}
  0x32   : > { %s9330_s28 = scalar_lea.vmem %s9544_s6, 9216  ;;  %p9338_p12 = scmp.lt.s32.totalorder %s9544_s6, %s9544_s6 }
  0x33   : > { %p9331_p5 = scmp.ne.s32.totalorder %s9544_s6, %s9330_s28  ;;  %p9339_p0 = scmp.lt.s32.totalorder %s9330_s28, %s9330_s28 }
  0x35   : > { %p9333_p7 = pnand %p9331_p5, %p9291_p13  ;;  %p9340_p2 = por %p9339_p0, %p9338_p12 }
  0x37   : > { %p9334_p9 = pneg %p9333_p7 }
  0x39   : > { %p9341_p1 = pnand %p9340_p2, %p9334_p9 }
  0x3b   : > { %9344 = shalt.err (!%p9341_p1)
}
  0x3c   : > { %9054 = dma.hbm_to_vmem [thread:$0]  (!%p9540_p11), %s13005_s3, 9216, %s9544_s6, [#allocation6], %s9449_s15, %s9449_s15, %s9450_s16  }
  0x3d   : > { %s9599_s14 = sadd.s32 1, %s9445_s21   ;;  %s29_s29 = sadd.s32 1, %s9441_s20 }
  0x3e   : > { %s26_s17 = ssub.s32 %s9445_s21, %s9599_s14  ;;  %p36_p13 = scmp.ne.s32.totalorder %s9441_s20, %s9437_s19 }
  0x3f   : > { %p27_p6 = scmp.eq.s32.totalorder %s26_s17, 0  ;;  %p37_p10 = scmp.eq.s32.totalorder %s9445_s21, 0 }
  0x40   : > { %p13203_p3 = scmp.eq.s32.totalorder %s9510_s22, 1  ;;  %p9065_p7 = scmp.lt.s32.totalorder %s9445_s21, 2 }
  0x41   : > { %s9615_s27 = scalar_select %p27_p6, %s9441_s20, %s29_s29  }
  0x42   : > { %p9609_p5 = por %p13203_p3, %p36_p13  ;;  %p38_p9 = por %p37_p10, %p36_p13 }
  0x43   : > { %s208_s30 = sand.u32 1, %s9441_s20   ;;  %s7994_s6 = sshll.u32 %s9445_s21, 12 }
  0x44   : > { %s13204_s23 = scalar_select %p9609_p5, 1, 0 }
  0x45   : > { %s7803_s7 = sshll.u32 %s208_s30, 8  ;;  %s9622_s8 = scalar_lea.hbm %s13002_s0, %s7994_s6 }
  0x46   : > { %s212_s9 = scalar_lea.vmem [#allocation2], %s7803_s7  ;;  %p9626_p11 = pnand %p9065_p7, %p38_p9 }
  0x47   : > { %s219_s10 = sshll.u32 %s212_s9, 4  ;;  %s9630_s28 = scalar_lea.sflag [#allocation3], %s208_s30  ;;  %s9624_s10 = int_to_ptr.vmem [resolvable:$true] %s219_s10 }
  0x48   : > { %s9345_s12 = scalar_lea.hbm %s9622_s8, 4096  ;;  %p9347_p0 = pneg %p9626_p11 }
  0x49   : > { %p9346_p12 = scmp.ne.s32.totalorder %s9622_s8, %s9345_s12  ;;  %s9350_s17 = scalar_lea.hbm %s13002_s0, 8192 }
  0x4a   : > { %p9351_p13 = scmp.lt.u32.totalorder %s9622_s8, %s13002_s0  ;;  %p9352_p6 = scmp.lt.u32.totalorder %s9350_s17, %s9345_s12 }
  0x4b   : > { %p9348_p2 = pnand %p9347_p0, %p9346_p12  ;;  %p9354_p3 = scmp.lt.u32.totalorder %s9345_s12, %s9622_s8 }
  0x4c   : > { %p9353_p10 = por %p9352_p6, %p9351_p13 }
  0x4d   : > { %p9349_p1 = pneg %p9348_p2 }
  0x4e   : > { %p9355_p7 = por %p9354_p3, %p9353_p10 }
  0x50   : > { %p9356_p9 = pnand %p9355_p7, %p9349_p1 }
  0x52   : > { %9359 = shalt.err (!%p9356_p9)
}
  0x53   : > { %s9360_s30 = scalar_lea.vmem %s9624_s10, 4096  ;;  %s9451_s15 = smov [#allocation2]  }
  0x54   : > { %p9361_p12 = scmp.ne.s32.totalorder %s9624_s10, %s9360_s30  ;;  %s9365_s16 = sshll.u32 %s9451_s15, 4  ;;  %s9366_s16 = int_to_ptr.vmem [resolvable:$false] %s9365_s16 }
  0x55   : > { %s9367_s9 = scalar_lea.vmem %s9366_s16, 8192  ;;  %p9368_p4 = scmp.lt.s32.totalorder %s9624_s10, %s9366_s16 }
  0x56   : > { %p9363_p2 = pnand %p9361_p12, %p9347_p0  ;;  %p9369_p13 = scmp.lt.s32.totalorder %s9367_s9, %s9360_s30 }
  0x58   : > { %p9364_p5 = pneg %p9363_p2  ;;  %p9370_p6 = por %p9369_p13, %p9368_p4 }
  0x5a   : > { %p9371_p10 = pnand %p9370_p6, %p9364_p5 }
  0x5c   : > { %9374 = shalt.err (!%p9371_p10)
}
  0x5d   : > { %s9452_s12 = smov 128   ;;  %s9453_s13 = smov 8  }
  0x5e   : > { %9058 = dma.hbm_to_vmem [thread:$0]  (!%p9626_p11), %s9622_s8, 4096, %s9624_s10, %s9630_s28, %s9452_s12, %s9452_s12, %s9453_s13  }
  0x5f   : > { %231 = sbr.rel (%p9529_p8) target bundleno = 1346 (0x542), region = 40 }
  0x66   : > { %s9661_s29 = sand.u32 1, %s9437_s19   ;;  %p13206_p4 = scmp.ne.s32.totalorder %s13199_s24, 0 }
  0x67   : > { %s7807_s17 = sshll.u32 %s9661_s29, 8  ;;  %s234_s7 = scalar_lea.sflag [#allocation3], %s9661_s29 }
  0x68   : > { %s9667_s6 = scalar_lea.vmem [#allocation2], %s7807_s17 }
  0x69   : > { %9420 = dma.done.wait (%p13206_p4), %s234_s7, 4096  }
  0x6a   : > { %9422 = vsyncadd (%p13206_p4), %s234_s7, 4294963200  ;;  %p13207_p5 = scmp.eq.s32.totalorder %s9510_s22, 0 }
  0x6c   : > { %9424 = dma.done.wait (%p13207_p5), [#allocation6], 18432   ;;  %p13208_p8 = pmov %p13207_p5 }
  0x6d   : > { %v275_v0 = vlaneseq  ;;  %vm9454_vm0 = vmmov 1   ;;  %v9111_v1 = vld [vmem:[#allocation5 + $0x40] sm:$0xff]   ;;  %v13017_v2 = vmov 0   ;;  %v9115_v10 = vld [vmem:[#allocation5 + $0x48] sm:$0xff]   ;;  %v9119_v18 = vld [vmem:[#allocation5 + $0x50] sm:$0xff]   ;;  %vm13102_vm5 = vcmask 1043456  }
  0x6e   : > { %9426 = vsyncadd (%p13208_p8), [#allocation6], 4294948864  ;;  %v9678_v3 = vrot.slane %v13017_v2, 1  ;;  %v9112_v4 = vld [vmem:[#allocation5] sm:$0xff]   ;;  %7996 = vmatprep.subr.bf16.mxu0 %v9111_v1  ;;  %v9683_v7 = vrot.slane %v13017_v2, 3  ;;  %v9686_v9 = vrot.slane %v13017_v2, 4 }
  0x6f   : > { %vm908_vm1 = vmpackc.low %vm9454_vm0, %vm9454_vm0  ;;  %v9680_v5 = vshrl.u32 %v275_v0, 7  ;;  %v9113_v6 = vld [vmem:[#allocation5 + $0xc0] sm:$0xff]   ;;  %7997 = vmatpush3.bf16.msra.mxu0 %v9112_v4  ;;  %v9116_v12 = vld [vmem:[#allocation5 + $0x8] sm:$0xff]   ;;  %vm1647_vm8 = vsmask.f32 7424  ;;  %s12861_s11 = scalar_lea.vmem [#allocation8], %s7807_s17 }
  0x70   : > { %13209 = vst [vmem:[#allocation12_spill] sm:$0xff] %v9678_v3  ;;  %v9114_v8 = vld [vmem:[#allocation5 + $0x80] sm:$0xff]   ;;  %8108 = vmatprep.subr.bf16.mxu1 %v9113_v6  ;;  %v9689_v11 = vsel %vm908_vm1, 65537, %v13017_v2  ;;  %7998 = vmatprep.subr.bf16.mxu0 %v9115_v10  ;;  %v9117_v14 = vld [vmem:[#allocation5 + $0xc8] sm:$0xff]   ;;  %v9120_v20 = vld [vmem:[#allocation5 + $0x10] sm:$0xff]   ;;  %s7995_s28 = sshll.u32 %s9510_s22, 12 }
  0x71   : > { %8109 = vmatpush3.bf16.msra.mxu1 %v9114_v8  ;;  %v278_v13 = vadd.s32 16, %v9680_v5  ;;  %v312_v15 = vand.u32 15, %v9680_v5  ;;  %v9118_v16 = vld [vmem:[#allocation5 + $0x88] sm:$0xff]   ;;  %v277_v17 = vadd.s32 8, %v9680_v5  ;;  %v279_v19 = vadd.s32 24, %v9680_v5  ;;  %v9121_v22 = vld [vmem:[#allocation5 + $0xd0] sm:$0xff]   ;;  %s12953_s9 = scalar_lea.hbm %s13007_s5, %s7995_s28 }
  0x72   : > { %8110 = vmatprep.subr.bf16.mxu1 %v9117_v14  ;;  %v281_v21 = vadd.s32 40, %v9680_v5  ;;  %v9697_v23 = vadd.s32 32, %v9680_v5  ;;  %v9122_v24 = vld [vmem:[#allocation5 + $0x90] sm:$0xff]   ;;  %v9700_v25 = vadd.s32 56, %v9680_v5  ;;  %v9123_v26 = vld [vmem:[#allocation5 + $0x58] sm:$0xff]   ;;  %v9703_v31 = vadd.s32 48, %v9680_v5 }
  0x73   : > { %7999 = vmatpush3.bf16.msra.mxu0 %v9116_v12  ;;  %v326_v27 = vand.u32 15, %v278_v13  ;;  %v9124_v28 = vld [vmem:[#allocation5 + $0x18] sm:$0xff]   ;;  %v319_v29 = vand.u32 15, %v277_v17  ;;  %v333_v33 = vand.u32 15, %v279_v19  ;;  %v9127_v34 = vld [vmem:[#allocation5 + $0x60] sm:$0xff]   ;;  %v9708_v41 = vadd.s32 72, %v9680_v5 }
  0x74   : > { %8000 = vmatprep.subr.bf16.mxu0 %v9119_v18  ;;  %v9125_v30 = vld [vmem:[#allocation5 + $0xd8] sm:$0xff]   ;;  %v347_v35 = vand.u32 15, %v281_v21  ;;  %v9128_v36 = vld [vmem:[#allocation5 + $0x20] sm:$0xff]   ;;  %v340_v37 = vand.u32 15, %v9697_v23  ;;  %v361_v39 = vand.u32 15, %v9700_v25  ;;  %v9131_v42 = vld [vmem:[#allocation5 + $0x68] sm:$0xff]  }
  0x75   : > { %8111 = vmatpush3.bf16.msra.mxu1 %v9118_v16  ;;  %v9126_v32 = vld [vmem:[#allocation5 + $0x98] sm:$0xff]   ;;  %v9129_v38 = vld [vmem:[#allocation5 + $0xe0] sm:$0xff]   ;;  %v9711_v43 = vadd.s32 64, %v9680_v5  ;;  %v9132_v44 = vld [vmem:[#allocation5 + $0x28] sm:$0xff]   ;;  %v9714_v45 = vadd.s32 88, %v9680_v5  ;;  %vm9716_vm2 = vcmp.ge.s32.totalorder %v312_v15, 1 }
  0x76   : > { %8112 = vmatprep.subr.bf16.mxu1 %v9121_v22  ;;  %v9130_v40 = vld [vmem:[#allocation5 + $0xa0] sm:$0xff]   ;;  %v9133_v46 = vld [vmem:[#allocation5 + $0xe8] sm:$0xff]   ;;  %v354_v48 = vand.u32 15, %v9703_v31  ;;  %vm9721_vm3 = vcmp.ge.s32.totalorder %v326_v27, 1  ;;  %v375_v51 = vand.u32 15, %v9708_v41  ;;  %v9135_v52 = vld [vmem:[#allocation5 + $0x70] sm:$0xff]  }
  0x77   : > { %8001 = vmatpush3.bf16.msra.mxu0 %v9120_v20  ;;  %v9134_v49 = vld [vmem:[#allocation5 + $0xa8] sm:$0xff]   ;;  %vm9726_vm4 = vcmp.lt.s32.totalorder %v319_v29, 15  ;;  %v368_v54 = vand.u32 15, %v9711_v43  ;;  %v9136_v55 = vld [vmem:[#allocation5 + $0x30] sm:$0xff]   ;;  %vm9731_vm6 = vcmp.lt.s32.totalorder %v333_v33, 15  ;;  %v389_v57 = vand.u32 15, %v9714_v45  ;;  %vm907_vm9 = vmpackc.low %vm9716_vm2, %vm9716_vm2 }
  0x78   : > { %8002 = vmatprep.subr.bf16.mxu0 %v9123_v26  ;;  %v9137_v58 = vld [vmem:[#allocation5 + $0xf0] sm:$0xff]   ;;  %vm9736_vm7 = vcmp.lt.s32.totalorder %v347_v35, 15  ;;  %v9741_v60 = vadd.s32 80, %v9680_v5  ;;  %v9744_v62 = vadd.s32 104, %v9680_v5  ;;  %v9139_v63 = vld [vmem:[#allocation5 + $0x78] sm:$0xff]   ;;  %v9747_v0 = vadd.s32 96, %v9680_v5  ;;  %vm909_vm10 = vmpackc.low %vm9721_vm3, %vm9721_vm3 }
  0x79   : > { %8113 = vmatpush3.bf16.msra.mxu1 %v9122_v24  ;;  %v9138_v61 = vld [vmem:[#allocation5 + $0xb0] sm:$0xff]   ;;  %v9140_v1 = vld [vmem:[#allocation5 + $0x38] sm:$0xff]   ;;  %v9750_v4 = vadd.s32 120, %v9680_v5  ;;  %v692_v10 = vld [vmem:[%s9667_s6] sm:$0xff]  ;;  %v9758_v15 = vadd.s32 112, %v9680_v5  ;;  %v9761_v16 = vadd.s32 136, %v9680_v5  ;;  %v9784_v35 = vor.u32 %v9686_v9, %v9683_v7 }
  0x7a   : > { %8114 = vmatprep.subr.bf16.mxu1 %v9125_v30  ;;  %v9141_v6 = vld [vmem:[#allocation5 + $0xf8] sm:$0xff]   ;;  %v382_v8 = vand.u32 15, %v9741_v60  ;;  %v693_v12 = vld [vmem:[%s9667_s6 + $0x8] sm:$0xff]  ;;  %v694_v13 = vld [vmem:[%s9667_s6 + $0x10] sm:$0xff]  ;;  %v9765_v19 = vadd.s32 128, %v9680_v5  ;;  %v941_v33 = vsel %vm909_vm10, 65537, %v13017_v2 }
  0x7b   : > { %8003 = vmatpush3.bf16.msra.mxu0 %v9124_v28  ;;  %v695_v17 = vld [vmem:[%s9667_s6 + $0x18] sm:$0xff]  ;;  %v724_v18 = vpack.c.bf16 %v693_v12, %v692_v10  ;;  %v939_v28 = vsel %vm907_vm9, 65537, %v13017_v2  ;;  %vm1019_vm11 = vsmask.f32 3328  ;;  %v9143_v29 = vld [vmem:[#allocation5 + $0x140] sm:$0xff]   ;;  %13220 = vst [vmem:[#allocation13_spill] sm:$0xff] %v9784_v35  ;;  %vm1292_vm12 = vmpackc.low %vm9726_vm4, %vm9726_vm4 }
  0x7c   : > { %8004 = vmatprep.subr.bf16.mxu0 %v9127_v34  ;;  %v725_v20 = vpack.c.bf16 %v695_v17, %v694_v13  ;;  %v9142_v21 = vld [vmem:[#allocation5 + $0xb8] sm:$0xff]   ;;  %v7811_v34 = vcombine.low %v939_v28, %v9689_v11  ;;  %vm1294_vm13 = vmpackc.low %vm9731_vm6, %vm9731_vm6  ;;  %vm1403_vm15 = vsmask.f32 4352  ;;  %vm9820_vm0 = vcmp.ge.s32.totalorder %v340_v37, 1  ;;  %v9147_v28 = vld [vmem:[#allocation5 + $0x150] sm:$0xff]   ;;  %s7706_s30 = sshll.u32 %s12861_s11, 4  ;;  %s12955_s30 = int_to_ptr.vmem [resolvable:$true] %s7706_s30 }
  0x7d   : > { %8115 = vmatpush3.bf16.msra.mxu1 %v9126_v32  ;;  %v757_v27 = vrot.slane %v724_v18, 4  ;;  %vm1296_vm14 = vmpackc.low %vm9736_vm7, %vm9736_vm7  ;;  %v1326_v56 = vsel %vm1294_vm13, 65537, %v13017_v2  ;;  %vm9830_vm1 = vcmp.lt.s32.totalorder %v361_v39, 15  ;;  %vm9839_vm2 = vcmp.ge.s32.totalorder %v354_v48, 1  ;;  %v9151_v30 = vld [vmem:[#allocation5 + $0x160] sm:$0xff]   ;;  %s7693_s22 = scalar_lea.sflag [#allocation4], %s9661_s29 }
  0x7e   : > { %8116 = vmatprep.subr.bf16.mxu1 %v9129_v38  ;;  %v9778_v32 = vrot.slane %v725_v20, 4  ;;  %v7812_v38 = vcombine.low %v941_v33, %v9689_v11  ;;  %v9816_v13 = vcombine.low %v9689_v11, %v1326_v56  ;;  %vm1798_vm6 = vcmask 1046528   ;;  %vm911_vm7 = vmpackc.low %vm9820_vm0, %vm9820_vm0  ;;  %s9375_s12 = scalar_lea.vmem %s12955_s30, 4096  ;;  %p13596_p0 = scmp.ne.s32.totalorder %s13204_s23, 0 }
  0x7f   : > { %8005 = vmatpush3.bf16.msra.mxu0 %v9128_v36  ;;  %v9790_v36 = vsel %vm13102_vm5, 0, %v757_v27  ;;  %vm1298_vm9 = vmpackc.low %vm9830_vm1, %vm9830_vm1  ;;  %vm9961_vm0 = vcmp.ge.s32.totalorder %v368_v54, 1  ;;  %p9376_p11 = scmp.ne.s32.totalorder %s12955_s30, %s9375_s12  ;;  %s9456_s13 = smov [#allocation8]  }
  0x80   : > { %8006 = vmatprep.subr.bf16.mxu0 %v9131_v42  ;;  %v9800_v7 = vsel %vm13102_vm5, %v757_v27, %v9778_v32  ;;  %v1654_v9 = vshll.u32 %v9790_v36, 16  ;;  %v1029_v50 = vshrl.u32 %v7812_v38, 16  ;;  %vm913_vm10 = vmpackc.low %vm9839_vm2, %vm9839_vm2  ;;  %s9379_s17 = sshll.u32 %s9456_s13, 4  ;;  %s9380_s17 = int_to_ptr.vmem [resolvable:$false] %s9379_s17 }
  0x81   : > { %8117 = vmatpush3.bf16.msra.mxu1 %v9130_v40  ;;  %v1324_v40 = vsel %vm1292_vm12, 65537, %v13017_v2  ;;  %v1662_v47 = vshll.u32 %v9800_v7, 16  ;;  %p9377_p1 = pnand %p9376_p11, %p13596_p0  ;;  %s9381_s7 = scalar_lea.vmem %s9380_s17, 8192 }
  0x82   : > { %8118 = vmatprep.subr.bf16.mxu1 %v9133_v46  ;;  %v1021_v46 = vshrl.u32 %v7811_v34, 16  ;;  %v1656_v53 = vrot.slane %v1654_v9, 1  ;;  %v7827_v12 = vcombine.low %v9689_v11, %v1324_v40  ;;  %p9382_p7 = scmp.lt.s32.totalorder %s12955_s30, %s9380_s17  ;;  %p9383_p9 = scmp.lt.s32.totalorder %s9381_s7, %s9375_s12 }
  0x83   : > { %8007 = vmatpush3.bf16.msra.mxu0 %v9132_v44  ;;  %v1658_v44 = vshrl.u32 %v9790_v36, 16  ;;  %p9378_p3 = pneg %p9377_p1 }
  0x84   : > { %8008 = vmatprep.subr.bf16.mxu0 %v9135_v52  ;;  %v1032_v52 = vshll.u32 %v7812_v38, 16  ;;  %v1657_v59 = vsel %vm1647_vm8, %v9678_v3, %v1656_v53  ;;  %v1405_v37 = vshrl.u32 %v7827_v12, 16  ;;  %v1408_v33 = vshll.u32 %v7827_v12, 16  ;;  %v696_v12 = vld [vmem:[%s9667_s6 + $0x20] sm:$0xff]  ;;  %p9384_p12 = por %p9383_p9, %p9382_p7 }
  0x85   : > { %8119 = vmatpush3.bf16.msra.mxu1 %v9134_v49  ;;  %v1024_v49 = vshll.u32 %v7811_v34, 16  ;;  %v1660_v10 = vor.u32 %v1658_v44, %v1656_v53  ;;  %v2102_v18 = vshrl.u32 %v1657_v59, 16  ;;  %v2105_v20 = vshll.u32 %v1657_v59, 16 }
  0x86   : > { %8120 = vmatprep.subr.bf16.mxu1 %v9137_v58  ;;  %v1328_v58 = vsel %vm1296_vm14, 65537, %v13017_v2  ;;  %v1407_v44 = vrot.slane %v1405_v37, 3  ;;  %vm9943_vm14 = vcmp.lt.s32.totalorder %v375_v51, 15  ;;  %p9385_p2 = pnand %p9384_p12, %p9378_p3 }
  0x87   : > { %8009 = vmatpush3.bf16.msra.mxu0 %v9136_v55  ;;  %v1023_v55 = vrot.slane %v1021_v46, 4  ;;  %v7829_v23 = vcombine.low %v9689_v11, %v1328_v58  ;;  %v2104_v38 = vrot.slane %v2102_v18, 3  ;;  %v2107_v40 = vrot.slane %v2105_v20, 4 }
  0x88   : > { %8010 = vmatprep.subr.bf16.mxu0 %v9139_v63  ;;  %v1026_v63 = vrot.slane %v1024_v49, 5  ;;  %v1410_v46 = vrot.slane %v1408_v33, 4  ;;  %v9144_v33 = vld [vmem:[#allocation5 + $0x100] sm:$0xff]  }
  0x89   : > { %8121 = vmatpush3.bf16.msra.mxu1 %v9138_v61  ;;  %v9810_v61 = vrot.slane %v1662_v47, 1  ;;  %v2108_v47 = vor.u32 %v2107_v40, %v2104_v38  ;;  %v697_v38 = vld [vmem:[%s9667_s6 + $0x28] sm:$0xff] }
  0x8a   : > { %8122 = vmatprep.subr.bf16.mxu1 %v9141_v6  ;;  %v1034_v6 = vrot.slane %v1032_v52, 5  ;;  %v9859_v53 = vor.u32 %v1410_v46, %v1407_v44 }
  0x8b   : > { %8011 = vmatpush3.bf16.msra.mxu0 %v9140_v1  ;;  %v1031_v1 = vrot.slane %v1029_v50, 4 }
  0x8c   : > { %8220 = vmatprep.subr.bf16.mxu0 %v9143_v29  ;;  %v1665_v29 = vsel %vm1647_vm8, %v1660_v10, %v9810_v61  ;;  %13229 = vst [vmem:[#allocation16_spill] sm:$0xff] %v9859_v53  ;;  %v1413_v10 = vshrl.u32 %v9816_v13, 16 }
  0x8d   : > { %8123 = vmatpush3.bf16.msra.mxu1 %v9142_v21  ;;  %v9824_v21 = vor.u32 %v1026_v63, %v1023_v55  ;;  %v9826_v27 = vor.u32 %v1034_v6, %v1031_v1  ;;  %v2110_v25 = vshrl.u32 %v1665_v29, 16  ;;  %v2113_v39 = vshll.u32 %v1665_v29, 16 }
  0x8e   : > { %v1415_v44 = vrot.slane %v1413_v10, 3 }
  0x8f   : > { %13223 = vst [vmem:[#allocation14_spill] sm:$0xff] %v9824_v21  ;;  %v9846_v9 = vsel %vm1019_vm11, %v9824_v21, %v9826_v27  ;;  %vm1579_vm3 = vcmp.ne.s16.totalorder %v9824_v21, 0  ;;  %v2112_v31 = vrot.slane %v2110_v25, 3  ;;  %v2115_v48 = vrot.slane %v2113_v39, 4 }
  0x90   : > { %13228 = vst [vmem:[#allocation15_spill] sm:$0xff] %v9846_v9  ;;  %vm1163_vm4 = vcmp.ne.s16.totalorder %v9846_v9, 0  ;;  %v1580_v50 = vsel %vm1579_vm3, %v9790_v36, 0 }
  0x91   : > { %v1179_v49 = vsel %vm1163_vm4, %v9790_v36, 0  ;;  %v1581_v52 = vsel %vm1163_vm4, %v9800_v7, 0  ;;  %v9861_v55 = vor.u32 %v2115_v48, %v2112_v31  ;;  %v2136_v63 = vshrl.u32 %v1580_v50, 16 }
  0x92   : > { %v2093_v56 = vshrl.u32 %v1179_v49, 16  ;;  %v2096_v58 = vshll.u32 %v1179_v49, 16  ;;  %v2139_v1 = vshll.u32 %v1580_v50, 16  ;;  %v2144_v6 = vshrl.u32 %v1581_v52, 16 }
  0x93   : > { %v2147_v59 = vshll.u32 %v1581_v52, 16  ;;  %v2117_v18 = vsel %vm1403_vm15, %v2108_v47, %v9861_v55  ;;  %v2138_v37 = vrot.slane %v2136_v63, 3  ;;  %v1416_v31 = vshll.u32 %v9816_v13, 16  ;;  %v698_v47 = vld [vmem:[%s9667_s6 + $0x30] sm:$0xff]  ;;  %v9145_v13 = vld [vmem:[#allocation5 + $0x148] sm:$0xff]  }
  0x94   : > { %v2095_v20 = vrot.slane %v2093_v56, 3  ;;  %v2098_v29 = vrot.slane %v2096_v58, 4  ;;  %3756 = vmatprep.mubr.bf16.mxu0 %v2117_v18  ;;  %v2141_v40 = vrot.slane %v2139_v1, 4  ;;  %v2146_v25 = vrot.slane %v2144_v6, 3 }
  0x95   : > { %v2149_v39 = vrot.slane %v2147_v59, 4  ;;  %v1422_v48 = vshrl.u32 %v7829_v23, 16  ;;  %v1425_v49 = vshll.u32 %v7829_v23, 16  ;;  %v726_v56 = vpack.c.bf16 %v697_v38, %v696_v12  ;;  %v699_v59 = vld [vmem:[%s9667_s6 + $0x38] sm:$0xff] }
  0x96   : > { %v9868_v46 = vor.u32 %v2098_v29, %v2095_v20  ;;  %v2142_v50 = vor.u32 %v2141_v40, %v2138_v37  ;;  %v1666_v58 = vshrl.u32 %v9800_v7, 16  ;;  %v1418_v63 = vrot.slane %v1416_v31, 4  ;;  %v9146_v40 = vld [vmem:[#allocation5 + $0x108] sm:$0xff]  }
  0x97   : > { %v9875_v52 = vor.u32 %v2149_v39, %v2146_v25  ;;  %v1424_v1 = vrot.slane %v1422_v48, 3  ;;  %v1427_v6 = vrot.slane %v1425_v49, 4  ;;  %v9890_v12 = vrot.slane %v726_v56, 4  ;;  %v9148_v49 = vld [vmem:[#allocation5 + $0x110] sm:$0xff]  }
  0x98   : > { %v2100_v23 = vsel %vm1403_vm15, %v9784_v35, %v9868_v46  ;;  %v1668_v18 = vor.u32 %v1666_v58, %v9810_v61  ;;  %v943_v20 = vsel %vm911_vm7, 65537, %v13017_v2  ;;  %v1419_v29 = vor.u32 %v1418_v63, %v1415_v44  ;;  %vm1300_vm7 = vmpackc.low %vm9943_vm14, %vm9943_vm14 }
  0x99   : > { %3757 = vmatmul.mubr.bf16.vlgmr.msra.gmra.mrb[0].mxu0 %v2100_v23  ;;  %v2151_v10 = vsel %vm1403_vm15, %v2142_v50, %v9875_v52  ;;  %v9899_v37 = vor.u32 %v1427_v6, %v1424_v1  ;;  %v7813_v38 = vcombine.low %v943_v20, %v9689_v11  ;;  %v1330_v61 = vsel %vm1298_vm9, 65537, %v13017_v2  ;;  %v9149_v50 = vld [vmem:[#allocation5 + $0x158] sm:$0xff]  }
  0x9a   : > { %3917 = vmatprep.mubr.bf16.mxu1 %v2151_v10  ;;  %8221 = vmatpush3.bf16.msra.mxu0 %v9144_v33  ;;  %v9911_v17 = vsel %vm13102_vm5, %v9778_v32, %v9890_v12  ;;  %v7830_v33 = vcombine.low %v9689_v11, %v1330_v61  ;;  %v727_v25 = vpack.c.bf16 %v699_v59, %v698_v47  ;;  %v9920_v39 = vsel %vm913_vm10, 65537, %v13017_v2  ;;  %vm915_vm10 = vmpackc.low %vm9961_vm0, %vm9961_vm0 }
  0x9b   : > { %8222 = vmatprep.subr.bf16.mxu0 %v9145_v13  ;;  %v9924_v44 = vsel %vm1403_vm15, %v9859_v53, %v1419_v29  ;;  %v9928_v32 = vsel %vm1403_vm15, %v1419_v29, %v9899_v37  ;;  %v1670_v31 = vshll.u32 %v9911_v17, 16  ;;  %v1038_v48 = vshrl.u32 %v7813_v38, 16 }
  0x9c   : > { %13230 = vst [vmem:[#allocation17_spill] sm:$0xff] %v9924_v44  ;;  %13231 = vst [vmem:[#allocation18_spill] sm:$0xff] %v9928_v32  ;;  %vm13103_vm12 = vcmp.ne.s16.totalorder %v9924_v44, 0  ;;  %vm1548_vm13 = vcmp.ne.s16.totalorder %v9928_v32, 0  ;;  %v1041_v34 = vshll.u32 %v7813_v38, 16  ;;  %v1431_v47 = vshrl.u32 %v7830_v33, 16 }
  0x9d   : > { %v1563_v56 = vsel %vm13103_vm12, %v9790_v36, 0  ;;  %v9939_v58 = vsel %vm1548_vm13, %v9800_v7, 0  ;;  %v1672_v13 = vrot.slane %v1670_v31, 1  ;;  %v1040_v23 = vrot.slane %v1038_v48, 4 }
  0x9e   : > { %8223 = vmatpush3.bf16.msra.mxu0 %v9146_v40  ;;  %v1800_v1 = vrot.slane %v1563_v56, 1  ;;  %v1802_v6 = vrot.slane %v9939_v58, 1  ;;  %v1043_v59 = vrot.slane %v1041_v34, 5  ;;  %v1433_v10 = vrot.slane %v1431_v47, 3  ;;  %v9150_v40 = vld [vmem:[#allocation5 + $0x118] sm:$0xff]  }
  0x9f   : > { %8224 = vmatprep.subr.bf16.mxu0 %v9147_v28  ;;  %v1673_v20 = vsel %vm1647_vm8, %v1668_v18, %v1672_v13  ;;  %v1434_v29 = vshll.u32 %v7830_v33, 16  ;;  %v9949_v38 = vrot.slane %v727_v25, 4  ;;  %v1674_v61 = vshrl.u32 %v9911_v17, 16 }
  0xa0   : > { %v1801_v41 = vsel %vm1798_vm6, %v9678_v3, %v1800_v1  ;;  %v1803_v51 = vsel %vm1798_vm6, %v1800_v1, %v1802_v6  ;;  %v2153_v31 = vshrl.u32 %v1673_v20, 16  ;;  %v2156_v48 = vshll.u32 %v1673_v20, 16 }
  0xa1   : > { %v2119_v34 = vshrl.u32 %v1801_v41, 16  ;;  %v2122_v47 = vshll.u32 %v1801_v41, 16  ;;  %v2127_v28 = vshrl.u32 %v1803_v51, 16  ;;  %v2130_v56 = vshll.u32 %v1803_v51, 16 }
  0xa2   : > { %8225 = vmatpush3.bf16.msra.mxu0 %v9148_v49  ;;  %v2155_v18 = vrot.slane %v2153_v31, 3  ;;  %v2158_v33 = vrot.slane %v2156_v48, 4  ;;  %v9957_v25 = vor.u32 %v1043_v59, %v1040_v23  ;;  %v1436_v42 = vrot.slane %v1434_v29, 4  ;;  %v9152_v29 = vld [vmem:[#allocation5 + $0x120] sm:$0xff]  }
  0xa3   : > { %8226 = vmatprep.subr.bf16.mxu0 %v9149_v50  ;;  %v2121_v26 = vrot.slane %v2119_v34, 3  ;;  %v2124_v24 = vrot.slane %v2122_v47, 4  ;;  %v2129_v22 = vrot.slane %v2127_v28, 3  ;;  %v2132_v14 = vrot.slane %v2130_v56, 4 }
  0xa4   : > { %v9965_v20 = vor.u32 %v2158_v33, %v2155_v18  ;;  %v9970_v49 = vsel %vm1019_vm11, %v9826_v27, %v9957_v25  ;;  %v9972_v23 = vor.u32 %v1436_v42, %v1433_v10  ;;  %v9977_v50 = vsel %vm13102_vm5, %v9890_v12, %v9949_v38 }
  0xa5   : > { %13236 = vst [vmem:[#allocation19_spill] sm:$0xff] %v9970_v49  ;;  %13237 = vst [vmem:[#allocation20_spill] sm:$0xff] %v9977_v50  ;;  %v2125_v59 = vor.u32 %v2124_v24, %v2121_v26  ;;  %v9979_v43 = vor.u32 %v2132_v14, %v2129_v22  ;;  %vm13113_vm1 = vcmp.ne.s16.totalorder %v9970_v49, 0  ;;  %v1676_v54 = vor.u32 %v1674_v61, %v1672_v13  ;;  %v700_v13 = vld [vmem:[%s9667_s6 + $0x40] sm:$0xff] }
  0xa6   : > { %8227 = vmatpush3.bf16.msra.mxu0 %v9150_v40  ;;  %v9985_v27 = vsel %vm1403_vm15, %v9861_v55, %v9965_v20  ;;  %v1180_v42 = vsel %vm13113_vm1, %v9800_v7, 0  ;;  %v1582_v14 = vsel %vm13113_vm1, %v9911_v17, 0  ;;  %v9996_v22 = vsel %vm1403_vm15, %v9899_v37, %v9972_v23 }
  0xa7   : > { %13238 = vst [vmem:[#allocation21_spill] sm:$0xff] %v9996_v22  ;;  %8228 = vmatprep.subr.bf16.mxu0 %v9151_v30  ;;  %v2134_v24 = vsel %vm1403_vm15, %v2125_v59, %v9979_v43  ;;  %3764 = vmatprep.mubr.bf16.mxu0 %v9985_v27  ;;  %v2222_v26 = vshrl.u32 %v1180_v42, 16  ;;  %v2225_v55 = vshll.u32 %v1180_v42, 16  ;;  %v2240_v12 = vshrl.u32 %v1582_v14, 16  ;;  %v701_v30 = vld [vmem:[%s9667_s6 + $0x48] sm:$0xff] }
  0xa8   : > { %3918 = vmatmul.mubr.bf16.vlgmr.msra.gmra.mrb[0].mxu1 %v2134_v24  ;;  %v2243_v10 = vshll.u32 %v1582_v14, 16  ;;  %vm13175_vm2 = vcmp.ne.s16.totalorder %v9996_v22, 0  ;;  %v1678_v61 = vshll.u32 %v9977_v50, 16  ;;  %v7814_v37 = vcombine.low %v9920_v39, %v9689_v11 }
  0xa9   : > { %vm10012_vm9 = vcmp.lt.s32.totalorder %v389_v57, 15  ;;  %v2224_v41 = vrot.slane %v2222_v26, 3  ;;  %v2227_v51 = vrot.slane %v2225_v55, 4  ;;  %v2242_v31 = vrot.slane %v2240_v12, 3 }
  0xaa   : > { %v10019_v48 = vsel %vm13175_vm2, %v9911_v17, 0  ;;  %8229 = vmatpush3.bf16.msra.mxu0 %v9152_v29  ;;  %v2245_v39 = vrot.slane %v2243_v10, 4  ;;  %v1680_v34 = vrot.slane %v1678_v61, 1  ;;  %v1047_v47 = vshrl.u32 %v7814_v37, 16  ;;  %v9153_v61 = vld [vmem:[#allocation5 + $0x168] sm:$0xff]   ;;  %vm1302_vm0 = vmpackc.low %vm10012_vm9, %vm10012_vm9 }
  0xab   : > { %v1804_v63 = vrot.slane %v10019_v48, 1  ;;  %v10022_v28 = vor.u32 %v2227_v51, %v2224_v41  ;;  %v1050_v45 = vshll.u32 %v7814_v37, 16  ;;  %v1332_v57 = vsel %vm1300_vm7, 65537, %v13017_v2  ;;  %v9154_v37 = vld [vmem:[#allocation5 + $0x128] sm:$0xff]   ;;  %8230 = vmatprep.subr.bf16.mxu0 %v9153_v61 }
  0xac   : > { %v728_v56 = vpack.c.bf16 %v701_v30, %v700_v13  ;;  %v10025_v18 = vor.u32 %v2245_v39, %v2242_v31  ;;  %v1681_v59 = vsel %vm1647_vm8, %v1676_v54, %v1680_v34  ;;  %v1049_v29 = vrot.slane %v1047_v47, 4 }
  0xad   : > { %v1805_v33 = vsel %vm1798_vm6, %v1802_v6, %v1804_v63  ;;  %v2229_v42 = vsel %vm1403_vm15, %v9868_v46, %v10022_v28  ;;  %v2196_v26 = vshrl.u32 %v1681_v59, 16  ;;  %v2199_v12 = vshll.u32 %v1681_v59, 16 }
  0xae   : > { %v2231_v14 = vshrl.u32 %v1805_v33, 16  ;;  %v2234_v24 = vshll.u32 %v1805_v33, 16  ;;  %3765 = vmatmul.mubr.bf16.gmra.mrb[4].mxu0 %v2229_v42  ;;  %v2247_v55 = vsel %vm1403_vm15, %v9875_v52, %v10025_v18  ;;  %v1052_v13 = vrot.slane %v1050_v45, 5 }
  0xaf   : > { %v7831_v58 = vcombine.low %v9689_v11, %v1332_v57  ;;  %3925 = vmatprep.mubr.bf16.mxu1 %v2247_v55  ;;  %v2198_v46 = vrot.slane %v2196_v26, 3  ;;  %v10043_v10 = vrot.slane %v728_v56, 4  ;;  %v2201_v30 = vrot.slane %v2199_v12, 4  ;;  %8231 = vmatpush3.bf16.msra.mxu0 %v9154_v37  ;;  %v702_v37 = vld [vmem:[%s9667_s6 + $0x50] sm:$0xff] }
  0xb0   : > { %v2233_v6 = vrot.slane %v2231_v14, 3  ;;  %v2236_v54 = vrot.slane %v2234_v24, 4  ;;  %v10045_v41 = vor.u32 %v1052_v13, %v1049_v29  ;;  %v1682_v39 = vshrl.u32 %v9977_v50, 16 }
  0xb1   : > { %v1440_v52 = vshrl.u32 %v7831_v58, 16  ;;  %v1443_v51 = vshll.u32 %v7831_v58, 16  ;;  %v10052_v1 = vsel %vm13102_vm5, %v9949_v38, %v10043_v10  ;;  %v947_v47 = vsel %vm915_vm10, 65537, %v13017_v2 }
  0xb2   : > { %v10047_v31 = vor.u32 %v2236_v54, %v2233_v6  ;;  %13241 = vst [vmem:[#allocation22_spill] sm:$0xff] %v10052_v1  ;;  %v10056_v45 = vor.u32 %v2201_v30, %v2198_v46  ;;  %v10061_v57 = vsel %vm1019_vm11, %v9957_v25, %v10045_v41  ;;  %v1684_v59 = vor.u32 %v1682_v39, %v1680_v34 }
  0xb3   : > { %13242 = vst [vmem:[#allocation23_spill] sm:$0xff] %v10061_v57  ;;  %v1442_v56 = vrot.slane %v1440_v52, 3  ;;  %v1445_v33 = vrot.slane %v1443_v51, 4  ;;  %vm13011_vm14 = vcmp.ne.s16.totalorder %v10061_v57, 0  ;;  %v1686_v29 = vshll.u32 %v10052_v1, 16  ;;  %v703_v51 = vld [vmem:[%s9667_s6 + $0x58] sm:$0xff] }
  0xb4   : > { %v2238_v38 = vsel %vm1403_vm15, %v9979_v43, %v10047_v31  ;;  %v10074_v25 = vsel %vm1403_vm15, %v9965_v20, %v10056_v45  ;;  %v1181_v42 = vsel %vm13011_vm14, %v9911_v17, 0  ;;  %v1583_v43 = vsel %vm13011_vm14, %v9977_v50, 0 }
  0xb5   : > { %3926 = vmatmul.mubr.bf16.gmra.mrb[4].mxu1 %v2238_v38  ;;  %v10082_v34 = vor.u32 %v1445_v33, %v1442_v56  ;;  %3772 = vmatprep.mubr.bf16.mxu0 %v10074_v25  ;;  %v2285_v40 = vshrl.u32 %v1181_v42, 16  ;;  %v2288_v14 = vshll.u32 %v1181_v42, 16  ;;  %v2303_v24 = vshrl.u32 %v1583_v43, 16 }
  0xb6   : > { %v2306_v26 = vshll.u32 %v1583_v43, 16  ;;  %v1688_v55 = vrot.slane %v1686_v29, 1  ;;  %v7815_v12 = vcombine.low %v947_v47, %v9689_v11  ;;  %v1334_v13 = vsel %vm1302_vm0, 65537, %v13017_v2 }
  0xb7   : > { %v10088_v20 = vsel %vm1403_vm15, %v9972_v23, %v10082_v34  ;;  %vm10094_vm7 = vcmp.ge.s32.totalorder %v382_v8, 1  ;;  %v2287_v6 = vrot.slane %v2285_v40, 3  ;;  %v2290_v54 = vrot.slane %v2288_v14, 4 }
  0xb8   : > { %13243 = vst [vmem:[#allocation24_spill] sm:$0xff] %v10088_v20  ;;  %v2305_v46 = vrot.slane %v2303_v24, 3  ;;  %v2308_v61 = vrot.slane %v2306_v26, 4  ;;  %v13246_v30 = vand.u32 15, %v9744_v62  ;;  %vm13012_vm10 = vcmp.ne.s16.totalorder %v10088_v20, 0 }
  0xb9   : > { %v1689_v52 = vsel %vm1647_vm8, %v1684_v59, %v1688_v55  ;;  %v1056_v60 = vshrl.u32 %v7815_v12, 16  ;;  %v1059_v8 = vshll.u32 %v7815_v12, 16  ;;  %v10108_v39 = vor.u32 %v2290_v54, %v2287_v6 }
  0xba   : > { %vm10101_vm9 = vcmp.lt.s32.totalorder %v13246_v30, 15  ;;  %v10110_v47 = vor.u32 %v2308_v61, %v2305_v46  ;;  %v10115_v56 = vsel %vm13012_vm10, %v9977_v50, 0  ;;  %v2267_v62 = vshrl.u32 %v1689_v52, 16  ;;  %vm917_vm10 = vmpackc.low %vm10094_vm7, %vm10094_vm7 }
  0xbb   : > { %v1806_v33 = vrot.slane %v10115_v56, 1  ;;  %v2270_v38 = vshll.u32 %v1689_v52, 16  ;;  %v1058_v29 = vrot.slane %v1056_v60, 4  ;;  %v1061_v42 = vrot.slane %v1059_v8, 5 }
  0xbc   : > { %v2292_v59 = vsel %vm1403_vm15, %v10022_v28, %v10108_v39  ;;  %v2310_v43 = vsel %vm1403_vm15, %v10025_v18, %v10110_v47  ;;  %v2269_v40 = vrot.slane %v2267_v62, 3  ;;  %v7832_v14 = vcombine.low %v9689_v11, %v1334_v13 }
  0xbd   : > { %3773 = vmatmul.mubr.bf16.gmra.mrb[8].mxu0 %v2292_v59  ;;  %3933 = vmatprep.mubr.bf16.mxu1 %v2310_v43  ;;  %v1807_v24 = vsel %vm1798_vm6, %v1804_v63, %v1806_v33  ;;  %v2272_v26 = vrot.slane %v2270_v38, 4  ;;  %v10130_v12 = vor.u32 %v1061_v42, %v1058_v29  ;;  %v729_v6 = vpack.c.bf16 %v703_v51, %v702_v37 }
  0xbe   : > { %v2294_v28 = vshrl.u32 %v1807_v24, 16  ;;  %v2297_v54 = vshll.u32 %v1807_v24, 16  ;;  %v1449_v46 = vshrl.u32 %v7832_v14, 16  ;;  %v1452_v61 = vshll.u32 %v7832_v14, 16 }
  0xbf   : > { %v10132_v18 = vor.u32 %v2272_v26, %v2269_v40  ;;  %v10137_v13 = vsel %vm1019_vm11, %v10045_v41, %v10130_v12  ;;  %v10139_v30 = vrot.slane %v729_v6, 4  ;;  %v1690_v48 = vshrl.u32 %v10052_v1, 16 }
  0xc0   : > { %13249 = vst [vmem:[#allocation25_spill] sm:$0xff] %v10137_v13  ;;  %v2296_v63 = vrot.slane %v2294_v28, 3  ;;  %v2299_v52 = vrot.slane %v2297_v54, 4  ;;  %vm13013_vm0 = vcmp.ne.s16.totalorder %v10137_v13, 0  ;;  %v1451_v37 = vrot.slane %v1449_v46, 3 }
  0xc1   : > { %v13250_v60 = vand.u32 15, %v9747_v0  ;;  %v10152_v41 = vsel %vm1403_vm15, %v10056_v45, %v10132_v18  ;;  %v1182_v51 = vsel %vm13013_vm0, %v9977_v50, 0  ;;  %v1584_v62 = vsel %vm13013_vm0, %v10052_v1, 0  ;;  %vm1304_vm0 = vmpackc.low %vm10101_vm9, %vm10101_vm9 }
  0xc2   : > { %v1454_v38 = vrot.slane %v1452_v61, 4  ;;  %v10160_v29 = vor.u32 %v2299_v52, %v2296_v63  ;;  %3780 = vmatprep.mubr.bf16.mxu0 %v10152_v41  ;;  %v2348_v0 = vshrl.u32 %v1182_v51, 16  ;;  %v2351_v42 = vshll.u32 %v1182_v51, 16  ;;  %v704_v52 = vld [vmem:[%s9667_s6 + $0x60] sm:$0xff] }
  0xc3   : > { %vm10145_vm14 = vcmp.ge.s32.totalorder %v13250_v60, 1  ;;  %v2366_v59 = vshrl.u32 %v1584_v62, 16  ;;  %v2369_v45 = vshll.u32 %v1584_v62, 16  ;;  %v10171_v40 = vsel %vm13102_vm5, %v10043_v10, %v10139_v30 }
  0xc4   : > { %v10166_v43 = vor.u32 %v1454_v38, %v1451_v37  ;;  %13253 = vst [vmem:[#allocation26_spill] sm:$0xff] %v10171_v40  ;;  %v1692_v14 = vor.u32 %v1690_v48, %v1688_v55  ;;  %v2301_v24 = vsel %vm1403_vm15, %v10047_v31, %v10160_v29  ;;  %v2350_v58 = vrot.slane %v2348_v0, 3  ;;  %v705_v38 = vld [vmem:[%s9667_s6 + $0x68] sm:$0xff] }
  0xc5   : > { %v2353_v26 = vrot.slane %v2351_v42, 4  ;;  %v2368_v6 = vrot.slane %v2366_v59, 3  ;;  %3934 = vmatmul.mubr.bf16.gmra.mrb[8].mxu1 %v2301_v24  ;;  %v2371_v28 = vrot.slane %v2369_v45, 4  ;;  %v1694_v55 = vshll.u32 %v10171_v40, 16 }
  0xc6   : > { %v10182_v10 = vsel %vm1403_vm15, %v10082_v34, %v10166_v43  ;;  %v949_v23 = vsel %vm917_vm10, 65537, %v13017_v2  ;;  %v1336_v46 = vsel %vm1304_vm0, 65537, %v13017_v2  ;;  %v13255_v0 = vand.u32 15, %v9750_v4  ;;  %vm919_vm10 = vmpackc.low %vm10145_vm14, %vm10145_vm14 }
  0xc7   : > { %13254 = vst [vmem:[#allocation27_spill] sm:$0xff] %v10182_v10  ;;  %v10186_v54 = vor.u32 %v2353_v26, %v2350_v58  ;;  %vm13079_vm7 = vcmp.ne.s16.totalorder %v10182_v10, 0  ;;  %v7816_v31 = vcombine.low %v949_v23, %v9689_v11  ;;  %v10191_v61 = vor.u32 %v2371_v28, %v2368_v6 }
  0xc8   : > { %v10196_v34 = vsel %vm13079_vm7, %v10052_v1, 0  ;;  %v1696_v48 = vrot.slane %v1694_v55, 1  ;;  %v7833_v63 = vcombine.low %v9689_v11, %v1336_v46  ;;  %vm10207_vm9 = vcmp.lt.s32.totalorder %v13255_v0, 15 }
  0xc9   : > { %v2355_v37 = vsel %vm1403_vm15, %v10108_v39, %v10186_v54  ;;  %v1808_v60 = vrot.slane %v10196_v34, 1  ;;  %v1065_v51 = vshrl.u32 %v7816_v31, 16  ;;  %v1068_v62 = vshll.u32 %v7816_v31, 16 }
  0xca   : > { %3781 = vmatmul.mubr.bf16.gmra.mrb[12].mxu0 %v2355_v37  ;;  %v2373_v59 = vsel %vm1403_vm15, %v10110_v47, %v10191_v61  ;;  %v1697_v45 = vsel %vm1647_vm8, %v1692_v14, %v1696_v48  ;;  %v1458_v24 = vshrl.u32 %v7833_v63, 16  ;;  %v1461_v39 = vshll.u32 %v7833_v63, 16 }
  0xcb   : > { %3941 = vmatprep.mubr.bf16.mxu1 %v2373_v59  ;;  %v1809_v4 = vsel %vm1798_vm6, %v1806_v33, %v1808_v60  ;;  %v2330_v58 = vshrl.u32 %v1697_v45, 16  ;;  %v2333_v26 = vshll.u32 %v1697_v45, 16  ;;  %v1067_v6 = vrot.slane %v1065_v51, 4  ;;  %v9155_v45 = vld [vmem:[#allocation5 + $0x170] sm:$0xff]  }
  0xcc   : > { %v2357_v28 = vshrl.u32 %v1809_v4, 16  ;;  %v2360_v55 = vshll.u32 %v1809_v4, 16  ;;  %v1070_v23 = vrot.slane %v1068_v62, 5  ;;  %v1460_v31 = vrot.slane %v1458_v24, 3  ;;  %v9156_v4 = vld [vmem:[#allocation5 + $0x130] sm:$0xff]   ;;  %8232 = vmatprep.subr.bf16.mxu0 %v9155_v45 }
  0xcd   : > { %v2332_v47 = vrot.slane %v2330_v58, 3  ;;  %v2335_v14 = vrot.slane %v2333_v26, 4  ;;  %v1463_v46 = vrot.slane %v1461_v39, 4  ;;  %v730_v63 = vpack.c.bf16 %v705_v38, %v704_v52  ;;  %8233 = vmatpush3.bf16.msra.mxu0 %v9156_v4 }
  0xce   : > { %v2359_v37 = vrot.slane %v2357_v28, 3  ;;  %v2362_v0 = vrot.slane %v2360_v55, 4  ;;  %v10223_v56 = vor.u32 %v1070_v23, %v1067_v6  ;;  %v1698_v33 = vshrl.u32 %v10171_v40, 16  ;;  %v10269_v6 = vld [vmem:[%s9667_s6 + $0x70] sm:$0xff] }
  0xcf   : > { %v10226_v59 = vor.u32 %v2335_v14, %v2332_v47  ;;  %v10228_v51 = vor.u32 %v1463_v46, %v1460_v31  ;;  %v10230_v62 = vrot.slane %v730_v63, 4  ;;  %v951_v8 = vsel %vm919_vm10, 65537, %v13017_v2 }
  0xd0   : > { %v10233_v24 = vor.u32 %v2362_v0, %v2359_v37  ;;  %v10238_v52 = vsel %vm1019_vm11, %v10130_v12, %v10223_v56  ;;  %v1700_v38 = vor.u32 %v1698_v33, %v1696_v48  ;;  %v7817_v39 = vcombine.low %v951_v8, %v9689_v11 }
  0xd1   : > { %13258 = vst [vmem:[#allocation28_spill] sm:$0xff] %v10238_v52  ;;  %v10244_v58 = vsel %vm1403_vm15, %v10132_v18, %v10226_v59  ;;  %vm13014_vm14 = vcmp.ne.s16.totalorder %v10238_v52, 0  ;;  %v10250_v26 = vsel %vm1403_vm15, %v10166_v43, %v10228_v51  ;;  %v10255_v12 = vsel %vm13102_vm5, %v10139_v30, %v10230_v62  ;;  %v10272_v30 = vld [vmem:[%s9667_s6 + $0x78] sm:$0xff] }
  0xd2   : > { %13259 = vst [vmem:[#allocation29_spill] sm:$0xff] %v10244_v58  ;;  %13260 = vst [vmem:[#allocation30_spill] sm:$0xff] %v10250_v26  ;;  %v2364_v48 = vsel %vm1403_vm15, %v10160_v29, %v10233_v24  ;;  %3788 = vmatprep.mubr.bf16.mxu0 %v10244_v58  ;;  %v1183_v18 = vsel %vm13014_vm14, %v10052_v1, 0  ;;  %v1585_v43 = vsel %vm13014_vm14, %v10171_v40, 0  ;;  %vm13078_vm0 = vcmp.ne.s16.totalorder %v10250_v26, 0 }
  0xd3   : > { %13261 = vst [vmem:[#allocation31_spill] sm:$0xff] %v10255_v12  ;;  %3942 = vmatmul.mubr.bf16.gmra.mrb[12].mxu1 %v2364_v48  ;;  %v2411_v28 = vshrl.u32 %v1183_v18, 16  ;;  %v2414_v29 = vshll.u32 %v1183_v18, 16  ;;  %v2429_v55 = vshrl.u32 %v1585_v43, 16  ;;  %v2432_v23 = vshll.u32 %v1585_v43, 16  ;;  %vm1306_vm14 = vmpackc.low %vm10207_vm9, %vm10207_vm9 }
  0xd4   : > { %v13262_v31 = vand.u32 15, %v9758_v15  ;;  %v10283_v14 = vsel %vm13078_vm0, %v10171_v40, 0  ;;  %v1702_v46 = vshll.u32 %v10255_v12, 16  ;;  %v1074_v63 = vshrl.u32 %v7817_v39, 16 }
  0xd5   : > { %v1077_v37 = vshll.u32 %v7817_v39, 16  ;;  %v2413_v0 = vrot.slane %v2411_v28, 3  ;;  %v2416_v33 = vrot.slane %v2414_v29, 4  ;;  %v2431_v15 = vrot.slane %v2429_v55, 3 }
  0xd6   : > { %vm10276_vm10 = vcmp.ge.s32.totalorder %v13262_v31, 1  ;;  %v2434_v8 = vrot.slane %v2432_v23, 4  ;;  %v1810_v45 = vrot.slane %v10283_v14, 1  ;;  %v10290_v4 = vrot.slane %v1702_v46, 1  ;;  %v9157_v46 = vld [vmem:[#allocation5 + $0x1c0] sm:$0xff]  }
  0xd7   : > { %v1076_v48 = vrot.slane %v1074_v63, 4  ;;  %v1079_v18 = vrot.slane %v1077_v37, 5  ;;  %v10292_v43 = vor.u32 %v2416_v33, %v2413_v0  ;;  %v1338_v39 = vsel %vm1306_vm14, 65537, %v13017_v2  ;;  %v9158_v37 = vld [vmem:[#allocation5 + $0x180] sm:$0xff]   ;;  %8332 = vmatprep.subr.bf16.mxu1 %v9157_v46  ;;  %vm921_vm14 = vmpackc.low %vm10276_vm10, %vm10276_vm10 }
  0xd8   : > { %v10294_v31 = vor.u32 %v2434_v8, %v2431_v15  ;;  %v731_v42 = vpack.c.bf16 %v10272_v30, %v10269_v6  ;;  %v1811_v28 = vsel %vm1798_vm6, %v1808_v60, %v1810_v45  ;;  %v1705_v29 = vsel %vm1647_vm8, %v1700_v38, %v10290_v4  ;;  %v9159_v15 = vld [vmem:[#allocation5 + $0x1c8] sm:$0xff]   ;;  %8333 = vmatpush3.bf16.msra.mxu1 %v9158_v37 }
  0xd9   : > { %v10306_v55 = vor.u32 %v1079_v18, %v1076_v48  ;;  %v7834_v23 = vcombine.low %v9689_v11, %v1338_v39  ;;  %v2418_v63 = vsel %vm1403_vm15, %v10186_v54, %v10292_v43  ;;  %v2420_v30 = vshrl.u32 %v1811_v28, 16  ;;  %8334 = vmatprep.subr.bf16.mxu1 %v9159_v15 }
  0xda   : > { %v2436_v6 = vsel %vm1403_vm15, %v10191_v61, %v10294_v31  ;;  %v2423_v34 = vshll.u32 %v1811_v28, 16  ;;  %3789 = vmatmul.mubr.bf16.gmra.mrb[16].mxu0 %v2418_v63  ;;  %v2393_v60 = vshrl.u32 %v1705_v29, 16  ;;  %v2396_v38 = vshll.u32 %v1705_v29, 16 }
  0xdb   : > { %3949 = vmatprep.mubr.bf16.mxu1 %v2436_v6  ;;  %v10318_v0 = vsel %vm1019_vm11, %v10223_v56, %v10306_v55  ;;  %v1467_v33 = vshrl.u32 %v7834_v23, 16  ;;  %v2422_v8 = vrot.slane %v2420_v30, 3  ;;  %v1470_v48 = vshll.u32 %v7834_v23, 16  ;;  %v9160_v23 = vld [vmem:[#allocation5 + $0x188] sm:$0xff]  }
  0xdc   : > { %13265 = vst [vmem:[#allocation32_spill] sm:$0xff] %v10318_v0  ;;  %v2425_v54 = vrot.slane %v2423_v34, 4  ;;  %vm13015_vm9 = vcmp.ne.s16.totalorder %v10318_v0, 0  ;;  %v2395_v61 = vrot.slane %v2393_v60, 3  ;;  %v2398_v18 = vrot.slane %v2396_v38, 4  ;;  %8335 = vmatpush3.bf16.msra.mxu1 %v9160_v23  ;;  %v10480_v0 = vld [vmem:[%s9667_s6 + $0xa0] sm:$0xff] }
  0xdd   : > { %v1184_v39 = vsel %vm13015_vm9, %v10171_v40, 0  ;;  %v1586_v28 = vsel %vm13015_vm9, %v10255_v12, 0  ;;  %v1469_v34 = vrot.slane %v1467_v33, 3  ;;  %v1472_v60 = vrot.slane %v1470_v48, 4 }
  0xde   : > { %v10327_v56 = vor.u32 %v2425_v54, %v2422_v8  ;;  %v2474_v29 = vshrl.u32 %v1184_v39, 16  ;;  %v2477_v63 = vshll.u32 %v1184_v39, 16  ;;  %v2492_v6 = vshrl.u32 %v1586_v28, 16 }
  0xdf   : > { %v10329_v46 = vor.u32 %v2398_v18, %v2395_v61  ;;  %v2495_v30 = vshll.u32 %v1586_v28, 16  ;;  %v10342_v48 = vor.u32 %v1472_v60, %v1469_v34  ;;  %v770_v47 = vrot.slane %v731_v42, 4  ;;  %v708_v61 = vld [vmem:[%s9667_s6 + $0x80] sm:$0xff] }
  0xe0   : > { %v2427_v37 = vsel %vm1403_vm15, %v10233_v24, %v10327_v56  ;;  %v2476_v38 = vrot.slane %v2474_v29, 3  ;;  %v2479_v8 = vrot.slane %v2477_v63, 4  ;;  %v2494_v54 = vrot.slane %v2492_v6, 3 }
  0xe1   : > { %3950 = vmatmul.mubr.bf16.gmra.mrb[16].mxu1 %v2427_v37  ;;  %v10340_v15 = vsel %vm1403_vm15, %v10226_v59, %v10329_v46  ;;  %v2497_v33 = vrot.slane %v2495_v30, 4  ;;  %v1706_v24 = vshrl.u32 %v10255_v12, 16  ;;  %v953_v39 = vsel %vm921_vm14, 65537, %v13017_v2  ;;  %v709_v59 = vld [vmem:[%s9667_s6 + $0x88] sm:$0xff] }
  0xe2   : > { %13266 = vst [vmem:[#allocation33_spill] sm:$0xff] %v10340_v15  ;;  %3796 = vmatprep.mubr.bf16.mxu0 %v10340_v15  ;;  %v10346_v18 = vor.u32 %v2479_v8, %v2476_v38  ;;  %v13267_v28 = vand.u32 15, %v9761_v16  ;;  %v10362_v42 = vsel %vm1403_vm15, %v10228_v51, %v10342_v48  ;;  %v10366_v6 = vsel %vm13102_vm5, %v10230_v62, %v770_v47 }
  0xe3   : > { %v10357_v63 = vor.u32 %v2497_v33, %v2494_v54  ;;  %13270 = vst [vmem:[#allocation34_spill] sm:$0xff] %v10362_v42  ;;  %13271 = vst [vmem:[#allocation35_spill] sm:$0xff] %v10366_v6  ;;  %v7818_v30 = vcombine.low %v953_v39, %v9689_v11  ;;  %vm13016_vm9 = vcmp.ne.s16.totalorder %v10362_v42, 0  ;;  %v1708_v23 = vor.u32 %v1706_v24, %v10290_v4 }
  0xe4   : > { %vm10352_vm10 = vcmp.lt.s32.totalorder %v13267_v28, 15  ;;  %v2481_v16 = vsel %vm1403_vm15, %v10292_v43, %v10346_v18  ;;  %v1710_v51 = vshll.u32 %v10366_v6, 16  ;;  %v10384_v34 = vsel %vm13016_vm9, %v10255_v12, 0 }
  0xe5   : > { %vm1308_vm14 = vmpackc.low %vm10352_vm10, %vm10352_vm10  ;;  %3797 = vmatmul.mubr.bf16.gmra.mrb[20].mxu0 %v2481_v16  ;;  %v2499_v62 = vsel %vm1403_vm15, %v10294_v31, %v10357_v63  ;;  %v1083_v60 = vshrl.u32 %v7818_v30, 16  ;;  %v1086_v37 = vshll.u32 %v7818_v30, 16  ;;  %v13019_v43 = vrot.slane %v10384_v34, 1 }
  0xe6   : > { %3957 = vmatprep.mubr.bf16.mxu1 %v2499_v62  ;;  %v1712_v38 = vrot.slane %v1710_v51, 1  ;;  %v1340_v4 = vsel %vm1308_vm14, 65537, %v13017_v2  ;;  %v732_v8 = vpack.c.bf16 %v709_v59, %v708_v61  ;;  %v1714_v31 = vshrl.u32 %v10366_v6, 16 }
  0xe7   : > { %v1085_v54 = vrot.slane %v1083_v60, 4  ;;  %v1088_v33 = vrot.slane %v1086_v37, 5  ;;  %v7835_v24 = vcombine.low %v9689_v11, %v1340_v4  ;;  %v1813_v39 = vsel %vm1798_vm6, %v1810_v45, %v13019_v43  ;;  %v711_v43 = vld [vmem:[%s9667_s6 + $0x98] sm:$0xff] }
  0xe8   : > { %v1713_v28 = vsel %vm1647_vm8, %v1708_v23, %v1712_v38  ;;  %v10396_v29 = vrot.slane %v732_v8, 4  ;;  %v13272_v30 = vand.u32 15, %v9765_v19  ;;  %v2483_v59 = vshrl.u32 %v1813_v39, 16 }
  0xe9   : > { %v2486_v16 = vshll.u32 %v1813_v39, 16  ;;  %v2456_v51 = vshrl.u32 %v1713_v28, 16  ;;  %v2459_v62 = vshll.u32 %v1713_v28, 16  ;;  %v10404_v60 = vor.u32 %v1088_v33, %v1085_v54  ;;  %v9162_v28 = vld [vmem:[#allocation5 + $0x190] sm:$0xff]  }
  0xea   : > { %vm10400_vm10 = vcmp.ge.s32.totalorder %v13272_v30, 1  ;;  %v1476_v37 = vshrl.u32 %v7835_v24, 16  ;;  %v1479_v14 = vshll.u32 %v7835_v24, 16  ;;  %v10408_v45 = vsel %vm13102_vm5, %v770_v47, %v10396_v29  ;;  %v9161_v30 = vld [vmem:[#allocation5 + $0x1d0] sm:$0xff]  }
  0xeb   : > { %13275 = vst [vmem:[#allocation36_spill] sm:$0xff] %v10408_v45  ;;  %v2485_v23 = vrot.slane %v2483_v59, 3  ;;  %v2488_v4 = vrot.slane %v2486_v16, 4  ;;  %v2458_v8 = vrot.slane %v2456_v51, 3  ;;  %v2461_v19 = vrot.slane %v2459_v62, 4  ;;  %vm923_vm14 = vmpackc.low %vm10400_vm10, %vm10400_vm10  ;;  %8336 = vmatprep.subr.bf16.mxu1 %v9161_v30  ;;  %v9163_v51 = vld [vmem:[#allocation5 + $0x1d8] sm:$0xff]  }
  0xec   : > { %v10416_v54 = vsel %vm1019_vm11, %v10306_v55, %v10404_v60  ;;  %v1478_v33 = vrot.slane %v1476_v37, 3  ;;  %v1481_v24 = vrot.slane %v1479_v14, 4  ;;  %v1716_v39 = vor.u32 %v1714_v31, %v1712_v38  ;;  %8337 = vmatpush3.bf16.msra.mxu1 %v9162_v28  ;;  %v9164_v37 = vld [vmem:[#allocation5 + $0x198] sm:$0xff]  }
  0xed   : > { %13276 = vst [vmem:[#allocation37_spill] sm:$0xff] %v10416_v54  ;;  %v10418_v47 = vor.u32 %v2488_v4, %v2485_v23  ;;  %v10420_v59 = vor.u32 %v2461_v19, %v2458_v8  ;;  %vm13031_vm9 = vcmp.ne.s16.totalorder %v10416_v54, 0  ;;  %v1718_v16 = vshll.u32 %v10408_v45, 16  ;;  %8338 = vmatprep.subr.bf16.mxu1 %v9163_v51  ;;  %v9165_v19 = vld [vmem:[#allocation5 + $0x178] sm:$0xff]  }
  0xee   : > { %v1185_v62 = vsel %vm13031_vm9, %v10255_v12, 0  ;;  %v1587_v55 = vsel %vm13031_vm9, %v10366_v6, 0  ;;  %v10430_v38 = vor.u32 %v1481_v24, %v1478_v33  ;;  %v955_v31 = vsel %vm923_vm14, 65537, %v13017_v2  ;;  %v9166_v24 = vld [vmem:[#allocation5 + $0x138] sm:$0xff]   ;;  %8234 = vmatprep.subr.bf16.mxu0 %v9165_v19  ;;  %v9167_v19 = vld [vmem:[#allocation5 + $0x1e0] sm:$0xff]  }
  0xef   : > { %v2490_v14 = vsel %vm1403_vm15, %v10327_v56, %v10418_v47  ;;  %v10444_v23 = vsel %vm1403_vm15, %v10329_v46, %v10420_v59  ;;  %v2537_v4 = vshrl.u32 %v1185_v62, 16  ;;  %v2540_v8 = vshll.u32 %v1185_v62, 16  ;;  %8235 = vmatpush3.bf16.msra.mxu0 %v9166_v24 }
  0xf0   : > { %13277 = vst [vmem:[#allocation38_spill] sm:$0xff] %v10444_v23  ;;  %3958 = vmatmul.mubr.bf16.gmra.mrb[20].mxu1 %v2490_v14  ;;  %3804 = vmatprep.mubr.bf16.mxu0 %v10444_v23  ;;  %v2555_v61 = vshrl.u32 %v1587_v55, 16  ;;  %v2558_v30 = vshll.u32 %v1587_v55, 16  ;;  %v10450_v56 = vsel %vm1403_vm15, %v10342_v48, %v10430_v38  ;;  %v1720_v33 = vrot.slane %v1718_v16, 1  ;;  %v710_v48 = vld [vmem:[%s9667_s6 + $0x90] sm:$0xff] }
  0xf1   : > { %13278 = vst [vmem:[#allocation39_spill] sm:$0xff] %v10450_v56  ;;  %v2539_v46 = vrot.slane %v2537_v4, 3  ;;  %v2542_v28 = vrot.slane %v2540_v8, 4  ;;  %vm13032_vm10 = vcmp.ne.s16.totalorder %v10450_v56, 0  ;;  %v7819_v51 = vcombine.low %v955_v31, %v9689_v11  ;;  %8339 = vmatpush3.bf16.msra.mxu1 %v9164_v37 }
  0xf2   : > { %v2557_v62 = vrot.slane %v2555_v61, 3  ;;  %v2560_v14 = vrot.slane %v2558_v30, 4  ;;  %v10457_v55 = vsel %vm13032_vm10, %v10366_v6, 0  ;;  %v1721_v2 = vsel %vm1647_vm8, %v1716_v39, %v1720_v33  ;;  %v9168_v39 = vld [vmem:[#allocation5 + $0x1a0] sm:$0xff]   ;;  %8340 = vmatprep.subr.bf16.mxu1 %v9167_v19 }
  0xf3   : > { %v10462_v16 = vor.u32 %v2542_v28, %v2539_v46  ;;  %v13030_v4 = vrot.slane %v10457_v55, 1  ;;  %v2519_v8 = vshrl.u32 %v1721_v2, 16  ;;  %v2522_v31 = vshll.u32 %v1721_v2, 16 }
  0xf4   : > { %v10465_v61 = vor.u32 %v2560_v14, %v2557_v62  ;;  %v1092_v30 = vshrl.u32 %v7819_v51, 16  ;;  %v1095_v35 = vshll.u32 %v7819_v51, 16  ;;  %v295_v3 = vadd.s32 152, %v9680_v5  ;;  %v9169_v62 = vld [vmem:[#allocation5 + $0x1e8] sm:$0xff]  }
  0xf5   : > { %v2544_v37 = vsel %vm1403_vm15, %v10346_v18, %v10462_v16  ;;  %v13279_v24 = vrot.slane %v10384_v34, 1  ;;  %v2521_v46 = vrot.slane %v2519_v8, 3  ;;  %v2524_v28 = vrot.slane %v2522_v31, 4  ;;  %v10483_v18 = vld [vmem:[%s9667_s6 + $0xa8] sm:$0xff]  ;;  %8341 = vmatpush3.bf16.msra.mxu1 %v9168_v39 }
  0xf6   : > { %3805 = vmatmul.mubr.bf16.gmra.mrb[24].mxu0 %v2544_v37  ;;  %v2562_v51 = vsel %vm1403_vm15, %v10357_v63, %v10465_v61  ;;  %v1094_v23 = vrot.slane %v1092_v30, 4  ;;  %v9170_v34 = vld [vmem:[#allocation5 + $0x1a8] sm:$0xff]   ;;  %v1097_v8 = vrot.slane %v1095_v35, 5  ;;  %v445_v31 = vand.u32 15, %v295_v3  ;;  %8342 = vmatprep.subr.bf16.mxu1 %v9169_v62 }
  0xf7   : > { %v1815_v2 = vsel %vm1798_vm6, %v13279_v24, %v13030_v4  ;;  %3965 = vmatprep.mubr.bf16.mxu1 %v2562_v51  ;;  %v10485_v24 = vor.u32 %v2524_v28, %v2521_v46  ;;  %v733_v19 = vpack.c.bf16 %v711_v43, %v710_v48  ;;  %v1722_v63 = vshrl.u32 %v10408_v45, 16 }
  0xf8   : > { %v2546_v14 = vshrl.u32 %v1815_v2, 16  ;;  %v2549_v54 = vshll.u32 %v1815_v2, 16  ;;  %v294_v2 = vadd.s32 144, %v9680_v5  ;;  %v10494_v39 = vor.u32 %v1097_v8, %v1094_v23  ;;  %v13329_v21 = vld [vmem:[#allocation39_spill] sm:$0xff] }
  0xf9   : > { %v10492_v30 = vsel %vm1403_vm15, %v10420_v59, %v10485_v24  ;;  %vm1214_vm14 = vcmp.lt.s32.totalorder %v445_v31, 15  ;;  %v10496_v46 = vrot.slane %v733_v19, 4  ;;  %v1724_v3 = vor.u32 %v1722_v63, %v1720_v33  ;;  %8343 = vmatpush3.bf16.msra.mxu1 %v9170_v34  ;;  %v9171_v33 = vld [vmem:[#allocation5 + $0x1f0] sm:$0xff]   ;;  %v9174_v34 = vld [vmem:[#allocation5 + $0x1b8] sm:$0xff]  }
  0xfa   : > { %v2548_v37 = vrot.slane %v2546_v14, 3  ;;  %v2551_v4 = vrot.slane %v2549_v54, 4  ;;  %13280 = vst [vmem:[#allocation40_spill] sm:$0xff] %v10492_v30  ;;  %3812 = vmatprep.mubr.bf16.mxu0 %v10492_v30  ;;  %vm1310_vm9 = vmpackc.low %vm1214_vm14, %vm1214_vm14  ;;  %v438_v43 = vand.u32 15, %v294_v2  ;;  %v297_v54 = vadd.s32 168, %v9680_v5  ;;  %v9172_v14 = vld [vmem:[#allocation5 + $0x1b0] sm:$0xff]   ;;  %8344 = vmatprep.subr.bf16.mxu1 %v9171_v33 }
  0xfb   : > { %v10505_v59 = vsel %vm1019_vm11, %v10404_v60, %v10494_v39  ;;  %v13282_v23 = vmov 0   ;;  %v734_v28 = vpack.c.bf16 %v10483_v18, %v10480_v0  ;;  %v9175_v30 = vld [vmem:[#allocation5 + $0x200] sm:$0xff]  }
  0xfc   : > { %v10498_v35 = vor.u32 %v2551_v4, %v2548_v37  ;;  %13281 = vst [vmem:[#allocation41_spill] sm:$0xff] %v10505_v59  ;;  %v1342_v48 = vsel %vm1310_vm9, 65537, %v13282_v23  ;;  %v10511_v4 = vsel %vm13102_vm5, %v10396_v29, %v10496_v46  ;;  %vm13045_vm14 = vcmp.ne.s16.totalorder %v10505_v59, 0  ;;  %8940 = vmatprep.subr.bf16.mxu0 %v9175_v30 }
  0xfd   : > { %13283 = vst [vmem:[#allocation42_spill] sm:$0xff] %v10511_v4  ;;  %v7836_v60 = vcombine.low %v9689_v11, %v1342_v48  ;;  %v1726_v51 = vshll.u32 %v10511_v4, 16  ;;  %v1186_v29 = vsel %vm13045_vm14, %v10366_v6, 0  ;;  %v1588_v0 = vsel %vm13045_vm14, %v10408_v45, 0  ;;  %8345 = vmatpush3.bf16.msra.mxu1 %v9172_v14 }
  0xfe   : > { %v2553_v62 = vsel %vm1403_vm15, %v10418_v47, %v10498_v35  ;;  %vm829_vm9 = vcmp.ge.s32.totalorder %v438_v43, 1  ;;  %v459_v18 = vand.u32 15, %v297_v54  ;;  %v9173_v47 = vld [vmem:[#allocation5 + $0x1f8] sm:$0xff]   ;;  %v2600_v8 = vshrl.u32 %v1186_v29, 16 }
  0xff   : > { %3966 = vmatmul.mubr.bf16.gmra.mrb[24].mxu1 %v2553_v62  ;;  %v2603_v31 = vshll.u32 %v1186_v29, 16  ;;  %v2618_v19 = vshrl.u32 %v1588_v0, 16  ;;  %v2621_v37 = vshll.u32 %v1588_v0, 16  ;;  %vm925_vm10 = vmpackc.low %vm829_vm9, %vm829_vm9  ;;  %v1485_v63 = vshrl.u32 %v7836_v60, 16  ;;  %8346 = vmatprep.subr.bf16.mxu1 %v9173_v47 }
 0x100   : > { %v1488_v2 = vshll.u32 %v7836_v60, 16  ;;  %v1728_v48 = vrot.slane %v1726_v51, 1  ;;  %v957_v62 = vsel %vm925_vm10, 65537, %v13282_v23  ;;  %v2602_v59 = vrot.slane %v2600_v8, 3 }
 0x101   : > { %v2605_v15 = vrot.slane %v2603_v31, 4  ;;  %v2620_v43 = vrot.slane %v2618_v19, 3  ;;  %v2623_v54 = vrot.slane %v2621_v37, 4  ;;  %v1487_v33 = vrot.slane %v1485_v63, 3  ;;  %8347 = vmatpush3.bf16.msra.mxu1 %v9174_v34 }
 0x102   : > { %v1490_v52 = vrot.slane %v1488_v2, 4  ;;  %v1729_v56 = vsel %vm1647_vm8, %v1724_v3, %v1728_v48  ;;  %v7820_v29 = vcombine.low %v957_v62, %v9689_v11  ;;  %vm1216_vm10 = vcmp.lt.s32.totalorder %v459_v18, 15 }
 0x103   : > { %v10530_v0 = vor.u32 %v2605_v15, %v2602_v59  ;;  %v10532_v14 = vor.u32 %v2623_v54, %v2620_v43  ;;  %v2582_v60 = vshrl.u32 %v1729_v56, 16  ;;  %v2585_v51 = vshll.u32 %v1729_v56, 16  ;;  %vm1312_vm9 = vmpackc.low %vm1216_vm10, %vm1216_vm10 }
 0x104   : > { %v1491_v47 = vor.u32 %v1490_v52, %v1487_v33  ;;  %v1101_v58 = vshrl.u32 %v7820_v29, 16  ;;  %v1104_v8 = vshll.u32 %v7820_v29, 16  ;;  %v1344_v18 = vsel %vm1312_vm9, 65537, %v13282_v23 }
 0x105   : > { %v2607_v31 = vsel %vm1403_vm15, %v10462_v16, %v10530_v0  ;;  %v2625_v3 = vsel %vm1403_vm15, %v10465_v61, %v10532_v14  ;;  %v2584_v30 = vrot.slane %v2582_v60, 3  ;;  %v2587_v15 = vrot.slane %v2585_v51, 4 }
 0x106   : > { %3813 = vmatmul.mubr.bf16.gmra.mrb[28].mxu0 %v2607_v31  ;;  %3973 = vmatprep.mubr.bf16.mxu1 %v2625_v3  ;;  %v10542_v56 = vsel %vm1403_vm15, %v10430_v38, %v1491_v47  ;;  %v1103_v52 = vrot.slane %v1101_v58, 4  ;;  %v1106_v59 = vrot.slane %v1104_v8, 5  ;;  %v7837_v34 = vcombine.low %v9689_v11, %v1344_v18 }
 0x107   : > { %13284 = vst [vmem:[#allocation43_spill] sm:$0xff] %v10542_v56  ;;  %vm13049_vm14 = vcmp.ne.s16.totalorder %v10542_v56, 0  ;;  %v10546_v16 = vor.u32 %v2587_v15, %v2584_v30  ;;  %v10549_v61 = vrot.slane %v734_v28, 4  ;;  %v1730_v38 = vshrl.u32 %v10511_v4, 16 }
 0x108   : > { %v1571_v19 = vsel %vm13049_vm14, %v10408_v45, 0  ;;  %v10554_v37 = vor.u32 %v1106_v59, %v1103_v52  ;;  %v296_v58 = vadd.s32 160, %v9680_v5  ;;  %v1494_v62 = vshrl.u32 %v7837_v34, 16 }
 0x109   : > { %v1816_v63 = vrot.slane %v1571_v19, 1  ;;  %v10561_v2 = vsel %vm1403_vm15, %v10485_v24, %v10546_v16  ;;  %v1497_v43 = vshll.u32 %v7837_v34, 16  ;;  %v10572_v54 = vsel %vm13102_vm5, %v10496_v46, %v10549_v61 }
 0x10a   : > { %13285 = vst [vmem:[#allocation44_spill] sm:$0xff] %v10561_v2  ;;  %3820 = vmatprep.mubr.bf16.mxu0 %v10561_v2  ;;  %v10567_v28 = vsel %vm1019_vm11, %v10494_v39, %v10554_v37  ;;  %13287 = vst [vmem:[#allocation46_spill] sm:$0xff] %v10572_v54  ;;  %v1732_v33 = vor.u32 %v1730_v38, %v1728_v48  ;;  %v452_v29 = vand.u32 15, %v296_v58  ;;  %v13288_v60 = vrot.slane %v10457_v55, 1 }
 0x10b   : > { %13286 = vst [vmem:[#allocation45_spill] sm:$0xff] %v10567_v28  ;;  %vm13048_vm10 = vcmp.ne.s16.totalorder %v10567_v28, 0  ;;  %v1496_v51 = vrot.slane %v1494_v62, 3  ;;  %v1499_v8 = vrot.slane %v1497_v43, 4  ;;  %v1734_v34 = vshll.u32 %v10572_v54, 16  ;;  %v715_v28 = vld [vmem:[%s9667_s6 + $0xb8] sm:$0xff] }
 0x10c   : > { %v1817_v24 = vsel %vm1798_vm6, %v13288_v60, %v1816_v63  ;;  %v1187_v39 = vsel %vm13048_vm10, %v10408_v45, 0  ;;  %v1589_v46 = vsel %vm13048_vm10, %v10511_v4, 0  ;;  %vm831_vm9 = vcmp.ge.s32.totalorder %v452_v29, 1 }
 0x10d   : > { %v2609_v31 = vshrl.u32 %v1817_v24, 16  ;;  %v2612_v3 = vshll.u32 %v1817_v24, 16  ;;  %v2663_v48 = vshrl.u32 %v1187_v39, 16  ;;  %v2666_v30 = vshll.u32 %v1187_v39, 16  ;;  %v714_v39 = vld [vmem:[%s9667_s6 + $0xb0] sm:$0xff]  ;;  %vm927_vm14 = vmpackc.low %vm831_vm9, %vm831_vm9 }
 0x10e   : > { %v2681_v55 = vshrl.u32 %v1589_v46, 16  ;;  %v2684_v15 = vshll.u32 %v1589_v46, 16  ;;  %v10584_v18 = vor.u32 %v1499_v8, %v1496_v51  ;;  %v1736_v24 = vrot.slane %v1734_v34, 1 }
 0x10f   : > { %v2611_v52 = vrot.slane %v2609_v31, 3  ;;  %v2614_v59 = vrot.slane %v2612_v3, 4  ;;  %v2665_v19 = vrot.slane %v2663_v48, 3  ;;  %v2668_v38 = vrot.slane %v2666_v30, 4 }
 0x110   : > { %v2683_v58 = vrot.slane %v2681_v55, 3  ;;  %v2686_v62 = vrot.slane %v2684_v15, 4  ;;  %v10589_v60 = vsel %vm1403_vm15, %v1491_v47, %v10584_v18  ;;  %v299_v51 = vadd.s32 184, %v9680_v5 }
 0x111   : > { %v2615_v43 = vor.u32 %v2614_v59, %v2611_v52  ;;  %13289 = vst [vmem:[#allocation47_spill] sm:$0xff] %v10589_v60  ;;  %v10593_v46 = vor.u32 %v2668_v38, %v2665_v19  ;;  %vm13053_vm10 = vcmp.ne.s16.totalorder %v10589_v60, 0  ;;  %v1737_v29 = vsel %vm1647_vm8, %v1732_v33, %v1736_v24 }
 0x112   : > { %v10595_v31 = vor.u32 %v2686_v62, %v2683_v58  ;;  %v10604_v47 = vsel %vm13053_vm10, %v10511_v4, 0  ;;  %v959_v3 = vsel %vm927_vm14, 65537, %v13282_v23  ;;  %v2645_v55 = vshrl.u32 %v1737_v29, 16 }
 0x113   : > { %v2616_v8 = vsel %vm1403_vm15, %v10498_v35, %v2615_v43  ;;  %v2670_v48 = vsel %vm1403_vm15, %v10530_v0, %v10593_v46  ;;  %v13050_v35 = vrot.slane %v10604_v47, 1  ;;  %v2648_v15 = vshll.u32 %v1737_v29, 16 }
 0x114   : > { %3974 = vmatmul.mubr.bf16.gmra.mrb[28].mxu1 %v2616_v8  ;;  %v2688_v30 = vsel %vm1403_vm15, %v10532_v14, %v10595_v31  ;;  %3821 = vmatmul.mubr.bf16.gmra.mrb[32].mxu0 %v2670_v48  ;;  %v7821_v33 = vcombine.low %v959_v3, %v9689_v11  ;;  %v473_v52 = vand.u32 15, %v299_v51  ;;  %v735_v59 = vpack.c.bf16 %v715_v28, %v714_v39  ;;  %v716_v28 = vld [vmem:[%s9667_s6 + $0xc0] sm:$0xff] }
 0x115   : > { %3981 = vmatprep.mubr.bf16.mxu1 %v2688_v30  ;;  %v1819_v34 = vsel %vm1798_vm6, %v1816_v63, %v13050_v35  ;;  %v2647_v0 = vrot.slane %v2645_v55, 3  ;;  %v1738_v19 = vshrl.u32 %v10572_v54, 16  ;;  %v298_v14 = vadd.s32 176, %v9680_v5  ;;  %v717_v55 = vld [vmem:[%s9667_s6 + $0xc8] sm:$0xff] }
 0x116   : > { %v2672_v38 = vshrl.u32 %v1819_v34, 16  ;;  %v2675_v58 = vshll.u32 %v1819_v34, 16  ;;  %v2650_v62 = vrot.slane %v2648_v15, 4  ;;  %v1110_v8 = vshrl.u32 %v7821_v33, 16 }
 0x117   : > { %v1113_v29 = vshll.u32 %v7821_v33, 16  ;;  %vm1218_vm14 = vcmp.lt.s32.totalorder %v473_v52, 15  ;;  %v10621_v48 = vrot.slane %v735_v59, 4  ;;  %v1740_v51 = vor.u32 %v1738_v19, %v1736_v24 }
 0x118   : > { %v2674_v39 = vrot.slane %v2672_v38, 3  ;;  %v2677_v3 = vrot.slane %v2675_v58, 4  ;;  %v2651_v30 = vor.u32 %v2650_v62, %v2647_v0  ;;  %v1112_v63 = vrot.slane %v1110_v8, 4  ;;  %vm1314_vm9 = vmpackc.low %vm1218_vm14, %vm1218_vm14 }
 0x119   : > { %v1115_v35 = vrot.slane %v1113_v29, 5  ;;  %v1346_v2 = vsel %vm1314_vm9, 65537, %v13282_v23  ;;  %v10629_v15 = vsel %vm13102_vm5, %v10549_v61, %v10621_v48  ;;  %v466_v33 = vand.u32 15, %v298_v14 }
 0x11a   : > { %13290 = vst [vmem:[#allocation48_spill] sm:$0xff] %v10629_v15  ;;  %v10631_v52 = vor.u32 %v2677_v3, %v2674_v39  ;;  %v10635_v24 = vsel %vm1403_vm15, %v10546_v16, %v2651_v30  ;;  %v7838_v59 = vcombine.low %v9689_v11, %v1346_v2  ;;  %v1742_v34 = vshll.u32 %v10629_v15, 16 }
 0x11b   : > { %13291 = vst [vmem:[#allocation49_spill] sm:$0xff] %v10635_v24  ;;  %3828 = vmatprep.mubr.bf16.mxu0 %v10635_v24  ;;  %v10640_v0 = vor.u32 %v1115_v35, %v1112_v63  ;;  %vm833_vm14 = vcmp.ge.s32.totalorder %v466_v33, 1  ;;  %v301_v19 = vadd.s32 200, %v9680_v5  ;;  %v736_v61 = vpack.c.bf16 %v717_v55, %v716_v28 }
 0x11c   : > { %v2679_v14 = vsel %vm1403_vm15, %v2615_v43, %v10631_v52  ;;  %v1503_v38 = vshrl.u32 %v7838_v59, 16  ;;  %v1506_v58 = vshll.u32 %v7838_v59, 16  ;;  %v1744_v62 = vrot.slane %v1742_v34, 1  ;;  %vm929_vm9 = vmpackc.low %vm833_vm14, %vm833_vm14 }
 0x11d   : > { %3982 = vmatmul.mubr.bf16.gmra.mrb[32].mxu1 %v2679_v14  ;;  %v10648_v16 = vsel %vm1019_vm11, %v10554_v37, %v10640_v0  ;;  %v961_v2 = vsel %vm929_vm9, 65537, %v13282_v23  ;;  %v487_v35 = vand.u32 15, %v301_v19  ;;  %v10651_v8 = vrot.slane %v736_v61, 4 }
 0x11e   : > { %13292 = vst [vmem:[#allocation50_spill] sm:$0xff] %v10648_v16  ;;  %vm13062_vm10 = vcmp.ne.s16.totalorder %v10648_v16, 0  ;;  %v1505_v29 = vrot.slane %v1503_v38, 3  ;;  %v1508_v28 = vrot.slane %v1506_v58, 4  ;;  %v1745_v43 = vsel %vm1647_vm8, %v1740_v51, %v1744_v62 }
 0x11f   : > { %v1188_v39 = vsel %vm13062_vm10, %v10511_v4, 0  ;;  %v1590_v37 = vsel %vm13062_vm10, %v10572_v54, 0  ;;  %v2708_v3 = vshrl.u32 %v1745_v43, 16  ;;  %v2711_v63 = vshll.u32 %v1745_v43, 16 }
 0x120   : > { %v2726_v55 = vshrl.u32 %v1188_v39, 16  ;;  %v2729_v33 = vshll.u32 %v1188_v39, 16  ;;  %v2744_v59 = vshrl.u32 %v1590_v37, 16  ;;  %v2747_v34 = vshll.u32 %v1590_v37, 16 }
 0x121   : > { %v10661_v19 = vor.u32 %v1508_v28, %v1505_v29  ;;  %v2710_v61 = vrot.slane %v2708_v3, 3  ;;  %v2713_v14 = vrot.slane %v2711_v63, 4  ;;  %v7822_v51 = vcombine.low %v961_v2, %v9689_v11 }
 0x122   : > { %v2728_v38 = vrot.slane %v2726_v55, 3  ;;  %v2731_v58 = vrot.slane %v2729_v33, 4  ;;  %v2746_v24 = vrot.slane %v2744_v59, 3  ;;  %v2749_v60 = vrot.slane %v2747_v34, 4 }
 0x123   : > { %v10667_v16 = vsel %vm1403_vm15, %v10584_v18, %v10661_v19  ;;  %v10669_v43 = vor.u32 %v2713_v14, %v2710_v61  ;;  %v1119_v39 = vshrl.u32 %v7822_v51, 16  ;;  %v1122_v56 = vshll.u32 %v7822_v51, 16 }
 0x124   : > { %13293 = vst [vmem:[#allocation51_spill] sm:$0xff] %v10667_v16  ;;  %v10671_v37 = vor.u32 %v2731_v58, %v2728_v38  ;;  %v10673_v29 = vor.u32 %v2749_v60, %v2746_v24  ;;  %vm13077_vm14 = vcmp.ne.s16.totalorder %v10667_v16, 0  ;;  %vm1220_vm9 = vcmp.lt.s32.totalorder %v487_v35, 15 }
 0x125   : > { %v10679_v2 = vsel %vm13077_vm14, %v10572_v54, 0  ;;  %v10683_v18 = vsel %vm1403_vm15, %v2651_v30, %v10669_v43  ;;  %v1121_v28 = vrot.slane %v1119_v39, 4  ;;  %v1124_v3 = vrot.slane %v1122_v56, 5  ;;  %vm1316_vm10 = vmpackc.low %vm1220_vm9, %vm1220_vm9 }
 0x126   : > { %13294 = vst [vmem:[#allocation52_spill] sm:$0xff] %v10683_v18  ;;  %v2733_v60 = vsel %vm1403_vm15, %v10593_v46, %v10671_v37  ;;  %v2751_v24 = vsel %vm1403_vm15, %v10595_v31, %v10673_v29  ;;  %v13063_v35 = vrot.slane %v10679_v2, 1  ;;  %v1348_v63 = vsel %vm1316_vm10, 65537, %v13282_v23 }
 0x127   : > { %3829 = vmatmul.mubr.bf16.gmra.mrb[36].mxu0 %v2733_v60  ;;  %3989 = vmatprep.mubr.bf16.mxu1 %v2751_v24  ;;  %v10693_v55 = vor.u32 %v1124_v3, %v1121_v28  ;;  %v7839_v30 = vcombine.low %v9689_v11, %v1348_v63  ;;  %v10699_v56 = vsel %vm13102_vm5, %v10621_v48, %v10651_v8  ;;  %v1746_v46 = vshrl.u32 %v10629_v15, 16 }
 0x128   : > { %13295 = vst [vmem:[#allocation53_spill] sm:$0xff] %v10699_v56  ;;  %v13296_v31 = vrot.slane %v10604_v47, 1  ;;  %3836 = vmatprep.mubr.bf16.mxu0 %v10683_v18  ;;  %v1750_v59 = vshll.u32 %v10699_v56, 16  ;;  %v300_v34 = vadd.s32 192, %v9680_v5  ;;  %v303_v61 = vadd.s32 216, %v9680_v5  ;;  %v719_v18 = vld [vmem:[%s9667_s6 + $0xd8] sm:$0xff] }
 0x129   : > { %v10714_v51 = vsel %vm1019_vm11, %v10640_v0, %v10693_v55  ;;  %v1512_v47 = vshrl.u32 %v7839_v30, 16  ;;  %v1515_v38 = vshll.u32 %v7839_v30, 16  ;;  %v1748_v58 = vor.u32 %v1746_v46, %v1744_v62 }
 0x12a   : > { %v1821_v33 = vsel %vm1798_vm6, %v13296_v31, %v13063_v35  ;;  %13297 = vst [vmem:[#allocation54_spill] sm:$0xff] %v10714_v51  ;;  %vm13076_vm10 = vcmp.ne.s16.totalorder %v10714_v51, 0  ;;  %v1752_v39 = vrot.slane %v1750_v59, 1  ;;  %v718_v35 = vld [vmem:[%s9667_s6 + $0xd0] sm:$0xff] }
 0x12b   : > { %v2735_v14 = vshrl.u32 %v1821_v33, 16  ;;  %v2738_v48 = vshll.u32 %v1821_v33, 16  ;;  %v1189_v60 = vsel %vm13076_vm10, %v10572_v54, 0  ;;  %v1591_v24 = vsel %vm13076_vm10, %v10629_v15, 0 }
 0x12c   : > { %v2789_v63 = vshrl.u32 %v1189_v60, 16  ;;  %v2792_v31 = vshll.u32 %v1189_v60, 16  ;;  %v2807_v0 = vshrl.u32 %v1591_v24, 16  ;;  %v2810_v33 = vshll.u32 %v1591_v24, 16 }
 0x12d   : > { %v2737_v28 = vrot.slane %v2735_v14, 3  ;;  %v2740_v3 = vrot.slane %v2738_v48, 4  ;;  %v1514_v62 = vrot.slane %v1512_v47, 3  ;;  %v1517_v30 = vrot.slane %v1515_v38, 4 }
 0x12e   : > { %v1753_v46 = vsel %vm1647_vm8, %v1748_v58, %v1752_v39  ;;  %v2791_v59 = vrot.slane %v2789_v63, 3  ;;  %v2794_v14 = vrot.slane %v2792_v31, 4  ;;  %v2809_v48 = vrot.slane %v2807_v0, 3 }
 0x12f   : > { %v10725_v16 = vor.u32 %v2740_v3, %v2737_v28  ;;  %v2812_v54 = vrot.slane %v2810_v33, 4  ;;  %v10731_v4 = vor.u32 %v1517_v30, %v1514_v62  ;;  %v2771_v60 = vshrl.u32 %v1753_v46, 16 }
 0x130   : > { %v2774_v24 = vshll.u32 %v1753_v46, 16  ;;  %v10733_v45 = vor.u32 %v2794_v14, %v2791_v59  ;;  %v480_v47 = vand.u32 15, %v300_v34  ;;  %v501_v38 = vand.u32 15, %v303_v61 }
 0x131   : > { %v2742_v51 = vsel %vm1403_vm15, %v10631_v52, %v10725_v16  ;;  %v10735_v28 = vor.u32 %v2812_v54, %v2809_v48  ;;  %v10740_v58 = vsel %vm1403_vm15, %v10661_v19, %v10731_v4  ;;  %v2773_v3 = vrot.slane %v2771_v60, 3 }
 0x132   : > { %3990 = vmatmul.mubr.bf16.gmra.mrb[36].mxu1 %v2742_v51  ;;  %13298 = vst [vmem:[#allocation55_spill] sm:$0xff] %v10740_v58  ;;  %v2776_v63 = vrot.slane %v2774_v24, 4  ;;  %v737_v31 = vpack.c.bf16 %v719_v18, %v718_v35  ;;  %v2796_v52 = vsel %vm1403_vm15, %v10671_v37, %v10733_v45  ;;  %vm1558_vm9 = vcmp.ne.s16.totalorder %v10740_v58, 0 }
 0x133   : > { %v2814_v51 = vsel %vm1403_vm15, %v10673_v29, %v10735_v28  ;;  %vm835_vm10 = vcmp.ge.s32.totalorder %v480_v47, 1  ;;  %3837 = vmatmul.mubr.bf16.gmra.mrb[40].mxu0 %v2796_v52  ;;  %v10752_v54 = vsel %vm1558_vm9, %v10629_v15, 0  ;;  %vm1222_vm0 = vcmp.lt.s32.totalorder %v501_v38, 15  ;;  %v720_v38 = vld [vmem:[%s9667_s6 + $0xe0] sm:$0xff] }
 0x134   : > { %3997 = vmatprep.mubr.bf16.mxu1 %v2814_v51  ;;  %v10754_v19 = vor.u32 %v2776_v63, %v2773_v3  ;;  %vm931_vm14 = vmpackc.low %vm835_vm10, %vm835_vm10  ;;  %v10756_v18 = vrot.slane %v737_v31, 4  ;;  %v13080_v37 = vrot.slane %v10752_v54, 1  ;;  %v1754_v35 = vshrl.u32 %v10699_v56, 16 }
 0x135   : > { %v963_v29 = vsel %vm931_vm14, 65537, %v13282_v23  ;;  %vm1318_vm7 = vmpackc.low %vm1222_vm0, %vm1222_vm0  ;;  %v302_v34 = vadd.s32 208, %v9680_v5  ;;  %v13301_v30 = vrot.slane %v10679_v2, 1 }
 0x136   : > { %v10765_v61 = vsel %vm1403_vm15, %v10669_v43, %v10754_v19  ;;  %v7823_v0 = vcombine.low %v963_v29, %v9689_v11  ;;  %v1350_v33 = vsel %vm1318_vm7, 65537, %v13282_v23  ;;  %v10772_v62 = vsel %vm13102_vm5, %v10651_v8, %v10756_v18  ;;  %v721_v8 = vld [vmem:[%s9667_s6 + $0xe8] sm:$0xff] }
 0x137   : > { %13299 = vst [vmem:[#allocation56_spill] sm:$0xff] %v10765_v61  ;;  %13300 = vst [vmem:[#allocation57_spill] sm:$0xff] %v10772_v62  ;;  %v1823_v46 = vsel %vm1798_vm6, %v13301_v30, %v13080_v37  ;;  %3844 = vmatprep.mubr.bf16.mxu0 %v10765_v61  ;;  %v7840_v43 = vcombine.low %v9689_v11, %v1350_v33  ;;  %v1756_v59 = vor.u32 %v1754_v35, %v1752_v39 }
 0x138   : > { %v1758_v14 = vshll.u32 %v10772_v62, 16  ;;  %v2798_v48 = vshrl.u32 %v1823_v46, 16  ;;  %v2801_v60 = vshll.u32 %v1823_v46, 16  ;;  %v1128_v24 = vshrl.u32 %v7823_v0, 16 }
 0x139   : > { %v1131_v47 = vshll.u32 %v7823_v0, 16  ;;  %v1521_v3 = vshrl.u32 %v7840_v43, 16  ;;  %v1524_v63 = vshll.u32 %v7840_v43, 16  ;;  %v494_v2 = vand.u32 15, %v302_v34 }
 0x13a   : > { %v10784_v31 = vrot.slane %v1758_v14, 1  ;;  %v2800_v52 = vrot.slane %v2798_v48, 3  ;;  %v2803_v51 = vrot.slane %v2801_v60, 4  ;;  %v1130_v29 = vrot.slane %v1128_v24, 4 }
 0x13b   : > { %v1133_v30 = vrot.slane %v1131_v47, 5  ;;  %v1523_v37 = vrot.slane %v1521_v3, 3  ;;  %v1526_v33 = vrot.slane %v1524_v63, 4  ;;  %vm837_vm7 = vcmp.ge.s32.totalorder %v494_v2, 1 }
 0x13c   : > { %v1761_v39 = vsel %vm1647_vm8, %v1756_v59, %v10784_v31  ;;  %v10788_v35 = vor.u32 %v2803_v51, %v2800_v52  ;;  %vm933_vm0 = vmpackc.low %vm837_vm7, %vm837_vm7  ;;  %v305_v14 = vadd.s32 232, %v9680_v5  ;;  %v738_v48 = vpack.c.bf16 %v721_v8, %v720_v38 }
 0x13d   : > { %v1134_v0 = vor.u32 %v1133_v30, %v1130_v29  ;;  %v2834_v46 = vshrl.u32 %v1761_v39, 16  ;;  %v2837_v61 = vshll.u32 %v1761_v39, 16  ;;  %v10790_v43 = vor.u32 %v1526_v33, %v1523_v37 }
 0x13e   : > { %v965_v34 = vsel %vm933_vm0, 65537, %v13282_v23  ;;  %v2805_v60 = vsel %vm1403_vm15, %v10725_v16, %v10788_v35  ;;  %v515_v8 = vand.u32 15, %v305_v14 }
 0x13f   : > { %v10799_v59 = vsel %vm1019_vm11, %v10693_v55, %v1134_v0  ;;  %v2836_v24 = vrot.slane %v2834_v46, 3  ;;  %v2839_v47 = vrot.slane %v2837_v61, 4  ;;  %3998 = vmatmul.mubr.bf16.gmra.mrb[40].mxu1 %v2805_v60  ;;  %v10805_v37 = vsel %vm1403_vm15, %v10731_v4, %v10790_v43 }
 0x140   : > { %13302 = vst [vmem:[#allocation58_spill] sm:$0xff] %v10799_v59  ;;  %vm13093_vm14 = vcmp.ne.s16.totalorder %v10799_v59, 0  ;;  %13303 = vst [vmem:[#allocation59_spill] sm:$0xff] %v10805_v37  ;;  %v7824_v38 = vcombine.low %v965_v34, %v9689_v11  ;;  %vm1559_vm10 = vcmp.ne.s16.totalorder %v10805_v37, 0  ;;  %vm1224_vm7 = vcmp.lt.s32.totalorder %v515_v8, 15 }
 0x141   : > { %v1190_v16 = vsel %vm13093_vm14, %v10629_v15, 0  ;;  %v1592_v55 = vsel %vm13093_vm14, %v10699_v56, 0  ;;  %v10815_v61 = vor.u32 %v2839_v47, %v2836_v24  ;;  %v10820_v52 = vsel %vm1559_vm10, %v10699_v56, 0  ;;  %vm1320_vm0 = vmpackc.low %vm1224_vm7, %vm1224_vm7 }
 0x142   : > { %v2852_v3 = vshrl.u32 %v1190_v16, 16  ;;  %v2855_v63 = vshll.u32 %v1190_v16, 16  ;;  %v2870_v2 = vshrl.u32 %v1592_v55, 16  ;;  %v2873_v4 = vshll.u32 %v1592_v55, 16 }
 0x143   : > { %v10825_v51 = vsel %vm1403_vm15, %v10754_v19, %v10815_v61  ;;  %v1137_v29 = vshrl.u32 %v7824_v38, 16  ;;  %v1140_v30 = vshll.u32 %v7824_v38, 16  ;;  %v13085_v14 = vrot.slane %v10820_v52, 1 }
 0x144   : > { %13304 = vst [vmem:[#allocation60_spill] sm:$0xff] %v10825_v51  ;;  %v2854_v33 = vrot.slane %v2852_v3, 3  ;;  %v2857_v39 = vrot.slane %v2855_v63, 4  ;;  %v2872_v46 = vrot.slane %v2870_v2, 3  ;;  %v2875_v34 = vrot.slane %v2873_v4, 4 }
 0x145   : > { %v1139_v60 = vrot.slane %v1137_v29, 4  ;;  %v1142_v24 = vrot.slane %v1140_v30, 5  ;;  %v10828_v55 = vrot.slane %v738_v48, 4  ;;  %v1762_v59 = vshrl.u32 %v10772_v62, 16 }
 0x146   : > { %v2858_v47 = vor.u32 %v2857_v39, %v2854_v33  ;;  %v2876_v16 = vor.u32 %v2875_v34, %v2872_v46  ;;  %v13305_v19 = vrot.slane %v10752_v54, 1  ;;  %v1352_v63 = vsel %vm1320_vm0, 65537, %v13282_v23 }
 0x147   : > { %v10836_v3 = vor.u32 %v1142_v24, %v1139_v60  ;;  %v304_v2 = vadd.s32 224, %v9680_v5  ;;  %v7841_v30 = vcombine.low %v9689_v11, %v1352_v63  ;;  %v10852_v33 = vsel %vm13102_vm5, %v10756_v18, %v10828_v55 }
 0x148   : > { %v1825_v38 = vsel %vm1798_vm6, %v13305_v19, %v13085_v14  ;;  %v2859_v8 = vsel %vm1403_vm15, %v10733_v45, %v2858_v47  ;;  %v2877_v48 = vsel %vm1403_vm15, %v10735_v28, %v2876_v16  ;;  %13307 = vst [vmem:[#allocation62_spill] sm:$0xff] %v10852_v33  ;;  %v1764_v28 = vor.u32 %v1762_v59, %v10784_v31  ;;  %v722_v59 = vld [vmem:[%s9667_s6 + $0xf0] sm:$0xff] }
 0x149   : > { %v2861_v4 = vshrl.u32 %v1825_v38, 16  ;;  %v2864_v29 = vshll.u32 %v1825_v38, 16  ;;  %3845 = vmatmul.mubr.bf16.gmra.mrb[44].mxu0 %v2859_v8  ;;  %4005 = vmatprep.mubr.bf16.mxu1 %v2877_v48  ;;  %v10846_v54 = vsel %vm1019_vm11, %v1134_v0, %v10836_v3  ;;  %v508_v39 = vand.u32 15, %v304_v2 }
 0x14a   : > { %13306 = vst [vmem:[#allocation61_spill] sm:$0xff] %v10846_v54  ;;  %3852 = vmatprep.mubr.bf16.mxu0 %v10825_v51  ;;  %vm13090_vm7 = vcmp.ne.s16.totalorder %v10846_v54, 0  ;;  %v1530_v34 = vshrl.u32 %v7841_v30, 16  ;;  %v1533_v60 = vshll.u32 %v7841_v30, 16  ;;  %v1766_v31 = vshll.u32 %v10852_v33, 16 }
 0x14b   : > { %v2863_v45 = vrot.slane %v2861_v4, 3  ;;  %v2866_v46 = vrot.slane %v2864_v29, 4  ;;  %v1191_v0 = vsel %vm13090_vm7, %v10699_v56, 0  ;;  %v1593_v18 = vsel %vm13090_vm7, %v10772_v62, 0  ;;  %v723_v4 = vld [vmem:[%s9667_s6 + $0xf8] sm:$0xff] }
 0x14c   : > { %v2915_v19 = vshrl.u32 %v1191_v0, 16  ;;  %v2918_v38 = vshll.u32 %v1191_v0, 16  ;;  %v2933_v63 = vshrl.u32 %v1593_v18, 16  ;;  %v2936_v2 = vshll.u32 %v1593_v18, 16 }
 0x14d   : > { %v10863_v24 = vor.u32 %v2866_v46, %v2863_v45  ;;  %v1532_v8 = vrot.slane %v1530_v34, 3  ;;  %v1535_v48 = vrot.slane %v1533_v60, 4  ;;  %v1768_v46 = vrot.slane %v1766_v31, 1 }
 0x14e   : > { %v2917_v14 = vrot.slane %v2915_v19, 3  ;;  %v2920_v51 = vrot.slane %v2918_v38, 4  ;;  %v2935_v54 = vrot.slane %v2933_v63, 3  ;;  %v2938_v30 = vrot.slane %v2936_v2, 4 }
 0x14f   : > { %v2868_v29 = vsel %vm1403_vm15, %v10788_v35, %v10863_v24  ;;  %v10871_v45 = vor.u32 %v1535_v48, %v1532_v8  ;;  %vm839_vm0 = vcmp.ge.s32.totalorder %v508_v39, 1  ;;  %v307_v18 = vadd.s32 248, %v9680_v5 }
 0x150   : > { %4006 = vmatmul.mubr.bf16.gmra.mrb[44].mxu1 %v2868_v29  ;;  %v10873_v0 = vor.u32 %v2920_v51, %v2917_v14  ;;  %vm935_vm7 = vmpackc.low %vm839_vm0, %vm839_vm0  ;;  %v739_v34 = vpack.c.bf16 %v723_v4, %v722_v59  ;;  %v1770_v60 = vshrl.u32 %v10852_v33, 16  ;;  %v10877_v37 = vor.u32 %v2938_v30, %v2935_v54 }
 0x151   : > { %v10882_v35 = vsel %vm1403_vm15, %v10790_v43, %v10871_v45  ;;  %v1769_v19 = vsel %vm1647_vm8, %v1764_v28, %v1768_v46  ;;  %v967_v38 = vsel %vm935_vm7, 65537, %v13282_v23  ;;  %v529_v63 = vand.u32 15, %v307_v18 }
 0x152   : > { %13308 = vst [vmem:[#allocation63_spill] sm:$0xff] %v10882_v35  ;;  %v2922_v51 = vsel %vm1403_vm15, %v2858_v47, %v10873_v0  ;;  %vm13094_vm0 = vcmp.ne.s16.totalorder %v10882_v35, 0  ;;  %v2897_v14 = vshrl.u32 %v1769_v19, 16  ;;  %v2900_v39 = vshll.u32 %v1769_v19, 16 }
 0x153   : > { %3853 = vmatmul.mubr.bf16.gmra.mrb[48].mxu0 %v2922_v51  ;;  %v2940_v54 = vsel %vm1403_vm15, %v2876_v16, %v10877_v37  ;;  %v10894_v43 = vsel %vm13094_vm0, %v10772_v62, 0  ;;  %v7825_v28 = vcombine.low %v967_v38, %v9689_v11  ;;  %v10898_v48 = vrot.slane %v739_v34, 4 }
 0x154   : > { %4013 = vmatprep.mubr.bf16.mxu1 %v2940_v54  ;;  %v13095_v2 = vrot.slane %v10894_v43, 1  ;;  %v2899_v47 = vrot.slane %v2897_v14, 3  ;;  %v2902_v8 = vrot.slane %v2900_v39, 4  ;;  %vm1226_vm7 = vcmp.lt.s32.totalorder %v529_v63, 15 }
 0x155   : > { %v1146_v31 = vshrl.u32 %v7825_v28, 16  ;;  %v1149_v59 = vshll.u32 %v7825_v28, 16  ;;  %v1772_v4 = vor.u32 %v1770_v60, %v1768_v46  ;;  %v13309_v16 = vrot.slane %v10820_v52, 1  ;;  %vm1322_vm14 = vmpackc.low %vm1226_vm7, %vm1226_vm7 }
 0x156   : > { %v10905_v30 = vor.u32 %v2902_v8, %v2899_v47  ;;  %v10910_v18 = vsel %vm13102_vm5, %v10828_v55, %v10898_v48  ;;  %v306_v34 = vadd.s32 240, %v9680_v5  ;;  %v1354_v60 = vsel %vm1322_vm14, 65537, %v13282_v23 }
 0x157   : > { %v1827_v29 = vsel %vm1798_vm6, %v13309_v16, %v13095_v2  ;;  %13310 = vst [vmem:[#allocation64_spill] sm:$0xff] %v10910_v18  ;;  %v1148_v51 = vrot.slane %v1146_v31, 4  ;;  %v1151_v46 = vrot.slane %v1149_v59, 5  ;;  %v1774_v14 = vshll.u32 %v10910_v18, 16 }
 0x158   : > { %v2924_v19 = vshrl.u32 %v1827_v29, 16  ;;  %v2927_v38 = vshll.u32 %v1827_v29, 16  ;;  %v10916_v52 = vsel %vm1403_vm15, %v10815_v61, %v10905_v30  ;;  %v522_v39 = vand.u32 15, %v306_v34 }
 0x159   : > { %13311 = vst [vmem:[#allocation65_spill] sm:$0xff] %v10916_v52  ;;  %3860 = vmatprep.mubr.bf16.mxu0 %v10916_v52  ;;  %v10921_v55 = vor.u32 %v1151_v46, %v1148_v51  ;;  %v7842_v5 = vcombine.low %v9689_v11, %v1354_v60  ;;  %v1776_v63 = vrot.slane %v1774_v14, 1  ;;  %v1778_v47 = vshrl.u32 %v10910_v18, 16 }
 0x15a   : > { %v2926_v54 = vrot.slane %v2924_v19, 3  ;;  %v2929_v28 = vrot.slane %v2927_v38, 4  ;;  %vm841_vm7 = vcmp.ge.s32.totalorder %v522_v39, 1 }
 0x15b   : > { %v10930_v61 = vsel %vm1019_vm11, %v10836_v3, %v10921_v55  ;;  %v1539_v31 = vshrl.u32 %v7842_v5, 16  ;;  %v1542_v59 = vshll.u32 %v7842_v5, 16  ;;  %vm937_vm14 = vmpackc.low %vm841_vm7, %vm841_vm7  ;;  %v1777_v16 = vsel %vm1647_vm8, %v1772_v4, %v1776_v63 }
 0x15c   : > { %v10925_v8 = vor.u32 %v2929_v28, %v2926_v54  ;;  %13312 = vst [vmem:[#allocation66_spill] sm:$0xff] %v10930_v61  ;;  %vm1176_vm0 = vcmp.ne.s16.totalorder %v10930_v61, 0  ;;  %v969_v29 = vsel %vm937_vm14, 65537, %v13282_v23  ;;  %v10935_v34 = vor.u32 %v1778_v47, %v1776_v63 }
 0x15d   : > { %v1192_v3 = vsel %vm1176_vm0, %v10772_v62, 0  ;;  %v1594_v38 = vsel %vm1176_vm0, %v10852_v33, 0  ;;  %v1541_v51 = vrot.slane %v1539_v31, 3  ;;  %v1544_v14 = vrot.slane %v1542_v59, 4 }
 0x15e   : > { %v2931_v19 = vsel %vm1403_vm15, %v10863_v24, %v10925_v8  ;;  %v2978_v46 = vshrl.u32 %v1192_v3, 16  ;;  %v2981_v4 = vshll.u32 %v1192_v3, 16  ;;  %v2996_v60 = vshrl.u32 %v1594_v38, 16 }
 0x15f   : > { %4014 = vmatmul.mubr.bf16.gmra.mrb[48].mxu1 %v2931_v19  ;;  %v2999_v23 = vshll.u32 %v1594_v38, 16  ;;  %v2960_v39 = vshrl.u32 %v1777_v16, 16  ;;  %v2963_v54 = vshll.u32 %v1777_v16, 16  ;;  %v7826_v28 = vcombine.low %v969_v29, %v9689_v11 }
 0x160   : > { %v2980_v24 = vrot.slane %v2978_v46, 3  ;;  %v2983_v5 = vrot.slane %v2981_v4, 4  ;;  %v2998_v63 = vrot.slane %v2996_v60, 3  ;;  %v10947_v2 = vor.u32 %v1544_v14, %v1541_v51 }
 0x161   : > { %v3001_v47 = vrot.slane %v2999_v23, 4  ;;  %v2962_v52 = vrot.slane %v2960_v39, 3  ;;  %v2965_v61 = vrot.slane %v2963_v54, 4  ;;  %v1155_v35 = vshrl.u32 %v7826_v28, 16 }
 0x162   : > { %13313 = vst [vmem:[#allocation67_spill] sm:$0xff] %v10947_v2  ;;  %v10949_v31 = vor.u32 %v2983_v5, %v2980_v24  ;;  %v1158_v3 = vshll.u32 %v7826_v28, 16  ;;  %v3113_v59 = vshrl.u32 %v10935_v34, 16  ;;  %v10957_v11 = vsel %vm1403_vm15, %v10871_v45, %v10947_v2 }
 0x163   : > { %v10951_v19 = vor.u32 %v3001_v47, %v2998_v63  ;;  %13314 = vst [vmem:[#allocation68_spill] sm:$0xff] %v10957_v11  ;;  %v10959_v16 = vor.u32 %v2965_v61, %v2962_v52  ;;  %v1157_v29 = vrot.slane %v1155_v35, 4  ;;  %vm1562_vm7 = vcmp.ne.s16.totalorder %v10947_v2, 0 }
 0x164   : > { %v2985_v38 = vsel %vm1403_vm15, %v10873_v0, %v10949_v31  ;;  %vm1561_vm14 = vcmp.ne.s16.totalorder %v10957_v11, 0  ;;  %v1160_v46 = vrot.slane %v1158_v3, 5  ;;  %v1578_v0 = vsel %vm1562_vm7, %v10910_v18, 0  ;;  %v11300_v11 = vld [vmem:[%s13004_s2] ss:$0 sm:$0xff] }
 0x165   : > { %13315 = vst [vmem:[#allocation69_spill] sm:$0xff] %v10959_v16  ;;  %v3003_v51 = vsel %vm1403_vm15, %v10877_v37, %v10951_v19  ;;  %3861 = vmatmul.mubr.bf16.gmra.mrb[52].mxu0 %v2985_v38  ;;  %v1577_v45 = vsel %vm1561_vm14, %v10852_v33, 0  ;;  %v10975_v35 = vsel %vm1403_vm15, %v10905_v30, %v10959_v16  ;;  %v3115_v52 = vrot.slane %v3113_v59, 3 }
 0x166   : > { %4021 = vmatprep.mubr.bf16.mxu1 %v3003_v51  ;;  %13316 = vst [vmem:[#allocation70_spill] sm:$0xff] %v10975_v35  ;;  %v1828_v37 = vrot.slane %v1577_v45, 1  ;;  %3868 = vmatprep.mubr.bf16.mxu0 %v10975_v35  ;;  %v10981_v61 = vor.u32 %v1160_v46, %v1157_v29  ;;  %v1830_v4 = vrot.slane %v1578_v0, 1  ;;  %v3116_v60 = vshll.u32 %v10935_v34, 16 }
 0x167   : > { %v10986_v23 = vsel %vm13102_vm5, %v10898_v48, 0  ;;  %v10991_v30 = vsel %vm13103_vm12, %v9800_v7, 0  ;;  %v10996_v14 = vsel %vm1548_vm13, %v9911_v17, 0  ;;  %v13319_v39 = vrot.slane %v10894_v43, 1 }
 0x168   : > { %13317 = vst [vmem:[#allocation71_spill] sm:$0xff] %v10981_v61  ;;  %13318 = vst [vmem:[#allocation72_spill] sm:$0xff] %v10986_v23  ;;  %v11004_v28 = vsel %vm1019_vm11, %v10921_v55, %v10981_v61  ;;  %v1831_v48 = vsel %vm1798_vm6, %v1828_v37, %v1830_v4  ;;  %v3118_v24 = vrot.slane %v3116_v60, 4  ;;  %vm13161_vm5 = vcmp.ne.s16.totalorder %v9859_v53, 0 }
 0x169   : > { %v1829_v54 = vsel %vm1798_vm6, %v13319_v39, %v1828_v37  ;;  %13320 = vst [vmem:[#allocation73_spill] sm:$0xff] %v11004_v28  ;;  %vm1177_vm12 = vcmp.ne.s16.totalorder %v11004_v28, 0  ;;  %v3050_v47 = vshrl.u32 %v1831_v48, 16  ;;  %v3053_v55 = vshll.u32 %v1831_v48, 16 }
 0x16a   : > { %v2987_v5 = vshrl.u32 %v1829_v54, 16  ;;  %v2990_v63 = vshll.u32 %v1829_v54, 16  ;;  %v1193_v43 = vsel %vm1177_vm12, %v10852_v33, 0  ;;  %v1595_v3 = vsel %vm1177_vm12, %v10910_v18, 0 }
 0x16b   : > { %v3119_v59 = vor.u32 %v3118_v24, %v3115_v52  ;;  %v3041_v51 = vshrl.u32 %v1193_v43, 16  ;;  %v3044_v46 = vshll.u32 %v1193_v43, 16  ;;  %v3059_v45 = vshrl.u32 %v1595_v3, 16 }
 0x16c   : > { %v2989_v29 = vrot.slane %v2987_v5, 3  ;;  %v2992_v38 = vrot.slane %v2990_v63, 4  ;;  %v3062_v0 = vshll.u32 %v1595_v3, 16  ;;  %v3052_v37 = vrot.slane %v3050_v47, 3 }
 0x16d   : > { %v3055_v60 = vrot.slane %v3053_v55, 4  ;;  %v3043_v54 = vrot.slane %v3041_v51, 3  ;;  %v3046_v32 = vrot.slane %v3044_v46, 4  ;;  %v11018_v35 = vsel %vm1579_vm3, %v9800_v7, 0 }
 0x16e   : > { %v2993_v39 = vor.u32 %v2992_v38, %v2989_v29  ;;  %v3061_v44 = vrot.slane %v3059_v45, 3  ;;  %v3064_v28 = vrot.slane %v3062_v0, 4  ;;  %v3120_v52 = vsel %vm1403_vm15, %v10959_v16, %v3119_v59 }
 0x16f   : > { %vm13112_vm11 = vcmp.ne.s16.totalorder %v10981_v61, 0  ;;  %v3047_v24 = vor.u32 %v3046_v32, %v3043_v54  ;;  %v3056_v43 = vor.u32 %v3055_v60, %v3052_v37  ;;  %v11033_v32 = vpop.f32.mrb[0].mxu0  ;;  %v3125_v0 = vshll.u32 %v1830_v4, 16 }
 0x170   : > { %v2994_v48 = vsel %vm1403_vm15, %v10925_v8, %v2993_v39  ;;  %v1194_v5 = vsel %vm13112_vm11, %v10910_v18, 0  ;;  %v1596_v63 = vsel %vm13112_vm11, %v10986_v23, 0  ;;  %v3065_v47 = vor.u32 %v3064_v28, %v3061_v44  ;;  %v11037_v54 = vpop.f32.mrb[1].mxu0 }
 0x171   : > { %4022 = vmatmul.mubr.bf16.gmra.mrb[52].mxu1 %v2994_v48  ;;  %v3104_v3 = vshrl.u32 %v1194_v5, 16  ;;  %v3107_v55 = vshll.u32 %v1194_v5, 16  ;;  %v3048_v59 = vsel %vm1403_vm15, %v10949_v31, %v3047_v24  ;;  %v3131_v29 = vshrl.u32 %v1596_v63, 16  ;;  %v11042_v60 = vpop.f32.mrb[2].mxu0 }
 0x172   : > { %v3134_v38 = vshll.u32 %v1596_v63, 16  ;;  %v3122_v8 = vshrl.u32 %v1830_v4, 16  ;;  %3869 = vmatmul.mubr.bf16.gmra.mrb[56].mxu0 %v3048_v59  ;;  %v3066_v51 = vsel %vm1403_vm15, %v10951_v19, %v3065_v47  ;;  %v1598_v31 = vsel %vm13161_vm5, %v9790_v36, 0 }
 0x173   : > { %v3106_v46 = vrot.slane %v3104_v3, 3  ;;  %v3109_v45 = vrot.slane %v3107_v55, 4  ;;  %4029 = vmatprep.mubr.bf16.mxu1 %v3066_v51  ;;  %3876 = vmatprep.mubr.bf16.mxu0 %v3120_v52  ;;  %v3133_v44 = vrot.slane %v3131_v29, 3  ;;  %v3127_v5 = vrot.slane %v3125_v0, 4  ;;  %v11045_v3 = vpop.f32.mrb[3].mxu0 }
 0x174   : > { %v3136_v28 = vrot.slane %v3134_v38, 4  ;;  %v3124_v37 = vrot.slane %v3122_v8, 3  ;;  %v1856_v63 = vrot.slane %v1598_v31, 1  ;;  %v1857_v19 = vrot.slane %v10991_v30, 1 }
 0x175   : > { %v3110_v48 = vor.u32 %v3109_v45, %v3106_v46  ;;  %v3057_v4 = vsel %vm1403_vm15, %v2993_v39, %v3056_v43  ;;  %v1859_v52 = vrot.slane %v10996_v14, 1  ;;  %v1616_v59 = vsel %vm1163_vm4, %v9911_v17, 0 }
 0x176   : > { %v3137_v55 = vor.u32 %v3136_v28, %v3133_v44  ;;  %v3128_v29 = vor.u32 %v3127_v5, %v3124_v37  ;;  %v1858_v38 = vsel %vm1798_vm6, %v1856_v63, %v1857_v19  ;;  %v2179_v8 = vshrl.u32 %v11018_v35, 16 }
 0x177   : > { %v3111_v36 = vsel %vm1403_vm15, %v3047_v24, %v3110_v48  ;;  %v1860_v51 = vsel %vm1798_vm6, %v1857_v19, %v1859_v52  ;;  %v2162_v46 = vshrl.u32 %v1858_v38, 16  ;;  %v2165_v39 = vshll.u32 %v1858_v38, 16 }
 0x178   : > { %v3138_v30 = vsel %vm1403_vm15, %v3065_v47, %v3137_v55  ;;  %v2170_v45 = vshrl.u32 %v1860_v51, 16  ;;  %v2173_v14 = vshll.u32 %v1860_v51, 16  ;;  %v2182_v0 = vshll.u32 %v11018_v35, 16 }
 0x179   : > { %4030 = vmatmul.mubr.bf16.gmra.mrb[56].mxu1 %v3057_v4  ;;  %v2164_v44 = vrot.slane %v2162_v46, 3  ;;  %v2167_v28 = vrot.slane %v2165_v39, 4  ;;  %v2187_v24 = vshrl.u32 %v1616_v59, 16  ;;  %v2190_v48 = vshll.u32 %v1616_v59, 16 }
 0x17a   : > { %4037 = vmatprep.mubr.bf16.mxu1 %v3138_v30  ;;  %3877 = vmatmul.mubr.bf16.gmra.mrb[60].mxu0 %v3111_v36  ;;  %v2172_v37 = vrot.slane %v2170_v45, 3  ;;  %v2175_v31 = vrot.slane %v2173_v14, 4  ;;  %v1601_v47 = vsel %vm13175_vm2, %v9977_v50, 0  ;;  %v3129_v5 = vsel %vm1403_vm15, %v3056_v43, %v3128_v29 }
 0x17b   : > { %v2168_v63 = vor.u32 %v2167_v28, %v2164_v44  ;;  %v2181_v19 = vrot.slane %v2179_v8, 3  ;;  %v1861_v4 = vrot.slane %v1601_v47, 1  ;;  %v2184_v38 = vrot.slane %v2182_v0, 4 }
 0x17c   : > { %v2176_v55 = vor.u32 %v2175_v31, %v2172_v37  ;;  %v1617_v35 = vsel %vm13113_vm1, %v9977_v50, 0  ;;  %vm13321_vm11 = vcmp.ne.s16.totalorder %v10088_v20, 0  ;;  %v2189_v59 = vrot.slane %v2187_v24, 3  ;;  %v9176_v37 = vld [vmem:[#allocation5 + $0x208] sm:$0xff]  }
 0x17d   : > { %v1602_v36 = vsel %vm13321_vm11, %v10052_v1, 0  ;;  %v2192_v30 = vrot.slane %v2190_v48, 4  ;;  %v1862_v51 = vsel %vm1798_vm6, %v1859_v52, %v1861_v4  ;;  %v2258_v39 = vshrl.u32 %v1617_v35, 16  ;;  %v11072_v48 = vpop.f32.mrb[0].mxu1 }
 0x17e   : > { %v1863_v46 = vrot.slane %v1602_v36, 1  ;;  %v2177_v43 = vsel %vm1403_vm15, %v2168_v63, %v2176_v55  ;;  %v2249_v29 = vshrl.u32 %v1862_v51, 16  ;;  %v2252_v8 = vshll.u32 %v1862_v51, 16 }
 0x17f   : > { %4078 = vmatprep.mubr.bf16.mxu0 %v2177_v43  ;;  %v2261_v44 = vshll.u32 %v1617_v35, 16  ;;  %v2185_v24 = vor.u32 %v2184_v38, %v2181_v19  ;;  %v2193_v31 = vor.u32 %v2192_v30, %v2189_v59  ;;  %vm13322_vm11 = vcmp.ne.s16.totalorder %v10182_v10, 0  ;;  %v9255_v35 = vld [vmem:[#allocation5 + $0x200] sm:$0xff]  }
 0x180   : > { %v1864_v45 = vsel %vm1798_vm6, %v1861_v4, %v1863_v46  ;;  %v2251_v14 = vrot.slane %v2249_v29, 3  ;;  %v2254_v0 = vrot.slane %v2252_v8, 4  ;;  %v11078_v4 = vpop.f32.mrb[1].mxu1  ;;  %v2260_v38 = vrot.slane %v2258_v39, 3 }
 0x181   : > { %4038 = vmatmul.mubr.bf16.gmra.mrb[60].mxu1 %v3129_v5  ;;  %v2312_v28 = vshrl.u32 %v1864_v45, 16  ;;  %v2315_v52 = vshll.u32 %v1864_v45, 16  ;;  %v1603_v5 = vsel %vm13322_vm11, %v10171_v40, 0  ;;  %v11080_v51 = vpop.f32.mrb[2].mxu1  ;;  %v2263_v59 = vrot.slane %v2261_v44, 4 }
 0x182   : > { %4239 = vmatprep.mubr.bf16.mxu1 %v10074_v25  ;;  %4079 = vmatmul.mubr.bf16.vlgmr.msra.gmra.mrb[64].mxu0 %v9985_v27  ;;  %v2255_v47 = vor.u32 %v2254_v0, %v2251_v14  ;;  %v1865_v30 = vrot.slane %v1603_v5, 1  ;;  %v9177_v27 = vld [vmem:[#allocation5 + $0x210] sm:$0xff]   ;;  %v11083_v43 = vpop.f32.mrb[3].mxu1  ;;  %v2194_v29 = vsel %vm1403_vm15, %v2185_v24, %v2193_v31  ;;  %vm13323_vm11 = vcmp.ne.s16.totalorder %v10061_v57, 0  ;;  %v9178_v5 = vld [vmem:[#allocation5 + $0x218] sm:$0xff]  }
 0x183   : > { %v2314_v63 = vrot.slane %v2312_v28, 3  ;;  %8941 = vmatpush3.bf16.msra.mxu0 %v9255_v35  ;;  %v2317_v36 = vrot.slane %v2315_v52, 4  ;;  %v1618_v45 = vsel %vm13323_vm11, %v10052_v1, 0  ;;  %vm13324_vm1 = vcmp.ne.s16.totalorder %v10250_v26, 0  ;;  %v11093_v28 = vpop.f32.mrb[4].mxu0 }
 0x184   : > { %v2256_v19 = vsel %vm1403_vm15, %v2176_v55, %v2255_v47  ;;  %8942 = vmatprep.subr.bf16.mxu0 %v9176_v37  ;;  %v1604_v14 = vsel %vm13324_vm1, %v10255_v12, 0  ;;  %v1866_v55 = vsel %vm1798_vm6, %v1863_v46, %v1865_v30  ;;  %v2264_v24 = vor.u32 %v2263_v59, %v2260_v38  ;;  %v11096_v35 = vpop.f32.mrb[5].mxu0 }
 0x185   : > { %4086 = vmatprep.mubr.bf16.mxu0 %v2256_v19  ;;  %v2318_v8 = vor.u32 %v2317_v36, %v2314_v63  ;;  %v1867_v39 = vrot.slane %v1604_v14, 1  ;;  %v2375_v0 = vshrl.u32 %v1866_v55, 16  ;;  %v2378_v44 = vshll.u32 %v1866_v55, 16  ;;  %v11100_v14 = vpop.f32.mrb[6].mxu0 }
 0x186   : > { %v2321_v63 = vshrl.u32 %v1618_v45, 16  ;;  %v2324_v36 = vshll.u32 %v1618_v45, 16  ;;  %vm13325_vm1 = vcmp.ne.s16.totalorder %v10362_v42, 0  ;;  %v11106_v38 = vpop.f32.mrb[7].mxu0  ;;  %v9179_v45 = vld [vmem:[#allocation5 + $0x220] sm:$0xff]   ;;  %vm13326_vm11 = vcmp.ne.s16.totalorder %v10137_v13, 0 }
 0x187   : > { %8943 = vmatpush3.bf16.msra.mxu0 %v9176_v37  ;;  %v2319_v52 = vsel %vm1403_vm15, %v2255_v47, %v2318_v8  ;;  %v2377_v19 = vrot.slane %v2375_v0, 3  ;;  %v2380_v46 = vrot.slane %v2378_v44, 4  ;;  %v1868_v37 = vsel %vm1798_vm6, %v1865_v30, %v1867_v39 }
 0x188   : > { %8944 = vmatprep.subr.bf16.mxu0 %v9177_v27  ;;  %v1605_v47 = vsel %vm13325_vm1, %v10366_v6, 0  ;;  %v2441_v55 = vshll.u32 %v1868_v37, 16  ;;  %v2265_v0 = vsel %vm1403_vm15, %v2193_v31, %v2264_v24  ;;  %v2323_v30 = vrot.slane %v2321_v63, 3  ;;  %v11109_v57 = vpop.f32.mrb[4].mxu1  ;;  %v9180_v31 = vld [vmem:[#allocation5 + $0x228] sm:$0xff]  }
 0x189   : > { %4240 = vmatmul.mubr.bf16.vlgmr.msra.gmra.mrb[64].mxu1 %v2194_v29  ;;  %v2381_v59 = vor.u32 %v2380_v46, %v2377_v19  ;;  %v2438_v29 = vshrl.u32 %v1868_v37, 16  ;;  %v2326_v44 = vrot.slane %v2324_v36, 4  ;;  %v1869_v61 = vrot.slane %v1605_v47, 1  ;;  %v11114_v49 = vpop.f32.mrb[5].mxu1  ;;  %v13327_v36 = vld [vmem:[#allocation29_spill] sm:$0xff] }
 0x18a   : > { %4247 = vmatprep.mubr.bf16.mxu1 %v10152_v41  ;;  %4087 = vmatmul.mubr.bf16.gmra.mrb[68].mxu0 %v10074_v25  ;;  %v1619_v25 = vsel %vm13326_vm11, %v10171_v40, 0  ;;  %v2443_v46 = vrot.slane %v2441_v55, 4  ;;  %vm13330_vm1 = vcmp.ne.s16.totalorder %v13329_v21, 0 }
 0x18b   : > { %4094 = vmatprep.mubr.bf16.mxu0 %v2319_v52  ;;  %8945 = vmatpush3.bf16.msra.mxu0 %v9177_v27  ;;  %v11116_v27 = vpop.f32.mrb[6].mxu1  ;;  %v2382_v52 = vsel %vm1403_vm15, %v2318_v8, %v2381_v59  ;;  %v2440_v19 = vrot.slane %v2438_v29, 3  ;;  %v2327_v37 = vor.u32 %v2326_v44, %v2323_v30  ;;  %v2384_v47 = vshrl.u32 %v1619_v25, 16  ;;  %v13331_v29 = vld [vmem:[#allocation28_spill] sm:$0xff]  ;;  %v9181_v30 = vld [vmem:[#allocation5 + $0x230] sm:$0xff]  }
 0x18c   : > { %8946 = vmatprep.subr.bf16.mxu0 %v9178_v5  ;;  %v11119_v63 = vpop.f32.mrb[7].mxu1  ;;  %v2387_v13 = vshll.u32 %v1619_v25, 16  ;;  %v1870_v9 = vsel %vm1798_vm6, %v1867_v39, %v1869_v61  ;;  %vm13332_vm11 = vcmp.ne.s16.totalorder %v13331_v29, 0 }
 0x18d   : > { %v2444_v8 = vor.u32 %v2443_v46, %v2440_v19  ;;  %v1620_v55 = vsel %vm13332_vm11, %v10255_v12, 0  ;;  %v2501_v42 = vshrl.u32 %v1870_v9, 16  ;;  %v2504_v26 = vshll.u32 %v1870_v9, 16 }
 0x18e   : > { %v2328_v44 = vsel %vm1403_vm15, %v2264_v24, %v2327_v37  ;;  %v2386_v39 = vrot.slane %v2384_v47, 3  ;;  %v2389_v25 = vrot.slane %v2387_v13, 4  ;;  %v9182_v24 = vld [vmem:[#allocation5 + $0x238] sm:$0xff]   ;;  %v13333_v13 = vld [vmem:[#allocation33_spill] sm:$0xff] }
 0x18f   : > { %8947 = vmatpush3.bf16.msra.mxu0 %v9178_v5  ;;  %v13328_v5 = vld [vmem:[#allocation36_spill] sm:$0xff]  ;;  %v2445_v46 = vsel %vm1403_vm15, %v2381_v59, %v2444_v8  ;;  %v2503_v9 = vrot.slane %v2501_v42, 3  ;;  %v2506_v29 = vrot.slane %v2504_v26, 4 }
 0x190   : > { %8948 = vmatprep.subr.bf16.mxu0 %v9179_v45  ;;  %v11131_v10 = vpop.f32.mrb[8].mxu0  ;;  %v2390_v47 = vor.u32 %v2389_v25, %v2386_v39 }
 0x191   : > { %4248 = vmatmul.mubr.bf16.gmra.mrb[68].mxu1 %v2265_v0  ;;  %v1606_v0 = vsel %vm13330_vm1, %v13328_v5, 0  ;;  %v11133_v21 = vpop.f32.mrb[9].mxu0  ;;  %v2507_v26 = vor.u32 %v2506_v29, %v2503_v9 }
 0x192   : > { %4255 = vmatprep.mubr.bf16.mxu1 %v13327_v36  ;;  %4095 = vmatmul.mubr.bf16.gmra.mrb[72].mxu0 %v10152_v41  ;;  %v1871_v41 = vrot.slane %v1606_v0, 1  ;;  %v11135_v19 = vpop.f32.mrb[10].mxu0  ;;  %v2391_v22 = vsel %vm1403_vm15, %v2327_v37, %v2390_v47 }
 0x193   : > { %4102 = vmatprep.mubr.bf16.mxu0 %v2382_v52  ;;  %8949 = vmatpush3.bf16.msra.mxu0 %v9179_v45  ;;  %v2447_v52 = vshrl.u32 %v1620_v55, 16  ;;  %v2450_v45 = vshll.u32 %v1620_v55, 16  ;;  %v11138_v12 = vpop.f32.mrb[11].mxu0  ;;  %v13334_v55 = vld [vmem:[#allocation42_spill] sm:$0xff]  ;;  %v2508_v29 = vsel %vm1403_vm15, %v2444_v8, %v2507_v26 }
 0x194   : > { %8950 = vmatprep.subr.bf16.mxu0 %v9180_v31  ;;  %v1872_v0 = vsel %vm1798_vm6, %v1869_v61, %v1871_v41  ;;  %v13337_v61 = vld [vmem:[#allocation32_spill] sm:$0xff] }
 0x195   : > { %v2452_v59 = vrot.slane %v2450_v45, 4  ;;  %v2564_v42 = vshrl.u32 %v1872_v0, 16  ;;  %v2567_v40 = vshll.u32 %v1872_v0, 16  ;;  %vm13338_vm11 = vcmp.ne.s16.totalorder %v13337_v61, 0  ;;  %v13340_v61 = vld [vmem:[#allocation46_spill] sm:$0xff] }
 0x197   : > { %8951 = vmatpush3.bf16.msra.mxu0 %v9180_v31  ;;  %v13335_v31 = vld [vmem:[#allocation43_spill] sm:$0xff] }
 0x198   : > { %8952 = vmatprep.subr.bf16.mxu0 %v9181_v30  ;;  %vm13336_vm1 = vcmp.ne.s16.totalorder %v13335_v31, 0  ;;  %v11147_v39 = vpop.f32.mrb[8].mxu1 }
 0x199   : > { %4256 = vmatmul.mubr.bf16.gmra.mrb[72].mxu1 %v2328_v44  ;;  %v1607_v20 = vsel %vm13336_vm1, %v13334_v55, 0  ;;  %v2449_v44 = vrot.slane %v2447_v52, 3  ;;  %v8137_v25 = vpop.f32.mrb[9].mxu1  ;;  %v2569_v52 = vrot.slane %v2567_v40, 4  ;;  %v11167_v40 = vadd.f32 %v11045_v3, %v11042_v60 }
 0x19a   : > { %4263 = vmatprep.mubr.bf16.mxu1 %v13333_v13  ;;  %4103 = vmatmul.mubr.bf16.gmra.mrb[76].mxu0 %v13327_v36  ;;  %v1873_v1 = vrot.slane %v1607_v20, 1  ;;  %v1621_v36 = vsel %vm13338_vm11, %v10366_v6, 0  ;;  %v11152_v16 = vpop.f32.mrb[10].mxu1 }
 0x19b   : > { %4110 = vmatprep.mubr.bf16.mxu0 %v2445_v46  ;;  %8953 = vmatpush3.bf16.msra.mxu0 %v9181_v30  ;;  %v2453_v31 = vor.u32 %v2452_v59, %v2449_v44  ;;  %v2566_v30 = vrot.slane %v2564_v42, 3  ;;  %v8140_v45 = vpop.f32.mrb[11].mxu1  ;;  %v13339_v46 = vld [vmem:[#allocation38_spill] sm:$0xff]  ;;  %v2510_v20 = vshrl.u32 %v1621_v36, 16  ;;  %v2513_v37 = vshll.u32 %v1621_v36, 16  ;;  %v13341_v44 = vld [vmem:[#allocation47_spill] sm:$0xff] }
 0x19c   : > { %8954 = vmatprep.subr.bf16.mxu0 %v9182_v24  ;;  %v1874_v9 = vsel %vm1798_vm6, %v1871_v41, %v1873_v1  ;;  %vm13342_vm1 = vcmp.ne.s16.totalorder %v13341_v44, 0  ;;  %v13343_v41 = vld [vmem:[#allocation37_spill] sm:$0xff] }
 0x19d   : > { %v8030_v0 = vpop.f32.mrb[12].mxu0  ;;  %v1608_v59 = vsel %vm13342_vm1, %v13340_v61, 0  ;;  %vm13344_vm11 = vcmp.ne.s16.totalorder %v13343_v41, 0  ;;  %v2570_v36 = vor.u32 %v2569_v52, %v2566_v30  ;;  %v2627_v44 = vshrl.u32 %v1874_v9, 16 }
 0x19e   : > { %v8031_v8 = vpop.f32.mrb[13].mxu0  ;;  %v2630_v6 = vshll.u32 %v1874_v9, 16  ;;  %v2512_v50 = vrot.slane %v2510_v20, 3  ;;  %v2515_v60 = vrot.slane %v2513_v37, 4  ;;  %v1875_v3 = vrot.slane %v1608_v59, 1 }
 0x19f   : > { %8955 = vmatpush3.bf16.msra.mxu0 %v9182_v24  ;;  %v2454_v24 = vsel %vm1403_vm15, %v2390_v47, %v2453_v31  ;;  %v8033_v42 = vpop.f32.mrb[14].mxu0  ;;  %v11179_v47 = vadd.f32 %v11083_v43, %v11080_v51  ;;  %v11187_v30 = vadd.f32 %v11106_v38, %v11100_v14  ;;  %v11192_v37 = vadd.f32 %v11114_v49, %v11109_v57  ;;  %v13345_v51 = vld [vmem:[#allocation40_spill] sm:$0xff] }
 0x1a0   : > { %v2632_v20 = vrot.slane %v2630_v6, 4  ;;  %v2516_v43 = vor.u32 %v2515_v60, %v2512_v50  ;;  %v11202_v38 = vadd.f32 %v11119_v63, %v11116_v27  ;;  %v11206_v6 = vadd.f32 %v11133_v21, %v11131_v10 }
 0x1a1   : > { %4264 = vmatmul.mubr.bf16.gmra.mrb[76].mxu1 %v2391_v22  ;;  %v11163_v22 = vadd.f32 %v11037_v54, %v11033_v32  ;;  %v11175_v32 = vadd.f32 %v11078_v4, %v11072_v48  ;;  %v8034_v54 = vpop.f32.mrb[15].mxu0  ;;  %v2571_v48 = vsel %vm1403_vm15, %v2507_v26, %v2570_v36  ;;  %v2629_v4 = vrot.slane %v2627_v44, 3 }
 0x1a2   : > { %4271 = vmatprep.mubr.bf16.mxu1 %v13339_v46  ;;  %4111 = vmatmul.mubr.bf16.gmra.mrb[80].mxu0 %v13333_v13  ;;  %v1622_v13 = vsel %vm13344_vm11, %v13328_v5, 0  ;;  %v11213_v27 = vadd.f32 %v11138_v12, %v11135_v19  ;;  %v2517_v21 = vsel %vm1403_vm15, %v2453_v31, %v2516_v43  ;;  %v13350_v19 = vld [vmem:[#allocation44_spill] sm:$0xff] }
 0x1a3   : > { %4118 = vmatprep.mubr.bf16.mxu0 %v2508_v29  ;;  %v11183_v29 = vadd.f32 %v11096_v35, %v11093_v28  ;;  %v2573_v52 = vshrl.u32 %v1622_v13, 16  ;;  %v2576_v9 = vshll.u32 %v1622_v13, 16  ;;  %v1876_v28 = vsel %vm1798_vm6, %v1873_v1, %v1875_v3  ;;  %v13346_v35 = vld [vmem:[#allocation51_spill] sm:$0xff]  ;;  %v13348_v1 = vld [vmem:[#allocation41_spill] sm:$0xff] }
 0x1a4   : > { %vm13347_vm1 = vcmp.ne.s16.totalorder %v13346_v35, 0  ;;  %vm13349_vm11 = vcmp.ne.s16.totalorder %v13348_v1, 0  ;;  %v2633_v44 = vor.u32 %v2632_v20, %v2629_v4  ;;  %v2690_v59 = vshrl.u32 %v1876_v28, 16 }
 0x1a5   : > { %v1609_v14 = vsel %vm13347_vm1, %v10629_v15, 0  ;;  %v2575_v57 = vrot.slane %v2573_v52, 3  ;;  %v2578_v50 = vrot.slane %v2576_v9, 4  ;;  %v1623_v26 = vsel %vm13349_vm11, %v13334_v55, 0 }
 0x1a6   : > { %v8142_v49 = vpop.f32.mrb[12].mxu1  ;;  %v1877_v10 = vrot.slane %v1609_v14, 1  ;;  %v11217_v13 = vadd.f32 %v8137_v25, %v11147_v39  ;;  %v2636_v52 = vshrl.u32 %v1623_v26, 16  ;;  %v2639_v9 = vshll.u32 %v1623_v26, 16 }
 0x1a7   : > { %v2579_v4 = vor.u32 %v2578_v50, %v2575_v57  ;;  %v2634_v20 = vsel %vm1403_vm15, %v2570_v36, %v2633_v44  ;;  %v1610_v39 = vsel %vm1558_vm9, %v10699_v56, 0  ;;  %v11228_v25 = vadd.f32 %v8031_v8, %v8030_v0  ;;  %v13351_v36 = vld [vmem:[#allocation45_spill] sm:$0xff] }
 0x1a8   : > { %v1878_v31 = vsel %vm1798_vm6, %v1875_v3, %v1877_v10  ;;  %v11230_v14 = vadd.f32 %v8034_v54, %v8033_v42  ;;  %vm13352_vm1 = vcmp.ne.s16.totalorder %v13351_v36, 0  ;;  %v2638_v8 = vrot.slane %v2636_v52, 3 }
 0x1a9   : > { %4272 = vmatmul.mubr.bf16.gmra.mrb[80].mxu1 %v2454_v24  ;;  %v2693_v24 = vshll.u32 %v1876_v28, 16  ;;  %v2692_v28 = vrot.slane %v2690_v59, 3  ;;  %v1624_v57 = vsel %vm13352_vm1, %v13340_v61, 0  ;;  %v2753_v3 = vshrl.u32 %v1878_v31, 16 }
 0x1aa   : > { %4279 = vmatprep.mubr.bf16.mxu1 %v13345_v51  ;;  %4119 = vmatmul.mubr.bf16.gmra.mrb[84].mxu0 %v13339_v46  ;;  %v8143_v46 = vpop.f32.mrb[13].mxu1  ;;  %v2756_v59 = vshll.u32 %v1878_v31, 16  ;;  %v2580_v0 = vsel %vm1403_vm15, %v2516_v43, %v2579_v4  ;;  %v2641_v42 = vrot.slane %v2639_v9, 4  ;;  %v2699_v54 = vshrl.u32 %v1624_v57, 16 }
 0x1ab   : > { %4126 = vmatprep.mubr.bf16.mxu0 %v2571_v48  ;;  %v8145_v63 = vpop.f32.mrb[14].mxu1  ;;  %v11220_v48 = vadd.f32 %v8140_v45, %v11152_v16  ;;  %v2695_v12 = vrot.slane %v2693_v24, 4  ;;  %v1879_v24 = vrot.slane %v1610_v39, 1  ;;  %v11237_v1 = vadd.f32 %v8143_v46, %v8142_v49  ;;  %v13353_v39 = vld [vmem:[#allocation49_spill] sm:$0xff] }
 0x1ac   : > { %v8146_v60 = vpop.f32.mrb[15].mxu1  ;;  %v2755_v58 = vrot.slane %v2753_v3, 3  ;;  %v2642_v43 = vor.u32 %v2641_v42, %v2638_v8  ;;  %v1611_v49 = vsel %vm1559_vm10, %v10772_v62, 0 }
 0x1ad   : > { %v8036_v16 = vpop.f32.mrb[16].mxu0  ;;  %v2696_v26 = vor.u32 %v2695_v12, %v2692_v28  ;;  %v11239_v41 = vadd.f32 %v8146_v60, %v8145_v63  ;;  %v2758_v28 = vrot.slane %v2756_v59, 4  ;;  %v1880_v12 = vsel %vm1798_vm6, %v1877_v10, %v1879_v24 }
 0x1ae   : > { %v8037_v45 = vpop.f32.mrb[17].mxu0  ;;  %v2701_v63 = vrot.slane %v2699_v54, 3  ;;  %v2819_v42 = vshll.u32 %v1880_v12, 16  ;;  %v1881_v52 = vrot.slane %v1611_v49, 1 }
 0x1af   : > { %v8039_v50 = vpop.f32.mrb[18].mxu0  ;;  %v2697_v36 = vsel %vm1403_vm15, %v2633_v44, %v2696_v26  ;;  %v2816_v44 = vshrl.u32 %v1880_v12, 16  ;;  %v2759_v59 = vor.u32 %v2758_v28, %v2755_v58  ;;  %v13357_v12 = vld [vmem:[#allocation52_spill] sm:$0xff] }
 0x1b0   : > { %v2821_v58 = vrot.slane %v2819_v42, 4 }
 0x1b1   : > { %4280 = vmatmul.mubr.bf16.gmra.mrb[84].mxu1 %v2517_v21  ;;  %v8040_v21 = vpop.f32.mrb[19].mxu0 }
 0x1b2   : > { %4287 = vmatprep.mubr.bf16.mxu1 %v13350_v19  ;;  %4127 = vmatmul.mubr.bf16.gmra.mrb[88].mxu0 %v13345_v51  ;;  %v2702_v51 = vshll.u32 %v1624_v57, 16  ;;  %v11248_v57 = vadd.f32 %v8037_v45, %v8036_v16  ;;  %v11250_v3 = vadd.f32 %v8040_v21, %v8039_v50  ;;  %v2818_v45 = vrot.slane %v2816_v44, 3 }
 0x1b3   : > { %4134 = vmatprep.mubr.bf16.mxu0 %v2634_v20  ;;  %v2760_v50 = vsel %vm1403_vm15, %v2696_v26, %v2759_v59  ;;  %v1882_v21 = vsel %vm1798_vm6, %v1879_v24, %v1881_v52 }
 0x1b4   : > { %v8148_v20 = vpop.f32.mrb[16].mxu1  ;;  %v2704_v9 = vrot.slane %v2702_v51, 4  ;;  %v2879_v26 = vshrl.u32 %v1882_v21, 16  ;;  %v2822_v44 = vor.u32 %v2821_v58, %v2818_v45 }
 0x1b5   : > { %v8149_v31 = vpop.f32.mrb[17].mxu1 }
 0x1b6   : > { %v8151_v46 = vpop.f32.mrb[18].mxu1  ;;  %v11256_v61 = vadd.f32 %v8149_v31, %v8148_v20  ;;  %v2705_v51 = vor.u32 %v2704_v9, %v2701_v63  ;;  %v13360_v31 = vld [vmem:[#allocation63_spill] sm:$0xff]  ;;  %v2882_v9 = vshll.u32 %v1882_v21, 16 }
 0x1b7   : > { %v8152_v60 = vpop.f32.mrb[19].mxu1 }
 0x1b8   : > { %v8042_v10 = vpop.f32.mrb[20].mxu0  ;;  %v11260_v28 = vadd.f32 %v8152_v60, %v8151_v46  ;;  %v2706_v46 = vsel %vm1403_vm15, %v2642_v43, %v2705_v51 }
 0x1b9   : > { %4288 = vmatmul.mubr.bf16.gmra.mrb[88].mxu1 %v2580_v0  ;;  %v13355_v0 = vld [vmem:[#allocation50_spill] sm:$0xff]  ;;  %v8043_v35 = vpop.f32.mrb[21].mxu0 }
 0x1ba   : > { %4295 = vmatprep.mubr.bf16.mxu1 %v13353_v39  ;;  %4135 = vmatmul.mubr.bf16.gmra.mrb[92].mxu0 %v13350_v19  ;;  %vm13356_vm11 = vcmp.ne.s16.totalorder %v13355_v0, 0  ;;  %v2643_v19 = vsel %vm1403_vm15, %v2579_v4, %v2642_v43  ;;  %v8045_v54 = vpop.f32.mrb[22].mxu0  ;;  %v13358_v4 = vld [vmem:[#allocation54_spill] sm:$0xff]  ;;  %v11272_v24 = vadd.f32 %v8043_v35, %v8042_v10  ;;  %v2823_v43 = vsel %vm1403_vm15, %v2759_v59, %v2822_v44 }
 0x1bb   : > { %4142 = vmatprep.mubr.bf16.mxu0 %v2697_v36  ;;  %v1625_v8 = vsel %vm13356_vm11, %v10629_v15, 0  ;;  %v8046_v36 = vpop.f32.mrb[23].mxu0  ;;  %vm13359_vm1 = vcmp.ne.s16.totalorder %v13358_v4, 0  ;;  %vm13361_vm11 = vcmp.ne.s16.totalorder %v13360_v31, 0  ;;  %v2881_v31 = vrot.slane %v2879_v26, 3 }
 0x1bc   : > { %v2762_v16 = vshrl.u32 %v1625_v8, 16  ;;  %v2765_v49 = vshll.u32 %v1625_v8, 16  ;;  %v1626_v20 = vsel %vm13359_vm1, %v10699_v56, 0  ;;  %v11270_v63 = vsel %vm13361_vm11, %v10852_v33, 0 }
 0x1bd   : > { %v11275_v8 = vadd.f32 %v8046_v36, %v8045_v54  ;;  %v2825_v42 = vshrl.u32 %v1626_v20, 16  ;;  %v1883_v4 = vrot.slane %v11270_v63, 1  ;;  %v2884_v56 = vrot.slane %v2882_v9, 4  ;;  %v13364_v36 = vld [vmem:[#allocation56_spill] sm:$0xff] }
 0x1be   : > { %v2764_v60 = vrot.slane %v2762_v16, 3  ;;  %v1613_v9 = vsel %vm1561_vm14, %v10910_v18, 0  ;;  %v1832_v59 = vshll.u32 %v10986_v23, 16 }
 0x1bf   : > { %v2827_v45 = vrot.slane %v2825_v42, 3  ;;  %v13366_v42 = vld [vmem:[#allocation61_spill] sm:$0xff] }
 0x1c0   : > { %vm13367_vm11 = vcmp.ne.s16.totalorder %v13366_v42, 0 }
 0x1c1   : > { %4296 = vmatmul.mubr.bf16.gmra.mrb[92].mxu1 %v2643_v19  ;;  %v2828_v19 = vshll.u32 %v1626_v20, 16 }
 0x1c2   : > { %4303 = vmatprep.mubr.bf16.mxu1 %v13357_v12  ;;  %4143 = vmatmul.mubr.bf16.gmra.mrb[96].mxu0 %v13353_v39  ;;  %v2767_v39 = vrot.slane %v2765_v49, 4  ;;  %v1884_v49 = vsel %vm1798_vm6, %v1881_v52, %v1883_v4  ;;  %v1628_v52 = vsel %vm13367_vm11, %v10852_v33, 0 }
 0x1c3   : > { %4150 = vmatprep.mubr.bf16.mxu0 %v2760_v50  ;;  %v8154_v0 = vpop.f32.mrb[20].mxu1  ;;  %v13362_v50 = vld [vmem:[#allocation58_spill] sm:$0xff]  ;;  %v2830_v58 = vrot.slane %v2828_v19, 4  ;;  %v2951_v42 = vshrl.u32 %v1628_v52, 16  ;;  %v2954_v33 = vshll.u32 %v1628_v52, 16 }
 0x1c4   : > { %vm13363_vm1 = vcmp.ne.s16.totalorder %v13362_v50, 0  ;;  %v8155_v35 = vpop.f32.mrb[21].mxu1  ;;  %v2768_v16 = vor.u32 %v2767_v39, %v2764_v60  ;;  %v2942_v60 = vshrl.u32 %v1884_v49, 16  ;;  %v2945_v39 = vshll.u32 %v1884_v49, 16 }
 0x1c5   : > { %v1627_v21 = vsel %vm13363_vm1, %v10772_v62, 0  ;;  %v11282_v10 = vadd.f32 %v8155_v35, %v8154_v0  ;;  %v8157_v54 = vpop.f32.mrb[22].mxu1  ;;  %v2885_v0 = vor.u32 %v2884_v56, %v2881_v31  ;;  %v1885_v35 = vrot.slane %v1613_v9, 1 }
 0x1c6   : > { %v8158_v20 = vpop.f32.mrb[23].mxu1  ;;  %v2888_v63 = vshrl.u32 %v1627_v21, 16  ;;  %v2891_v26 = vshll.u32 %v1627_v21, 16  ;;  %v2831_v21 = vor.u32 %v2830_v58, %v2827_v45  ;;  %v2944_v58 = vrot.slane %v2942_v60, 3 }
 0x1c7   : > { %v2947_v9 = vrot.slane %v2945_v39, 4  ;;  %v1614_v62 = vsel %vm1562_vm7, %v10986_v23, 0  ;;  %v11321_v60 = vadd.f32 %v11167_v40, %v11300_v11 }
 0x1c8   : > { %v2890_v56 = vrot.slane %v2888_v63, 3  ;;  %v2893_v31 = vrot.slane %v2891_v26, 4  ;;  %v13368_v26 = vld [vmem:[#allocation60_spill] sm:$0xff] }
 0x1c9   : > { %4304 = vmatmul.mubr.bf16.gmra.mrb[96].mxu1 %v2706_v46  ;;  %v11291_v46 = vadd.f32 %v8158_v20, %v8157_v54  ;;  %v8048_v19 = vpop.f32.mrb[24].mxu0  ;;  %v2886_v20 = vsel %vm1403_vm15, %v2822_v44, %v2885_v0  ;;  %v1886_v44 = vsel %vm1798_vm6, %v1883_v4, %v1885_v35 }
 0x1ca   : > { %4311 = vmatprep.mubr.bf16.mxu1 %v13364_v36  ;;  %4151 = vmatmul.mubr.bf16.gmra.mrb[100].mxu0 %v13357_v12  ;;  %v2769_v12 = vsel %vm1403_vm15, %v2705_v51, %v2768_v16  ;;  %v8049_v50 = vpop.f32.mrb[25].mxu0  ;;  %v1836_v51 = vshrl.u32 %v10986_v23, 16  ;;  %v3005_v2 = vshrl.u32 %v1886_v44, 16  ;;  %v3008_v40 = vshll.u32 %v1886_v44, 16  ;;  %v13372_v44 = vld [vmem:[#allocation65_spill] sm:$0xff] }
 0x1cb   : > { %4158 = vmatprep.mubr.bf16.mxu0 %v2823_v43  ;;  %13365 = vst [vmem:[#allocation29_spill] sm:$0xff] %v11291_v46  ;;  %v1834_v43 = vrot.slane %v1832_v59, 1  ;;  %v11302_v54 = vadd.f32 %v8049_v50, %v8048_v19  ;;  %v8051_v49 = vpop.f32.mrb[26].mxu0  ;;  %v11314_v50 = vadd.f32 %v11163_v22, %v11300_v11  ;;  %v2832_v59 = vsel %vm1403_vm15, %v2768_v16, %v2831_v21 }
 0x1cc   : > { %v8052_v45 = vpop.f32.mrb[27].mxu0  ;;  %v1629_v19 = vsel %vm1176_vm0, %v10910_v18, 0  ;;  %v2953_v22 = vrot.slane %v2951_v42, 3  ;;  %v2894_v16 = vor.u32 %v2893_v31, %v2890_v56  ;;  %v11336_v42 = vadd.f32 %v11183_v29, %v11300_v11 }
 0x1cd   : > { %v11309_v63 = vadd.f32 %v8052_v45, %v8051_v49  ;;  %v1835_v39 = vsel %vm1647_vm8, %v10935_v34, %v1834_v43  ;;  %v11328_v49 = vrot.slane %v1614_v62, 1  ;;  %v11330_v4 = vor.u32 %v1836_v51, %v1834_v43 }
 0x1ce   : > { %v2948_v45 = vor.u32 %v2947_v9, %v2944_v58  ;;  %v3023_v55 = vshrl.u32 %v1835_v39, 16  ;;  %v3014_v5 = vshrl.u32 %v1629_v19, 16  ;;  %v3017_v34 = vshll.u32 %v1629_v19, 16 }
 0x1cf   : > { %v11340_v62 = vadd.f32 %v11187_v30, %v11300_v11  ;;  %v3026_v56 = vshll.u32 %v1835_v39, 16  ;;  %v2895_v30 = vsel %vm1403_vm15, %v2831_v21, %v2894_v16  ;;  %v3007_v9 = vrot.slane %v3005_v2, 3 }
 0x1d0   : > { %v2949_v58 = vsel %vm1403_vm15, %v2885_v0, %v2948_v45  ;;  %v3025_v39 = vrot.slane %v3023_v55, 3  ;;  %v3016_v19 = vrot.slane %v3014_v5, 3  ;;  %v11363_v2 = vadd.f32 %v11213_v27, %v11300_v11 }
 0x1d1   : > { %4312 = vmatmul.mubr.bf16.gmra.mrb[100].mxu1 %v2769_v12  ;;  %v2956_v12 = vrot.slane %v2954_v33, 4  ;;  %v11344_v33 = vadd.f32 %v11206_v6, %v11300_v11  ;;  %v3010_v6 = vrot.slane %v3008_v40, 4  ;;  %v11367_v5 = vadd.f32 %v11228_v25, %v11300_v11 }
 0x1d2   : > { %4319 = vmatprep.mubr.bf16.mxu1 %v13368_v26  ;;  %4159 = vmatmul.mubr.bf16.gmra.mrb[104].mxu0 %v13364_v36  ;;  %v8160_v36 = vpop.f32.mrb[24].mxu1 }
 0x1d3   : > { %4166 = vmatprep.mubr.bf16.mxu0 %v2886_v20  ;;  %v8161_v15 = vpop.f32.mrb[25].mxu1  ;;  %v2957_v43 = vor.u32 %v2956_v12, %v2953_v22  ;;  %v13370_v20 = vld [vmem:[#allocation12_spill] sm:$0xff]  ;;  %v3019_v22 = vrot.slane %v3017_v34, 4  ;;  %v1630_v12 = vsel %vm1177_vm12, %v10986_v23, 0  ;;  %v3011_v40 = vor.u32 %v3010_v6, %v3007_v9 }
 0x1d4   : > { %v11332_v46 = vadd.f32 %v8161_v15, %v8160_v36  ;;  %v8163_v52 = vpop.f32.mrb[26].mxu1  ;;  %v1888_v15 = vsel %vm1798_vm6, %v1885_v35, %v11328_v49  ;;  %v1889_v51 = vsel %vm1647_vm8, %v11330_v4, %v13370_v20  ;;  %v3077_v34 = vshrl.u32 %v1630_v12, 16 }
 0x1d5   : > { %v8164_v31 = vpop.f32.mrb[27].mxu1  ;;  %v3068_v36 = vshrl.u32 %v1888_v15, 16  ;;  %v2958_v0 = vsel %vm1403_vm15, %v2894_v16, %v2957_v43  ;;  %v3089_v55 = vshll.u32 %v1889_v51, 16  ;;  %v11375_v16 = vadd.f32 %v11230_v14, %v11300_v11 }
 0x1d6   : > { %v11351_v29 = vadd.f32 %v8164_v31, %v8163_v52  ;;  %v3028_v52 = vrot.slane %v3026_v56, 4  ;;  %v3086_v31 = vshrl.u32 %v1889_v51, 16  ;;  %v3152_v56 = vshll.u32 %v11328_v49, 16 }
 0x1d7   : > { %v3080_v27 = vshll.u32 %v1630_v12, 16  ;;  %v3070_v51 = vrot.slane %v3068_v36, 3  ;;  %v3012_v12 = vsel %vm1403_vm15, %v2948_v45, %v3011_v40 }
 0x1d8   : > { %13371 = vst [vmem:[#allocation33_spill] sm:$0xff] %v11351_v29  ;;  %v11379_v23 = vor.u32 %v3028_v52, %v3025_v39  ;;  %v3088_v6 = vrot.slane %v3086_v31, 3  ;;  %v3091_v29 = vrot.slane %v3089_v55, 4  ;;  %v3079_v39 = vrot.slane %v3077_v34, 3  ;;  %v13379_v34 = vld [vmem:[#allocation69_spill] sm:$0xff] }
 0x1d9   : > { %4320 = vmatmul.mubr.bf16.gmra.mrb[104].mxu1 %v2832_v59  ;;  %v3071_v59 = vshll.u32 %v1888_v15, 16  ;;  %v8054_v21 = vpop.f32.mrb[28].mxu0  ;;  %v3154_v36 = vrot.slane %v3152_v56, 4  ;;  %v3082_v31 = vrot.slane %v3080_v27, 4  ;;  %v3140_v55 = vshrl.u32 %v11330_v4, 16 }
 0x1da   : > { %4327 = vmatprep.mubr.bf16.mxu1 %v13372_v44  ;;  %4167 = vmatmul.mubr.bf16.gmra.mrb[108].mxu0 %v13368_v26  ;;  %v3149_v26 = vshrl.u32 %v11328_v49, 16  ;;  %v8055_v15 = vpop.f32.mrb[29].mxu0  ;;  %v1631_v49 = vsel %vm13161_vm5, %v9800_v7, 0  ;;  %v13377_v7 = vld [vmem:[#allocation20_spill] sm:$0xff]  ;;  %v11408_v27 = vor.u32 %v3091_v29, %v3088_v6 }
 0x1db   : > { %4174 = vmatprep.mubr.bf16.mxu0 %v2949_v58  ;;  %v11371_v58 = vor.u32 %v3019_v22, %v3016_v19  ;;  %v11377_v35 = vadd.f32 %v8055_v15, %v8054_v21  ;;  %v8057_v25 = vpop.f32.mrb[30].mxu0  ;;  %v3073_v9 = vrot.slane %v3071_v59, 4  ;;  %v13374_v19 = vld [vmem:[#allocation17_spill] sm:$0xff]  ;;  %v13376_v59 = vld [vmem:[#allocation70_spill] sm:$0xff]  ;;  %v3143_v21 = vshll.u32 %v11330_v4, 16  ;;  %v13383_v29 = vld [vmem:[#allocation24_spill] sm:$0xff] }
 0x1dc   : > { %v8058_v18 = vpop.f32.mrb[31].mxu0  ;;  %vm13375_vm1 = vcmp.ne.s16.totalorder %v13374_v19, 0  ;;  %v3151_v52 = vrot.slane %v3149_v26, 3  ;;  %v1633_v53 = vsel %vm1548_vm13, %v13377_v7, 0  ;;  %v1906_v45 = vrot.slane %v1631_v49, 1 }
 0x1dd   : > { %v1632_v14 = vsel %vm13375_vm1, %v9911_v17, 0  ;;  %v11387_v22 = vadd.f32 %v8058_v18, %v8057_v25  ;;  %v3159_v17 = vshrl.u32 %v13370_v20, 16  ;;  %v3162_v18 = vshll.u32 %v13370_v20, 16 }
 0x1de   : > { %v11402_v26 = vsel %vm1403_vm15, %v13379_v34, %v11379_v23  ;;  %v11406_v4 = vsel %vm1403_vm15, %v2957_v43, %v11371_v58  ;;  %v3074_v56 = vor.u32 %v3073_v9, %v3070_v51  ;;  %v3155_v25 = vor.u32 %v3154_v36, %v3151_v52  ;;  %v13382_v51 = vld [vmem:[#allocation26_spill] sm:$0xff] }
 0x1df   : > { %v1909_v49 = vrot.slane %v1633_v53, 1  ;;  %v3794_v34 = vadd.f32 %v11250_v3, %v11300_v11  ;;  %v11419_v15 = vrot.slane %v3140_v55, 3  ;;  %v11421_v43 = vrot.slane %v3143_v21, 4 }
 0x1e0   : > { %vm13384_vm11 = vcmp.ne.s16.totalorder %v13383_v29, 0  ;;  %v3161_v6 = vrot.slane %v3159_v17, 3  ;;  %v3164_v53 = vrot.slane %v3162_v18, 4  ;;  %v3075_v36 = vsel %vm1403_vm15, %v3011_v40, %v3074_v56 }
 0x1e1   : > { %4328 = vmatmul.mubr.bf16.gmra.mrb[108].mxu1 %v2895_v30  ;;  %v1907_v30 = vrot.slane %v1632_v14, 1  ;;  %v13380_v14 = vld [vmem:[#allocation22_spill] sm:$0xff]  ;;  %v11426_v9 = vsel %vm13384_vm11, %v13382_v51, 0  ;;  %v3093_v3 = vsel %vm1403_vm15, %v11379_v23, %v11408_v27  ;;  %v11437_v21 = vadd.f32 %v11175_v32, %v11314_v50 }
 0x1e2   : > { %4335 = vmatprep.mubr.bf16.mxu1 %v13376_v59  ;;  %4175 = vmatmul.mubr.bf16.gmra.mrb[112].mxu0 %v13372_v44  ;;  %v11412_v44 = vadd.f32 %v11248_v57, %v11300_v11  ;;  %v1634_v7 = vsel %vm13175_vm2, %v13380_v14, 0  ;;  %v11428_v57 = vor.u32 %v3082_v31, %v3079_v39  ;;  %v3156_v14 = vsel %vm1403_vm15, %v3074_v56, %v3155_v25 }
 0x1e3   : > { %4182 = vmatprep.mubr.bf16.mxu0 %v3012_v12  ;;  %v1908_v52 = vsel %vm1798_vm6, %v1906_v45, %v1907_v30  ;;  %v1911_v55 = vrot.slane %v1634_v7, 1  ;;  %v1910_v39 = vsel %vm1798_vm6, %v1907_v30, %v1909_v49  ;;  %v11444_v40 = vadd.f32 %v11179_v47, %v11321_v60  ;;  %v13387_v45 = vld [vmem:[#allocation27_spill] sm:$0xff] }
 0x1e4   : > { %v3799_v32 = vadd.f32 %v11272_v24, %v11300_v11  ;;  %v2205_v50 = vshrl.u32 %v1908_v52, 16  ;;  %vm13388_vm1 = vcmp.ne.s16.totalorder %v13387_v45, 0  ;;  %v11457_v47 = vor.u32 %v3164_v53, %v3161_v6 }
 0x1e5   : > { %13385 = vst [vmem:[#allocation38_spill] sm:$0xff] %v11444_v40  ;;  %v3802_v60 = vadd.f32 %v11275_v8, %v11300_v11  ;;  %v2208_v7 = vshll.u32 %v1908_v52, 16  ;;  %v2213_v24 = vshrl.u32 %v1910_v39, 16  ;;  %v2216_v29 = vshll.u32 %v1910_v39, 16 }
 0x1e6   : > { %13389 = vst [vmem:[#allocation40_spill] sm:$0xff] %v11457_v47  ;;  %v1912_v45 = vsel %vm1798_vm6, %v1909_v49, %v1911_v55  ;;  %v13390_v40 = vrot.slane %v11426_v9, 1  ;;  %v11468_v52 = vadd.f32 %v11192_v37, %v11336_v42  ;;  %v3807_v39 = vadd.f32 %v11302_v54, %v11300_v11 }
 0x1e7   : > { %v8166_v17 = vpop.f32.mrb[28].mxu1  ;;  %v8060_v25 = vpop.f32.mrb[32].mxu0  ;;  %v3810_v49 = vadd.f32 %v11309_v63, %v11300_v11  ;;  %v11484_v37 = vadd.f32 %v11217_v13, %v11344_v33  ;;  %v2210_v42 = vrot.slane %v2208_v7, 4  ;;  %v11488_v54 = vadd.f32 %v11220_v48, %v11363_v2 }
 0x1e8   : > { %v8167_v56 = vpop.f32.mrb[29].mxu1  ;;  %v8061_v31 = vpop.f32.mrb[33].mxu0  ;;  %v11492_v63 = vadd.f32 %v11237_v1, %v11367_v5  ;;  %v11501_v13 = vadd.f32 %v11256_v61, %v11412_v44  ;;  %v11504_v33 = vadd.f32 %v11260_v28, %v3794_v34  ;;  %v11507_v48 = vadd.f32 %v11282_v10, %v3799_v32  ;;  %v13391_v1 = vld [vmem:[#allocation29_spill] sm:$0xff]  ;;  %v13393_v61 = vld [vmem:[#allocation35_spill] sm:$0xff] }
 0x1e9   : > { %4336 = vmatmul.mubr.bf16.gmra.mrb[112].mxu1 %v2958_v0  ;;  %v13386_v0 = vld [vmem:[#allocation31_spill] sm:$0xff]  ;;  %v8168_v51 = vadd.f32 %v8167_v56, %v8166_v17  ;;  %v8169_v18 = vpop.f32.mrb[30].mxu1  ;;  %v8062_v12 = vadd.f32 %v8061_v31, %v8060_v25  ;;  %v8063_v19 = vpop.f32.mrb[34].mxu0  ;;  %v3815_v17 = vadd.f32 %v11377_v35, %v11300_v11  ;;  %v11496_v35 = vadd.f32 %v11239_v41, %v11375_v16  ;;  %v13392_v5 = vld [vmem:[#allocation33_spill] sm:$0xff] }
 0x1ea   : > { %4343 = vmatprep.mubr.bf16.mxu1 %v11402_v26  ;;  %v11454_v30 = vsel %vm13388_vm1, %v13386_v0, 0  ;;  %4183 = vmatmul.mubr.bf16.gmra.mrb[116].mxu0 %v13376_v59  ;;  %v8170_v0 = vpop.f32.mrb[31].mxu1  ;;  %v1914_v59 = vsel %vm1798_vm6, %v1911_v55, %v13390_v40  ;;  %v8064_v8 = vpop.f32.mrb[35].mxu0  ;;  %v3818_v55 = vadd.f32 %v11387_v22, %v11300_v11  ;;  %v11480_v40 = vadd.f32 %v11202_v38, %v11340_v62 }
 0x1eb   : > { %4190 = vmatprep.mubr.bf16.mxu0 %v3075_v36  ;;  %v1915_v6 = vrot.slane %v11454_v30, 1  ;;  %v8171_v53 = vadd.f32 %v8170_v0, %v8169_v18  ;;  %v2207_v36 = vrot.slane %v2205_v50, 3  ;;  %v8065_v31 = vadd.f32 %v8064_v8, %v8063_v19  ;;  %v13394_v19 = vld [vmem:[#allocation30_spill] sm:$0xff] }
 0x1ec   : > { %v2215_v38 = vrot.slane %v2213_v24, 3  ;;  %v2218_v62 = vrot.slane %v2216_v29, 4  ;;  %v11510_v2 = vadd.f32 %v13391_v1, %v3802_v60  ;;  %v11513_v41 = vadd.f32 %v11332_v46, %v3807_v39 }
 0x1ed   : > { %v11516_v16 = vadd.f32 %v13392_v5, %v3810_v49  ;;  %vm13395_vm11 = vcmp.ne.s16.totalorder %v13394_v19, 0  ;;  %v3823_v22 = vadd.f32 %v8062_v12, %v11300_v11  ;;  %v11527_v44 = vadd.f32 %v8171_v53, %v3818_v55 }
 0x1ee   : > { %v11522_v28 = vsel %vm13395_vm11, %v13393_v61, 0  ;;  %v2276_v46 = vshrl.u32 %v1912_v45, 16  ;;  %v2279_v34 = vshll.u32 %v1912_v45, 16  ;;  %v2339_v29 = vshrl.u32 %v1914_v59, 16 }
 0x1ef   : > { %v2211_v32 = vor.u32 %v2210_v42, %v2207_v36  ;;  %v3826_v50 = vadd.f32 %v8065_v31, %v11300_v11  ;;  %v3084_v12 = vsel %vm1403_vm15, %v11371_v58, %v11428_v57  ;;  %v13396_v60 = vor.u32 %v11421_v43, %v11419_v15  ;;  %v9184_v36 = vld [vmem:[#allocation7] sm:$0xff]   ;;  %v13399_v31 = vld [vmem:[#allocation34_spill] sm:$0xff] }
 0x1f0   : > { %v8172_v10 = vpop.f32.mrb[32].mxu1  ;;  %v1917_v45 = vrot.slane %v11522_v28, 1  ;;  %v3166_v24 = vsel %vm1403_vm15, %v11408_v27, %v11457_v47  ;;  %v13397_v0 = vrot.slane %v11426_v9, 1  ;;  %v2278_v43 = vrot.slane %v2276_v46, 3  ;;  %v13398_v9 = vld [vmem:[#allocation36_spill] sm:$0xff] }
 0x1f1   : > { %4344 = vmatmul.mubr.bf16.gmra.mrb[116].mxu1 %v11406_v4  ;;  %v11525_v4 = vadd.f32 %v8168_v51, %v3815_v17  ;;  %v8173_v18 = vpop.f32.mrb[33].mxu1  ;;  %v9183_v51 = vld [vmem:[#allocation7 + $0x40] sm:$0xff]   ;;  %v2281_v53 = vrot.slane %v2279_v34, 4  ;;  %vm13400_vm1 = vcmp.ne.s16.totalorder %v13399_v31, 0 }
 0x1f2   : > { %4351 = vmatprep.mubr.bf16.mxu1 %v3093_v3  ;;  %4191 = vmatmul.mubr.bf16.gmra.mrb[120].mxu0 %v11402_v26  ;;  %v2342_v3 = vshll.u32 %v1914_v59, 16  ;;  %v2219_v26 = vor.u32 %v2218_v62, %v2215_v38  ;;  %v8174_v56 = vadd.f32 %v8173_v18, %v8172_v10  ;;  %v8175_v25 = vpop.f32.mrb[34].mxu1  ;;  %v1916_v58 = vsel %vm1798_vm6, %v13397_v0, %v1915_v6  ;;  %v13401_v38 = vld [vmem:[#allocation42_spill] sm:$0xff]  ;;  %v13402_v62 = vld [vmem:[#allocation39_spill] sm:$0xff] }
 0x1f3   : > { %4198 = vmatprep.mubr.bf16.mxu0 %v3156_v14  ;;  %v3147_v14 = vsel %vm1403_vm15, %v11379_v23, %v13396_v60  ;;  %v8176_v7 = vpop.f32.mrb[35].mxu1  ;;  %v2341_v23 = vrot.slane %v2339_v29, 3  ;;  %8468 = vmatprep.subr.bf16.mxu1 %v9183_v51  ;;  %v1918_v27 = vsel %vm1798_vm6, %v1915_v6, %v1917_v45  ;;  %v1638_v17 = vsel %vm13400_vm1, %v13398_v9, 0  ;;  %v13404_v6 = vld [vmem:[#allocation13_spill] sm:$0xff]  ;;  %v13406_v60 = vld [vmem:[#allocation43_spill] sm:$0xff] }
 0x1f4   : > { %v11547_v59 = vadd.f32 %v8174_v56, %v3823_v22  ;;  %v8177_v15 = vadd.f32 %v8176_v7, %v8175_v25  ;;  %v2344_v8 = vrot.slane %v2342_v3, 4  ;;  %v2220_v39 = vsel %vm1403_vm15, %v2211_v32, %v2219_v26  ;;  %8469 = vmatpush3.bf16.msra.mxu1 %v9184_v36 }
 0x1f5   : > { %v2402_v55 = vshrl.u32 %v1916_v58, 16  ;;  %v2405_v42 = vshll.u32 %v1916_v58, 16  ;;  %vm13403_vm11 = vcmp.ne.s16.totalorder %v13402_v62, 0  ;;  %v2282_v5 = vor.u32 %v2281_v53, %v2278_v43  ;;  %v13409_v43 = vld [vmem:[#allocation47_spill] sm:$0xff] }
 0x1f6   : > { %v11550_v49 = vadd.f32 %v8177_v15, %v3826_v50  ;;  %v1639_v1 = vsel %vm13403_vm11, %v13401_v38, 0  ;;  %v2345_v61 = vor.u32 %v2344_v8, %v2341_v23  ;;  %v2465_v28 = vshrl.u32 %v1918_v27, 16  ;;  %v13408_v15 = vld [vmem:[#allocation48_spill] sm:$0xff] }
 0x1f7   : > { %v2468_v22 = vshll.u32 %v1918_v27, 16  ;;  %v1919_v30 = vrot.slane %v1638_v17, 1  ;;  %v3157_v46 = vsel %vm1403_vm15, %v11428_v57, %v13404_v6  ;;  %v1921_v34 = vrot.slane %v1639_v1, 1 }
 0x1f8   : > { %v2404_v3 = vrot.slane %v2402_v55, 3  ;;  %v2407_v18 = vrot.slane %v2405_v42, 4  ;;  %v2283_v56 = vsel %vm1403_vm15, %v2219_v26, %v2282_v5  ;;  %v2346_v25 = vsel %vm1403_vm15, %v2282_v5, %v2345_v61  ;;  %v9185_v42 = vld [vmem:[#allocation7 + $0x48] sm:$0xff]  }
 0x1f9   : > { %4352 = vmatmul.mubr.bf16.gmra.mrb[120].mxu1 %v3084_v12  ;;  %v13405_v12 = vld [vmem:[#allocation46_spill] sm:$0xff]  ;;  %vm13407_vm1 = vcmp.ne.s16.totalorder %v13406_v60, 0  ;;  %v2467_v51 = vrot.slane %v2465_v28, 3  ;;  %v1920_v57 = vsel %vm1798_vm6, %v1917_v45, %v1919_v30  ;;  %v1922_v58 = vsel %vm1798_vm6, %v1919_v30, %v1921_v34  ;;  %8470 = vmatprep.subr.bf16.mxu1 %v9185_v42 }
 0x1fa   : > { %4359 = vmatprep.mubr.bf16.mxu1 %v3166_v24  ;;  %4199 = vmatmul.mubr.bf16.gmra.mrb[124].mxu0 %v3147_v14  ;;  %v8066_v10 = vpop.f32.mrb[36].mxu0  ;;  %v1640_v14 = vsel %vm13407_vm1, %v13405_v12, 0  ;;  %v2470_v24 = vrot.slane %v2468_v22, 4  ;;  %vm13410_vm11 = vcmp.ne.s16.totalorder %v13409_v43, 0  ;;  %v2408_v26 = vor.u32 %v2407_v18, %v2404_v3  ;;  %v13411_v12 = vld [vmem:[#allocation53_spill] sm:$0xff] }
 0x1fb   : > { %8956 = vmatprep.mubr.bf16.mxu0 %v2220_v39  ;;  %v8067_v29 = vpop.f32.mrb[37].mxu0  ;;  %v1641_v53 = vsel %vm13410_vm11, %v13408_v15, 0  ;;  %v1923_v23 = vrot.slane %v1640_v14, 1  ;;  %v2528_v8 = vshrl.u32 %v1920_v57, 16  ;;  %v2531_v36 = vshll.u32 %v1920_v57, 16  ;;  %v13412_v14 = vld [vmem:[#allocation51_spill] sm:$0xff] }
 0x1fc   : > { %v8068_v32 = vadd.f32 %v8067_v29, %v8066_v10  ;;  %v8069_v50 = vpop.f32.mrb[38].mxu0  ;;  %v2471_v39 = vor.u32 %v2470_v24, %v2467_v51  ;;  %v2591_v27 = vshrl.u32 %v1922_v58, 16  ;;  %v2594_v9 = vshll.u32 %v1922_v58, 16  ;;  %v9186_v29 = vld [vmem:[#allocation7 + $0x8] sm:$0xff]  }
 0x1fd   : > { %v8070_v7 = vpop.f32.mrb[39].mxu0  ;;  %v1925_v17 = vrot.slane %v1641_v53, 1  ;;  %v2409_v38 = vsel %vm1403_vm15, %v2345_v61, %v2408_v26  ;;  %v1924_v1 = vsel %vm1798_vm6, %v1921_v34, %v1923_v23  ;;  %v2530_v28 = vrot.slane %v2528_v8, 3  ;;  %8471 = vmatpush3.bf16.msra.mxu1 %v9186_v29  ;;  %v13414_v15 = vld [vmem:[#allocation57_spill] sm:$0xff] }
 0x1fe   : > { %v8071_v0 = vadd.f32 %v8070_v7, %v8069_v50  ;;  %v3831_v55 = vadd.f32 %v8068_v32, %v11300_v11  ;;  %v2533_v22 = vrot.slane %v2531_v36, 4  ;;  %v2472_v3 = vsel %vm1403_vm15, %v2408_v26, %v2471_v39 }
 0x1ff   : > { %v2593_v18 = vrot.slane %v2591_v27, 3  ;;  %v2596_v50 = vrot.slane %v2594_v9, 4  ;;  %v1926_v32 = vsel %vm1798_vm6, %v1923_v23, %v1925_v17  ;;  %vm13413_vm1 = vcmp.ne.s16.totalorder %v13412_v14, 0 }
 0x200   : > { %v3834_v30 = vadd.f32 %v8071_v0, %v11300_v11  ;;  %v1642_v7 = vsel %vm13413_vm1, %v13411_v12, 0  ;;  %v2654_v24 = vshrl.u32 %v1924_v1, 16  ;;  %v2657_v57 = vshll.u32 %v1924_v1, 16 }
 0x201   : > { %4360 = vmatmul.mubr.bf16.gmra.mrb[124].mxu1 %v3157_v46  ;;  %v1643_v26 = vsel %vm1558_vm9, %v13414_v15, 0  ;;  %v2534_v23 = vor.u32 %v2533_v22, %v2530_v28  ;;  %v2717_v8 = vshrl.u32 %v1926_v32, 16  ;;  %v2597_v9 = vor.u32 %v2596_v50, %v2593_v18  ;;  %v13418_v50 = vld [vmem:[#allocation64_spill] sm:$0xff] }
 0x202   : > { %8957 = vmatmul.mubr.bf16.vlgmr.msra.gmra.mrb[128].mxu0 %v2283_v56  ;;  %vm13424_vm1 = vcmask 1043456  }
 0x203   : > { %8960 = vmatprep.mubr.bf16.mxu0 %v2346_v25  ;;  %v2535_v1 = vsel %vm1403_vm15, %v2471_v39, %v2534_v23  ;;  %v2719_v28 = vrot.slane %v2717_v8, 3 }
 0x205   : > { %v8178_v45 = vpop.f32.mrb[36].mxu1 }
 0x206   : > { %v8179_v5 = vpop.f32.mrb[37].mxu1  ;;  %v8072_v25 = vpop.f32.mrb[40].mxu0 }
 0x207   : > { %v8180_v10 = vadd.f32 %v8179_v5, %v8178_v45  ;;  %v8181_v46 = vpop.f32.mrb[38].mxu1  ;;  %v8073_v51 = vpop.f32.mrb[41].mxu0  ;;  %v1927_v45 = vrot.slane %v1642_v7, 1  ;;  %v1929_v5 = vrot.slane %v1643_v26, 1 }
 0x208   : > { %v8182_v56 = vpop.f32.mrb[39].mxu1  ;;  %v8074_v0 = vadd.f32 %v8073_v51, %v8072_v25  ;;  %v8075_v58 = vpop.f32.mrb[42].mxu0 }
 0x209   : > { %v11580_v61 = vadd.f32 %v8180_v10, %v3831_v55  ;;  %v8183_v34 = vadd.f32 %v8182_v56, %v8181_v46  ;;  %v8076_v27 = vpop.f32.mrb[43].mxu0  ;;  %v2720_v55 = vshll.u32 %v1926_v32, 16  ;;  %v2659_v10 = vrot.slane %v2657_v57, 4  ;;  %v13416_v46 = vld [vmem:[#allocation62_spill] sm:$0xff]  ;;  %v13419_v32 = vld [vmem:[#allocation63_spill] sm:$0xff] }
 0x20a   : > { %8961 = vmatmul.mubr.bf16.gmra.mrb[132].mxu0 %v2409_v38  ;;  %v8077_v42 = vadd.f32 %v8076_v27, %v8075_v58  ;;  %v2656_v38 = vrot.slane %v2654_v24, 3  ;;  %v1644_v56 = vsel %vm1559_vm10, %v13416_v46, 0  ;;  %v1930_v18 = vsel %vm1798_vm6, %v1927_v45, %v1929_v5 }
 0x20b   : > { %8964 = vmatprep.mubr.bf16.mxu0 %v2472_v3  ;;  %v11588_v36 = vadd.f32 %v8183_v34, %v3834_v30  ;;  %v2598_v3 = vsel %vm1403_vm15, %v2534_v23, %v2597_v9  ;;  %v2722_v22 = vrot.slane %v2720_v55, 4  ;;  %v1928_v30 = vsel %vm1798_vm6, %v1925_v17, %v1927_v45  ;;  %v9187_v55 = vld [vmem:[#allocation7 + $0x50] sm:$0xff]  }
 0x20c   : > { %vm13420_vm11 = vcmp.ne.s16.totalorder %v13419_v32, 0  ;;  %v2660_v34 = vor.u32 %v2659_v10, %v2656_v38  ;;  %v1931_v12 = vrot.slane %v1644_v56, 1  ;;  %v2780_v39 = vshrl.u32 %v1928_v30, 16  ;;  %8472 = vmatprep.subr.bf16.mxu1 %v9187_v55 }
 0x20d   : > { %v1645_v25 = vsel %vm13420_vm11, %v13418_v50, 0  ;;  %v2783_v7 = vshll.u32 %v1928_v30, 16  ;;  %v3839_v51 = vadd.f32 %v8074_v0, %v11300_v11  ;;  %v2723_v57 = vor.u32 %v2722_v22, %v2719_v28  ;;  %v13421_v50 = vld [vmem:[#allocation72_spill] sm:$0xff]  ;;  %vm13425_vm11 = vmmov %vm13424_vm1 }
 0x20e   : > { %v2843_v15 = vshrl.u32 %v1930_v18, 16  ;;  %v2846_v26 = vshll.u32 %v1930_v18, 16  ;;  %v1933_v17 = vrot.slane %v1645_v25, 1  ;;  %v3842_v23 = vadd.f32 %v8077_v42, %v11300_v11 }
 0x20f   : > { %v2661_v45 = vsel %vm1403_vm15, %v2597_v9, %v2660_v34  ;;  %v1932_v10 = vsel %vm1798_vm6, %v1929_v5, %v1931_v12  ;;  %v2785_v46 = vrot.slane %v2783_v7, 4  ;;  %v2724_v28 = vsel %vm1403_vm15, %v2660_v34, %v2723_v57 }
 0x210   : > { %v2845_v22 = vrot.slane %v2843_v15, 3  ;;  %v2848_v30 = vrot.slane %v2846_v26, 4  ;;  %v1934_v42 = vsel %vm1798_vm6, %v1931_v12, %v1933_v17  ;;  %v1646_v25 = vsel %vm1561_vm14, %v13421_v50, 0 }
 0x211   : > { %v2906_v5 = vshrl.u32 %v1932_v10, 16  ;;  %v2909_v7 = vshll.u32 %v1932_v10, 16  ;;  %v1935_v15 = vrot.slane %v1646_v25, 1 }
 0x212   : > { %8965 = vmatmul.mubr.bf16.gmra.mrb[136].mxu0 %v2535_v1  ;;  %v8184_v24 = vpop.f32.mrb[40].mxu1  ;;  %v2782_v1 = vrot.slane %v2780_v39, 3 }
 0x213   : > { %8968 = vmatprep.mubr.bf16.mxu0 %v2598_v3  ;;  %v8185_v58 = vpop.f32.mrb[41].mxu1  ;;  %v9188_v3 = vld [vmem:[#allocation7 + $0x10] sm:$0xff]   ;;  %v2911_v55 = vrot.slane %v2909_v7, 4  ;;  %v1936_v10 = vsel %vm1798_vm6, %v1933_v17, %v1935_v15 }
 0x214   : > { %v8186_v8 = vadd.f32 %v8185_v58, %v8184_v24  ;;  %v8187_v27 = vpop.f32.mrb[42].mxu1  ;;  %8473 = vmatpush3.bf16.msra.mxu1 %v9188_v3  ;;  %v2786_v39 = vor.u32 %v2785_v46, %v2782_v1  ;;  %v2972_v24 = vshll.u32 %v1934_v42, 16  ;;  %v2849_v58 = vor.u32 %v2848_v30, %v2845_v22 }
 0x215   : > { %v8188_v38 = vpop.f32.mrb[43].mxu1  ;;  %v1937_v1 = vsel %vm1798_vm6, %v1935_v15, %v13370_v20  ;;  %v3032_v50 = vshrl.u32 %v1936_v10, 16  ;;  %v3035_v25 = vshll.u32 %v1936_v10, 16 }
 0x216   : > { %v11604_v56 = vadd.f32 %v8186_v8, %v3839_v51  ;;  %v8189_v0 = vadd.f32 %v8188_v38, %v8187_v27  ;;  %v2969_v51 = vshrl.u32 %v1934_v42, 16  ;;  %v2908_v8 = vrot.slane %v2906_v5, 3 }
 0x217   : > { %v2787_v27 = vsel %vm1403_vm15, %v2723_v57, %v2786_v39  ;;  %v2974_v3 = vrot.slane %v2972_v24, 4  ;;  %v3098_v24 = vshll.u32 %v1937_v1, 16 }
 0x218   : > { %v11608_v18 = vadd.f32 %v8189_v0, %v3842_v23  ;;  %v2971_v0 = vrot.slane %v2969_v51, 3  ;;  %v2912_v30 = vor.u32 %v2911_v55, %v2908_v8  ;;  %v3095_v51 = vshrl.u32 %v1937_v1, 16 }
 0x219   : > { %v3037_v55 = vrot.slane %v3035_v25, 4  ;;  %v3100_v1 = vrot.slane %v3098_v24, 4 }
 0x21a   : > { %8969 = vmatmul.mubr.bf16.gmra.mrb[140].mxu0 %v2661_v45  ;;  %v2850_v45 = vsel %vm1403_vm15, %v2786_v39, %v2849_v58  ;;  %v2975_v57 = vor.u32 %v2974_v3, %v2971_v0  ;;  %v9190_v0 = vld [vmem:[#allocation7 + $0x18] sm:$0xff]   ;;  %v3097_v10 = vrot.slane %v3095_v51, 3 }
 0x21b   : > { %8972 = vmatprep.mubr.bf16.mxu0 %v2724_v28 }
 0x21c   : > { %v8078_v34 = vpop.f32.mrb[44].mxu0  ;;  %v2976_v8 = vsel %vm1403_vm15, %v2912_v30, %v2975_v57 }
 0x21d   : > { %v8079_v26 = vpop.f32.mrb[45].mxu0 }
 0x21e   : > { %v8080_v12 = vadd.f32 %v8079_v26, %v8078_v34  ;;  %v8081_v23 = vpop.f32.mrb[46].mxu0  ;;  %v9189_v34 = vld [vmem:[#allocation7 + $0x58] sm:$0xff]  }
 0x21f   : > { %v8082_v38 = vpop.f32.mrb[47].mxu0  ;;  %8474 = vmatprep.subr.bf16.mxu1 %v9189_v34 }
 0x220   : > { %v8083_v28 = vadd.f32 %v8082_v38, %v8081_v23  ;;  %v3847_v46 = vadd.f32 %v8080_v12, %v11300_v11  ;;  %v2913_v12 = vsel %vm1403_vm15, %v2849_v58, %v2912_v30  ;;  %8475 = vmatpush3.bf16.msra.mxu1 %v9190_v0  ;;  %v3101_v58 = vor.u32 %v3100_v1, %v3097_v10 }
 0x222   : > { %8973 = vmatmul.mubr.bf16.gmra.mrb[144].mxu0 %v2787_v27  ;;  %v3850_v5 = vadd.f32 %v8083_v28, %v11300_v11  ;;  %v3034_v27 = vrot.slane %v3032_v50, 3 }
 0x223   : > { %v8190_v22 = vpop.f32.mrb[44].mxu1  ;;  %8976 = vmatprep.mubr.bf16.mxu0 %v2850_v45 }
 0x224   : > { %v8191_v42 = vpop.f32.mrb[45].mxu1 }
 0x225   : > { %v8192_v7 = vadd.f32 %v8191_v42, %v8190_v22  ;;  %v8193_v39 = vpop.f32.mrb[46].mxu1  ;;  %v3038_v42 = vor.u32 %v3037_v55, %v3034_v27 }
 0x226   : > { %v8194_v17 = vpop.f32.mrb[47].mxu1  ;;  %v8084_v23 = vpop.f32.mrb[48].mxu0 }
 0x227   : > { %v11620_v26 = vadd.f32 %v8192_v7, %v3847_v46  ;;  %v8195_v15 = vadd.f32 %v8194_v17, %v8193_v39  ;;  %v8085_v38 = vpop.f32.mrb[49].mxu0  ;;  %v3039_v30 = vsel %vm1403_vm15, %v2975_v57, %v3038_v42  ;;  %v3102_v50 = vsel %vm1403_vm15, %v3038_v42, %v3101_v58 }
 0x228   : > { %v8086_v45 = vadd.f32 %v8085_v38, %v8084_v23  ;;  %v8087_v28 = vpop.f32.mrb[50].mxu0  ;;  %v9191_v23 = vld [vmem:[#allocation7 + $0x60] sm:$0xff]   ;;  %v3175_v57 = vsel %vm1403_vm15, %v3101_v58, %v11457_v47  ;;  %v9193_v58 = vld [vmem:[#allocation7 + $0x68] sm:$0xff]  }
 0x229   : > { %v11624_v3 = vadd.f32 %v8195_v15, %v3850_v5  ;;  %v8088_v22 = vpop.f32.mrb[51].mxu0  ;;  %8476 = vmatprep.subr.bf16.mxu1 %v9191_v23 }
 0x22a   : > { %8977 = vmatmul.mubr.bf16.gmra.mrb[148].mxu0 %v2913_v12  ;;  %v8089_v46 = vadd.f32 %v8088_v22, %v8087_v28  ;;  %v3855_v25 = vadd.f32 %v8086_v45, %v11300_v11 }
 0x22b   : > { %8980 = vmatprep.mubr.bf16.mxu0 %v2976_v8  ;;  %v9192_v8 = vld [vmem:[#allocation7 + $0x20] sm:$0xff]  }
 0x22c   : > { %v3858_v39 = vadd.f32 %v8089_v46, %v11300_v11  ;;  %8477 = vmatpush3.bf16.msra.mxu1 %v9192_v8 }
 0x22d   : > { %8478 = vmatprep.subr.bf16.mxu1 %v9193_v58 }
 0x232   : > { %v8196_v7 = vpop.f32.mrb[48].mxu1  ;;  %8981 = vmatmul.mubr.bf16.gmra.mrb[152].mxu0 %v3039_v30 }
 0x233   : > { %v8197_v5 = vpop.f32.mrb[49].mxu1  ;;  %8984 = vmatprep.mubr.bf16.mxu0 %v3102_v50 }
 0x234   : > { %v8198_v51 = vadd.f32 %v8197_v5, %v8196_v7  ;;  %v8199_v24 = vpop.f32.mrb[50].mxu1 }
 0x235   : > { %v8200_v17 = vpop.f32.mrb[51].mxu1 }
 0x236   : > { %v11630_v34 = vadd.f32 %v8198_v51, %v3855_v25  ;;  %v8201_v15 = vadd.f32 %v8200_v17, %v8199_v24  ;;  %v9194_v17 = vld [vmem:[#allocation7 + $0x28] sm:$0xff]  }
 0x237   : > { %8479 = vmatpush3.bf16.msra.mxu1 %v9194_v17 }
 0x238   : > { %v11632_v12 = vadd.f32 %v8201_v15, %v3858_v39  ;;  %v8090_v27 = vpop.f32.mrb[52].mxu0 }
 0x239   : > { %v8091_v55 = vpop.f32.mrb[53].mxu0 }
 0x23a   : > { %8985 = vmatmul.mubr.bf16.gmra.mrb[156].mxu0 %v3175_v57  ;;  %v8092_v38 = vadd.f32 %v8091_v55, %v8090_v27  ;;  %v8093_v0 = vpop.f32.mrb[54].mxu0 }
 0x23b   : > { %v8094_v45 = vpop.f32.mrb[55].mxu0 }
 0x23c   : > { %v8095_v28 = vadd.f32 %v8094_v45, %v8093_v0  ;;  %v3863_v10 = vadd.f32 %v8092_v38, %v11300_v11 }
 0x23e   : > { %v3866_v46 = vadd.f32 %v8095_v28, %v11300_v11 }
 0x244   : > { %v8202_v1 = vpop.f32.mrb[52].mxu1 }
 0x245   : > { %v8203_v22 = vpop.f32.mrb[53].mxu1  ;;  %v8096_v50 = vpop.f32.mrb[56].mxu0 }
 0x246   : > { %v8204_v42 = vadd.f32 %v8203_v22, %v8202_v1  ;;  %v8205_v30 = vpop.f32.mrb[54].mxu1  ;;  %v8097_v7 = vpop.f32.mrb[57].mxu0 }
 0x247   : > { %v8206_v25 = vpop.f32.mrb[55].mxu1  ;;  %v8098_v51 = vadd.f32 %v8097_v7, %v8096_v50  ;;  %v8099_v24 = vpop.f32.mrb[58].mxu0 }
 0x248   : > { %v11638_v5 = vadd.f32 %v8204_v42, %v3863_v10  ;;  %v8207_v39 = vadd.f32 %v8206_v25, %v8205_v30  ;;  %v8100_v15 = vpop.f32.mrb[59].mxu0 }
 0x249   : > { %v8101_v57 = vadd.f32 %v8100_v15, %v8099_v24  ;;  %v3871_v8 = vadd.f32 %v8098_v51, %v11300_v11 }
 0x24a   : > { %v11640_v23 = vadd.f32 %v8207_v39, %v3866_v46  ;;  %v9195_v46 = vld [vmem:[#allocation7 + $0xc0] sm:$0xff]  }
 0x24b   : > { %v3874_v38 = vadd.f32 %v8101_v57, %v11300_v11  ;;  %8580 = vmatprep.subr.bf16.mxu0 %v9195_v46  ;;  %v9196_v39 = vld [vmem:[#allocation7 + $0x80] sm:$0xff]  }
 0x24c   : > { %v8208_v27 = vpop.f32.mrb[56].mxu1  ;;  %8581 = vmatpush3.bf16.msra.mxu0 %v9196_v39 }
 0x24d   : > { %v8209_v55 = vpop.f32.mrb[57].mxu1  ;;  %v8102_v28 = vpop.f32.mrb[60].mxu0 }
 0x24e   : > { %v8210_v0 = vadd.f32 %v8209_v55, %v8208_v27  ;;  %v8211_v45 = vpop.f32.mrb[58].mxu1  ;;  %v8103_v1 = vpop.f32.mrb[61].mxu0  ;;  %v9197_v55 = vld [vmem:[#allocation7 + $0x70] sm:$0xff]  }
 0x24f   : > { %v8212_v10 = vpop.f32.mrb[59].mxu1  ;;  %v8104_v30 = vadd.f32 %v8103_v1, %v8102_v28  ;;  %v8105_v50 = vpop.f32.mrb[62].mxu0  ;;  %8480 = vmatprep.subr.bf16.mxu1 %v9197_v55 }
 0x250   : > { %v11644_v22 = vadd.f32 %v8210_v0, %v3871_v8  ;;  %v8213_v42 = vadd.f32 %v8212_v10, %v8211_v45  ;;  %v8106_v58 = vpop.f32.mrb[63].mxu0  ;;  %v9198_v0 = vld [vmem:[#allocation7 + $0xc8] sm:$0xff]  }
 0x251   : > { %v8107_v7 = vadd.f32 %v8106_v58, %v8105_v50  ;;  %v3879_v51 = vadd.f32 %v8104_v30, %v11300_v11  ;;  %8582 = vmatprep.subr.bf16.mxu0 %v9198_v0  ;;  %v9199_v30 = vld [vmem:[#allocation7 + $0x30] sm:$0xff]   ;;  %v9200_v50 = vld [vmem:[#allocation7 + $0x88] sm:$0xff]  }
 0x252   : > { %v11646_v25 = vadd.f32 %v8213_v42, %v3874_v38  ;;  %v9201_v58 = vld [vmem:[#allocation7 + $0xd0] sm:$0xff]   ;;  %8481 = vmatpush3.bf16.msra.mxu1 %v9199_v30  ;;  %8583 = vmatpush3.bf16.msra.mxu0 %v9200_v50 }
 0x253   : > { %v3882_v15 = vadd.f32 %v8107_v7, %v11300_v11  ;;  %8584 = vmatprep.subr.bf16.mxu0 %v9201_v58  ;;  %v9203_v58 = vld [vmem:[#allocation7 + $0xd8] sm:$0xff]  }
 0x254   : > { %v8214_v24 = vpop.f32.mrb[60].mxu1 }
 0x255   : > { %v8215_v17 = vpop.f32.mrb[61].mxu1  ;;  %v8236_v27 = vpop.f32.mrb[64].mxu0 }
 0x256   : > { %v8216_v57 = vadd.f32 %v8215_v17, %v8214_v24  ;;  %v8217_v8 = vpop.f32.mrb[62].mxu1  ;;  %v8237_v28 = vpop.f32.mrb[65].mxu0  ;;  %v9202_v24 = vld [vmem:[#allocation7 + $0x90] sm:$0xff]  }
 0x257   : > { %v8218_v45 = vpop.f32.mrb[63].mxu1  ;;  %v8238_v1 = vadd.f32 %v8237_v28, %v8236_v27  ;;  %v8239_v42 = vpop.f32.mrb[66].mxu0  ;;  %v13423_v17 = vld [vmem:[#allocation38_spill] sm:$0xff]  ;;  %8585 = vmatpush3.bf16.msra.mxu0 %v9202_v24 }
 0x258   : > { %v11650_v10 = vadd.f32 %v8216_v57, %v3879_v51  ;;  %v8219_v38 = vadd.f32 %v8218_v45, %v8217_v8  ;;  %v8240_v46 = vpop.f32.mrb[67].mxu0  ;;  %8586 = vmatprep.subr.bf16.mxu0 %v9203_v58  ;;  %v9210_v58 = vld [vmem:[#allocation7 + $0xa8] sm:$0xff]  }
 0x259   : > { %v4081_v11 = vadd.f32 %v8238_v1, %v11437_v21  ;;  %v8241_v7 = vadd.f32 %v8240_v46, %v8239_v42 }
 0x25a   : > { %v11652_v39 = vadd.f32 %v8219_v38, %v3882_v15 }
 0x25b   : > { %v4084_v57 = vadd.f32 %v8241_v7, %v13423_v17  ;;  %v9204_v7 = vld [vmem:[#allocation7 + $0x98] sm:$0xff]  }
 0x25c   : > { %v8348_v51 = vpop.f32.mrb[64].mxu1  ;;  %8587 = vmatpush3.bf16.msra.mxu0 %v9204_v7 }
 0x25d   : > { %v8349_v8 = vpop.f32.mrb[65].mxu1  ;;  %v8242_v0 = vpop.f32.mrb[68].mxu0 }
 0x25e   : > { %v8350_v27 = vadd.f32 %v8349_v8, %v8348_v51  ;;  %v8351_v55 = vpop.f32.mrb[66].mxu1  ;;  %v8243_v28 = vpop.f32.mrb[69].mxu0  ;;  %v9205_v51 = vld [vmem:[#allocation7 + $0xe0] sm:$0xff]  }
 0x25f   : > { %v8352_v45 = vpop.f32.mrb[67].mxu1  ;;  %v8244_v15 = vadd.f32 %v8243_v28, %v8242_v0  ;;  %v8245_v38 = vpop.f32.mrb[70].mxu0  ;;  %8588 = vmatprep.subr.bf16.mxu0 %v9205_v51 }
 0x260   : > { %v8353_v47 = vadd.f32 %v8352_v45, %v8351_v55  ;;  %v11656_v9 = vadd.f32 %v8350_v27, %v4081_v11  ;;  %v8246_v21 = vpop.f32.mrb[71].mxu0  ;;  %v9206_v27 = vld [vmem:[#allocation7 + $0xa0] sm:$0xff]  }
 0x261   : > { %v4089_v1 = vadd.f32 %v8244_v15, %v11468_v52  ;;  %v8247_v42 = vadd.f32 %v8246_v21, %v8245_v38  ;;  %v9207_v21 = vld [vmem:[#allocation7 + $0x78] sm:$0xff]   ;;  %8589 = vmatpush3.bf16.msra.mxu0 %v9206_v27 }
 0x262   : > { %v11659_v30 = vadd.f32 %v8353_v47, %v4084_v57  ;;  %8482 = vmatprep.subr.bf16.mxu1 %v9207_v21  ;;  %v9213_v21 = vld [vmem:[#allocation7 + $0xf8] sm:$0xff]  }
 0x263   : > { %v4092_v46 = vadd.f32 %v8247_v42, %v11480_v40  ;;  %v9208_v42 = vld [vmem:[#allocation7 + $0xe8] sm:$0xff]  }
 0x264   : > { %v8354_v50 = vpop.f32.mrb[68].mxu1  ;;  %8590 = vmatprep.subr.bf16.mxu0 %v9208_v42  ;;  %v9214_v42 = vld [vmem:[#allocation7 + $0xb8] sm:$0xff]  }
 0x265   : > { %v8355_v24 = vpop.f32.mrb[69].mxu1  ;;  %v8248_v55 = vpop.f32.mrb[72].mxu0  ;;  %8591 = vmatpush3.bf16.msra.mxu0 %v9210_v58 }
 0x266   : > { %v8356_v17 = vadd.f32 %v8355_v24, %v8354_v50  ;;  %v8357_v8 = vpop.f32.mrb[70].mxu1  ;;  %v8249_v11 = vpop.f32.mrb[73].mxu0  ;;  %v9209_v50 = vld [vmem:[#allocation7 + $0x38] sm:$0xff]  }
 0x267   : > { %v8358_v0 = vpop.f32.mrb[71].mxu1  ;;  %v8250_v52 = vadd.f32 %v8249_v11, %v8248_v55  ;;  %v8251_v28 = vpop.f32.mrb[74].mxu0  ;;  %8483 = vmatpush3.bf16.msra.mxu1 %v9209_v50 }
 0x268   : > { %v8359_v45 = vadd.f32 %v8358_v0, %v8357_v8  ;;  %v11662_v47 = vadd.f32 %v8356_v17, %v4089_v1  ;;  %v8252_v57 = vpop.f32.mrb[75].mxu0  ;;  %v9211_v8 = vld [vmem:[#allocation7 + $0xf0] sm:$0xff]  }
 0x269   : > { %v4097_v40 = vadd.f32 %v8250_v52, %v11484_v37  ;;  %v8253_v15 = vadd.f32 %v8252_v57, %v8251_v28  ;;  %8592 = vmatprep.subr.bf16.mxu0 %v9211_v8 }
 0x26a   : > { %v11665_v38 = vadd.f32 %v8359_v45, %v4092_v46  ;;  %v9212_v46 = vld [vmem:[#allocation7 + $0xb0] sm:$0xff]  }
 0x26b   : > { %v4100_v7 = vadd.f32 %v8253_v15, %v11488_v54  ;;  %8593 = vmatpush3.bf16.msra.mxu0 %v9212_v46 }
 0x26c   : > { %v8360_v24 = vpop.f32.mrb[72].mxu1  ;;  %8594 = vmatprep.subr.bf16.mxu0 %v9213_v21 }
 0x26d   : > { %v8361_v1 = vpop.f32.mrb[73].mxu1  ;;  %v8254_v55 = vpop.f32.mrb[76].mxu0 }
 0x26e   : > { %v8362_v51 = vadd.f32 %v8361_v1, %v8360_v24  ;;  %v8363_v17 = vpop.f32.mrb[74].mxu1  ;;  %v8255_v0 = vpop.f32.mrb[77].mxu0 }
 0x26f   : > { %v8364_v37 = vpop.f32.mrb[75].mxu1  ;;  %v8256_v45 = vadd.f32 %v8255_v0, %v8254_v55  ;;  %v8257_v52 = vpop.f32.mrb[78].mxu0  ;;  %8595 = vmatpush3.bf16.msra.mxu0 %v9214_v42 }
 0x270   : > { %v8365_v11 = vadd.f32 %v8364_v37, %v8363_v17  ;;  %v11668_v27 = vadd.f32 %v8362_v51, %v4097_v40  ;;  %v8258_v28 = vpop.f32.mrb[79].mxu0 }
 0x271   : > { %v4105_v54 = vadd.f32 %v8256_v45, %v11492_v63  ;;  %v8259_v57 = vadd.f32 %v8258_v28, %v8257_v52 }
 0x272   : > { %v11671_v15 = vadd.f32 %v8365_v11, %v4100_v7 }
 0x273   : > { %v4108_v24 = vadd.f32 %v8259_v57, %v11496_v35 }
 0x274   : > { %v8366_v50 = vpop.f32.mrb[76].mxu1 }
 0x275   : > { %v8367_v58 = vpop.f32.mrb[77].mxu1  ;;  %v8260_v55 = vpop.f32.mrb[80].mxu0 }
 0x276   : > { %v8368_v1 = vadd.f32 %v8367_v58, %v8366_v50  ;;  %v8369_v17 = vpop.f32.mrb[78].mxu1  ;;  %v8261_v51 = vpop.f32.mrb[81].mxu0  ;;  %v9215_v58 = vld [vmem:[#allocation7 + $0x140] sm:$0xff]  }
 0x277   : > { %v8370_v40 = vpop.f32.mrb[79].mxu1  ;;  %v8262_v37 = vadd.f32 %v8261_v51, %v8260_v55  ;;  %v8263_v63 = vpop.f32.mrb[82].mxu0  ;;  %8692 = vmatprep.subr.bf16.mxu1 %v9215_v58 }
 0x278   : > { %v8371_v8 = vadd.f32 %v8370_v40, %v8369_v17  ;;  %v11674_v0 = vadd.f32 %v8368_v1, %v4105_v54  ;;  %v8264_v7 = vpop.f32.mrb[83].mxu0 }
 0x279   : > { %v4113_v46 = vadd.f32 %v8262_v37, %v11501_v13  ;;  %v8265_v11 = vadd.f32 %v8264_v7, %v8263_v63 }
 0x27a   : > { %v11677_v45 = vadd.f32 %v8371_v8, %v4108_v24 }
 0x27b   : > { %v4116_v52 = vadd.f32 %v8265_v11, %v11504_v33 }
 0x27c   : > { %v8372_v35 = vpop.f32.mrb[80].mxu1 }
 0x27d   : > { %v8373_v28 = vpop.f32.mrb[81].mxu1  ;;  %v8266_v50 = vpop.f32.mrb[84].mxu0 }
 0x27e   : > { %v8374_v57 = vadd.f32 %v8373_v28, %v8372_v35  ;;  %v8375_v21 = vpop.f32.mrb[82].mxu1  ;;  %v8267_v17 = vpop.f32.mrb[85].mxu0 }
 0x27f   : > { %v8376_v42 = vpop.f32.mrb[83].mxu1  ;;  %v8268_v40 = vadd.f32 %v8267_v17, %v8266_v50  ;;  %v8269_v54 = vpop.f32.mrb[86].mxu0 }
 0x280   : > { %v8377_v55 = vadd.f32 %v8376_v42, %v8375_v21  ;;  %v11680_v1 = vadd.f32 %v8374_v57, %v4113_v46  ;;  %v8270_v13 = vpop.f32.mrb[87].mxu0 }
 0x281   : > { %v4121_v24 = vadd.f32 %v8268_v40, %v11507_v48  ;;  %v8271_v51 = vadd.f32 %v8270_v13, %v8269_v54 }
 0x282   : > { %v11683_v8 = vadd.f32 %v8377_v55, %v4116_v52 }
 0x283   : > { %v4124_v37 = vadd.f32 %v8271_v51, %v11510_v2 }
 0x284   : > { %v8378_v33 = vpop.f32.mrb[84].mxu1 }
 0x285   : > { %v8379_v63 = vpop.f32.mrb[85].mxu1  ;;  %v8272_v35 = vpop.f32.mrb[88].mxu0 }
 0x286   : > { %v8380_v7 = vadd.f32 %v8379_v63, %v8378_v33  ;;  %v8381_v11 = vpop.f32.mrb[86].mxu1  ;;  %v8273_v21 = vpop.f32.mrb[89].mxu0 }
 0x287   : > { %v8382_v28 = vpop.f32.mrb[87].mxu1  ;;  %v8274_v42 = vadd.f32 %v8273_v21, %v8272_v35  ;;  %v8275_v46 = vpop.f32.mrb[90].mxu0 }
 0x288   : > { %v8383_v50 = vadd.f32 %v8382_v28, %v8381_v11  ;;  %v11686_v57 = vadd.f32 %v8380_v7, %v4121_v24  ;;  %v8276_v58 = vpop.f32.mrb[91].mxu0 }
 0x289   : > { %v4129_v48 = vadd.f32 %v8274_v42, %v11513_v41  ;;  %v8277_v17 = vadd.f32 %v8276_v58, %v8275_v46 }
 0x28a   : > { %v11689_v52 = vadd.f32 %v8383_v50, %v4124_v37 }
 0x28b   : > { %v4132_v2 = vadd.f32 %v8277_v17, %v11516_v16 }
 0x28c   : > { %v8384_v55 = vpop.f32.mrb[88].mxu1 }
 0x28d   : > { %v8385_v40 = vpop.f32.mrb[89].mxu1  ;;  %v8278_v51 = vpop.f32.mrb[92].mxu0 }
 0x28e   : > { %v8386_v54 = vadd.f32 %v8385_v40, %v8384_v55  ;;  %v8387_v13 = vpop.f32.mrb[90].mxu1  ;;  %v8279_v63 = vpop.f32.mrb[93].mxu0 }
 0x28f   : > { %v8388_v33 = vpop.f32.mrb[91].mxu1  ;;  %v8280_v35 = vadd.f32 %v8279_v63, %v8278_v51  ;;  %v8281_v28 = vpop.f32.mrb[94].mxu0 }
 0x290   : > { %v8389_v11 = vadd.f32 %v8388_v33, %v8387_v13  ;;  %v11692_v24 = vadd.f32 %v8386_v54, %v4129_v48  ;;  %v8282_v7 = vpop.f32.mrb[95].mxu0 }
 0x291   : > { %v4137_v41 = vadd.f32 %v8280_v35, %v11525_v4  ;;  %v8283_v21 = vadd.f32 %v8282_v7, %v8281_v28 }
 0x292   : > { %v11695_v37 = vadd.f32 %v8389_v11, %v4132_v2 }
 0x293   : > { %v4140_v16 = vadd.f32 %v8283_v21, %v11527_v44 }
 0x294   : > { %v8390_v50 = vpop.f32.mrb[92].mxu1 }
 0x295   : > { %v8391_v42 = vpop.f32.mrb[93].mxu1  ;;  %v8284_v17 = vpop.f32.mrb[96].mxu0 }
 0x296   : > { %v8392_v46 = vadd.f32 %v8391_v42, %v8390_v50  ;;  %v8393_v58 = vpop.f32.mrb[94].mxu1  ;;  %v8285_v40 = vpop.f32.mrb[97].mxu0 }
 0x297   : > { %v8394_v55 = vpop.f32.mrb[95].mxu1  ;;  %v8286_v51 = vadd.f32 %v8285_v40, %v8284_v17  ;;  %v8287_v33 = vpop.f32.mrb[98].mxu0 }
 0x298   : > { %v8395_v13 = vadd.f32 %v8394_v55, %v8393_v58  ;;  %v11698_v48 = vadd.f32 %v8392_v46, %v4137_v41  ;;  %v8288_v54 = vpop.f32.mrb[99].mxu0 }
 0x299   : > { %v4145_v4 = vadd.f32 %v8286_v51, %v11547_v59  ;;  %v8289_v63 = vadd.f32 %v8288_v54, %v8287_v33 }
 0x29a   : > { %v11701_v2 = vadd.f32 %v8395_v13, %v4140_v16 }
 0x29b   : > { %v4148_v44 = vadd.f32 %v8289_v63, %v11550_v49 }
 0x29c   : > { %v8396_v11 = vpop.f32.mrb[96].mxu1 }
 0x29d   : > { %v8397_v35 = vpop.f32.mrb[97].mxu1  ;;  %v8290_v21 = vpop.f32.mrb[100].mxu0 }
 0x29e   : > { %v8398_v28 = vadd.f32 %v8397_v35, %v8396_v11  ;;  %v8399_v7 = vpop.f32.mrb[98].mxu1  ;;  %v8291_v42 = vpop.f32.mrb[101].mxu0 }
 0x29f   : > { %v8400_v50 = vpop.f32.mrb[99].mxu1  ;;  %v8292_v17 = vadd.f32 %v8291_v42, %v8290_v21  ;;  %v8293_v55 = vpop.f32.mrb[102].mxu0 }
 0x2a0   : > { %v8401_v58 = vadd.f32 %v8400_v50, %v8399_v7  ;;  %v11704_v41 = vadd.f32 %v8398_v28, %v4145_v4  ;;  %v8294_v46 = vpop.f32.mrb[103].mxu0 }
 0x2a1   : > { %v4153_v59 = vadd.f32 %v8292_v17, %v11580_v61  ;;  %v8295_v40 = vadd.f32 %v8294_v46, %v8293_v55 }
 0x2a2   : > { %v11707_v16 = vadd.f32 %v8401_v58, %v4148_v44 }
 0x2a3   : > { %v4156_v49 = vadd.f32 %v8295_v40, %v11588_v36 }
 0x2a4   : > { %v8402_v13 = vpop.f32.mrb[100].mxu1 }
 0x2a5   : > { %v8403_v51 = vpop.f32.mrb[101].mxu1  ;;  %v8296_v63 = vpop.f32.mrb[104].mxu0 }
 0x2a6   : > { %v8404_v33 = vadd.f32 %v8403_v51, %v8402_v13  ;;  %v8405_v54 = vpop.f32.mrb[102].mxu1  ;;  %v8297_v35 = vpop.f32.mrb[105].mxu0 }
 0x2a7   : > { %v8406_v11 = vpop.f32.mrb[103].mxu1  ;;  %v8298_v21 = vadd.f32 %v8297_v35, %v8296_v63  ;;  %v8299_v50 = vpop.f32.mrb[106].mxu0 }
 0x2a8   : > { %v8407_v7 = vadd.f32 %v8406_v11, %v8405_v54  ;;  %v11710_v4 = vadd.f32 %v8404_v33, %v4153_v59  ;;  %v8300_v28 = vpop.f32.mrb[107].mxu0 }
 0x2a9   : > { %v4161_v61 = vadd.f32 %v8298_v21, %v11604_v56  ;;  %v8301_v42 = vadd.f32 %v8300_v28, %v8299_v50 }
 0x2aa   : > { %v11713_v44 = vadd.f32 %v8407_v7, %v4156_v49 }
 0x2ab   : > { %v4164_v36 = vadd.f32 %v8301_v42, %v11608_v18 }
 0x2ac   : > { %v8408_v58 = vpop.f32.mrb[104].mxu1 }
 0x2ad   : > { %v8409_v17 = vpop.f32.mrb[105].mxu1  ;;  %v8302_v40 = vpop.f32.mrb[108].mxu0 }
 0x2ae   : > { %v8410_v55 = vadd.f32 %v8409_v17, %v8408_v58  ;;  %v8411_v46 = vpop.f32.mrb[106].mxu1  ;;  %v8303_v51 = vpop.f32.mrb[109].mxu0 }
 0x2af   : > { %v8412_v13 = vpop.f32.mrb[107].mxu1  ;;  %v8304_v63 = vadd.f32 %v8303_v51, %v8302_v40  ;;  %v8305_v11 = vpop.f32.mrb[110].mxu0 }
 0x2b0   : > { %v8413_v54 = vadd.f32 %v8412_v13, %v8411_v46  ;;  %v11716_v59 = vadd.f32 %v8410_v55, %v4161_v61  ;;  %v8306_v33 = vpop.f32.mrb[111].mxu0 }
 0x2b1   : > { %v4169_v56 = vadd.f32 %v8304_v63, %v11620_v26  ;;  %v8307_v35 = vadd.f32 %v8306_v33, %v8305_v11 }
 0x2b2   : > { %v11719_v49 = vadd.f32 %v8413_v54, %v4164_v36 }
 0x2b3   : > { %v4172_v18 = vadd.f32 %v8307_v35, %v11624_v3 }
 0x2b4   : > { %v8414_v7 = vpop.f32.mrb[108].mxu1 }
 0x2b5   : > { %v8415_v21 = vpop.f32.mrb[109].mxu1  ;;  %v8308_v42 = vpop.f32.mrb[112].mxu0 }
 0x2b6   : > { %v8416_v50 = vadd.f32 %v8415_v21, %v8414_v7  ;;  %v8417_v28 = vpop.f32.mrb[110].mxu1  ;;  %v8309_v17 = vpop.f32.mrb[113].mxu0 }
 0x2b7   : > { %v8418_v58 = vpop.f32.mrb[111].mxu1  ;;  %v8310_v40 = vadd.f32 %v8309_v17, %v8308_v42  ;;  %v8311_v13 = vpop.f32.mrb[114].mxu0 }
 0x2b8   : > { %v8419_v46 = vadd.f32 %v8418_v58, %v8417_v28  ;;  %v11722_v61 = vadd.f32 %v8416_v50, %v4169_v56  ;;  %v8312_v55 = vpop.f32.mrb[115].mxu0 }
 0x2b9   : > { %v4177_v26 = vadd.f32 %v8310_v40, %v11630_v34  ;;  %v8313_v51 = vadd.f32 %v8312_v55, %v8311_v13 }
 0x2ba   : > { %v11725_v36 = vadd.f32 %v8419_v46, %v4172_v18 }
 0x2bb   : > { %v4180_v3 = vadd.f32 %v8313_v51, %v11632_v12 }
 0x2bc   : > { %v8420_v54 = vpop.f32.mrb[112].mxu1 }
 0x2bd   : > { %v8421_v63 = vpop.f32.mrb[113].mxu1  ;;  %v8314_v35 = vpop.f32.mrb[116].mxu0 }
 0x2be   : > { %v8422_v11 = vadd.f32 %v8421_v63, %v8420_v54  ;;  %v8423_v33 = vpop.f32.mrb[114].mxu1  ;;  %v8315_v21 = vpop.f32.mrb[117].mxu0 }
 0x2bf   : > { %v8424_v7 = vpop.f32.mrb[115].mxu1  ;;  %v8316_v42 = vadd.f32 %v8315_v21, %v8314_v35  ;;  %v8317_v58 = vpop.f32.mrb[118].mxu0 }
 0x2c0   : > { %v8425_v28 = vadd.f32 %v8424_v7, %v8423_v33  ;;  %v11728_v56 = vadd.f32 %v8422_v11, %v4177_v26  ;;  %v8318_v50 = vpop.f32.mrb[119].mxu0 }
 0x2c1   : > { %v4185_v34 = vadd.f32 %v8316_v42, %v11638_v5  ;;  %v8319_v17 = vadd.f32 %v8318_v50, %v8317_v58 }
 0x2c2   : > { %v11731_v18 = vadd.f32 %v8425_v28, %v4180_v3 }
 0x2c3   : > { %v4188_v12 = vadd.f32 %v8319_v17, %v11640_v23 }
 0x2c4   : > { %v8426_v46 = vpop.f32.mrb[116].mxu1 }
 0x2c5   : > { %v8427_v40 = vpop.f32.mrb[117].mxu1  ;;  %v8320_v51 = vpop.f32.mrb[120].mxu0 }
 0x2c6   : > { %v8428_v13 = vadd.f32 %v8427_v40, %v8426_v46  ;;  %v8429_v55 = vpop.f32.mrb[118].mxu1  ;;  %v8321_v63 = vpop.f32.mrb[121].mxu0 }
 0x2c7   : > { %v8430_v54 = vpop.f32.mrb[119].mxu1  ;;  %v8322_v35 = vadd.f32 %v8321_v63, %v8320_v51  ;;  %v8323_v7 = vpop.f32.mrb[122].mxu0 }
 0x2c8   : > { %v8431_v33 = vadd.f32 %v8430_v54, %v8429_v55  ;;  %v11734_v26 = vadd.f32 %v8428_v13, %v4185_v34  ;;  %v8324_v11 = vpop.f32.mrb[123].mxu0 }
 0x2c9   : > { %v4193_v5 = vadd.f32 %v8322_v35, %v11644_v22  ;;  %v8325_v21 = vadd.f32 %v8324_v11, %v8323_v7 }
 0x2ca   : > { %v11737_v3 = vadd.f32 %v8431_v33, %v4188_v12  ;;  %v9223_v33 = vld [vmem:[#allocation7 + $0x1c0] sm:$0xff]  }
 0x2cb   : > { %v4196_v23 = vadd.f32 %v8325_v21, %v11646_v25  ;;  %8804 = vmatprep.subr.bf16.mxu0 %v9223_v33 }
 0x2cc   : > { %v8432_v28 = vpop.f32.mrb[120].mxu1 }
 0x2cd   : > { %v8433_v42 = vpop.f32.mrb[121].mxu1  ;;  %v8326_v17 = vpop.f32.mrb[124].mxu0 }
 0x2ce   : > { %v8434_v58 = vadd.f32 %v8433_v42, %v8432_v28  ;;  %v8435_v50 = vpop.f32.mrb[122].mxu1  ;;  %v8327_v40 = vpop.f32.mrb[125].mxu0 }
 0x2cf   : > { %v8436_v46 = vpop.f32.mrb[123].mxu1  ;;  %v8328_v51 = vadd.f32 %v8327_v40, %v8326_v17  ;;  %v8329_v54 = vpop.f32.mrb[126].mxu0 }
 0x2d0   : > { %v8437_v55 = vadd.f32 %v8436_v46, %v8435_v50  ;;  %v11740_v34 = vadd.f32 %v8434_v58, %v4193_v5  ;;  %v8330_v13 = vpop.f32.mrb[127].mxu0 }
 0x2d1   : > { %v4201_v22 = vadd.f32 %v8328_v51, %v11650_v10  ;;  %v8331_v63 = vadd.f32 %v8330_v13, %v8329_v54 }
 0x2d2   : > { %v11743_v12 = vadd.f32 %v8437_v55, %v4196_v23 }
 0x2d3   : > { %v4204_v25 = vadd.f32 %v8331_v63, %v11652_v39 }
 0x2d4   : > { %v8438_v35 = vpop.f32.mrb[124].mxu1 }
 0x2d5   : > { %v8439_v7 = vpop.f32.mrb[125].mxu1  ;;  %v8958_v28 = vpop.f32.mrb[128].mxu0 }
 0x2d6   : > { %v8440_v11 = vadd.f32 %v8439_v7, %v8438_v35  ;;  %v8441_v21 = vpop.f32.mrb[126].mxu1  ;;  %v4411_v50 = vadd.f32 %v8958_v28, %v11662_v47  ;;  %v4402_v5 = vpop.f32.mrb[129].mxu0 }
 0x2d7   : > { %v8442_v42 = vpop.f32.mrb[127].mxu1  ;;  %v4403_v17 = vadd.f32 %v4402_v5, %v11656_v9  ;;  %v8959_v10 = vpop.f32.mrb[130].mxu0 }
 0x2d8   : > { %v8443_v58 = vadd.f32 %v8442_v42, %v8441_v21  ;;  %v11748_v46 = vadd.f32 %v8440_v11, %v4201_v22  ;;  %v4414_v23 = vadd.f32 %v8959_v10, %v11665_v38  ;;  %v4405_v40 = vpop.f32.mrb[131].mxu0  ;;  %v4531_v51 = vmax.f32 %v4411_v50, 0.0 }
 0x2d9   : > { %v4406_v39 = vadd.f32 %v4405_v40, %v11659_v30  ;;  %v4529_v13 = vmax.f32 %v4403_v17, 0.0 }
 0x2da   : > { %v11752_v55 = vadd.f32 %v8443_v58, %v4204_v25  ;;  %v4532_v54 = vmax.f32 %v4414_v23, 0.0 }
 0x2db   : > { %v4530_v63 = vmax.f32 %v4406_v39, 0.0 }
 0x2dc   : > { %v4562_v33 = vpack.c.bf16 %v4532_v54, %v4531_v51 }
 0x2dd   : > { %v4561_v47 = vpack.c.bf16 %v4530_v63, %v4529_v13  ;;  %v8962_v35 = vpop.f32.mrb[132].mxu0 }
 0x2de   : > { %v4594_v7 = vrot.slane %v4562_v33, 4  ;;  %v4427_v9 = vadd.f32 %v8962_v35, %v11674_v0  ;;  %v4418_v21 = vpop.f32.mrb[133].mxu0  ;;  %v13427_v0 = vld [vmem:[#allocation17_spill] sm:$0xff] }
 0x2df   : > { %v4593_v22 = vrot.slane %v4561_v47, 4  ;;  %v4419_v11 = vadd.f32 %v4418_v21, %v11668_v27  ;;  %v8963_v38 = vpop.f32.mrb[134].mxu0  ;;  %vm13428_vm5 = vcmp.ne.s16.totalorder %v13427_v0, 0 }
 0x2e0   : > { %v4535_v28 = vmax.f32 %v4427_v9, 0.0  ;;  %v4430_v30 = vadd.f32 %v8963_v38, %v11677_v45  ;;  %v4421_v25 = vpop.f32.mrb[135].mxu0 }
 0x2e1   : > { %v11758_v42 = vsel %vm13424_vm1, %v4593_v22, %v4594_v7  ;;  %v11761_v50 = vsel %vm13425_vm11, 0, %v4593_v22  ;;  %v4533_v5 = vmax.f32 %v4419_v11, 0.0  ;;  %v4422_v58 = vadd.f32 %v4421_v25, %v11671_v15  ;;  %vm13433_vm11 = vmmov %vm13424_vm1 }
 0x2e2   : > { %13426 = vst [vmem:[#allocation44_spill] sm:$0xff] %v11761_v50  ;;  %v4661_v17 = vsel %vm13428_vm5, %v11761_v50, 0  ;;  %v4743_v27 = vshll.u32 %v11761_v50, 16  ;;  %v4747_v10 = vshrl.u32 %v11761_v50, 16  ;;  %v4536_v23 = vmax.f32 %v4430_v30, 0.0  ;;  %vm13432_vm5 = vmmov %vm13424_vm1 }
 0x2e3   : > { %v4886_v45 = vrot.slane %v4661_v17, 1  ;;  %v4534_v40 = vmax.f32 %v4422_v58, 0.0  ;;  %v4677_v51 = vsel %vm1579_vm3, %v11761_v50, 0  ;;  %v4678_v13 = vsel %vm1163_vm4, %v11758_v42, 0 }
 0x2e4   : > { %v11775_v15 = vpack.c.bf16 %v4536_v23, %v4535_v28  ;;  %v5219_v63 = vshrl.u32 %v4677_v51, 16  ;;  %v5222_v33 = vshll.u32 %v4677_v51, 16  ;;  %v5227_v47 = vshrl.u32 %v4678_v13, 16 }
 0x2e5   : > { %v4563_v35 = vpack.c.bf16 %v4534_v40, %v4533_v5  ;;  %v8966_v9 = vpop.f32.mrb[136].mxu0  ;;  %v5230_v21 = vshll.u32 %v4678_v13, 16  ;;  %v11780_v11 = vsel %vm1548_vm13, %v11758_v42, 0  ;;  %v4887_v38 = vsel %vm1798_vm6, %v13370_v20, %v4886_v45 }
 0x2e6   : > { %v4598_v30 = vrot.slane %v11775_v15, 4  ;;  %v4443_v25 = vadd.f32 %v8966_v9, %v11686_v57  ;;  %v4434_v28 = vpop.f32.mrb[137].mxu0  ;;  %v5221_v58 = vrot.slane %v5219_v63, 3  ;;  %v5224_v17 = vrot.slane %v5222_v33, 4 }
 0x2e7   : > { %v4596_v23 = vrot.slane %v4563_v35, 4  ;;  %v4435_v5 = vadd.f32 %v4434_v28, %v11680_v1  ;;  %v8967_v40 = vpop.f32.mrb[138].mxu0  ;;  %v5229_v51 = vrot.slane %v5227_v47, 3  ;;  %v5232_v13 = vrot.slane %v5230_v21, 4 }
 0x2e8   : > { %v4539_v39 = vmax.f32 %v4443_v25, 0.0  ;;  %v4446_v22 = vadd.f32 %v8967_v40, %v11689_v52  ;;  %v4437_v0 = vpop.f32.mrb[139].mxu0  ;;  %v5225_v32 = vor.u32 %v5224_v17, %v5221_v58  ;;  %v13162_v29 = vrot.slane %v11780_v11, 1 }
 0x2e9   : > { %v11790_v15 = vsel %vm13432_vm5, %v4594_v7, %v4596_v23  ;;  %v11793_v57 = vsel %vm13424_vm1, %v4596_v23, %v4598_v30  ;;  %v4537_v63 = vmax.f32 %v4435_v5, 0.0  ;;  %v4438_v33 = vadd.f32 %v4437_v0, %v11683_v8  ;;  %vm13434_vm5 = vmmov %vm13424_vm1 }
 0x2ea   : > { %v4540_v1 = vmax.f32 %v4446_v22, 0.0  ;;  %v11796_v35 = vor.u32 %v5232_v13, %v5229_v51  ;;  %v4889_v52 = vsel %vm1798_vm6, %v4886_v45, %v13162_v29  ;;  %v5202_v47 = vshrl.u32 %v4887_v38, 16 }
 0x2eb   : > { %v4538_v9 = vmax.f32 %v4438_v33, 0.0  ;;  %v5205_v21 = vshll.u32 %v4887_v38, 16  ;;  %v5210_v25 = vshrl.u32 %v4889_v52, 16  ;;  %v5213_v28 = vshll.u32 %v4889_v52, 16  ;;  %v9224_v52 = vld [vmem:[#allocation7 + $0x180] sm:$0xff]  }
 0x2ec   : > { %v11801_v7 = vpack.c.bf16 %v4540_v1, %v4539_v39  ;;  %v5234_v58 = vsel %vm1403_vm15, %v5225_v32, %v11796_v35  ;;  %v5204_v17 = vrot.slane %v5202_v47, 3  ;;  %v4745_v23 = vrot.slane %v4743_v27, 1 }
 0x2ed   : > { %v4565_v8 = vpack.c.bf16 %v4538_v9, %v4537_v63  ;;  %6984 = vmatprep.mubr.bf16.mxu0 %v5234_v58  ;;  %v8970_v0 = vpop.f32.mrb[140].mxu0  ;;  %v5207_v22 = vrot.slane %v5205_v21, 4  ;;  %v5212_v5 = vrot.slane %v5210_v25, 3  ;;  %v5215_v40 = vrot.slane %v5213_v28, 4  ;;  %v9227_v28 = vld [vmem:[#allocation7 + $0x1c8] sm:$0xff]  }
 0x2ee   : > { %v13163_v45 = vrot.slane %v11801_v7, 4  ;;  %v4459_v51 = vadd.f32 %v8970_v0, %v11698_v48  ;;  %v4450_v38 = vpop.f32.mrb[141].mxu0  ;;  %v4746_v39 = vsel %vm1647_vm8, %v13370_v20, %v4745_v23  ;;  %v4749_v13 = vor.u32 %v4747_v10, %v4745_v23 }
 0x2ef   : > { %v4600_v33 = vrot.slane %v4565_v8, 4  ;;  %v5208_v1 = vor.u32 %v5207_v22, %v5204_v17  ;;  %v11809_v32 = vor.u32 %v5215_v40, %v5212_v5  ;;  %v4451_v27 = vadd.f32 %v4450_v38, %v11692_v24  ;;  %v8971_v63 = vpop.f32.mrb[142].mxu0  ;;  %v13435_v5 = vld [vmem:[#allocation19_spill] sm:$0xff] }
 0x2f0   : > { %v4543_v47 = vmax.f32 %v4459_v51, 0.0  ;;  %v4462_v9 = vadd.f32 %v8971_v63, %v11701_v2  ;;  %v4453_v21 = vpop.f32.mrb[143].mxu0  ;;  %v4751_v25 = vshll.u32 %v11758_v42, 16  ;;  %v5185_v48 = vshrl.u32 %v4746_v39, 16  ;;  %v9231_v63 = vld [vmem:[#allocation7 + $0x1d0] sm:$0xff]  }
 0x2f1   : > { %v11815_v58 = vsel %vm13433_vm11, %v4598_v30, %v4600_v33  ;;  %v11820_v10 = vsel %vm13434_vm5, %v4600_v33, %v13163_v45  ;;  %v5217_v24 = vsel %vm1403_vm15, %v5208_v1, %v11809_v32  ;;  %v4541_v17 = vmax.f32 %v4451_v27, 0.0  ;;  %v9228_v33 = vld [vmem:[#allocation7 + $0x188] sm:$0xff]   ;;  %vm13439_vm11 = vmmov %vm13434_vm5 }
 0x2f2   : > { %6985 = vmatmul.mubr.bf16.vlgmr.msra.gmra.mrb[160].mxu0 %v5217_v24  ;;  %v4544_v23 = vmax.f32 %v4462_v9, 0.0  ;;  %v4454_v2 = vadd.f32 %v4453_v21, %v11695_v37  ;;  %v11825_v8 = vrot.slane %v4751_v25, 1  ;;  %v5187_v0 = vrot.slane %v5185_v48, 3 }
 0x2f3   : > { %v5188_v22 = vshll.u32 %v4746_v39, 16  ;;  %v4645_v30 = vsel %vm1163_vm4, %v11761_v50, 0  ;;  %vm13436_vm1 = vcmp.ne.s16.totalorder %v13435_v5, 0  ;;  %v11836_v38 = vsel %vm13175_vm2, %v11790_v15, 0  ;;  %8805 = vmatpush3.bf16.msra.mxu0 %v9224_v52 }
 0x2f4   : > { %v4679_v40 = vsel %vm13436_vm1, %v11790_v15, 0  ;;  %v11838_v37 = vpack.c.bf16 %v4544_v23, %v4543_v47  ;;  %v4542_v1 = vmax.f32 %v4454_v2, 0.0  ;;  %v4754_v39 = vsel %vm1647_vm8, %v4749_v13, %v11825_v8  ;;  %8806 = vmatprep.subr.bf16.mxu0 %v9227_v28  ;;  %v9232_v13 = vld [vmem:[#allocation7 + $0x190] sm:$0xff]  }
 0x2f5   : > { %v5176_v27 = vshrl.u32 %v4645_v30, 16  ;;  %v5190_v9 = vrot.slane %v5188_v22, 4  ;;  %v5193_v21 = vshrl.u32 %v4754_v39, 16  ;;  %v5196_v25 = vshll.u32 %v4754_v39, 16  ;;  %v8974_v24 = vpop.f32.mrb[144].mxu0 }
 0x2f6   : > { %v5179_v48 = vshll.u32 %v4645_v30, 16  ;;  %v13168_v29 = vrot.slane %v11838_v37, 4  ;;  %v4567_v45 = vpack.c.bf16 %v4542_v1, %v4541_v17  ;;  %v5323_v52 = vshrl.u32 %v4679_v40, 16  ;;  %v4466_v51 = vpop.f32.mrb[145].mxu0 }
 0x2f7   : > { %v5178_v20 = vrot.slane %v5176_v27, 3  ;;  %v5191_v47 = vor.u32 %v5190_v9, %v5187_v0  ;;  %v5195_v23 = vrot.slane %v5193_v21, 3  ;;  %v5198_v2 = vrot.slane %v5196_v25, 4  ;;  %v8975_v50 = vpop.f32.mrb[146].mxu0  ;;  %8807 = vmatpush3.bf16.msra.mxu0 %v9228_v33  ;;  %v9217_v9 = vld [vmem:[#allocation7 + $0x148] sm:$0xff]  }
 0x2f8   : > { %v5181_v54 = vrot.slane %v5179_v48, 4  ;;  %v4604_v28 = vrot.slane %v4567_v45, 4  ;;  %v5325_v53 = vrot.slane %v5323_v52, 3  ;;  %v5326_v22 = vshll.u32 %v4679_v40, 16  ;;  %v4469_v30 = vpop.f32.mrb[147].mxu0  ;;  %8808 = vmatprep.subr.bf16.mxu0 %v9231_v63  ;;  %v9216_v40 = vld [vmem:[#allocation7 + $0x100] sm:$0xff]  }
 0x2f9   : > { %v4475_v39 = vadd.f32 %v8974_v24, %v11710_v4  ;;  %v11844_v14 = vor.u32 %v5198_v2, %v5195_v23  ;;  %v13167_v1 = vrot.slane %v11836_v38, 1  ;;  %v4467_v0 = vadd.f32 %v4466_v51, %v11704_v41 }
 0x2fa   : > { %v11846_v17 = vor.u32 %v5181_v54, %v5178_v20  ;;  %v13438_v27 = vrot.slane %v11801_v7, 4  ;;  %v11858_v45 = vsel %vm13434_vm5, %v4604_v28, %v13168_v29  ;;  %v5328_v4 = vrot.slane %v5326_v22, 4  ;;  %v9236_v29 = vld [vmem:[#allocation7 + $0x198] sm:$0xff]  }
 0x2fb   : > { %v4547_v63 = vmax.f32 %v4475_v39, 0.0  ;;  %v5200_v20 = vsel %vm1403_vm15, %v5191_v47, %v11844_v14  ;;  %v13440_v54 = vrot.slane %v11780_v11, 1  ;;  %v4545_v51 = vmax.f32 %v4467_v0, 0.0  ;;  %8809 = vmatpush3.bf16.msra.mxu0 %v9232_v13  ;;  %v13441_v47 = vld [vmem:[#allocation23_spill] sm:$0xff] }
 0x2fc   : > { %v11853_v33 = vsel %vm13439_vm11, %v13438_v27, %v4604_v28  ;;  %v5183_v41 = vsel %vm1403_vm15, %v13404_v6, %v11846_v17  ;;  %6823 = vmatprep.mubr.bf16.mxu1 %v5200_v20  ;;  %v5329_v21 = vor.u32 %v5328_v4, %v5325_v53  ;;  %v4755_v24 = vshrl.u32 %v11758_v42, 16  ;;  %v9218_v27 = vld [vmem:[#allocation7 + $0x108] sm:$0xff]   ;;  %v9235_v4 = vld [vmem:[#allocation7 + $0x1d8] sm:$0xff]  }
 0x2fd   : > { %v4891_v7 = vsel %vm1798_vm6, %v13440_v54, %v13167_v1  ;;  %6824 = vmatmul.mubr.bf16.vlgmr.msra.gmra.mrb[128].mxu1 %v5183_v41  ;;  %v4759_v52 = vshll.u32 %v11790_v15, 16  ;;  %vm13442_vm1 = vcmp.ne.s16.totalorder %v13441_v47, 0  ;;  %v4478_v11 = vadd.f32 %v8975_v50, %v11713_v44  ;;  %v8978_v28 = vpop.f32.mrb[148].mxu0  ;;  %8810 = vmatprep.subr.bf16.mxu0 %v9235_v4  ;;  %v9221_v1 = vld [vmem:[#allocation7 + $0x158] sm:$0xff]  }
 0x2fe   : > { %v5314_v25 = vshrl.u32 %v4891_v7, 16  ;;  %v5317_v48 = vshll.u32 %v4891_v7, 16  ;;  %v4680_v23 = vsel %vm13442_vm1, %v11793_v57, 0  ;;  %v4470_v2 = vadd.f32 %v4469_v30, %v11707_v16  ;;  %8693 = vmatpush3.bf16.msra.mxu1 %v9216_v40  ;;  %v4482_v0 = vpop.f32.mrb[149].mxu0  ;;  %v9219_v16 = vld [vmem:[#allocation7 + $0x150] sm:$0xff]   ;;  %vm13445_vm1 = vmmov %vm13434_vm5 }
 0x2ff   : > { %v5330_v13 = vsel %vm1403_vm15, %v11796_v35, %v5329_v21  ;;  %v4757_v39 = vor.u32 %v4755_v24, %v11825_v8  ;;  %v4761_v20 = vrot.slane %v4759_v52, 1  ;;  %v5386_v41 = vshrl.u32 %v4680_v23, 16  ;;  %v11880_v44 = vpop.f32.mrb[150].mxu0  ;;  %8694 = vmatprep.subr.bf16.mxu1 %v9217_v9  ;;  %8811 = vmatpush3.bf16.msra.mxu0 %v9236_v29 }
 0x300   : > { %v5316_v53 = vrot.slane %v5314_v25, 3  ;;  %v5319_v22 = vrot.slane %v5317_v48, 4  ;;  %6992 = vmatprep.mubr.bf16.mxu0 %v5330_v13  ;;  %v5389_v54 = vshll.u32 %v4680_v23, 16  ;;  %v4548_v7 = vmax.f32 %v4478_v11, 0.0  ;;  %v11888_v40 = vpop.f32.mrb[151].mxu0 }
 0x301   : > { %v4546_v35 = vmax.f32 %v4470_v2, 0.0  ;;  %vm13443_vm11 = vcmp.ne.s16.totalorder %v13435_v5, 0  ;;  %v4763_v8 = vshrl.u32 %v11790_v15, 16  ;;  %v4762_v25 = vsel %vm1647_vm8, %v4757_v39, %v4761_v20  ;;  %v9220_v39 = vld [vmem:[#allocation7 + $0x110] sm:$0xff]  }
 0x302   : > { %v11882_v50 = vor.u32 %v5319_v22, %v5316_v53  ;;  %v4646_v30 = vsel %vm13443_vm11, %v11758_v42, 0  ;;  %v5388_v48 = vrot.slane %v5386_v41, 3  ;;  %v5391_v24 = vrot.slane %v5389_v54, 4  ;;  %8695 = vmatpush3.bf16.msra.mxu1 %v9218_v27 }
 0x303   : > { %v11891_v52 = vpack.c.bf16 %v4548_v7, %v4547_v63  ;;  %v5236_v23 = vshrl.u32 %v4762_v25, 16  ;;  %v5239_v11 = vshll.u32 %v4762_v25, 16  ;;  %v4569_v2 = vpack.c.bf16 %v4546_v35, %v4545_v51  ;;  %8696 = vmatprep.subr.bf16.mxu1 %v9219_v16 }
 0x304   : > { %v5321_v9 = vsel %vm1403_vm15, %v11809_v32, %v11882_v50  ;;  %v11896_v13 = vor.u32 %v5391_v24, %v5388_v48  ;;  %v5305_v22 = vshrl.u32 %v4646_v30, 16  ;;  %v5308_v4 = vshll.u32 %v4646_v30, 16  ;;  %v9237_v32 = vld [vmem:[#allocation7 + $0x1e0] sm:$0xff]  }
 0x305   : > { %6993 = vmatmul.mubr.bf16.gmra.mrb[164].mxu0 %v5321_v9  ;;  %v13169_v53 = vrot.slane %v11891_v52, 4  ;;  %v5238_v41 = vrot.slane %v5236_v23, 3  ;;  %v5241_v63 = vrot.slane %v5239_v11, 4  ;;  %v4608_v54 = vrot.slane %v4569_v2, 4  ;;  %v11902_v48 = vpop.f32.mrb[152].mxu0  ;;  %v13446_v11 = vld [vmem:[#allocation24_spill] sm:$0xff]  ;;  %8812 = vmatprep.subr.bf16.mxu0 %v9237_v32 }
 0x306   : > { %v4765_v7 = vor.u32 %v4763_v8, %v4761_v20  ;;  %v5393_v51 = vsel %vm1403_vm15, %v5329_v21, %v11896_v13  ;;  %v5307_v27 = vrot.slane %v5305_v22, 3  ;;  %v5310_v35 = vrot.slane %v5308_v4, 4  ;;  %v11917_v8 = vpop.f32.mrb[153].mxu0  ;;  %8697 = vmatpush3.bf16.msra.mxu1 %v9220_v39  ;;  %v9222_v4 = vld [vmem:[#allocation7 + $0x118] sm:$0xff]  }
 0x307   : > { %v4767_v25 = vshll.u32 %v11793_v57, 16  ;;  %v11904_v24 = vor.u32 %v5241_v63, %v5238_v41  ;;  %7000 = vmatprep.mubr.bf16.mxu0 %v5393_v51  ;;  %v13444_v16 = vrot.slane %v11838_v37, 4  ;;  %v11914_v20 = vsel %vm13445_vm1, %v4608_v54, %v13169_v53  ;;  %v11929_v22 = vpop.f32.mrb[154].mxu0  ;;  %v9238_v41 = vld [vmem:[#allocation7 + $0x1a0] sm:$0xff]   ;;  %8698 = vmatprep.subr.bf16.mxu1 %v9221_v1 }
 0x308   : > { %v4491_v21 = vadd.f32 %v8978_v28, %v11722_v61  ;;  %v11919_v9 = vor.u32 %v5310_v35, %v5307_v27  ;;  %vm13447_vm11 = vcmp.ne.s16.totalorder %v13446_v11, 0  ;;  %v4483_v2 = vadd.f32 %v4482_v0, %v11716_v59  ;;  %v11940_v27 = vpop.f32.mrb[155].mxu0  ;;  %v9225_v59 = vld [vmem:[#allocation7 + $0x160] sm:$0xff]   ;;  %v9240_v0 = vld [vmem:[#allocation7 + $0x1e8] sm:$0xff]   ;;  %8813 = vmatpush3.bf16.msra.mxu0 %v9238_v41 }
 0x309   : > { %v11909_v30 = vsel %vm13434_vm5, %v13444_v16, %v4608_v54  ;;  %v11921_v23 = vrot.slane %v4767_v25, 1  ;;  %v11926_v37 = vsel %vm13447_vm11, %v11793_v57, 0  ;;  %v11934_v61 = vsel %vm1403_vm15, %v11844_v14, %v11904_v24  ;;  %v13449_v54 = vld [vmem:[#allocation25_spill] sm:$0xff]  ;;  %8814 = vmatprep.subr.bf16.mxu0 %v9240_v0 }
 0x30a   : > { %13448 = vst [vmem:[#allocation49_spill] sm:$0xff] %v11934_v61  ;;  %v4551_v28 = vmax.f32 %v4491_v21, 0.0  ;;  %v4892_v63 = vrot.slane %v11926_v37, 1  ;;  %vm13450_vm5 = vcmp.ne.s16.totalorder %v13449_v54, 0  ;;  %6831 = vmatprep.mubr.bf16.mxu1 %v11934_v61  ;;  %v5312_v14 = vsel %vm1403_vm15, %v11846_v17, %v11919_v9  ;;  %8699 = vmatpush3.bf16.msra.mxu1 %v9222_v4 }
 0x30b   : > { %v4681_v51 = vsel %vm13450_vm5, %v11815_v58, 0  ;;  %v4770_v29 = vsel %vm1647_vm8, %v4765_v7, %v11921_v23  ;;  %v4549_v39 = vmax.f32 %v4483_v2, 0.0  ;;  %6832 = vmatmul.mubr.bf16.gmra.mrb[132].mxu1 %v5312_v14  ;;  %v13451_v1 = vrot.slane %v11836_v38, 1  ;;  %v9226_v7 = vld [vmem:[#allocation7 + $0x120] sm:$0xff]   ;;  %v9242_v2 = vld [vmem:[#allocation7 + $0x1a8] sm:$0xff]   ;;  %8700 = vmatprep.subr.bf16.mxu1 %v9225_v59 }
 0x30c   : > { %v5449_v35 = vshrl.u32 %v4681_v51, 16  ;;  %v5279_v25 = vshrl.u32 %v4770_v29, 16  ;;  %v5282_v16 = vshll.u32 %v4770_v29, 16  ;;  %v5452_v21 = vshll.u32 %v4681_v51, 16  ;;  %v9229_v38 = vld [vmem:[#allocation7 + $0x168] sm:$0xff]   ;;  %v9243_v51 = vld [vmem:[#allocation7 + $0x1f0] sm:$0xff]   ;;  %8815 = vmatpush3.bf16.msra.mxu0 %v9242_v2 }
 0x30d   : > { %v4893_v32 = vsel %vm1798_vm6, %v13451_v1, %v4892_v63  ;;  %v4494_v17 = vadd.f32 %v11880_v44, %v11725_v36  ;;  %v4486_v5 = vadd.f32 %v11888_v40, %v11719_v49  ;;  %vm13452_vm1 = vcmp.ne.s16.totalorder %v13441_v47, 0  ;;  %v11960_v44 = vpop.f32.mrb[156].mxu0  ;;  %8816 = vmatprep.subr.bf16.mxu0 %v9243_v51  ;;  %v13453_v51 = vld [vmem:[#allocation27_spill] sm:$0xff] }
 0x30e   : > { %v5377_v53 = vshrl.u32 %v4893_v32, 16  ;;  %v5380_v6 = vshll.u32 %v4893_v32, 16  ;;  %v5451_v61 = vrot.slane %v5449_v35, 3  ;;  %v5281_v14 = vrot.slane %v5279_v25, 3  ;;  %v11966_v49 = vpop.f32.mrb[157].mxu0  ;;  %8701 = vmatpush3.bf16.msra.mxu1 %v9226_v7 }
 0x30f   : > { %v5284_v11 = vrot.slane %v5282_v16, 4  ;;  %v5454_v29 = vrot.slane %v5452_v21, 4  ;;  %v4552_v35 = vmax.f32 %v4494_v17, 0.0  ;;  %v4647_v36 = vsel %vm13452_vm1, %v11790_v15, 0  ;;  %v11973_v0 = vpop.f32.mrb[158].mxu0  ;;  %v9230_v21 = vld [vmem:[#allocation7 + $0x128] sm:$0xff]   ;;  %8702 = vmatprep.subr.bf16.mxu1 %v9229_v38 }
 0x310   : > { %v5379_v1 = vrot.slane %v5377_v53, 3  ;;  %v5382_v32 = vrot.slane %v5380_v6, 4  ;;  %v4550_v25 = vmax.f32 %v4486_v5, 0.0  ;;  %v5368_v16 = vshrl.u32 %v4647_v36, 16  ;;  %v11983_v17 = vpop.f32.mrb[159].mxu0 }
 0x311   : > { %v11962_v4 = vor.u32 %v5284_v11, %v5281_v14  ;;  %v11964_v41 = vor.u32 %v5454_v29, %v5451_v61  ;;  %v11970_v59 = vpack.c.bf16 %v4552_v35, %v4551_v28  ;;  %v5371_v6 = vshll.u32 %v4647_v36, 16  ;;  %v9233_v14 = vld [vmem:[#allocation7 + $0x170] sm:$0xff]  }
 0x312   : > { %v11968_v40 = vor.u32 %v5382_v32, %v5379_v1  ;;  %v4771_v53 = vshrl.u32 %v11793_v57, 16  ;;  %v4571_v61 = vpack.c.bf16 %v4550_v25, %v4549_v39  ;;  %v5370_v28 = vrot.slane %v5368_v16, 3  ;;  %v9244_v29 = vld [vmem:[#allocation7 + $0x1b0] sm:$0xff]   ;;  %v13455_v25 = vld [vmem:[#allocation28_spill] sm:$0xff]  ;;  %8703 = vmatpush3.bf16.msra.mxu1 %v9230_v21 }
 0x313   : > { %v11978_v11 = vsel %vm1403_vm15, %v11904_v24, %v11962_v4  ;;  %v5456_v5 = vsel %vm1403_vm15, %v11896_v13, %v11964_v41  ;;  %v13173_v24 = vrot.slane %v11970_v59, 4  ;;  %v5373_v2 = vrot.slane %v5371_v6, 4  ;;  %v9245_v13 = vld [vmem:[#allocation7 + $0x1f8] sm:$0xff]   ;;  %v9234_v6 = vld [vmem:[#allocation7 + $0x130] sm:$0xff]   ;;  %8704 = vmatprep.subr.bf16.mxu1 %v9233_v14  ;;  %8817 = vmatpush3.bf16.msra.mxu0 %v9244_v29 }
 0x314   : > { %6839 = vmatprep.mubr.bf16.mxu1 %v11978_v11  ;;  %v5384_v7 = vsel %vm1403_vm15, %v11882_v50, %v11968_v40  ;;  %v4773_v1 = vor.u32 %v4771_v53, %v11921_v23  ;;  %v4612_v39 = vrot.slane %v4571_v61, 4  ;;  %v4775_v32 = vshll.u32 %v11815_v58, 16  ;;  %8818 = vmatprep.subr.bf16.mxu0 %v9245_v13 }
 0x315   : > { %7001 = vmatmul.mubr.bf16.gmra.mrb[168].mxu0 %v5384_v7  ;;  %v4507_v38 = vadd.f32 %v11902_v48, %v11734_v26  ;;  %vm13454_vm11 = vcmp.ne.s16.totalorder %v13453_v51, 0  ;;  %v11999_v50 = vor.u32 %v5373_v2, %v5370_v28  ;;  %v4499_v23 = vadd.f32 %v11917_v8, %v11728_v56  ;;  %v9239_v56 = vld [vmem:[#allocation7 + $0x178] sm:$0xff]  }
 0x316   : > { %v11997_v35 = vsel %vm13454_vm11, %v11815_v58, 0  ;;  %7008 = vmatprep.mubr.bf16.mxu0 %v5456_v5  ;;  %vm13456_vm5 = vcmp.ne.s16.totalorder %v13455_v25, 0  ;;  %v13457_v26 = vrot.slane %v11891_v52, 4  ;;  %vm13458_vm1 = vcmask 1043456   ;;  %v9246_v8 = vld [vmem:[#allocation7 + $0x1b8] sm:$0xff]   ;;  %8705 = vmatpush3.bf16.msra.mxu1 %v9234_v6 }
 0x317   : > { %v4894_v36 = vrot.slane %v11997_v35, 1  ;;  %v4682_v16 = vsel %vm13456_vm5, %v11820_v10, 0  ;;  %vm13459_vm11 = vmmov %vm13458_vm1  ;;  %v4777_v5 = vrot.slane %v4775_v32, 1  ;;  %v4555_v61 = vmax.f32 %v4507_v38, 0.0  ;;  %8706 = vmatprep.subr.bf16.mxu1 %v9239_v56  ;;  %8819 = vmatpush3.bf16.msra.mxu0 %v9246_v8 }
 0x318   : > { %v12010_v48 = vsel %vm13458_vm1, %v13457_v26, %v4612_v39  ;;  %v12015_v53 = vsel %vm13459_vm11, %v4612_v39, %v13173_v24  ;;  %v5375_v21 = vsel %vm1403_vm15, %v11919_v9, %v11999_v50  ;;  %v4553_v28 = vmax.f32 %v4499_v23, 0.0  ;;  %v9241_v24 = vld [vmem:[#allocation7 + $0x138] sm:$0xff]  }
 0x319   : > { %13460 = vst [vmem:[#allocation52_spill] sm:$0xff] %v12015_v53  ;;  %v4895_v52 = vsel %vm1798_vm6, %v4892_v63, %v4894_v36  ;;  %v5512_v7 = vshrl.u32 %v4682_v16, 16  ;;  %6840 = vmatmul.mubr.bf16.gmra.mrb[136].mxu1 %v5375_v21  ;;  %v4778_v2 = vsel %vm1647_vm8, %v4773_v1, %v4777_v5  ;;  %v5515_v29 = vshll.u32 %v4682_v16, 16  ;;  %v9247_v1 = vld [vmem:[#allocation7 + $0x200] sm:$0xff]  }
 0x31a   : > { %v5440_v14 = vshrl.u32 %v4895_v52, 16  ;;  %v5443_v39 = vshll.u32 %v4895_v52, 16  ;;  %v5350_v32 = vshrl.u32 %v4778_v2, 16  ;;  %v5353_v38 = vshll.u32 %v4778_v2, 16  ;;  %8707 = vmatpush3.bf16.msra.mxu1 %v9241_v24 }
 0x31b   : > { %v5514_v26 = vrot.slane %v5512_v7, 3  ;;  %v4510_v9 = vadd.f32 %v11929_v22, %v11737_v3  ;;  %v5517_v63 = vrot.slane %v5515_v29, 4  ;;  %v4502_v13 = vadd.f32 %v11940_v27, %v11731_v18  ;;  %8988 = vmatprep.subr.bf16.mxu1 %v9247_v1 }
 0x31c   : > { %v5442_v37 = vrot.slane %v5440_v14, 3  ;;  %v5445_v47 = vrot.slane %v5443_v39, 4  ;;  %v5352_v23 = vrot.slane %v5350_v32, 3  ;;  %v5355_v21 = vrot.slane %v5353_v38, 4 }
 0x31d   : > { %v4556_v16 = vmax.f32 %v4510_v9, 0.0  ;;  %vm13461_vm5 = vcmp.ne.s16.totalorder %v13449_v54, 0  ;;  %v12033_v3 = vor.u32 %v5517_v63, %v5514_v26  ;;  %v4554_v22 = vmax.f32 %v4502_v13, 0.0 }
 0x31e   : > { %v4648_v52 = vsel %vm13461_vm5, %v11793_v57, 0  ;;  %v5446_v7 = vor.u32 %v5445_v47, %v5442_v37  ;;  %v5356_v2 = vor.u32 %v5355_v21, %v5352_v23  ;;  %v4779_v18 = vshrl.u32 %v11815_v58, 16 }
 0x31f   : > { %v5431_v6 = vshrl.u32 %v4648_v52, 16  ;;  %v12035_v14 = vpack.c.bf16 %v4556_v16, %v4555_v61  ;;  %v5434_v39 = vshll.u32 %v4648_v52, 16  ;;  %v5519_v56 = vsel %vm1403_vm15, %v11964_v41, %v12033_v3 }
 0x320   : > { %v5447_v27 = vsel %vm1403_vm15, %v11968_v40, %v5446_v7  ;;  %v4573_v8 = vpack.c.bf16 %v4554_v22, %v4553_v28  ;;  %v12045_v29 = vsel %vm1403_vm15, %v11962_v4, %v5356_v2  ;;  %v4781_v38 = vor.u32 %v4779_v18, %v4777_v5  ;;  %v13463_v5 = vld [vmem:[#allocation32_spill] sm:$0xff] }
 0x321   : > { %v5433_v47 = vrot.slane %v5431_v6, 3  ;;  %7009 = vmatmul.mubr.bf16.gmra.mrb[172].mxu0 %v5447_v27  ;;  %v4618_v61 = vrot.slane %v12035_v14, 4  ;;  %v5436_v32 = vrot.slane %v5434_v39, 4  ;;  %6847 = vmatprep.mubr.bf16.mxu1 %v12045_v29  ;;  %v4783_v24 = vshll.u32 %v11820_v10, 16 }
 0x322   : > { %7016 = vmatprep.mubr.bf16.mxu0 %v5519_v56  ;;  %v4616_v40 = vrot.slane %v4573_v8, 4  ;;  %v4523_v41 = vadd.f32 %v11960_v44, %v11748_v46  ;;  %vm13462_vm1 = vcmp.ne.s16.totalorder %v13394_v19, 0  ;;  %v4515_v9 = vadd.f32 %v11966_v49, %v11740_v34 }
 0x323   : > { %v4666_v28 = vsel %vm13462_vm1, %v11820_v10, 0  ;;  %v5437_v4 = vor.u32 %v5436_v32, %v5433_v47  ;;  %vm13464_vm11 = vcmp.ne.s16.totalorder %v13463_v5, 0  ;;  %v13465_v63 = vrot.slane %v11970_v59, 4 }
 0x324   : > { %v4896_v26 = vrot.slane %v4666_v28, 1  ;;  %v4683_v37 = vsel %vm13464_vm11, %v11853_v33, 0  ;;  %vm13466_vm5 = vcmask 1043456   ;;  %v4785_v44 = vrot.slane %v4783_v24, 1 }
 0x325   : > { %v12063_v13 = vsel %vm13466_vm5, %v13465_v63, %v4616_v40  ;;  %vm13468_vm2 = vmmov %vm13466_vm5  ;;  %v4559_v1 = vmax.f32 %v4523_v41, 0.0  ;;  %v5438_v23 = vsel %vm1403_vm15, %v11999_v50, %v5437_v4  ;;  %v4557_v49 = vmax.f32 %v4515_v9, 0.0 }
 0x326   : > { %13467 = vst [vmem:[#allocation56_spill] sm:$0xff] %v12063_v13  ;;  %v12068_v46 = vsel %vm13468_vm2, %v4616_v40, %v4618_v61  ;;  %v4897_v34 = vsel %vm1798_vm6, %v4894_v36, %v4896_v26  ;;  %v5575_v21 = vshrl.u32 %v4683_v37, 16  ;;  %6848 = vmatmul.mubr.bf16.gmra.mrb[140].mxu1 %v5438_v23  ;;  %v4786_v59 = vsel %vm1647_vm8, %v4781_v38, %v4785_v44 }
 0x327   : > { %13469 = vst [vmem:[#allocation60_spill] sm:$0xff] %v12068_v46  ;;  %v5503_v16 = vshrl.u32 %v4897_v34, 16  ;;  %v5506_v52 = vshll.u32 %v4897_v34, 16  ;;  %v5578_v22 = vshll.u32 %v4683_v37, 16  ;;  %v5413_v6 = vshrl.u32 %v4786_v59, 16 }
 0x328   : > { %v5416_v39 = vshll.u32 %v4786_v59, 16  ;;  %v5577_v18 = vrot.slane %v5575_v21, 3  ;;  %v4526_v27 = vadd.f32 %v11973_v0, %v11752_v55  ;;  %v4518_v35 = vadd.f32 %v11983_v17, %v11743_v12 }
 0x329   : > { %v5505_v56 = vrot.slane %v5503_v16, 3  ;;  %v5508_v50 = vrot.slane %v5506_v52, 4  ;;  %v5580_v8 = vrot.slane %v5578_v22, 4  ;;  %v5415_v36 = vrot.slane %v5413_v6, 3 }
 0x32a   : > { %v5418_v47 = vrot.slane %v5416_v39, 4  ;;  %v4560_v32 = vmax.f32 %v4526_v27, 0.0  ;;  %vm13470_vm2 = vcmp.ne.s16.totalorder %v13455_v25, 0  ;;  %v4558_v41 = vmax.f32 %v4518_v35, 0.0 }
 0x32b   : > { %v4649_v38 = vsel %vm13470_vm2, %v11815_v58, 0  ;;  %v5509_v40 = vor.u32 %v5508_v50, %v5505_v56  ;;  %v5581_v24 = vor.u32 %v5580_v8, %v5577_v18  ;;  %vm13471_vm1 = vcmp.ne.s16.totalorder %v13399_v31, 0  ;;  %vm13475_vm2 = vmmov %vm13466_vm5 }
 0x32c   : > { %v5494_v28 = vshrl.u32 %v4649_v38, 16  ;;  %v5419_v9 = vor.u32 %v5418_v47, %v5415_v36  ;;  %v4576_v37 = vpack.c.bf16 %v4560_v32, %v4559_v1  ;;  %v5497_v55 = vshll.u32 %v4649_v38, 16 }
 0x32d   : > { %v5510_v0 = vsel %vm1403_vm15, %v5446_v7, %v5509_v40  ;;  %v4575_v63 = vpack.c.bf16 %v4558_v41, %v4557_v49  ;;  %v5582_v17 = vsel %vm1403_vm15, %v12033_v3, %v5581_v24  ;;  %v4791_v1 = vshll.u32 %v11853_v33, 16  ;;  %v13472_v49 = vld [vmem:[#allocation37_spill] sm:$0xff] }
 0x32e   : > { %v5496_v23 = vrot.slane %v5494_v28, 3  ;;  %v12085_v12 = vsel %vm1403_vm15, %v5356_v2, %v5419_v9  ;;  %7017 = vmatmul.mubr.bf16.gmra.mrb[176].mxu0 %v5510_v0  ;;  %v4622_v34 = vrot.slane %v4576_v37, 4  ;;  %v5499_v21 = vrot.slane %v5497_v55, 4 }
 0x32f   : > { %6855 = vmatprep.mubr.bf16.mxu1 %v12085_v12  ;;  %7024 = vmatprep.mubr.bf16.mxu0 %v5582_v17  ;;  %v4620_v59 = vrot.slane %v4575_v63, 4  ;;  %v4667_v7 = vsel %vm13471_vm1, %v11853_v33, 0  ;;  %vm13473_vm11 = vcmp.ne.s16.totalorder %v13472_v49, 0  ;;  %v4787_v52 = vshrl.u32 %v11820_v10, 16  ;;  %vm13476_vm1 = vmmov %vm13475_vm2 }
 0x330   : > { %v4684_v2 = vsel %vm13473_vm11, %v11858_v45, 0  ;;  %v5500_v16 = vor.u32 %v5499_v21, %v5496_v23  ;;  %v4898_v3 = vrot.slane %v4667_v7, 1  ;;  %v4793_v56 = vrot.slane %v4791_v1, 1 }
 0x331   : > { %v5638_v22 = vshrl.u32 %v4684_v2, 16  ;;  %v12101_v6 = vsel %vm13466_vm5, %v4618_v61, %v4620_v59  ;;  %v4789_v39 = vor.u32 %v4787_v52, %v4785_v44  ;;  %v12104_v18 = vsel %vm13475_vm2, %v4620_v59, %v4622_v34 }
 0x332   : > { %13474 = vst [vmem:[#allocation65_spill] sm:$0xff] %v12101_v6  ;;  %v5501_v27 = vsel %vm1403_vm15, %v5437_v4, %v5500_v16  ;;  %v4899_v50 = vsel %vm1798_vm6, %v4896_v26, %v4898_v3  ;;  %v12109_v8 = vsel %vm13476_vm1, %v4622_v34, 0  ;;  %v5641_v61 = vshll.u32 %v4684_v2, 16 }
 0x333   : > { %6856 = vmatmul.mubr.bf16.gmra.mrb[144].mxu1 %v5501_v27  ;;  %v5566_v35 = vshrl.u32 %v4899_v50, 16  ;;  %v5569_v36 = vshll.u32 %v4899_v50, 16  ;;  %v4794_v14 = vsel %vm1647_vm8, %v4789_v39, %v4793_v56  ;;  %v5640_v47 = vrot.slane %v5638_v22, 3 }
 0x334   : > { %vm13477_vm11 = vcmp.ne.s16.totalorder %v13463_v5, 0  ;;  %v5476_v32 = vshrl.u32 %v4794_v14, 16  ;;  %v5479_v38 = vshll.u32 %v4794_v14, 16  ;;  %v5643_v28 = vrot.slane %v5641_v61, 4 }
 0x335   : > { %v4650_v44 = vsel %vm13477_vm11, %v11820_v10, 0  ;;  %v5568_v4 = vrot.slane %v5566_v35, 3  ;;  %v5571_v41 = vrot.slane %v5569_v36, 4  ;;  %v4795_v55 = vshrl.u32 %v11853_v33, 16  ;;  %v13479_v35 = vld [vmem:[#allocation41_spill] sm:$0xff] }
 0x336   : > { %v5557_v26 = vshrl.u32 %v4650_v44, 16  ;;  %v5560_v37 = vshll.u32 %v4650_v44, 16  ;;  %v5478_v0 = vrot.slane %v5476_v32, 3  ;;  %v5481_v63 = vrot.slane %v5479_v38, 4 }
 0x337   : > { %v5572_v23 = vor.u32 %v5571_v41, %v5568_v4  ;;  %v4799_v17 = vshll.u32 %v11858_v45, 16  ;;  %v5644_v34 = vor.u32 %v5643_v28, %v5640_v47  ;;  %v4797_v1 = vor.u32 %v4795_v55, %v4793_v56 }
 0x338   : > { %v5559_v21 = vrot.slane %v5557_v26, 3  ;;  %v5562_v59 = vrot.slane %v5560_v37, 4  ;;  %v5482_v7 = vor.u32 %v5481_v63, %v5478_v0  ;;  %vm13478_vm5 = vcmp.ne.s16.totalorder %v13402_v62, 0 }
 0x339   : > { %v5573_v2 = vsel %vm1403_vm15, %v5509_v40, %v5572_v23  ;;  %v4801_v52 = vrot.slane %v4799_v17, 1  ;;  %v4668_v22 = vsel %vm13478_vm5, %v11858_v45, 0  ;;  %v5645_v39 = vsel %vm1403_vm15, %v5581_v24, %v5644_v34 }
 0x33a   : > { %7025 = vmatmul.mubr.bf16.gmra.mrb[180].mxu0 %v5573_v2  ;;  %v5563_v27 = vor.u32 %v5562_v59, %v5559_v21  ;;  %v4900_v50 = vrot.slane %v4668_v22, 1  ;;  %vm13480_vm2 = vcmp.ne.s16.totalorder %v13479_v35, 0  ;;  %v12126_v14 = vsel %vm1403_vm15, %v5419_v9, %v5482_v7 }
 0x33b   : > { %v4685_v36 = vsel %vm13480_vm2, %v11909_v30, 0  ;;  %7032 = vmatprep.mubr.bf16.mxu0 %v5645_v39  ;;  %v4802_v40 = vsel %vm1647_vm8, %v4797_v1, %v4801_v52  ;;  %6863 = vmatprep.mubr.bf16.mxu1 %v12126_v14  ;;  %vm13481_vm1 = vcmp.ne.s16.totalorder %v13472_v49, 0  ;;  %v4803_v55 = vshrl.u32 %v11858_v45, 16 }
 0x33c   : > { %v5701_v56 = vshrl.u32 %v4685_v36, 16  ;;  %v5704_v47 = vshll.u32 %v4685_v36, 16  ;;  %v5564_v61 = vsel %vm1403_vm15, %v5500_v16, %v5563_v27  ;;  %v5539_v44 = vshrl.u32 %v4802_v40, 16 }
 0x33d   : > { %v5542_v24 = vshll.u32 %v4802_v40, 16  ;;  %v4901_v32 = vsel %vm1798_vm6, %v4898_v3, %v4900_v50  ;;  %6864 = vmatmul.mubr.bf16.gmra.mrb[148].mxu1 %v5564_v61  ;;  %v4651_v37 = vsel %vm13481_vm1, %v11853_v33, 0  ;;  %v4805_v3 = vor.u32 %v4803_v55, %v4801_v52 }
 0x33e   : > { %v5629_v38 = vshrl.u32 %v4901_v32, 16  ;;  %v5632_v4 = vshll.u32 %v4901_v32, 16  ;;  %v5703_v41 = vrot.slane %v5701_v56, 3  ;;  %v5706_v28 = vrot.slane %v5704_v47, 4 }
 0x33f   : > { %v5541_v9 = vrot.slane %v5539_v44, 3  ;;  %v5544_v26 = vrot.slane %v5542_v24, 4  ;;  %v5620_v17 = vshrl.u32 %v4651_v37, 16  ;;  %v5623_v59 = vshll.u32 %v4651_v37, 16  ;;  %v13483_v44 = vld [vmem:[#allocation45_spill] sm:$0xff] }
 0x340   : > { %v5631_v0 = vrot.slane %v5629_v38, 3  ;;  %v5634_v63 = vrot.slane %v5632_v4, 4  ;;  %v5707_v16 = vor.u32 %v5706_v28, %v5703_v41  ;;  %v4807_v1 = vshll.u32 %v11909_v30, 16 }
 0x341   : > { %v5545_v21 = vor.u32 %v5544_v26, %v5541_v9  ;;  %v5622_v39 = vrot.slane %v5620_v17, 3  ;;  %vm13482_vm11 = vcmp.ne.s16.totalorder %v13406_v60, 0  ;;  %v5625_v56 = vrot.slane %v5623_v59, 4 }
 0x342   : > { %v5635_v2 = vor.u32 %v5634_v63, %v5631_v0  ;;  %v5708_v22 = vsel %vm1403_vm15, %v5644_v34, %v5707_v16  ;;  %v4669_v36 = vsel %vm13482_vm11, %v11909_v30, 0  ;;  %v4809_v47 = vrot.slane %v4807_v1, 1 }
 0x343   : > { %v12142_v40 = vsel %vm1403_vm15, %v5482_v7, %v5545_v21  ;;  %v4902_v61 = vrot.slane %v4669_v36, 1  ;;  %vm13484_vm5 = vcmp.ne.s16.totalorder %v13483_v44, 0  ;;  %v4652_v34 = vsel %vm13480_vm2, %v11858_v45, 0 }
 0x344   : > { %6871 = vmatprep.mubr.bf16.mxu1 %v12142_v40  ;;  %v5636_v52 = vsel %vm1403_vm15, %v5572_v23, %v5635_v2  ;;  %v4686_v24 = vsel %vm13484_vm5, %v11914_v20, 0  ;;  %v4811_v32 = vshrl.u32 %v11909_v30, 16  ;;  %v5626_v7 = vor.u32 %v5625_v56, %v5622_v39 }
 0x345   : > { %7033 = vmatmul.mubr.bf16.gmra.mrb[184].mxu0 %v5636_v52  ;;  %v4810_v38 = vsel %vm1647_vm8, %v4805_v3, %v4809_v47  ;;  %v4903_v4 = vsel %vm1798_vm6, %v4900_v50, %v4902_v61  ;;  %v5764_v41 = vshrl.u32 %v4686_v24, 16  ;;  %v5767_v0 = vshll.u32 %v4686_v24, 16 }
 0x346   : > { %7040 = vmatprep.mubr.bf16.mxu0 %v5708_v22  ;;  %v5602_v28 = vshrl.u32 %v4810_v38, 16  ;;  %v5605_v23 = vshll.u32 %v4810_v38, 16  ;;  %v5692_v9 = vshrl.u32 %v4903_v4, 16  ;;  %v5695_v26 = vshll.u32 %v4903_v4, 16 }
 0x347   : > { %v5627_v37 = vsel %vm1403_vm15, %v5563_v27, %v5626_v7  ;;  %v5766_v55 = vrot.slane %v5764_v41, 3  ;;  %v5683_v63 = vshrl.u32 %v4652_v34, 16  ;;  %v5769_v36 = vrot.slane %v5767_v0, 4 }
 0x348   : > { %6872 = vmatmul.mubr.bf16.gmra.mrb[152].mxu1 %v5627_v37  ;;  %v5604_v17 = vrot.slane %v5602_v28, 3  ;;  %v5607_v59 = vrot.slane %v5605_v23, 4  ;;  %v5694_v1 = vrot.slane %v5692_v9, 3  ;;  %v5697_v39 = vrot.slane %v5695_v26, 4  ;;  %v13486_v28 = vld [vmem:[#allocation50_spill] sm:$0xff] }
 0x349   : > { %v5685_v3 = vrot.slane %v5683_v63, 3  ;;  %v5686_v56 = vshll.u32 %v4652_v34, 16  ;;  %v4813_v50 = vor.u32 %v4811_v32, %v4809_v47  ;;  %v4815_v38 = vshll.u32 %v11914_v20, 16 }
 0x34a   : > { %v5608_v52 = vor.u32 %v5607_v59, %v5604_v17  ;;  %v5698_v22 = vor.u32 %v5697_v39, %v5694_v1  ;;  %vm13485_vm1 = vcmp.ne.s16.totalorder %v13409_v43, 0  ;;  %v5770_v4 = vor.u32 %v5769_v36, %v5766_v55 }
 0x34b   : > { %v4670_v27 = vsel %vm13485_vm1, %v11914_v20, 0  ;;  %v5688_v24 = vrot.slane %v5686_v56, 4  ;;  %vm13487_vm11 = vcmp.ne.s16.totalorder %v13486_v28, 0  ;;  %v4817_v34 = vrot.slane %v4815_v38, 1 }
 0x34c   : > { %v4904_v41 = vrot.slane %v4670_v27, 1  ;;  %v4687_v23 = vsel %vm13487_vm11, %v12010_v48, 0  ;;  %v12164_v9 = vsel %vm1403_vm15, %v5545_v21, %v5608_v52  ;;  %v5699_v47 = vsel %vm1403_vm15, %v5635_v2, %v5698_v22 }
 0x34d   : > { %v5827_v32 = vshrl.u32 %v4687_v23, 16  ;;  %6879 = vmatprep.mubr.bf16.mxu1 %v12164_v9  ;;  %7041 = vmatmul.mubr.bf16.gmra.mrb[188].mxu0 %v5699_v47  ;;  %v5771_v26 = vsel %vm1403_vm15, %v5707_v16, %v5770_v4  ;;  %v5689_v37 = vor.u32 %v5688_v24, %v5685_v3  ;;  %v5830_v0 = vshll.u32 %v4687_v23, 16 }
 0x34e   : > { %v4905_v55 = vsel %vm1798_vm6, %v4902_v61, %v4904_v41  ;;  %7048 = vmatprep.mubr.bf16.mxu0 %v5771_v26  ;;  %v4818_v63 = vsel %vm1647_vm8, %v4813_v50, %v4817_v34  ;;  %v4653_v16 = vsel %vm13484_vm5, %v11909_v30, 0  ;;  %v4819_v61 = vshrl.u32 %v11914_v20, 16 }
 0x34f   : > { %v5755_v17 = vshrl.u32 %v4905_v55, 16  ;;  %v5758_v59 = vshll.u32 %v4905_v55, 16  ;;  %v5829_v21 = vrot.slane %v5827_v32, 3  ;;  %v5690_v1 = vsel %vm1403_vm15, %v5626_v7, %v5689_v37 }
 0x350   : > { %v5665_v2 = vshrl.u32 %v4818_v63, 16  ;;  %v5668_v39 = vshll.u32 %v4818_v63, 16  ;;  %v5832_v36 = vrot.slane %v5830_v0, 4  ;;  %6880 = vmatmul.mubr.bf16.gmra.mrb[156].mxu1 %v5690_v1  ;;  %v5746_v24 = vshrl.u32 %v4653_v16, 16  ;;  %v13488_v63 = vld [vmem:[#allocation51_spill] sm:$0xff] }
 0x351   : > { %v5757_v56 = vrot.slane %v5755_v17, 3  ;;  %v5760_v38 = vrot.slane %v5758_v59, 4  ;;  %v5749_v47 = vshll.u32 %v4653_v16, 16  ;;  %v4821_v32 = vor.u32 %v4819_v61, %v4817_v34  ;;  %v13491_v34 = vld [vmem:[#allocation54_spill] sm:$0xff] }
 0x352   : > { %v5667_v3 = vrot.slane %v5665_v2, 3  ;;  %v5670_v27 = vrot.slane %v5668_v39, 4  ;;  %v5833_v50 = vor.u32 %v5832_v36, %v5829_v21  ;;  %v4823_v7 = vshll.u32 %v12010_v48, 16 }
 0x353   : > { %v5761_v23 = vor.u32 %v5760_v38, %v5757_v56  ;;  %v5748_v0 = vrot.slane %v5746_v24, 3  ;;  %vm13489_vm2 = vcmp.ne.s16.totalorder %v13488_v63, 0  ;;  %v5751_v1 = vrot.slane %v5749_v47, 4 }
 0x354   : > { %v5671_v26 = vor.u32 %v5670_v27, %v5667_v3  ;;  %v5834_v55 = vsel %vm1403_vm15, %v5770_v4, %v5833_v50  ;;  %v4671_v17 = vsel %vm13489_vm2, %v12010_v48, 0  ;;  %v4825_v2 = vrot.slane %v4823_v7, 1 }
 0x355   : > { %v5762_v59 = vsel %vm1403_vm15, %v5698_v22, %v5761_v23  ;;  %v4906_v39 = vrot.slane %v4671_v17, 1  ;;  %vm13492_vm1 = vcmp.ne.s16.totalorder %v13491_v34, 0  ;;  %v4654_v4 = vsel %vm13487_vm11, %v11914_v20, 0 }
 0x356   : > { %v12183_v21 = vsel %vm1403_vm15, %v5608_v52, %v5671_v26  ;;  %7049 = vmatmul.mubr.bf16.gmra.mrb[192].mxu0 %v5762_v59  ;;  %v4688_v36 = vsel %vm13492_vm1, %v12015_v53, 0  ;;  %v4827_v56 = vshrl.u32 %v12010_v48, 16  ;;  %v5752_v22 = vor.u32 %v5751_v1, %v5748_v0  ;;  %vm13497_vm2 = vmmov %vm13492_vm1 }
 0x357   : > { %13490 = vst [vmem:[#allocation70_spill] sm:$0xff] %v12183_v21  ;;  %6887 = vmatprep.mubr.bf16.mxu1 %v12183_v21  ;;  %7056 = vmatprep.mubr.bf16.mxu0 %v5834_v55  ;;  %v4826_v38 = vsel %vm1647_vm8, %v4821_v32, %v4825_v2  ;;  %v4907_v52 = vsel %vm1798_vm6, %v4904_v41, %v4906_v39  ;;  %v5890_v16 = vshrl.u32 %v4688_v36, 16  ;;  %v5893_v17 = vshll.u32 %v4688_v36, 16 }
 0x358   : > { %v5728_v61 = vshrl.u32 %v4826_v38, 16  ;;  %v5731_v3 = vshll.u32 %v4826_v38, 16  ;;  %v5818_v27 = vshrl.u32 %v4907_v52, 16  ;;  %v5821_v24 = vshll.u32 %v4907_v52, 16 }
 0x359   : > { %v5753_v47 = vsel %vm1403_vm15, %v5689_v37, %v5752_v22  ;;  %v5892_v7 = vrot.slane %v5890_v16, 3  ;;  %v5809_v59 = vshrl.u32 %v4654_v4, 16  ;;  %v5895_v0 = vrot.slane %v5893_v17, 4 }
 0x35a   : > { %6888 = vmatmul.mubr.bf16.gmra.mrb[160].mxu1 %v5753_v47  ;;  %v5730_v28 = vrot.slane %v5728_v61, 3  ;;  %v5733_v44 = vrot.slane %v5731_v3, 4  ;;  %v5820_v63 = vrot.slane %v5818_v27, 3  ;;  %v5823_v55 = vrot.slane %v5821_v24, 4  ;;  %v13494_v61 = vld [vmem:[#allocation58_spill] sm:$0xff] }
 0x35b   : > { %v5811_v1 = vrot.slane %v5809_v59, 3  ;;  %v5812_v32 = vshll.u32 %v4654_v4, 16  ;;  %v4829_v21 = vor.u32 %v4827_v56, %v4825_v2  ;;  %v4831_v38 = vshll.u32 %v12015_v53, 16 }
 0x35c   : > { %v5734_v41 = vor.u32 %v5733_v44, %v5730_v28  ;;  %v5824_v35 = vor.u32 %v5823_v55, %v5820_v63  ;;  %v4672_v37 = vsel %vm1558_vm9, %v12015_v53, 0  ;;  %v5896_v16 = vor.u32 %v5895_v0, %v5892_v7 }
 0x35d   : > { %v5814_v36 = vrot.slane %v5812_v32, 4  ;;  %v4908_v43 = vrot.slane %v4672_v37, 1  ;;  %vm13495_vm5 = vcmp.ne.s16.totalorder %v13494_v61, 0  ;;  %v4833_v44 = vrot.slane %v4831_v38, 1 }
 0x35e   : > { %v4689_v3 = vsel %vm13495_vm5, %v12063_v13, 0  ;;  %v12204_v27 = vsel %vm1403_vm15, %v5671_v26, %v5734_v41  ;;  %v5825_v2 = vsel %vm1403_vm15, %v5761_v23, %v5824_v35  ;;  %v5897_v63 = vsel %vm1403_vm15, %v5833_v50, %v5896_v16  ;;  %vm13502_vm11 = vmmov %vm13495_vm5 }
 0x35f   : > { %13496 = vst [vmem:[#allocation20_spill] sm:$0xff] %v12204_v27  ;;  %v5953_v28 = vshrl.u32 %v4689_v3, 16  ;;  %6895 = vmatprep.mubr.bf16.mxu1 %v12204_v27  ;;  %7057 = vmatmul.mubr.bf16.gmra.mrb[196].mxu0 %v5825_v2  ;;  %v5815_v4 = vor.u32 %v5814_v36, %v5811_v1  ;;  %v4909_v56 = vsel %vm1798_vm6, %v4906_v39, %v4908_v43  ;;  %v5956_v24 = vshll.u32 %v4689_v3, 16 }
 0x360   : > { %7064 = vmatprep.mubr.bf16.mxu0 %v5897_v63  ;;  %v4834_v47 = vsel %vm1647_vm8, %v4829_v21, %v4833_v44  ;;  %v5881_v7 = vshrl.u32 %v4909_v56, 16  ;;  %v5884_v17 = vshll.u32 %v4909_v56, 16  ;;  %v4655_v50 = vsel %vm13497_vm2, %v12010_v48, 0 }
 0x361   : > { %v5955_v26 = vrot.slane %v5953_v28, 3  ;;  %v5816_v59 = vsel %vm1403_vm15, %v5752_v22, %v5815_v4  ;;  %v5791_v23 = vshrl.u32 %v4834_v47, 16  ;;  %v5794_v55 = vshll.u32 %v4834_v47, 16 }
 0x362   : > { %v5958_v0 = vrot.slane %v5956_v24, 4  ;;  %6896 = vmatmul.mubr.bf16.gmra.mrb[164].mxu1 %v5816_v59  ;;  %v5883_v32 = vrot.slane %v5881_v7, 3  ;;  %v5886_v38 = vrot.slane %v5884_v17, 4  ;;  %v4835_v39 = vshrl.u32 %v12015_v53, 16 }
 0x363   : > { %v5793_v1 = vrot.slane %v5791_v23, 3  ;;  %v5796_v37 = vrot.slane %v5794_v55, 4  ;;  %v5872_v36 = vshrl.u32 %v4655_v50, 16  ;;  %v5875_v2 = vshll.u32 %v4655_v50, 16 }
 0x364   : > { %v5959_v21 = vor.u32 %v5958_v0, %v5955_v26  ;;  %v5887_v3 = vor.u32 %v5886_v38, %v5883_v32  ;;  %v4837_v28 = vor.u32 %v4835_v39, %v4833_v44  ;;  %v4839_v22 = vshll.u32 %v12063_v13, 16  ;;  %v13500_v44 = vld [vmem:[#allocation61_spill] sm:$0xff] }
 0x365   : > { %v5797_v63 = vor.u32 %v5796_v37, %v5793_v1  ;;  %v5874_v24 = vrot.slane %v5872_v36, 3  ;;  %v4673_v7 = vsel %vm1559_vm10, %v12063_v13, 0  ;;  %v5877_v59 = vrot.slane %v5875_v2, 4 }
 0x366   : > { %v5960_v56 = vsel %vm1403_vm15, %v5896_v16, %v5959_v21  ;;  %v5888_v17 = vsel %vm1403_vm15, %v5824_v35, %v5887_v3  ;;  %v4841_v23 = vrot.slane %v4839_v22, 1  ;;  %v4910_v55 = vrot.slane %v4673_v7, 1 }
 0x367   : > { %v12223_v26 = vsel %vm1403_vm15, %v5734_v41, %v5797_v63  ;;  %7065 = vmatmul.mubr.bf16.gmra.mrb[200].mxu0 %v5888_v17  ;;  %vm13501_vm1 = vcmp.ne.s16.totalorder %v13500_v44, 0  ;;  %v4656_v16 = vsel %vm13502_vm11, %v12015_v53, 0  ;;  %v4843_v32 = vshrl.u32 %v12063_v13, 16 }
 0x368   : > { %13499 = vst [vmem:[#allocation69_spill] sm:$0xff] %v12223_v26  ;;  %v4690_v0 = vsel %vm13501_vm1, %v12068_v46, 0  ;;  %6903 = vmatprep.mubr.bf16.mxu1 %v12223_v26  ;;  %7072 = vmatprep.mubr.bf16.mxu0 %v5960_v56  ;;  %v5878_v35 = vor.u32 %v5877_v59, %v5874_v24  ;;  %v4842_v38 = vsel %vm1647_vm8, %v4837_v28, %v4841_v23  ;;  %v5935_v17 = vshrl.u32 %v4656_v16, 16  ;;  %vm13507_vm2 = vmmov %vm13501_vm1 }
 0x369   : > { %v4911_v41 = vsel %vm1798_vm6, %v4908_v43, %v4910_v55  ;;  %v6016_v50 = vshrl.u32 %v4690_v0, 16  ;;  %v5854_v39 = vshrl.u32 %v4842_v38, 16  ;;  %v5857_v1 = vshll.u32 %v4842_v38, 16 }
 0x36a   : > { %v5944_v37 = vshrl.u32 %v4911_v41, 16  ;;  %v5947_v36 = vshll.u32 %v4911_v41, 16  ;;  %v5879_v2 = vsel %vm1403_vm15, %v5815_v4, %v5878_v35  ;;  %v6019_v7 = vshll.u32 %v4690_v0, 16  ;;  %v13503_v41 = vld [vmem:[#allocation63_spill] sm:$0xff] }
 0x36b   : > { %v6018_v22 = vrot.slane %v6016_v50, 3  ;;  %6904 = vmatmul.mubr.bf16.gmra.mrb[168].mxu1 %v5879_v2  ;;  %v5856_v61 = vrot.slane %v5854_v39, 3  ;;  %v5859_v34 = vrot.slane %v5857_v1, 4  ;;  %v5937_v59 = vrot.slane %v5935_v17, 3 }
 0x36c   : > { %v5946_v47 = vrot.slane %v5944_v37, 3  ;;  %v5949_v56 = vrot.slane %v5947_v36, 4  ;;  %v6021_v24 = vrot.slane %v6019_v7, 4  ;;  %v5938_v28 = vshll.u32 %v4656_v16, 16 }
 0x36d   : > { %v4845_v26 = vor.u32 %v4843_v32, %v4841_v23  ;;  %v5860_v43 = vor.u32 %v5859_v34, %v5856_v61  ;;  %v4847_v38 = vshll.u32 %v12068_v46, 16  ;;  %vm13504_vm5 = vcmp.ne.s16.totalorder %v13503_v41, 0 }
 0x36e   : > { %v5950_v52 = vor.u32 %v5949_v56, %v5946_v47  ;;  %v4674_v4 = vsel %vm13504_vm5, %v12068_v46, 0  ;;  %v6022_v50 = vor.u32 %v6021_v24, %v6018_v22  ;;  %v5940_v0 = vrot.slane %v5938_v28, 4 }
 0x36f   : > { %v4912_v27 = vrot.slane %v4674_v4, 1  ;;  %v4691_v1 = vsel %vm1176_vm0, %v12101_v6, 0  ;;  %v12244_v37 = vsel %vm1403_vm15, %v5797_v63, %v5860_v43  ;;  %v4849_v34 = vrot.slane %v4847_v38, 1 }
 0x370   : > { %13506 = vst [vmem:[#allocation22_spill] sm:$0xff] %v12244_v37  ;;  %v5951_v23 = vsel %vm1403_vm15, %v5887_v3, %v5950_v52  ;;  %v6079_v61 = vshrl.u32 %v4691_v1, 16  ;;  %6911 = vmatprep.mubr.bf16.mxu1 %v12244_v37  ;;  %v6023_v47 = vsel %vm1403_vm15, %v5959_v21, %v6022_v50  ;;  %v5941_v16 = vor.u32 %v5940_v0, %v5937_v59 }
 0x371   : > { %7073 = vmatmul.mubr.bf16.gmra.mrb[204].mxu0 %v5951_v23  ;;  %v4913_v32 = vsel %vm1798_vm6, %v4910_v55, %v4912_v27  ;;  %v6082_v36 = vshll.u32 %v4691_v1, 16  ;;  %v4850_v2 = vsel %vm1647_vm8, %v4845_v26, %v4849_v34  ;;  %v4657_v21 = vsel %vm13507_vm2, %v12063_v13, 0 }
 0x372   : > { %7080 = vmatprep.mubr.bf16.mxu0 %v6023_v47  ;;  %v6007_v22 = vshrl.u32 %v4913_v32, 16  ;;  %v6010_v7 = vshll.u32 %v4913_v32, 16  ;;  %v6081_v63 = vrot.slane %v6079_v61, 3  ;;  %v5942_v17 = vsel %vm1403_vm15, %v5878_v35, %v5941_v16 }
 0x373   : > { %v5917_v3 = vshrl.u32 %v4850_v2, 16  ;;  %v5920_v56 = vshll.u32 %v4850_v2, 16  ;;  %v6084_v24 = vrot.slane %v6082_v36, 4  ;;  %6912 = vmatmul.mubr.bf16.gmra.mrb[172].mxu1 %v5942_v17  ;;  %v4851_v55 = vshrl.u32 %v12068_v46, 16 }
 0x374   : > { %v6009_v28 = vrot.slane %v6007_v22, 3  ;;  %v6012_v38 = vrot.slane %v6010_v7, 4  ;;  %v5998_v0 = vshrl.u32 %v4657_v21, 16  ;;  %v6001_v23 = vshll.u32 %v4657_v21, 16 }
 0x375   : > { %v5919_v59 = vrot.slane %v5917_v3, 3  ;;  %v5922_v4 = vrot.slane %v5920_v56, 4  ;;  %v6085_v26 = vor.u32 %v6084_v24, %v6081_v63  ;;  %v4853_v61 = vor.u32 %v4851_v55, %v4849_v34 }
 0x376   : > { %v6013_v1 = vor.u32 %v6012_v38, %v6009_v28  ;;  %v4855_v35 = vshll.u32 %v12101_v6, 16  ;;  %v6000_v36 = vrot.slane %v5998_v0, 3  ;;  %v4675_v22 = vsel %vm1561_vm14, %v12101_v6, 0 }
 0x377   : > { %v5923_v47 = vor.u32 %v5922_v4, %v5919_v59  ;;  %v6086_v32 = vsel %vm1403_vm15, %v6022_v50, %v6085_v26  ;;  %v6003_v17 = vrot.slane %v6001_v23, 4  ;;  %v4914_v56 = vrot.slane %v4675_v22, 1 }
 0x378   : > { %v6014_v7 = vsel %vm1403_vm15, %v5950_v52, %v6013_v1  ;;  %v4857_v3 = vrot.slane %v4855_v35, 1  ;;  %v4692_v24 = vsel %vm1177_vm12, %v12104_v18, 0  ;;  %v4658_v50 = vsel %vm1176_vm0, %v12068_v46, 0 }
 0x379   : > { %v12263_v63 = vsel %vm1403_vm15, %v5860_v43, %v5923_v47  ;;  %7081 = vmatmul.mubr.bf16.gmra.mrb[208].mxu0 %v6014_v7  ;;  %v4859_v28 = vshrl.u32 %v12101_v6, 16  ;;  %v6004_v52 = vor.u32 %v6003_v17, %v6000_v36  ;;  %v4915_v43 = vsel %vm1798_vm6, %v4912_v27, %v4914_v56 }
 0x37a   : > { %13509 = vst [vmem:[#allocation26_spill] sm:$0xff] %v12263_v63  ;;  %6919 = vmatprep.mubr.bf16.mxu1 %v12263_v63  ;;  %7088 = vmatprep.mubr.bf16.mxu0 %v6086_v32  ;;  %v4858_v38 = vsel %vm1647_vm8, %v4853_v61, %v4857_v3  ;;  %v6142_v21 = vshrl.u32 %v4692_v24, 16  ;;  %v6070_v4 = vshrl.u32 %v4915_v43, 16  ;;  %v6073_v0 = vshll.u32 %v4915_v43, 16 }
 0x37b   : > { %v5980_v55 = vshrl.u32 %v4858_v38, 16  ;;  %v5983_v59 = vshll.u32 %v4858_v38, 16  ;;  %v6005_v23 = vsel %vm1403_vm15, %v5941_v16, %v6004_v52  ;;  %v6145_v22 = vshll.u32 %v4692_v24, 16 }
 0x37c   : > { %v6144_v35 = vrot.slane %v6142_v21, 3  ;;  %v6061_v7 = vshrl.u32 %v4658_v50, 16  ;;  %6920 = vmatmul.mubr.bf16.gmra.mrb[176].mxu1 %v6005_v23  ;;  %v6072_v2 = vrot.slane %v6070_v4, 3  ;;  %v6075_v32 = vrot.slane %v6073_v0, 4 }
 0x37d   : > { %v5982_v39 = vrot.slane %v5980_v55, 3  ;;  %v5985_v44 = vrot.slane %v5983_v59, 4  ;;  %v6147_v36 = vrot.slane %v6145_v22, 4  ;;  %v6064_v61 = vshll.u32 %v4658_v50, 16  ;;  %v13512_v55 = vld [vmem:[#allocation71_spill] sm:$0xff] }
 0x37e   : > { %v6063_v17 = vrot.slane %v6061_v7, 3  ;;  %v4861_v63 = vor.u32 %v4859_v28, %v4857_v3  ;;  %v6076_v41 = vor.u32 %v6075_v32, %v6072_v2  ;;  %v4863_v38 = vshll.u32 %v12104_v18, 16 }
 0x37f   : > { %v5986_v27 = vor.u32 %v5985_v44, %v5982_v39  ;;  %v4676_v16 = vsel %vm1562_vm7, %v12104_v18, 0  ;;  %v6148_v21 = vor.u32 %v6147_v36, %v6144_v35  ;;  %v6066_v24 = vrot.slane %v6064_v61, 4 }
 0x380   : > { %v4916_v37 = vrot.slane %v4676_v16, 1  ;;  %vm13513_vm1 = vcmp.ne.s16.totalorder %v13512_v55, 0  ;;  %v6077_v3 = vsel %vm1403_vm15, %v6013_v1, %v6076_v41  ;;  %v4865_v44 = vrot.slane %v4863_v38, 1 }
 0x381   : > { %v4693_v59 = vsel %vm13513_vm1, %v12109_v8, 0  ;;  %v12284_v4 = vsel %vm1403_vm15, %v5923_v47, %v5986_v27  ;;  %7089 = vmatmul.mubr.bf16.gmra.mrb[212].mxu0 %v6077_v3  ;;  %v6149_v2 = vsel %vm1403_vm15, %v6085_v26, %v6148_v21  ;;  %v6067_v50 = vor.u32 %v6066_v24, %v6063_v17  ;;  %vm13514_vm11 = vmmov %vm13513_vm1 }
 0x382   : > { %v6214_v39 = vshrl.u32 %v4693_v59, 16  ;;  %6927 = vmatprep.mubr.bf16.mxu1 %v12284_v4  ;;  %v4917_v28 = vsel %vm1798_vm6, %v4914_v56, %v4916_v37  ;;  %v6217_v0 = vshll.u32 %v4693_v59, 16  ;;  %7096 = vmatprep.mubr.bf16.mxu0 %v6149_v2  ;;  %v4866_v23 = vsel %vm1647_vm8, %v4861_v63, %v4865_v44 }
 0x383   : > { %v6133_v35 = vshrl.u32 %v4917_v28, 16  ;;  %v6136_v22 = vshll.u32 %v4917_v28, 16  ;;  %v6068_v7 = vsel %vm1403_vm15, %v6004_v52, %v6067_v50  ;;  %v6043_v1 = vshrl.u32 %v4866_v23, 16 }
 0x384   : > { %v6216_v47 = vrot.slane %v6214_v39, 3  ;;  %v6046_v32 = vshll.u32 %v4866_v23, 16  ;;  %v6219_v36 = vrot.slane %v6217_v0, 4  ;;  %6928 = vmatmul.mubr.bf16.gmra.mrb[180].mxu1 %v6068_v7  ;;  %v4659_v26 = vsel %vm1177_vm12, %v12101_v6, 0 }
 0x385   : > { %v6135_v61 = vrot.slane %v6133_v35, 3  ;;  %v6138_v38 = vrot.slane %v6136_v22, 4  ;;  %v4867_v56 = vshrl.u32 %v12104_v18, 16  ;;  %v6045_v17 = vrot.slane %v6043_v1, 3 }
 0x386   : > { %v6048_v16 = vrot.slane %v6046_v32, 4  ;;  %v6220_v63 = vor.u32 %v6219_v36, %v6216_v47  ;;  %v6124_v24 = vshrl.u32 %v4659_v26, 16  ;;  %v6127_v3 = vshll.u32 %v4659_v26, 16 }
 0x387   : > { %v6139_v59 = vor.u32 %v6138_v38, %v6135_v61  ;;  %v12296_v39 = vor.u32 %v4867_v56, %v4865_v44  ;;  %v6205_v52 = vshrl.u32 %v4916_v37, 16  ;;  %v6208_v23 = vshll.u32 %v4916_v37, 16  ;;  %v13515_v56 = vld [vmem:[#allocation44_spill] sm:$0xff] }
 0x388   : > { %v12298_v2 = vor.u32 %v6048_v16, %v6045_v17  ;;  %v6221_v28 = vsel %vm1403_vm15, %v6148_v21, %v6220_v63  ;;  %v6126_v0 = vrot.slane %v6124_v24, 3  ;;  %v6129_v22 = vrot.slane %v6127_v3, 4  ;;  %v13516_v17 = vld [vmem:[#allocation16_spill] sm:$0xff]  ;;  %v13518_v16 = vld [vmem:[#allocation17_spill] sm:$0xff] }
 0x389   : > { %v6140_v35 = vsel %vm1403_vm15, %v6076_v41, %v6139_v59  ;;  %v6196_v7 = vshrl.u32 %v12296_v39, 16  ;;  %v6199_v1 = vshll.u32 %v12296_v39, 16  ;;  %v6207_v44 = vrot.slane %v6205_v52, 3 }
 0x38a   : > { %v12306_v47 = vsel %vm1403_vm15, %v5986_v27, %v12298_v2  ;;  %7097 = vmatmul.mubr.bf16.gmra.mrb[216].mxu0 %v6140_v35  ;;  %v6210_v32 = vrot.slane %v6208_v23, 4  ;;  %v4660_v21 = vsel %vm13514_vm11, %v12104_v18, 0  ;;  %v6130_v41 = vor.u32 %v6129_v22, %v6126_v0 }
 0x38b   : > { %6935 = vmatprep.mubr.bf16.mxu1 %v12306_v47  ;;  %7104 = vmatprep.mubr.bf16.mxu0 %v6221_v28  ;;  %v6198_v37 = vrot.slane %v6196_v7, 3  ;;  %v6201_v36 = vrot.slane %v6199_v1, 4  ;;  %v6187_v61 = vshrl.u32 %v4660_v21, 16  ;;  %v6190_v26 = vshll.u32 %v4660_v21, 16 }
 0x38c   : > { %v6211_v38 = vor.u32 %v6210_v32, %v6207_v44  ;;  %vm13517_vm5 = vcmp.ne.s16.totalorder %v13516_v17, 0  ;;  %vm13519_vm2 = vcmp.ne.s16.totalorder %v13518_v16, 0  ;;  %v6131_v55 = vsel %vm1403_vm15, %v6067_v50, %v6130_v41 }
 0x38d   : > { %v4694_v27 = vsel %vm13517_vm5, %v13515_v56, 0  ;;  %v4695_v63 = vsel %vm13519_vm2, %v11758_v42, 0  ;;  %v6202_v24 = vor.u32 %v6201_v36, %v6198_v37  ;;  %v6189_v3 = vrot.slane %v6187_v61, 3  ;;  %6936 = vmatmul.mubr.bf16.gmra.mrb[184].mxu1 %v6131_v55 }
 0x38e   : > { %v4696_v28 = vsel %vm1548_vm13, %v11790_v15, 0  ;;  %v6212_v0 = vsel %vm1403_vm15, %v6139_v59, %v6211_v38  ;;  %v6192_v23 = vrot.slane %v6190_v26, 4  ;;  %v4942_v35 = vrot.slane %v4694_v27, 1 }
 0x38f   : > { %v4943_v22 = vrot.slane %v4695_v63, 1  ;;  %v6203_v7 = vsel %vm1403_vm15, %v12298_v2, %v6202_v24  ;;  %v4945_v1 = vrot.slane %v4696_v28, 1  ;;  %v4711_v50 = vsel %vm1579_vm3, %v11758_v42, 0 }
 0x390   : > { %v4712_v21 = vsel %vm1163_vm4, %v11790_v15, 0  ;;  %6943 = vmatprep.mubr.bf16.mxu1 %v6203_v7  ;;  %v6193_v37 = vor.u32 %v6192_v23, %v6189_v3  ;;  %v5262_v59 = vshrl.u32 %v4711_v50, 16  ;;  %v5265_v61 = vshll.u32 %v4711_v50, 16  ;;  %v13523_v50 = vld [vmem:[#allocation21_spill] sm:$0xff] }
 0x391   : > { %v4944_v36 = vsel %vm1798_vm6, %v4942_v35, %v4943_v22  ;;  %v4946_v38 = vsel %vm1798_vm6, %v4943_v22, %v4945_v1  ;;  %v5270_v27 = vshrl.u32 %v4712_v21, 16  ;;  %v5273_v35 = vshll.u32 %v4712_v21, 16 }
 0x392   : > { %v5245_v26 = vshrl.u32 %v4944_v36, 16  ;;  %v5248_v56 = vshll.u32 %v4944_v36, 16  ;;  %7105 = vmatmul.mubr.bf16.gmra.mrb[220].mxu0 %v6212_v0  ;;  %v5253_v63 = vshrl.u32 %v4946_v38, 16  ;;  %v5256_v55 = vshll.u32 %v4946_v38, 16  ;;  %v13525_v38 = vld [vmem:[#allocation19_spill] sm:$0xff] }
 0x393   : > { %v5264_v24 = vrot.slane %v5262_v59, 3  ;;  %7306 = vmatprep.mubr.bf16.mxu0 %v11978_v11  ;;  %v5267_v32 = vrot.slane %v5265_v61, 4  ;;  %v5272_v7 = vrot.slane %v5270_v27, 3  ;;  %vm13524_vm3 = vcmp.ne.s16.totalorder %v13523_v50, 0 }
 0x394   : > { %v5247_v28 = vrot.slane %v5245_v26, 3  ;;  %v5250_v44 = vrot.slane %v5248_v56, 4  ;;  %v5255_v3 = vrot.slane %v5253_v63, 3  ;;  %v5258_v23 = vrot.slane %v5256_v55, 4  ;;  %v13527_v55 = vld [vmem:[#allocation24_spill] sm:$0xff] }
 0x395   : > { %v4697_v22 = vsel %vm13524_vm3, %v11793_v57, 0  ;;  %v6194_v36 = vsel %vm1403_vm15, %v6130_v41, %v6193_v37  ;;  %vm13526_vm4 = vcmp.ne.s16.totalorder %v13525_v38, 0  ;;  %v5275_v56 = vrot.slane %v5273_v35, 4 }
 0x396   : > { %v5251_v17 = vor.u32 %v5250_v44, %v5247_v28  ;;  %v4947_v0 = vrot.slane %v4697_v22, 1  ;;  %v4713_v59 = vsel %vm13526_vm4, %v11793_v57, 0  ;;  %6944 = vmatmul.mubr.bf16.gmra.mrb[188].mxu1 %v6194_v36  ;;  %v5259_v26 = vor.u32 %v5258_v23, %v5255_v3  ;;  %v13530_v36 = vld [vmem:[#allocation23_spill] sm:$0xff] }
 0x397   : > { %v5341_v61 = vshrl.u32 %v4713_v59, 16  ;;  %v5344_v27 = vshll.u32 %v4713_v59, 16  ;;  %v5268_v63 = vor.u32 %v5267_v32, %v5264_v24  ;;  %vm13528_vm1 = vcmp.ne.s16.totalorder %v13527_v55, 0 }
 0x398   : > { %v4948_v21 = vsel %vm1798_vm6, %v4945_v1, %v4947_v0  ;;  %v4698_v50 = vsel %vm13528_vm1, %v11815_v58, 0  ;;  %vm13529_vm11 = vcmp.ne.s16.totalorder %v13453_v51, 0  ;;  %v5260_v37 = vsel %vm1403_vm15, %v5251_v17, %v5259_v26 }
 0x399   : > { %v4699_v41 = vsel %vm13529_vm11, %v11820_v10, 0  ;;  %v5276_v28 = vor.u32 %v5275_v56, %v5272_v7  ;;  %v5332_v44 = vshrl.u32 %v4948_v21, 16  ;;  %v5335_v22 = vshll.u32 %v4948_v21, 16  ;;  %7145 = vmatprep.mubr.bf16.mxu1 %v5260_v37 }
 0x39a   : > { %v5343_v3 = vrot.slane %v5341_v61, 3  ;;  %v5346_v23 = vrot.slane %v5344_v27, 4  ;;  %v4949_v35 = vrot.slane %v4698_v50, 1  ;;  %vm13531_vm5 = vcmp.ne.s16.totalorder %v13530_v36, 0  ;;  %v9248_v61 = vld [vmem:[#allocation7 + $0x208] sm:$0xff]  }
 0x39b   : > { %v5277_v24 = vsel %vm1403_vm15, %v5268_v63, %v5276_v28  ;;  %v5334_v1 = vrot.slane %v5332_v44, 3  ;;  %v5337_v32 = vrot.slane %v5335_v22, 4  ;;  %v4714_v38 = vsel %vm13531_vm5, %v11815_v58, 0  ;;  %v13532_v63 = vld [vmem:[#allocation49_spill] sm:$0xff] }
 0x39c   : > { %7307 = vmatmul.mubr.bf16.vlgmr.msra.gmra.mrb[224].mxu0 %v5277_v24  ;;  %v4950_v59 = vsel %vm1798_vm6, %v4947_v0, %v4949_v35  ;;  %v4951_v51 = vrot.slane %v4699_v41, 1  ;;  %v5347_v27 = vor.u32 %v5346_v23, %v5343_v3  ;;  %v5404_v50 = vshrl.u32 %v4714_v38, 16  ;;  %v9256_v24 = vld [vmem:[#allocation7 + $0x200] sm:$0xff]  }
 0x39d   : > { %7314 = vmatprep.mubr.bf16.mxu0 %v12045_v29  ;;  %v5338_v17 = vor.u32 %v5337_v32, %v5334_v1  ;;  %v5395_v7 = vshrl.u32 %v4950_v59, 16  ;;  %v5398_v56 = vshll.u32 %v4950_v59, 16  ;;  %v5407_v21 = vshll.u32 %v4714_v38, 16  ;;  %v9249_v1 = vld [vmem:[#allocation7 + $0x210] sm:$0xff]  }
 0x39e   : > { %7146 = vmatmul.mubr.bf16.vlgmr.msra.gmra.mrb[192].mxu1 %v13532_v63  ;;  %v4952_v0 = vsel %vm1798_vm6, %v4949_v35, %v4951_v51  ;;  %vm13533_vm2 = vcmp.ne.s16.totalorder %v13394_v19, 0  ;;  %v5348_v3 = vsel %vm1403_vm15, %v5276_v28, %v5347_v27  ;;  %v5406_v23 = vrot.slane %v5404_v50, 3 }
 0x39f   : > { %v5339_v37 = vsel %vm1403_vm15, %v5259_v26, %v5338_v17  ;;  %v5397_v44 = vrot.slane %v5395_v7, 3  ;;  %v5400_v22 = vrot.slane %v5398_v56, 4  ;;  %8989 = vmatpush3.bf16.msra.mxu1 %v9256_v24  ;;  %v4700_v41 = vsel %vm13533_vm2, %v11853_v33, 0  ;;  %v9250_v7 = vld [vmem:[#allocation7 + $0x218] sm:$0xff]  }
 0x3a0   : > { %7153 = vmatprep.mubr.bf16.mxu1 %v5339_v37  ;;  %8990 = vmatprep.subr.bf16.mxu1 %v9248_v61  ;;  %v5409_v32 = vrot.slane %v5407_v21, 4  ;;  %v5458_v38 = vshrl.u32 %v4952_v0, 16  ;;  %v5461_v26 = vshll.u32 %v4952_v0, 16  ;;  %vm13534_vm3 = vcmp.ne.s16.totalorder %v13449_v54, 0 }
 0x3a1   : > { %v5401_v36 = vor.u32 %v5400_v22, %v5397_v44  ;;  %v4715_v59 = vsel %vm13534_vm3, %v11820_v10, 0  ;;  %v4953_v35 = vrot.slane %v4700_v41, 1  ;;  %vm13535_vm4 = vcmp.ne.s16.totalorder %v13399_v31, 0  ;;  %v9251_v44 = vld [vmem:[#allocation7 + $0x220] sm:$0xff]  }
 0x3a2   : > { %v5410_v56 = vor.u32 %v5409_v32, %v5406_v23  ;;  %v5467_v63 = vshrl.u32 %v4715_v59, 16  ;;  %v5460_v50 = vrot.slane %v5458_v38, 3  ;;  %v5463_v21 = vrot.slane %v5461_v26, 4 }
 0x3a3   : > { %8991 = vmatpush3.bf16.msra.mxu1 %v9248_v61  ;;  %v5402_v28 = vsel %vm1403_vm15, %v5338_v17, %v5401_v36  ;;  %v5470_v37 = vshll.u32 %v4715_v59, 16  ;;  %v4954_v54 = vsel %vm1798_vm6, %v4951_v51, %v4953_v35  ;;  %v4701_v61 = vsel %vm13535_vm4, %v11858_v45, 0 }
 0x3a4   : > { %7315 = vmatmul.mubr.bf16.gmra.mrb[228].mxu0 %v5348_v3  ;;  %8992 = vmatprep.subr.bf16.mxu1 %v9249_v1  ;;  %v5411_v22 = vsel %vm1403_vm15, %v5347_v27, %v5410_v56  ;;  %v5469_v24 = vrot.slane %v5467_v63, 3  ;;  %vm13536_vm1 = vcmp.ne.s16.totalorder %v13455_v25, 0  ;;  %v5464_v17 = vor.u32 %v5463_v21, %v5460_v50  ;;  %v9253_v63 = vld [vmem:[#allocation7 + $0x230] sm:$0xff]  }
 0x3a5   : > { %7322 = vmatprep.mubr.bf16.mxu0 %v12085_v12  ;;  %v5472_v0 = vrot.slane %v5470_v37, 4  ;;  %v5521_v41 = vshrl.u32 %v4954_v54, 16  ;;  %v5524_v3 = vshll.u32 %v4954_v54, 16  ;;  %v4955_v51 = vrot.slane %v4701_v61, 1  ;;  %v9254_v61 = vld [vmem:[#allocation7 + $0x238] sm:$0xff]  }
 0x3a6   : > { %7154 = vmatmul.mubr.bf16.gmra.mrb[196].mxu1 %v11978_v11  ;;  %v4716_v11 = vsel %vm13536_vm1, %v11853_v33, 0  ;;  %v5465_v27 = vsel %vm1403_vm15, %v5401_v36, %v5464_v17  ;;  %vm13537_vm11 = vcmp.ne.s16.totalorder %v13402_v62, 0  ;;  %vm13538_vm5 = vcmp.ne.s16.totalorder %v13463_v5, 0 }
 0x3a7   : > { %7161 = vmatprep.mubr.bf16.mxu1 %v5402_v28  ;;  %8993 = vmatpush3.bf16.msra.mxu1 %v9249_v1  ;;  %v9252_v1 = vld [vmem:[#allocation7 + $0x228] sm:$0xff]   ;;  %v5530_v23 = vshrl.u32 %v4716_v11, 16  ;;  %v5533_v32 = vshll.u32 %v4716_v11, 16  ;;  %v5473_v38 = vor.u32 %v5472_v0, %v5469_v24  ;;  %v5523_v25 = vrot.slane %v5521_v41, 3 }
 0x3a8   : > { %8994 = vmatprep.subr.bf16.mxu1 %v9250_v7  ;;  %v5526_v26 = vrot.slane %v5524_v3, 4  ;;  %v4956_v59 = vsel %vm1798_vm6, %v4953_v35, %v4955_v51  ;;  %vm13539_vm2 = vcmp.ne.s16.totalorder %v13406_v60, 0  ;;  %vm13540_vm3 = vcmp.ne.s16.totalorder %v13472_v49, 0 }
 0x3a9   : > { %v5532_v28 = vrot.slane %v5530_v23, 3  ;;  %v5535_v50 = vrot.slane %v5533_v32, 4  ;;  %v5474_v36 = vsel %vm1403_vm15, %v5410_v56, %v5473_v38  ;;  %v5584_v37 = vshrl.u32 %v4956_v59, 16 }
 0x3aa   : > { %v5527_v21 = vor.u32 %v5526_v26, %v5523_v25  ;;  %v5587_v54 = vshll.u32 %v4956_v59, 16  ;;  %v4703_v41 = vsel %vm13539_vm2, %v11914_v20, 0 }
 0x3ab   : > { %8995 = vmatpush3.bf16.msra.mxu1 %v9250_v7  ;;  %v4702_v7 = vsel %vm13537_vm11, %v11909_v30, 0  ;;  %v5536_v5 = vor.u32 %v5535_v50, %v5532_v28  ;;  %v5586_v11 = vrot.slane %v5584_v37, 3  ;;  %v4959_v25 = vrot.slane %v4703_v41, 1  ;;  %v13541_v28 = vld [vmem:[#allocation47_spill] sm:$0xff]  ;;  %v13543_v37 = vld [vmem:[#allocation41_spill] sm:$0xff] }
 0x3ac   : > { %7323 = vmatmul.mubr.bf16.gmra.mrb[232].mxu0 %v5411_v22  ;;  %8996 = vmatprep.subr.bf16.mxu1 %v9251_v44  ;;  %v4957_v35 = vrot.slane %v4702_v7, 1  ;;  %v5528_v24 = vsel %vm1403_vm15, %v5464_v17, %v5527_v21  ;;  %v5589_v0 = vrot.slane %v5587_v54, 4  ;;  %vm13542_vm4 = vcmp.ne.s16.totalorder %v13541_v28, 0 }
 0x3ad   : > { %7330 = vmatprep.mubr.bf16.mxu0 %v12126_v14  ;;  %v5537_v17 = vsel %vm1403_vm15, %v5473_v38, %v5536_v5  ;;  %v4704_v50 = vsel %vm13542_vm4, %v12010_v48, 0  ;;  %vm13544_vm1 = vcmp.ne.s16.totalorder %v13543_v37, 0 }
 0x3ae   : > { %7162 = vmatmul.mubr.bf16.gmra.mrb[200].mxu1 %v12045_v29  ;;  %v4717_v29 = vsel %vm13538_vm5, %v11858_v45, 0  ;;  %v4958_v56 = vsel %vm1798_vm6, %v4955_v51, %v4957_v35  ;;  %v5590_v23 = vor.u32 %v5589_v0, %v5586_v11  ;;  %v4960_v38 = vsel %vm1798_vm6, %v4957_v35, %v4959_v25 }
 0x3af   : > { %7169 = vmatprep.mubr.bf16.mxu1 %v5465_v27  ;;  %8997 = vmatpush3.bf16.msra.mxu1 %v9251_v44  ;;  %v5593_v44 = vshrl.u32 %v4717_v29, 16  ;;  %v5596_v22 = vshll.u32 %v4717_v29, 16  ;;  %v5647_v32 = vshrl.u32 %v4958_v56, 16  ;;  %v5650_v27 = vshll.u32 %v4958_v56, 16 }
 0x3b0   : > { %8998 = vmatprep.subr.bf16.mxu1 %v9252_v1  ;;  %v5591_v59 = vsel %vm1403_vm15, %v5527_v21, %v5590_v23  ;;  %v4719_v54 = vsel %vm13544_vm1, %v11914_v20, 0  ;;  %v5710_v21 = vshrl.u32 %v4960_v38, 16 }
 0x3b1   : > { %v5595_v3 = vrot.slane %v5593_v44, 3  ;;  %v5649_v7 = vrot.slane %v5647_v32, 3  ;;  %v5713_v44 = vshll.u32 %v4960_v38, 16  ;;  %v5719_v35 = vshrl.u32 %v4719_v54, 16 }
 0x3b2   : > { %v5722_v11 = vshll.u32 %v4719_v54, 16  ;;  %v5712_v56 = vrot.slane %v5710_v21, 3 }
 0x3b3   : > { %8999 = vmatpush3.bf16.msra.mxu1 %v9252_v1  ;;  %v5598_v1 = vrot.slane %v5596_v22, 4  ;;  %v4961_v22 = vrot.slane %v4704_v50, 1  ;;  %v5715_v41 = vrot.slane %v5713_v44, 4 }
 0x3b4   : > { %7331 = vmatmul.mubr.bf16.gmra.mrb[236].mxu0 %v5474_v36  ;;  %9000 = vmatprep.subr.bf16.mxu1 %v9253_v63 }
 0x3b5   : > { %7338 = vmatprep.mubr.bf16.mxu0 %v12142_v40  ;;  %v5599_v51 = vor.u32 %v5598_v1, %v5595_v3  ;;  %v4962_v3 = vsel %vm1798_vm6, %v4959_v25, %v4961_v22  ;;  %v13546_v1 = vld [vmem:[#allocation51_spill] sm:$0xff] }
 0x3b6   : > { %7170 = vmatmul.mubr.bf16.gmra.mrb[204].mxu1 %v12085_v12  ;;  %v4718_v12 = vsel %vm13540_vm3, %v11909_v30, 0  ;;  %vm13547_vm11 = vcmp.ne.s16.totalorder %v13546_v1, 0 }
 0x3b7   : > { %7177 = vmatprep.mubr.bf16.mxu1 %v5528_v24  ;;  %9001 = vmatpush3.bf16.msra.mxu1 %v9253_v63  ;;  %v5656_v26 = vshrl.u32 %v4718_v12, 16  ;;  %v5652_v63 = vrot.slane %v5650_v27, 4  ;;  %v5659_v49 = vshll.u32 %v4718_v12, 16  ;;  %v5600_v29 = vsel %vm1403_vm15, %v5536_v5, %v5599_v51  ;;  %v13545_v24 = vld [vmem:[#allocation70_spill] sm:$0xff] }
 0x3b8   : > { %9002 = vmatprep.subr.bf16.mxu1 %v9254_v61  ;;  %v4705_v12 = vsel %vm13547_vm11, %v12015_v53, 0  ;;  %v5721_v27 = vrot.slane %v5719_v35, 3 }
 0x3b9   : > { %v5658_v36 = vrot.slane %v5656_v26, 3  ;;  %v5724_v26 = vrot.slane %v5722_v11, 4 }
 0x3bb   : > { %9003 = vmatpush3.bf16.msra.mxu1 %v9254_v61  ;;  %v5661_v61 = vrot.slane %v5659_v49, 4  ;;  %v13550_v49 = vld [vmem:[#allocation20_spill] sm:$0xff]  ;;  %v5725_v38 = vor.u32 %v5724_v26, %v5721_v27  ;;  %v13554_v26 = vld [vmem:[#allocation69_spill] sm:$0xff] }
 0x3bc   : > { %7339 = vmatmul.mubr.bf16.gmra.mrb[240].mxu0 %v5537_v17  ;;  %v13548_v17 = vld [vmem:[#allocation45_spill] sm:$0xff] }
 0x3bd   : > { %7346 = vmatprep.mubr.bf16.mxu0 %v12164_v9  ;;  %v5662_v5 = vor.u32 %v5661_v61, %v5658_v36  ;;  %vm13549_vm5 = vcmp.ne.s16.totalorder %v13548_v17, 0 }
 0x3be   : > { %7178 = vmatmul.mubr.bf16.gmra.mrb[208].mxu1 %v12126_v14  ;;  %v5653_v14 = vor.u32 %v5652_v63, %v5649_v7  ;;  %v4720_v32 = vsel %vm13549_vm5, %v12010_v48, 0  ;;  %v5776_v7 = vshll.u32 %v4962_v3, 16  ;;  %v4963_v63 = vrot.slane %v4705_v12, 1 }
 0x3bf   : > { %7185 = vmatprep.mubr.bf16.mxu1 %v5591_v59  ;;  %v5716_v59 = vor.u32 %v5715_v41, %v5712_v56  ;;  %v5782_v50 = vshrl.u32 %v4720_v32, 16  ;;  %v5726_v12 = vsel %vm1403_vm15, %v5662_v5, %v5725_v38  ;;  %vm13579_vm5 = vcmp.ne.s16.totalorder %v13394_v19, 0 }
 0x3c0   : > { %v5654_v0 = vsel %vm1403_vm15, %v5590_v23, %v5653_v14  ;;  %v5773_v23 = vshrl.u32 %v4962_v3, 16  ;;  %v5778_v61 = vrot.slane %v5776_v7, 4  ;;  %v4964_v44 = vsel %vm1798_vm6, %v4961_v22, %v4963_v63 }
 0x3c1   : > { %v5717_v37 = vsel %vm1403_vm15, %v5653_v14, %v5716_v59  ;;  %v5784_v41 = vrot.slane %v5782_v50, 3  ;;  %v5839_v27 = vshll.u32 %v4964_v44, 16 }
 0x3c2   : > { %v5775_v54 = vrot.slane %v5773_v23, 3 }
 0x3c4   : > { %7347 = vmatmul.mubr.bf16.gmra.mrb[244].mxu0 %v5600_v29  ;;  %v5785_v29 = vshll.u32 %v4720_v32, 16  ;;  %v5779_v17 = vor.u32 %v5778_v61, %v5775_v54  ;;  %v5836_v32 = vshrl.u32 %v4964_v44, 16 }
 0x3c5   : > { %7354 = vmatprep.mubr.bf16.mxu0 %v13545_v24  ;;  %v8596_v25 = vpop.f32.mrb[160].mxu0 }
 0x3c6   : > { %7186 = vmatmul.mubr.bf16.gmra.mrb[212].mxu1 %v12142_v40  ;;  %v5663_v40 = vsel %vm1403_vm15, %v5599_v51, %v5662_v5  ;;  %v8597_v36 = vpop.f32.mrb[161].mxu0  ;;  %v5787_v3 = vrot.slane %v5785_v29, 4  ;;  %v5838_v50 = vrot.slane %v5836_v32, 3  ;;  %v5841_v29 = vrot.slane %v5839_v27, 4  ;;  %v13558_v27 = vld [vmem:[#allocation22_spill] sm:$0xff] }
 0x3c7   : > { %7193 = vmatprep.mubr.bf16.mxu1 %v5654_v0  ;;  %v12423_v21 = vadd.f32 %v8597_v36, %v8596_v25  ;;  %v8599_v51 = vpop.f32.mrb[162].mxu0  ;;  %v4706_v0 = vsel %vm1558_vm9, %v12063_v13, 0  ;;  %v5780_v25 = vsel %vm1403_vm15, %v5716_v59, %v5779_v17 }
 0x3c8   : > { %v8600_v35 = vpop.f32.mrb[163].mxu0  ;;  %v4965_v22 = vrot.slane %v4706_v0, 1  ;;  %v5788_v7 = vor.u32 %v5787_v3, %v5784_v41  ;;  %v13556_v0 = vld [vmem:[#allocation54_spill] sm:$0xff]  ;;  %v5842_v3 = vor.u32 %v5841_v29, %v5838_v50 }
 0x3c9   : > { %v12429_v56 = vadd.f32 %v8600_v35, %v8599_v51  ;;  %vm13557_vm3 = vcmp.ne.s16.totalorder %v13556_v0, 0 }
 0x3ca   : > { %v4966_v36 = vsel %vm1798_vm6, %v4963_v63, %v4965_v22  ;;  %v5789_v35 = vsel %vm1403_vm15, %v5725_v38, %v5788_v7 }
 0x3cb   : > { %v5902_v63 = vshll.u32 %v4966_v36, 16 }
 0x3cc   : > { %7355 = vmatmul.mubr.bf16.gmra.mrb[248].mxu0 %v5663_v40 }
 0x3cd   : > { %7362 = vmatprep.mubr.bf16.mxu0 %v13550_v49  ;;  %v5904_v0 = vrot.slane %v5902_v63, 4 }
 0x3ce   : > { %7194 = vmatmul.mubr.bf16.gmra.mrb[216].mxu1 %v12164_v9  ;;  %v13552_v9 = vld [vmem:[#allocation50_spill] sm:$0xff] }
 0x3cf   : > { %7201 = vmatprep.mubr.bf16.mxu1 %v5717_v37  ;;  %vm13553_vm2 = vcmp.ne.s16.totalorder %v13552_v9, 0  ;;  %v4707_v37 = vsel %vm1559_vm10, %v12068_v46, 0  ;;  %v5899_v9 = vshrl.u32 %v4966_v36, 16 }
 0x3d0   : > { %v4721_v14 = vsel %vm13553_vm2, %v12015_v53, 0  ;;  %v8484_v54 = vpop.f32.mrb[128].mxu1  ;;  %vm13580_vm2 = vcmp.ne.s16.totalorder %v13399_v31, 0 }
 0x3d1   : > { %v5845_v40 = vshrl.u32 %v4721_v14, 16  ;;  %v5848_v23 = vshll.u32 %v4721_v14, 16  ;;  %v8485_v44 = vpop.f32.mrb[129].mxu1  ;;  %v4967_v14 = vrot.slane %v4707_v37, 1 }
 0x3d2   : > { %v12446_v59 = vadd.f32 %v8485_v44, %v8484_v54  ;;  %v8487_v41 = vpop.f32.mrb[130].mxu1  ;;  %v5843_v54 = vsel %vm1403_vm15, %v5779_v17, %v5842_v3  ;;  %v5901_v44 = vrot.slane %v5899_v9, 3  ;;  %v13561_v17 = vld [vmem:[#allocation58_spill] sm:$0xff] }
 0x3d3   : > { %v5847_v61 = vrot.slane %v5845_v40, 3  ;;  %v5850_v51 = vrot.slane %v5848_v23, 4  ;;  %v4968_v50 = vsel %vm1798_vm6, %v4965_v22, %v4967_v14  ;;  %vm13562_vm1 = vcmp.ne.s16.totalorder %v13561_v17, 0  ;;  %v13565_v17 = vld [vmem:[#allocation61_spill] sm:$0xff] }
 0x3d4   : > { %7363 = vmatmul.mubr.bf16.gmra.mrb[252].mxu0 %v5726_v12  ;;  %v8488_v12 = vpop.f32.mrb[131].mxu1  ;;  %v4723_v9 = vsel %vm13562_vm1, %v12068_v46, 0  ;;  %v5905_v22 = vor.u32 %v5904_v0, %v5901_v44  ;;  %vm13566_vm11 = vcmp.ne.s16.totalorder %v13565_v17, 0 }
 0x3d5   : > { %7370 = vmatprep.mubr.bf16.mxu0 %v13554_v26  ;;  %v12448_v32 = vadd.f32 %v8488_v12, %v8487_v41  ;;  %v5851_v40 = vor.u32 %v5850_v51, %v5847_v61  ;;  %v5962_v41 = vshrl.u32 %v4968_v50, 16  ;;  %v5974_v5 = vshll.u32 %v4723_v9, 16 }
 0x3d6   : > { %7202 = vmatmul.mubr.bf16.gmra.mrb[220].mxu1 %v13545_v24  ;;  %v4722_v24 = vsel %vm13557_vm3, %v12063_v13, 0  ;;  %vm13581_vm3 = vcmp.ne.s16.totalorder %v13402_v62, 0 }
 0x3d7   : > { %7209 = vmatprep.mubr.bf16.mxu1 %v5780_v25  ;;  %v5908_v23 = vshrl.u32 %v4722_v24, 16  ;;  %v5911_v38 = vshll.u32 %v4722_v24, 16  ;;  %v5852_v51 = vsel %vm1403_vm15, %v5788_v7, %v5851_v40  ;;  %v4918_v7 = vshll.u32 %v12109_v8, 16 }
 0x3d8   : > { %v8602_v25 = vpop.f32.mrb[164].mxu0  ;;  %v5964_v1 = vrot.slane %v5962_v41, 3 }
 0x3d9   : > { %v8603_v29 = vpop.f32.mrb[165].mxu0  ;;  %v5910_v12 = vrot.slane %v5908_v23, 3 }
 0x3da   : > { %v12454_v36 = vadd.f32 %v8603_v29, %v8602_v25  ;;  %v8605_v37 = vpop.f32.mrb[166].mxu0  ;;  %v5913_v25 = vrot.slane %v5911_v38, 4  ;;  %v13563_v29 = vld [vmem:[#allocation26_spill] sm:$0xff] }
 0x3db   : > { %v8606_v24 = vpop.f32.mrb[167].mxu0 }
 0x3dc   : > { %7371 = vmatmul.mubr.bf16.gmra.mrb[0].mxu0 %v5789_v35  ;;  %v13559_v35 = vld [vmem:[#allocation63_spill] sm:$0xff]  ;;  %v12463_v63 = vadd.f32 %v8606_v24, %v8605_v37  ;;  %v5906_v37 = vsel %vm1403_vm15, %v5842_v3, %v5905_v22  ;;  %v5914_v24 = vor.u32 %v5913_v25, %v5910_v12 }
 0x3dd   : > { %7378 = vmatprep.mubr.bf16.mxu0 %v13558_v27  ;;  %vm13560_vm4 = vcmp.ne.s16.totalorder %v13559_v35, 0  ;;  %v5971_v35 = vshrl.u32 %v4723_v9, 16 }
 0x3de   : > { %7210 = vmatmul.mubr.bf16.gmra.mrb[224].mxu1 %v13550_v49  ;;  %v4708_v61 = vsel %vm13560_vm4, %v12101_v6, 0  ;;  %v5965_v49 = vshll.u32 %v4968_v50, 16  ;;  %v8490_v11 = vpop.f32.mrb[132].mxu1  ;;  %v5915_v12 = vsel %vm1403_vm15, %v5851_v40, %v5914_v24  ;;  %vm13582_vm4 = vcmp.ne.s16.totalorder %v13406_v60, 0 }
 0x3df   : > { %7217 = vmatprep.mubr.bf16.mxu1 %v5843_v54  ;;  %v4969_v54 = vrot.slane %v4708_v61, 1  ;;  %v8491_v13 = vpop.f32.mrb[133].mxu1  ;;  %v5973_v41 = vrot.slane %v5971_v35, 3  ;;  %v4736_v62 = vsel %vm13582_vm4, %v12010_v48, 0 }
 0x3e0   : > { %v5967_v50 = vrot.slane %v5965_v49, 4  ;;  %v12470_v38 = vadd.f32 %v8491_v13, %v8490_v11  ;;  %v8493_v44 = vpop.f32.mrb[134].mxu1  ;;  %v5976_v49 = vrot.slane %v5974_v5, 4  ;;  %v4920_v11 = vrot.slane %v4918_v7, 1 }
 0x3e1   : > { %v4970_v23 = vsel %vm1798_vm6, %v4967_v14, %v4969_v54  ;;  %v8494_v0 = vpop.f32.mrb[135].mxu1  ;;  %v4922_v5 = vshrl.u32 %v12109_v8, 16 }
 0x3e2   : > { %v12480_v3 = vadd.f32 %v8494_v0, %v8493_v44  ;;  %v5968_v9 = vor.u32 %v5967_v50, %v5964_v1  ;;  %v6025_v14 = vshrl.u32 %v4970_v23, 16  ;;  %v6028_v13 = vshll.u32 %v4970_v23, 16 }
 0x3e3   : > { %v5977_v50 = vor.u32 %v5976_v49, %v5973_v41  ;;  %v12493_v46 = vor.u32 %v4922_v5, %v4920_v11  ;;  %v12503_v49 = vld [vmem:[%s13006_s4] ss:$0 sm:$0xff] }
 0x3e4   : > { %7379 = vmatmul.mubr.bf16.gmra.mrb[4].mxu0 %v5852_v51  ;;  %v12475_v51 = vsel %vm1561_vm14, %v12104_v18, 0  ;;  %v5969_v1 = vsel %vm1403_vm15, %v5905_v22, %v5968_v9  ;;  %v6027_v23 = vrot.slane %v6025_v14, 3  ;;  %v6030_v7 = vrot.slane %v6028_v13, 4 }
 0x3e5   : > { %7386 = vmatprep.mubr.bf16.mxu0 %v13563_v29  ;;  %v4971_v25 = vrot.slane %v12475_v51, 1 }
 0x3e6   : > { %7218 = vmatmul.mubr.bf16.gmra.mrb[228].mxu1 %v13554_v26  ;;  %v4724_v26 = vsel %vm13566_vm11, %v12101_v6, 0  ;;  %v6031_v5 = vor.u32 %v6030_v7, %v6027_v23 }
 0x3e7   : > { %7225 = vmatprep.mubr.bf16.mxu1 %v5906_v37  ;;  %v4921_v37 = vsel %vm1647_vm8, %v12296_v39, %v4920_v11  ;;  %v6034_v35 = vshrl.u32 %v4724_v26, 16  ;;  %v6037_v17 = vshll.u32 %v4724_v26, 16  ;;  %v4972_v61 = vsel %vm1798_vm6, %v4969_v54, %v4971_v25 }
 0x3e8   : > { %v8608_v44 = vpop.f32.mrb[168].mxu0  ;;  %v6106_v40 = vshrl.u32 %v4921_v37, 16  ;;  %v6109_v51 = vshll.u32 %v4921_v37, 16  ;;  %v5978_v54 = vsel %vm1403_vm15, %v5914_v24, %v5977_v50  ;;  %v6088_v14 = vshrl.u32 %v4972_v61, 16 }
 0x3e9   : > { %v8609_v0 = vpop.f32.mrb[169].mxu0  ;;  %v6036_v26 = vrot.slane %v6034_v35, 3  ;;  %v6039_v28 = vrot.slane %v6037_v17, 4  ;;  %v6091_v13 = vshll.u32 %v4972_v61, 16  ;;  %v6826_v24 = vadd.f32 %v12446_v59, %v12503_v49 }
 0x3ea   : > { %v8611_v39 = vpop.f32.mrb[170].mxu0  ;;  %v6108_v35 = vrot.slane %v6106_v40, 3  ;;  %v6111_v17 = vrot.slane %v6109_v51, 4  ;;  %v4726_v40 = vsel %vm1177_vm12, %v12109_v8, 0  ;;  %v6090_v51 = vrot.slane %v6088_v14, 3 }
 0x3eb   : > { %v8612_v6 = vpop.f32.mrb[171].mxu0  ;;  %v12517_v61 = vor.u32 %v6039_v28, %v6036_v26  ;;  %v6829_v28 = vadd.f32 %v12448_v32, %v12503_v49  ;;  %v6834_v26 = vadd.f32 %v12470_v38, %v12503_v49  ;;  %v6837_v32 = vadd.f32 %v12480_v3, %v12503_v49 }
 0x3ec   : > { %7387 = vmatmul.mubr.bf16.gmra.mrb[8].mxu0 %v5915_v12  ;;  %v12490_v12 = vadd.f32 %v8609_v0, %v8608_v44  ;;  %v12495_v22 = vadd.f32 %v8612_v6, %v8611_v39  ;;  %v8496_v41 = vpop.f32.mrb[136].mxu1  ;;  %v4725_v6 = vsel %vm1176_vm0, %v12104_v18, 0  ;;  %vm13574_vm0 = vcmp.ne.s16.totalorder %v13527_v55, 0 }
 0x3ed   : > { %7394 = vmatprep.mubr.bf16.mxu0 %v12284_v4  ;;  %v8497_v11 = vpop.f32.mrb[137].mxu1  ;;  %v6097_v23 = vshrl.u32 %v4725_v6, 16  ;;  %v12549_v3 = vadd.f32 %v12429_v56, %v6829_v28 }
 0x3ee   : > { %7226 = vmatmul.mubr.bf16.gmra.mrb[232].mxu1 %v13558_v27  ;;  %v4710_v27 = vsel %vm1562_vm7, %v12109_v8, 0  ;;  %v8498_v44 = vadd.f32 %v8497_v11, %v8496_v41  ;;  %v8499_v43 = vpop.f32.mrb[138].mxu1  ;;  %v6093_v41 = vrot.slane %v6091_v13, 4  ;;  %v12524_v11 = vor.u32 %v6111_v17, %v6108_v35 }
 0x3ef   : > { %7233 = vmatprep.mubr.bf16.mxu1 %v5969_v1  ;;  %v13568_v1 = vld [vmem:[#allocation12_spill] sm:$0xff]  ;;  %v8500_v39 = vpop.f32.mrb[139].mxu1  ;;  %v12512_v53 = vrot.slane %v4710_v27, 1  ;;  %v6032_v27 = vsel %vm1403_vm15, %v5968_v9, %v6031_v5  ;;  %v6160_v13 = vshrl.u32 %v4726_v40, 16  ;;  %v6099_v9 = vrot.slane %v6097_v23, 3 }
 0x3f0   : > { %v4975_v0 = vsel %vm1647_vm8, %v12493_v46, %v13568_v1  ;;  %v8501_v7 = vadd.f32 %v8500_v39, %v8499_v43  ;;  %v12535_v35 = vadd.f32 %v12423_v21, %v6826_v24  ;;  %v6094_v17 = vor.u32 %v6093_v41, %v6090_v51 }
 0x3f1   : > { %v6169_v59 = vshrl.u32 %v4975_v0, 16  ;;  %v6172_v37 = vshll.u32 %v4975_v0, 16  ;;  %v4974_v14 = vsel %vm1798_vm6, %v4971_v25, %v12512_v53  ;;  %v12544_v25 = vsel %vm1403_vm15, %v12298_v2, %v12524_v11 }
 0x3f2   : > { %v6154_v23 = vshll.u32 %v4974_v14, 16  ;;  %v12552_v51 = vadd.f32 %v12454_v36, %v6834_v26  ;;  %v6163_v41 = vshll.u32 %v4726_v40, 16  ;;  %v6095_v2 = vsel %vm1403_vm15, %v6031_v5, %v6094_v17 }
 0x3f3   : > { %v6171_v39 = vrot.slane %v6169_v59, 3  ;;  %v6174_v21 = vrot.slane %v6172_v37, 4  ;;  %v6842_v37 = vadd.f32 %v8498_v44, %v12503_v49  ;;  %v6162_v26 = vrot.slane %v6160_v13, 3  ;;  %v13570_v13 = vld [vmem:[#allocation16_spill] sm:$0xff] }
 0x3f4   : > { %7395 = vmatmul.mubr.bf16.gmra.mrb[12].mxu0 %v5978_v54  ;;  %v6100_v54 = vshll.u32 %v4725_v6, 16  ;;  %v8614_v34 = vpop.f32.mrb[172].mxu0  ;;  %v6156_v28 = vrot.slane %v6154_v23, 4  ;;  %vm13569_vm8 = vcmp.ne.s16.totalorder %v13518_v16, 0  ;;  %v6845_v44 = vadd.f32 %v8501_v7, %v12503_v49 }
 0x3f5   : > { %7402 = vmatprep.mubr.bf16.mxu0 %v12306_v47  ;;  %v8615_v6 = vpop.f32.mrb[173].mxu0  ;;  %v6175_v40 = vor.u32 %v6174_v21, %v6171_v39  ;;  %v4728_v5 = vsel %vm13569_vm8, %v11790_v15, 0  ;;  %vm13571_vm12 = vcmp.ne.s16.totalorder %v13570_v13, 0 }
 0x3f6   : > { %7234 = vmatmul.mubr.bf16.gmra.mrb[236].mxu1 %v13563_v29  ;;  %v6041_v29 = vsel %vm1403_vm15, %v5977_v50, %v12517_v61  ;;  %v6102_v43 = vrot.slane %v6100_v54, 4  ;;  %v12539_v38 = vadd.f32 %v8615_v6, %v8614_v34  ;;  %v8617_v0 = vpop.f32.mrb[174].mxu0  ;;  %v6151_v50 = vshrl.u32 %v4974_v14, 16 }
 0x3f7   : > { %7241 = vmatprep.mubr.bf16.mxu1 %v6032_v27  ;;  %v8618_v27 = vpop.f32.mrb[175].mxu0  ;;  %v12557_v14 = vadd.f32 %v12463_v63, %v6837_v32  ;;  %v6232_v63 = vshrl.u32 %v12512_v53, 16  ;;  %v6235_v32 = vshll.u32 %v12512_v53, 16  ;;  %v4993_v39 = vrot.slane %v4728_v5, 1 }
 0x3f8   : > { %v12546_v24 = vadd.f32 %v8618_v27, %v8617_v0  ;;  %v6103_v59 = vor.u32 %v6102_v43, %v6099_v9  ;;  %v6153_v56 = vrot.slane %v6151_v50, 3  ;;  %v6165_v9 = vrot.slane %v6163_v41, 4 }
 0x3f9   : > { %v8502_v54 = vpop.f32.mrb[140].mxu1  ;;  %v4727_v0 = vsel %vm13571_vm12, %v11758_v42, 0  ;;  %v12576_v50 = vadd.f32 %v12490_v12, %v6842_v37  ;;  %v6234_v27 = vrot.slane %v6232_v63, 3 }
 0x3fa   : > { %v8503_v34 = vpop.f32.mrb[141].mxu1  ;;  %v6104_v16 = vsel %vm1403_vm15, %v12517_v61, %v6103_v59  ;;  %v6157_v15 = vor.u32 %v6156_v28, %v6153_v56  ;;  %v6166_v53 = vor.u32 %v6165_v9, %v6162_v26  ;;  %v4992_v21 = vrot.slane %v4727_v0, 1 }
 0x3fb   : > { %v8505_v36 = vpop.f32.mrb[142].mxu1  ;;  %v6237_v61 = vrot.slane %v6235_v32, 4  ;;  %v6223_v26 = vshrl.u32 %v12493_v46, 16 }
 0x3fc   : > { %7403 = vmatmul.mubr.bf16.gmra.mrb[16].mxu0 %v6041_v29  ;;  %v8504_v29 = vadd.f32 %v8503_v34, %v8502_v54  ;;  %v8506_v6 = vpop.f32.mrb[143].mxu1  ;;  %v13572_v54 = vld [vmem:[#allocation21_spill] sm:$0xff]  ;;  %v6158_v34 = vsel %vm1403_vm15, %v6094_v17, %v6157_v15  ;;  %v4994_v28 = vsel %vm1798_vm6, %v4992_v21, %v4993_v39 }
 0x3fd   : > { %7410 = vmatprep.mubr.bf16.mxu0 %v12544_v25  ;;  %v8507_v43 = vadd.f32 %v8506_v6, %v8505_v36  ;;  %v6238_v5 = vor.u32 %v6237_v61, %v6234_v27  ;;  %v5288_v63 = vshrl.u32 %v4994_v28, 16  ;;  %v13576_v27 = vld [vmem:[#allocation27_spill] sm:$0xff] }
 0x3fe   : > { %7242 = vmatmul.mubr.bf16.gmra.mrb[240].mxu1 %v12284_v4  ;;  %v4729_v4 = vsel %vm1548_vm13, %v11793_v57, 0  ;;  %v6176_v57 = vsel %vm1403_vm15, %v12524_v11, %v6175_v40  ;;  %vm13573_vm13 = vcmp.ne.s16.totalorder %v13572_v54, 0  ;;  %v6850_v37 = vadd.f32 %v8504_v29, %v12503_v49 }
 0x3ff   : > { %7249 = vmatprep.mubr.bf16.mxu1 %v6095_v2  ;;  %v4995_v7 = vrot.slane %v4729_v4, 1  ;;  %v4730_v12 = vsel %vm13573_vm13, %v11815_v58, 0  ;;  %v12586_v2 = vadd.f32 %v12495_v22, %v6845_v44  ;;  %v4731_v58 = vsel %vm13574_vm0, %v11820_v10, 0  ;;  %v13575_v10 = vld [vmem:[#allocation40_spill] sm:$0xff] }
 0x400   : > { %v6226_v22 = vshll.u32 %v12493_v46, 16  ;;  %v4997_v17 = vrot.slane %v4730_v12, 1  ;;  %v6853_v29 = vadd.f32 %v8507_v43, %v12503_v49  ;;  %v5291_v4 = vshll.u32 %v4994_v28, 16 }
 0x401   : > { %v8620_v52 = vpop.f32.mrb[176].mxu0  ;;  %v4996_v6 = vsel %vm1798_vm6, %v4993_v39, %v4995_v7  ;;  %v4999_v0 = vrot.slane %v4731_v58, 1  ;;  %v6241_v55 = vsel %vm1403_vm15, %v6175_v40, %v13575_v10  ;;  %v6225_v39 = vrot.slane %v6223_v26, 3 }
 0x402   : > { %v8621_v23 = vpop.f32.mrb[177].mxu0  ;;  %v5296_v32 = vshrl.u32 %v4996_v6, 16  ;;  %v5299_v13 = vshll.u32 %v4996_v6, 16  ;;  %v6239_v43 = vsel %vm1403_vm15, %v6157_v15, %v6238_v5  ;;  %vm13577_vm7 = vcmp.ne.s16.totalorder %v13576_v27, 0 }
 0x403   : > { %v12580_v42 = vadd.f32 %v8621_v23, %v8620_v52  ;;  %v8623_v41 = vpop.f32.mrb[178].mxu0  ;;  %v6228_v52 = vrot.slane %v6226_v22, 4  ;;  %v4998_v23 = vsel %vm1798_vm6, %v4995_v7, %v4997_v17  ;;  %v4732_v21 = vsel %vm13577_vm7, %v11853_v33, 0  ;;  %v13578_v7 = vld [vmem:[#allocation13_spill] sm:$0xff] }
 0x404   : > { %7411 = vmatmul.mubr.bf16.gmra.mrb[20].mxu0 %v6104_v16  ;;  %v8624_v56 = vpop.f32.mrb[179].mxu0  ;;  %v12603_v16 = vadd.f32 %v12539_v38, %v6850_v37  ;;  %v5293_v61 = vrot.slane %v5291_v4, 4  ;;  %v12613_v54 = vadd.f32 %v12546_v24, %v6853_v29  ;;  %v5298_v12 = vrot.slane %v5296_v32, 3 }
 0x405   : > { %7418 = vmatprep.mubr.bf16.mxu0 %v6176_v57  ;;  %v12592_v36 = vadd.f32 %v8624_v56, %v8623_v41  ;;  %v5290_v41 = vrot.slane %v5288_v63, 3  ;;  %v5301_v15 = vrot.slane %v5299_v13, 4  ;;  %v6240_v37 = vsel %vm1403_vm15, %v6166_v53, %v13578_v7 }
 0x406   : > { %7250 = vmatmul.mubr.bf16.gmra.mrb[244].mxu1 %v12306_v47  ;;  %v6167_v47 = vsel %vm1403_vm15, %v6103_v59, %v6166_v53  ;;  %v8508_v9 = vpop.f32.mrb[144].mxu1  ;;  %v5359_v33 = vshrl.u32 %v4998_v23, 16  ;;  %v5362_v28 = vshll.u32 %v4998_v23, 16  ;;  %v5001_v26 = vrot.slane %v4732_v21, 1 }
 0x407   : > { %7257 = vmatprep.mubr.bf16.mxu1 %v6158_v34  ;;  %v8509_v44 = vpop.f32.mrb[145].mxu1  ;;  %v5000_v34 = vsel %vm1798_vm6, %v4997_v17, %v4999_v0  ;;  %v4733_v24 = vsel %vm13579_vm5, %v11858_v45, 0  ;;  %v6229_v58 = vor.u32 %v6228_v52, %v6225_v39  ;;  %v5294_v5 = vor.u32 %v5293_v61, %v5290_v41 }
 0x408   : > { %v8510_v59 = vadd.f32 %v8509_v44, %v8508_v9  ;;  %v8511_v46 = vpop.f32.mrb[146].mxu1  ;;  %v5425_v22 = vshll.u32 %v5000_v34, 16  ;;  %v5302_v9 = vor.u32 %v5301_v15, %v5298_v12  ;;  %v5003_v45 = vrot.slane %v4733_v24, 1 }
 0x409   : > { %v8512_v57 = vpop.f32.mrb[147].mxu1  ;;  %v6230_v63 = vsel %vm1403_vm15, %v12524_v11, %v6229_v58  ;;  %v5361_v44 = vrot.slane %v5359_v33, 3  ;;  %v5364_v32 = vrot.slane %v5362_v28, 4  ;;  %v4734_v23 = vsel %vm13580_vm2, %v11909_v30, 0 }
 0x40a   : > { %v8513_v38 = vadd.f32 %v8512_v57, %v8511_v46  ;;  %v6858_v40 = vadd.f32 %v8510_v59, %v12503_v49  ;;  %v5002_v59 = vsel %vm1798_vm6, %v4999_v0, %v5001_v26  ;;  %v5427_v57 = vrot.slane %v5425_v22, 4 }
 0x40b   : > { %v5303_v52 = vsel %vm1403_vm15, %v5294_v5, %v5302_v9  ;;  %v5004_v0 = vsel %vm1798_vm6, %v5001_v26, %v5003_v45  ;;  %v5488_v41 = vshll.u32 %v5002_v59, 16  ;;  %v5365_v61 = vor.u32 %v5364_v32, %v5361_v44 }
 0x40c   : > { %7419 = vmatmul.mubr.bf16.gmra.mrb[24].mxu0 %v6167_v47  ;;  %v5422_v47 = vshrl.u32 %v5000_v34, 16  ;;  %v12625_v53 = vadd.f32 %v12580_v42, %v6858_v40  ;;  %v5005_v15 = vrot.slane %v4734_v23, 1  ;;  %v5548_v31 = vshrl.u32 %v5004_v0, 16 }
 0x40d   : > { %7426 = vmatprep.mubr.bf16.mxu0 %v6241_v55  ;;  %v8626_v56 = vpop.f32.mrb[180].mxu0  ;;  %v5551_v30 = vshll.u32 %v5004_v0, 16  ;;  %v5490_v24 = vrot.slane %v5488_v41, 4 }
 0x40e   : > { %7258 = vmatmul.mubr.bf16.gmra.mrb[248].mxu1 %v12544_v25  ;;  %v6861_v25 = vadd.f32 %v8513_v38, %v12503_v49  ;;  %v8627_v6 = vpop.f32.mrb[181].mxu0  ;;  %v4735_v38 = vsel %vm13581_vm3, %v11914_v20, 0  ;;  %v5366_v20 = vsel %vm1403_vm15, %v5302_v9, %v5365_v61  ;;  %v5550_v5 = vrot.slane %v5548_v31, 3 }
 0x40f   : > { %7265 = vmatprep.mubr.bf16.mxu1 %v6239_v43  ;;  %v8628_v29 = vadd.f32 %v8627_v6, %v8626_v56  ;;  %v8629_v17 = vpop.f32.mrb[182].mxu0  ;;  %v5424_v43 = vrot.slane %v5422_v47, 3  ;;  %v5007_v7 = vrot.slane %v4735_v38, 1  ;;  %v5006_v47 = vsel %vm1798_vm6, %v5003_v45, %v5005_v15 }
 0x410   : > { %v8630_v4 = vpop.f32.mrb[183].mxu0  ;;  %v8514_v19 = vpop.f32.mrb[148].mxu1  ;;  %v12631_v42 = vadd.f32 %v12592_v36, %v6861_v25  ;;  %v5485_v36 = vshrl.u32 %v5002_v59, 16  ;;  %v5611_v32 = vshrl.u32 %v5006_v47, 16  ;;  %v13583_v59 = vld [vmem:[#allocation52_spill] sm:$0xff] }
 0x411   : > { %v8631_v13 = vadd.f32 %v8630_v4, %v8629_v17  ;;  %v8515_v55 = vpop.f32.mrb[149].mxu1  ;;  %v5428_v12 = vor.u32 %v5427_v57, %v5424_v43  ;;  %v5008_v4 = vsel %vm1798_vm6, %v5005_v15, %v5007_v7 }
 0x412   : > { %v8516_v46 = vadd.f32 %v8515_v55, %v8514_v19  ;;  %v8517_v39 = vpop.f32.mrb[150].mxu1  ;;  %v5487_v26 = vrot.slane %v5485_v36, 3  ;;  %v5009_v19 = vrot.slane %v4736_v62, 1  ;;  %v5614_v55 = vshll.u32 %v5006_v47, 16 }
 0x413   : > { %v8518_v11 = vpop.f32.mrb[151].mxu1  ;;  %v5429_v25 = vsel %vm1403_vm15, %v5365_v61, %v5428_v12  ;;  %v5674_v43 = vshrl.u32 %v5008_v4, 16  ;;  %v5677_v57 = vshll.u32 %v5008_v4, 16  ;;  %v5613_v61 = vrot.slane %v5611_v32, 3 }
 0x414   : > { %7427 = vmatmul.mubr.bf16.gmra.mrb[28].mxu0 %v6240_v37  ;;  %v6866_v27 = vadd.f32 %v8516_v46, %v12503_v49  ;;  %v8519_v21 = vadd.f32 %v8518_v11, %v8517_v39  ;;  %v5491_v9 = vor.u32 %v5490_v24, %v5487_v26  ;;  %v13584_v46 = vld [vmem:[#allocation47_spill] sm:$0xff] }
 0x415   : > { %vm13585_vm1 = vcmp.ne.s16.totalorder %v13584_v46, 0 }
 0x416   : > { %7266 = vmatmul.mubr.bf16.gmra.mrb[252].mxu1 %v6230_v63  ;;  %v6869_v40 = vadd.f32 %v8519_v21, %v12503_v49  ;;  %v12643_v37 = vadd.f32 %v8628_v29, %v6866_v27  ;;  %v5553_v63 = vrot.slane %v5551_v30, 4  ;;  %v4737_v45 = vsel %vm13585_vm1, %v13583_v59, 0 }
 0x417   : > { %9004 = vmatprep.mubr.bf16.mxu1 %v5303_v52  ;;  %v5010_v21 = vsel %vm1798_vm6, %v5007_v7, %v5009_v19  ;;  %v5011_v0 = vrot.slane %v4737_v45, 1  ;;  %v5492_v15 = vsel %vm1403_vm15, %v5428_v12, %v5491_v9  ;;  %v5676_v30 = vrot.slane %v5674_v43, 3 }
 0x418   : > { %v8632_v34 = vpop.f32.mrb[184].mxu0  ;;  %v12651_v22 = vadd.f32 %v8631_v13, %v6869_v40  ;;  %v5554_v11 = vor.u32 %v5553_v63, %v5550_v5  ;;  %v5616_v40 = vrot.slane %v5614_v55, 4  ;;  %v5737_v62 = vshrl.u32 %v5010_v21, 16 }
 0x419   : > { %v8633_v56 = vpop.f32.mrb[185].mxu0  ;;  %v5740_v12 = vshll.u32 %v5010_v21, 16  ;;  %v5012_v47 = vsel %vm1798_vm6, %v5009_v19, %v5011_v0 }
 0x41a   : > { %v8634_v33 = vadd.f32 %v8633_v56, %v8632_v34  ;;  %v8635_v28 = vpop.f32.mrb[186].mxu0  ;;  %v5679_v56 = vrot.slane %v5677_v57, 4  ;;  %v5555_v26 = vsel %vm1403_vm15, %v5491_v9, %v5554_v11  ;;  %v5617_v63 = vor.u32 %v5616_v40, %v5613_v61  ;;  %v13591_v61 = vld [vmem:[#allocation65_spill] sm:$0xff] }
 0x41b   : > { %v8636_v6 = vpop.f32.mrb[187].mxu0  ;;  %v8520_v58 = vpop.f32.mrb[152].mxu1  ;;  %v5800_v55 = vshrl.u32 %v5012_v47, 16  ;;  %v5803_v59 = vshll.u32 %v5012_v47, 16  ;;  %v5742_v19 = vrot.slane %v5740_v12, 4 }
 0x41c   : > { %v8637_v29 = vadd.f32 %v8636_v6, %v8635_v28  ;;  %v8521_v17 = vpop.f32.mrb[153].mxu1  ;;  %v5680_v9 = vor.u32 %v5679_v56, %v5676_v30  ;;  %v5618_v57 = vsel %vm1403_vm15, %v5554_v11, %v5617_v63 }
 0x41d   : > { %v8522_v60 = vadd.f32 %v8521_v17, %v8520_v58  ;;  %v8523_v48 = vpop.f32.mrb[154].mxu1  ;;  %v13589_v17 = vld [vmem:[#allocation60_spill] sm:$0xff]  ;;  %v5805_v56 = vrot.slane %v5803_v59, 4 }
 0x41e   : > { %9005 = vmatmul.mubr.bf16.vlgmr.msra.gmra.mrb[0].mxu1 %v5366_v20  ;;  %v8524_v44 = vpop.f32.mrb[155].mxu1  ;;  %v13587_v20 = vld [vmem:[#allocation51_spill] sm:$0xff] }
 0x41f   : > { %9008 = vmatprep.mubr.bf16.mxu1 %v5429_v25  ;;  %v6874_v13 = vadd.f32 %v8522_v60, %v12503_v49  ;;  %v8525_v39 = vadd.f32 %v8524_v44, %v8523_v48  ;;  %vm13588_vm11 = vcmp.ne.s16.totalorder %v13587_v20, 0 }
 0x420   : > { %v8638_v52 = vpop.f32.mrb[188].mxu0 }
 0x421   : > { %v6877_v23 = vadd.f32 %v8525_v39, %v12503_v49  ;;  %v8639_v27 = vpop.f32.mrb[189].mxu0  ;;  %v12660_v38 = vadd.f32 %v8634_v33, %v6874_v13  ;;  %v13586_v33 = vld [vmem:[#allocation56_spill] sm:$0xff]  ;;  %v5739_v39 = vrot.slane %v5737_v62, 3 }
 0x422   : > { %v8640_v36 = vadd.f32 %v8639_v27, %v8638_v52  ;;  %v8641_v41 = vpop.f32.mrb[190].mxu0  ;;  %v4738_v25 = vsel %vm13588_vm11, %v13586_v33, 0  ;;  %v5681_v27 = vsel %vm1403_vm15, %v5617_v63, %v5680_v9 }
 0x423   : > { %v8642_v34 = vpop.f32.mrb[191].mxu0  ;;  %v8526_v31 = vpop.f32.mrb[156].mxu1  ;;  %v12663_v28 = vadd.f32 %v8637_v29, %v6877_v23  ;;  %v4739_v29 = vsel %vm1558_vm9, %v13589_v17, 0  ;;  %v5013_v44 = vrot.slane %v4738_v25, 1  ;;  %v13593_v25 = vld [vmem:[#allocation63_spill] sm:$0xff] }
 0x424   : > { %v8643_v24 = vadd.f32 %v8642_v34, %v8641_v41  ;;  %v8527_v7 = vpop.f32.mrb[157].mxu1  ;;  %v5015_v46 = vrot.slane %v4739_v29, 1  ;;  %vm13594_vm9 = vcmp.ne.s16.totalorder %v13593_v25, 0 }
 0x425   : > { %v8528_v6 = vadd.f32 %v8527_v7, %v8526_v31  ;;  %v8529_v58 = vpop.f32.mrb[158].mxu1  ;;  %v5014_v41 = vsel %vm1798_vm6, %v5011_v0, %v5013_v44 }
 0x426   : > { %9009 = vmatmul.mubr.bf16.gmra.mrb[4].mxu1 %v5492_v15  ;;  %v8530_v4 = vpop.f32.mrb[159].mxu1  ;;  %v4740_v15 = vsel %vm1559_vm10, %v13591_v61, 0  ;;  %v5016_v11 = vsel %vm1798_vm6, %v5013_v44, %v5015_v46  ;;  %v5863_v20 = vshrl.u32 %v5014_v41, 16 }
 0x427   : > { %9012 = vmatprep.mubr.bf16.mxu1 %v5555_v26  ;;  %v6882_v60 = vadd.f32 %v8528_v6, %v12503_v49  ;;  %v8531_v48 = vadd.f32 %v8530_v4, %v8529_v58  ;;  %v5743_v26 = vor.u32 %v5742_v19, %v5739_v39  ;;  %v5017_v0 = vrot.slane %v4740_v15, 1 }
 0x428   : > { %v4741_v6 = vsel %vm13594_vm9, %v12104_v18, 0  ;;  %v5866_v58 = vshll.u32 %v5014_v41, 16  ;;  %v5926_v12 = vshrl.u32 %v5016_v11, 16  ;;  %v5929_v47 = vshll.u32 %v5016_v11, 16 }
 0x429   : > { %v8644_v32 = vpop.f32.mrb[192].mxu0  ;;  %v6885_v45 = vadd.f32 %v8531_v48, %v12503_v49  ;;  %v12675_v43 = vadd.f32 %v8640_v36, %v6882_v60  ;;  %v5802_v36 = vrot.slane %v5800_v55, 3  ;;  %v5744_v63 = vsel %vm1403_vm15, %v5680_v9, %v5743_v26 }
 0x42a   : > { %v8645_v13 = vpop.f32.mrb[193].mxu0  ;;  %v5019_v60 = vrot.slane %v4741_v6, 1  ;;  %v5018_v55 = vsel %vm1798_vm6, %v5015_v46, %v5017_v0  ;;  %v5928_v39 = vrot.slane %v5926_v12, 3  ;;  %v5931_v19 = vrot.slane %v5929_v47, 4 }
 0x42b   : > { %v8646_v52 = vadd.f32 %v8645_v13, %v8644_v32  ;;  %v8647_v23 = vpop.f32.mrb[194].mxu0  ;;  %v12683_v34 = vadd.f32 %v8643_v24, %v6885_v45  ;;  %v5806_v29 = vor.u32 %v5805_v56, %v5802_v36  ;;  %v5865_v32 = vrot.slane %v5863_v20, 3 }
 0x42c   : > { %v8648_v21 = vpop.f32.mrb[195].mxu0  ;;  %v5868_v13 = vrot.slane %v5866_v58, 4  ;;  %v5020_v61 = vsel %vm1798_vm6, %v5017_v0, %v5019_v60  ;;  %v5992_v36 = vshll.u32 %v5018_v55, 16 }
 0x42d   : > { %v8649_v31 = vadd.f32 %v8648_v21, %v8647_v23  ;;  %v8532_v30 = vpop.f32.mrb[160].mxu1  ;;  %v4742_v23 = vsel %vm1561_vm14, %v12109_v8, 0  ;;  %v5807_v9 = vsel %vm1403_vm15, %v5743_v26, %v5806_v29  ;;  %v5932_v8 = vor.u32 %v5931_v19, %v5928_v39 }
 0x42e   : > { %9013 = vmatmul.mubr.bf16.gmra.mrb[8].mxu1 %v5618_v57  ;;  %v8533_v7 = vpop.f32.mrb[161].mxu1  ;;  %v5021_v56 = vrot.slane %v4742_v23, 1  ;;  %v5869_v11 = vor.u32 %v5868_v13, %v5865_v32  ;;  %v6055_v20 = vshll.u32 %v5020_v61, 16  ;;  %v5994_v58 = vrot.slane %v5992_v36, 4 }
 0x42f   : > { %9016 = vmatprep.mubr.bf16.mxu1 %v5681_v27  ;;  %v8534_v62 = vadd.f32 %v8533_v7, %v8532_v30  ;;  %v8535_v33 = vpop.f32.mrb[162].mxu1  ;;  %v5989_v30 = vshrl.u32 %v5018_v55, 16 }
 0x430   : > { %v8536_v24 = vpop.f32.mrb[163].mxu1  ;;  %v5870_v12 = vsel %vm1403_vm15, %v5806_v29, %v5869_v11 }
 0x431   : > { %v6890_v17 = vadd.f32 %v8534_v62, %v12503_v49  ;;  %v8537_v5 = vadd.f32 %v8536_v24, %v8535_v33  ;;  %v6052_v33 = vshrl.u32 %v5020_v61, 16  ;;  %v5991_v24 = vrot.slane %v5989_v30, 3 }
 0x432   : > { %v8650_v4 = vpop.f32.mrb[196].mxu0 }
 0x433   : > { %v6893_v48 = vadd.f32 %v8537_v5, %v12503_v49  ;;  %v8651_v44 = vpop.f32.mrb[197].mxu0  ;;  %v12693_v59 = vadd.f32 %v8646_v52, %v6890_v17  ;;  %v5022_v5 = vsel %vm1798_vm6, %v5019_v60, %v5021_v56  ;;  %v5995_v13 = vor.u32 %v5994_v58, %v5991_v24 }
 0x434   : > { %v8652_v18 = vadd.f32 %v8651_v44, %v8650_v4  ;;  %v8653_v45 = vpop.f32.mrb[198].mxu0  ;;  %v6057_v44 = vrot.slane %v6055_v20, 4  ;;  %v6115_v57 = vshrl.u32 %v5022_v5, 16  ;;  %v6118_v60 = vshll.u32 %v5022_v5, 16 }
 0x435   : > { %v8654_v27 = vpop.f32.mrb[199].mxu0  ;;  %v8538_v21 = vpop.f32.mrb[164].mxu1  ;;  %v12699_v41 = vadd.f32 %v8649_v31, %v6893_v48  ;;  %v6054_v48 = vrot.slane %v6052_v33, 3  ;;  %v5996_v61 = vsel %vm1403_vm15, %v5932_v8, %v5995_v13 }
 0x436   : > { %9017 = vmatmul.mubr.bf16.gmra.mrb[12].mxu1 %v5744_v63  ;;  %v8655_v46 = vadd.f32 %v8654_v27, %v8653_v45  ;;  %v8539_v52 = vpop.f32.mrb[165].mxu1  ;;  %v5933_v63 = vsel %vm1403_vm15, %v5869_v11, %v5932_v8  ;;  %v6120_v36 = vrot.slane %v6118_v60, 4 }
 0x437   : > { %9020 = vmatprep.mubr.bf16.mxu1 %v5807_v9  ;;  %v8540_v40 = vadd.f32 %v8539_v52, %v8538_v21  ;;  %v8541_v15 = vpop.f32.mrb[166].mxu1  ;;  %v6058_v9 = vor.u32 %v6057_v44, %v6054_v48 }
 0x438   : > { %v8542_v7 = vpop.f32.mrb[167].mxu1 }
 0x439   : > { %v6898_v62 = vadd.f32 %v8540_v40, %v12503_v49  ;;  %v8543_v26 = vadd.f32 %v8542_v7, %v8541_v15 }
 0x43a   : > { %v8656_v31 = vpop.f32.mrb[200].mxu0 }
 0x43b   : > { %v6901_v25 = vadd.f32 %v8543_v26, %v12503_v49  ;;  %v8657_v6 = vpop.f32.mrb[201].mxu0  ;;  %v12704_v0 = vadd.f32 %v8652_v18, %v6898_v62  ;;  %v5023_v18 = vsel %vm1798_vm6, %v5021_v56, %v13568_v1  ;;  %v6117_v1 = vrot.slane %v6115_v57, 3 }
 0x43c   : > { %v8658_v47 = vadd.f32 %v8657_v6, %v8656_v31  ;;  %v8659_v17 = vpop.f32.mrb[202].mxu0  ;;  %v6178_v27 = vshrl.u32 %v5023_v18, 16  ;;  %v6181_v21 = vshll.u32 %v5023_v18, 16  ;;  %v6059_v62 = vsel %vm1403_vm15, %v5995_v13, %v6058_v9 }
 0x43d   : > { %v8660_v4 = vpop.f32.mrb[203].mxu0  ;;  %v12709_v32 = vadd.f32 %v8655_v46, %v6901_v25  ;;  %v6121_v24 = vor.u32 %v6120_v36, %v6117_v1 }
 0x43e   : > { %9021 = vmatmul.mubr.bf16.gmra.mrb[16].mxu1 %v5870_v12  ;;  %v8661_v55 = vadd.f32 %v8660_v4, %v8659_v17  ;;  %v8544_v45 = vpop.f32.mrb[168].mxu1  ;;  %v6180_v26 = vrot.slane %v6178_v27, 3  ;;  %v6183_v33 = vrot.slane %v6181_v21, 4 }
 0x43f   : > { %9024 = vmatprep.mubr.bf16.mxu1 %v5933_v63  ;;  %v8545_v29 = vpop.f32.mrb[169].mxu1  ;;  %v6122_v48 = vsel %vm1403_vm15, %v6058_v9, %v6121_v24 }
 0x440   : > { %v8546_v39 = vadd.f32 %v8545_v29, %v8544_v45  ;;  %v8547_v19 = vpop.f32.mrb[170].mxu1 }
 0x441   : > { %v8548_v23 = vpop.f32.mrb[171].mxu1 }
 0x442   : > { %v6906_v52 = vadd.f32 %v8546_v39, %v12503_v49  ;;  %v8549_v46 = vadd.f32 %v8548_v23, %v8547_v19 }
 0x444   : > { %v8662_v40 = vpop.f32.mrb[204].mxu0  ;;  %v6909_v15 = vadd.f32 %v8549_v46, %v12503_v49  ;;  %v12716_v56 = vadd.f32 %v8658_v47, %v6906_v52  ;;  %v6184_v47 = vor.u32 %v6183_v33, %v6180_v26 }
 0x445   : > { %v8663_v30 = vpop.f32.mrb[205].mxu0 }
 0x446   : > { %v8664_v11 = vadd.f32 %v8663_v30, %v8662_v40  ;;  %9025 = vmatmul.mubr.bf16.gmra.mrb[20].mxu1 %v5996_v61  ;;  %v8665_v7 = vpop.f32.mrb[206].mxu0  ;;  %v8550_v31 = vpop.f32.mrb[172].mxu1  ;;  %v12719_v25 = vadd.f32 %v8661_v55, %v6909_v15  ;;  %v6185_v29 = vsel %vm1403_vm15, %v6121_v24, %v6184_v47  ;;  %v6242_v61 = vsel %vm1403_vm15, %v6184_v47, %v13575_v10 }
 0x447   : > { %9028 = vmatprep.mubr.bf16.mxu1 %v6059_v62  ;;  %v8666_v20 = vpop.f32.mrb[207].mxu0  ;;  %v8551_v6 = vpop.f32.mrb[173].mxu1 }
 0x448   : > { %v8667_v8 = vadd.f32 %v8666_v20, %v8665_v7  ;;  %v8552_v58 = vadd.f32 %v8551_v6, %v8550_v31  ;;  %v8553_v12 = vpop.f32.mrb[174].mxu1 }
 0x449   : > { %v8554_v17 = vpop.f32.mrb[175].mxu1 }
 0x44a   : > { %v6914_v5 = vadd.f32 %v8552_v58, %v12503_v49  ;;  %v8555_v63 = vadd.f32 %v8554_v17, %v8553_v12 }
 0x44c   : > { %v8668_v4 = vpop.f32.mrb[208].mxu0  ;;  %v6917_v44 = vadd.f32 %v8555_v63, %v12503_v49  ;;  %v12724_v18 = vadd.f32 %v8664_v11, %v6914_v5 }
 0x44d   : > { %v8669_v45 = vpop.f32.mrb[209].mxu0 }
 0x44e   : > { %v8670_v55 = vadd.f32 %v8669_v45, %v8668_v4  ;;  %9029 = vmatmul.mubr.bf16.gmra.mrb[24].mxu1 %v6122_v48  ;;  %v8671_v13 = vpop.f32.mrb[210].mxu0  ;;  %v12727_v19 = vadd.f32 %v8667_v8, %v6917_v44 }
 0x44f   : > { %9032 = vmatprep.mubr.bf16.mxu1 %v6185_v29  ;;  %v8672_v39 = vpop.f32.mrb[211].mxu0  ;;  %v8556_v60 = vpop.f32.mrb[176].mxu1 }
 0x450   : > { %v8673_v57 = vadd.f32 %v8672_v39, %v8671_v13  ;;  %v8557_v23 = vpop.f32.mrb[177].mxu1 }
 0x451   : > { %v8558_v27 = vadd.f32 %v8557_v23, %v8556_v60  ;;  %v8559_v21 = vpop.f32.mrb[178].mxu1 }
 0x452   : > { %v8560_v9 = vpop.f32.mrb[179].mxu1 }
 0x453   : > { %v6922_v52 = vadd.f32 %v8558_v27, %v12503_v49  ;;  %v8561_v46 = vadd.f32 %v8560_v9, %v8559_v21 }
 0x454   : > { %v8674_v40 = vpop.f32.mrb[212].mxu0 }
 0x455   : > { %v6925_v15 = vadd.f32 %v8561_v46, %v12503_v49  ;;  %v8675_v30 = vpop.f32.mrb[213].mxu0  ;;  %v12733_v1 = vadd.f32 %v8670_v55, %v6922_v52 }
 0x456   : > { %9033 = vmatmul.mubr.bf16.gmra.mrb[28].mxu1 %v6242_v61  ;;  %v8676_v36 = vadd.f32 %v8675_v30, %v8674_v40  ;;  %v8677_v11 = vpop.f32.mrb[214].mxu0 }
 0x457   : > { %v8678_v7 = vpop.f32.mrb[215].mxu0  ;;  %v8562_v62 = vpop.f32.mrb[180].mxu1  ;;  %v12735_v26 = vadd.f32 %v8673_v57, %v6925_v15 }
 0x458   : > { %v8679_v33 = vadd.f32 %v8678_v7, %v8677_v11  ;;  %v8563_v20 = vpop.f32.mrb[181].mxu1 }
 0x459   : > { %v8564_v31 = vadd.f32 %v8563_v20, %v8562_v62  ;;  %v8565_v8 = vpop.f32.mrb[182].mxu1 }
 0x45a   : > { %v8566_v6 = vpop.f32.mrb[183].mxu1 }
 0x45b   : > { %v6930_v10 = vadd.f32 %v8564_v31, %v12503_v49  ;;  %v8567_v24 = vadd.f32 %v8566_v6, %v8565_v8 }
 0x45d   : > { %v8680_v58 = vpop.f32.mrb[216].mxu0  ;;  %v6933_v12 = vadd.f32 %v8567_v24, %v12503_v49  ;;  %v12739_v47 = vadd.f32 %v8676_v36, %v6930_v10 }
 0x45e   : > { %v8681_v17 = vpop.f32.mrb[217].mxu0 }
 0x45f   : > { %v8682_v5 = vadd.f32 %v8681_v17, %v8680_v58  ;;  %v8683_v63 = vpop.f32.mrb[218].mxu0  ;;  %v12741_v48 = vadd.f32 %v8679_v33, %v6933_v12 }
 0x460   : > { %v8684_v4 = vpop.f32.mrb[219].mxu0  ;;  %v8568_v45 = vpop.f32.mrb[184].mxu1 }
 0x461   : > { %v8685_v44 = vadd.f32 %v8684_v4, %v8683_v63  ;;  %v8569_v55 = vpop.f32.mrb[185].mxu1 }
 0x462   : > { %v8570_v13 = vadd.f32 %v8569_v55, %v8568_v45  ;;  %v8571_v29 = vpop.f32.mrb[186].mxu1 }
 0x463   : > { %v8572_v39 = vpop.f32.mrb[187].mxu1 }
 0x464   : > { %v6938_v57 = vadd.f32 %v8570_v13, %v12503_v49  ;;  %v8573_v60 = vadd.f32 %v8572_v39, %v8571_v29 }
 0x465   : > { %v8686_v23 = vpop.f32.mrb[220].mxu0 }
 0x466   : > { %v8687_v27 = vpop.f32.mrb[221].mxu0  ;;  %v6941_v21 = vadd.f32 %v8573_v60, %v12503_v49  ;;  %v12745_v46 = vadd.f32 %v8682_v5, %v6938_v57 }
 0x467   : > { %v8688_v9 = vadd.f32 %v8687_v27, %v8686_v23  ;;  %v8689_v52 = vpop.f32.mrb[222].mxu0 }
 0x468   : > { %v8690_v61 = vpop.f32.mrb[223].mxu0  ;;  %v12747_v30 = vadd.f32 %v8685_v44, %v6941_v21 }
 0x469   : > { %v8691_v40 = vadd.f32 %v8690_v61, %v8689_v52  ;;  %v8574_v15 = vpop.f32.mrb[188].mxu1 }
 0x46a   : > { %v8575_v36 = vpop.f32.mrb[189].mxu1 }
 0x46b   : > { %v8576_v11 = vadd.f32 %v8575_v36, %v8574_v15  ;;  %v8577_v7 = vpop.f32.mrb[190].mxu1 }
 0x46c   : > { %v8578_v62 = vpop.f32.mrb[191].mxu1 }
 0x46d   : > { %v6946_v33 = vadd.f32 %v8576_v11, %v12503_v49  ;;  %v8579_v20 = vadd.f32 %v8578_v62, %v8577_v7 }
 0x46f   : > { %v8820_v31 = vpop.f32.mrb[224].mxu0  ;;  %v6949_v8 = vadd.f32 %v8579_v20, %v12503_v49  ;;  %v12751_v10 = vadd.f32 %v8688_v9, %v6946_v33 }
 0x470   : > { %v8821_v6 = vpop.f32.mrb[225].mxu0 }
 0x471   : > { %v8822_v24 = vadd.f32 %v8821_v6, %v8820_v31  ;;  %v8823_v58 = vpop.f32.mrb[226].mxu0  ;;  %v8708_v17 = vpop.f32.mrb[192].mxu1  ;;  %v12753_v5 = vadd.f32 %v8691_v40, %v6949_v8 }
 0x472   : > { %v8824_v12 = vpop.f32.mrb[227].mxu0  ;;  %v8709_v4 = vpop.f32.mrb[193].mxu1 }
 0x473   : > { %v8825_v63 = vadd.f32 %v8824_v12, %v8823_v58  ;;  %v8710_v44 = vadd.f32 %v8709_v4, %v8708_v17  ;;  %v8711_v45 = vpop.f32.mrb[194].mxu1 }
 0x474   : > { %v8712_v55 = vpop.f32.mrb[195].mxu1 }
 0x475   : > { %v7148_v13 = vadd.f32 %v8710_v44, %v12535_v35  ;;  %v8713_v29 = vadd.f32 %v8712_v55, %v8711_v45 }
 0x477   : > { %v8826_v39 = vpop.f32.mrb[228].mxu0  ;;  %v7151_v49 = vadd.f32 %v8713_v29, %v12549_v3  ;;  %v12757_v27 = vadd.f32 %v8822_v24, %v7148_v13 }
 0x478   : > { %v8827_v57 = vpop.f32.mrb[229].mxu0 }
 0x479   : > { %v8828_v60 = vadd.f32 %v8827_v57, %v8826_v39  ;;  %v8829_v23 = vpop.f32.mrb[230].mxu0  ;;  %v8714_v9 = vpop.f32.mrb[196].mxu1  ;;  %v12759_v40 = vadd.f32 %v8825_v63, %v7151_v49 }
 0x47a   : > { %v8830_v21 = vpop.f32.mrb[231].mxu0  ;;  %v8715_v61 = vpop.f32.mrb[197].mxu1 }
 0x47b   : > { %v8831_v52 = vadd.f32 %v8830_v21, %v8829_v23  ;;  %v8716_v15 = vadd.f32 %v8715_v61, %v8714_v9  ;;  %v8717_v36 = vpop.f32.mrb[198].mxu1 }
 0x47c   : > { %v8718_v11 = vpop.f32.mrb[199].mxu1 }
 0x47d   : > { %v7156_v35 = vadd.f32 %v8716_v15, %v12552_v51  ;;  %v8719_v7 = vadd.f32 %v8718_v11, %v8717_v36 }
 0x47f   : > { %v8832_v62 = vpop.f32.mrb[232].mxu0  ;;  %v7159_v3 = vadd.f32 %v8719_v7, %v12557_v14  ;;  %v12763_v20 = vadd.f32 %v8828_v60, %v7156_v35 }
 0x480   : > { %v8833_v33 = vpop.f32.mrb[233].mxu0 }
 0x481   : > { %v8834_v31 = vadd.f32 %v8833_v33, %v8832_v62  ;;  %v8835_v8 = vpop.f32.mrb[234].mxu0  ;;  %v8720_v24 = vpop.f32.mrb[200].mxu1  ;;  %v12765_v58 = vadd.f32 %v8831_v52, %v7159_v3 }
 0x482   : > { %v8836_v6 = vpop.f32.mrb[235].mxu0  ;;  %v8721_v17 = vpop.f32.mrb[201].mxu1 }
 0x483   : > { %v8837_v12 = vadd.f32 %v8836_v6, %v8835_v8  ;;  %v8722_v63 = vadd.f32 %v8721_v17, %v8720_v24  ;;  %v8723_v4 = vpop.f32.mrb[202].mxu1 }
 0x484   : > { %v8724_v44 = vpop.f32.mrb[203].mxu1 }
 0x485   : > { %v7164_v51 = vadd.f32 %v8722_v63, %v12576_v50  ;;  %v8725_v45 = vadd.f32 %v8724_v44, %v8723_v4 }
 0x487   : > { %v8838_v55 = vpop.f32.mrb[236].mxu0  ;;  %v7167_v14 = vadd.f32 %v8725_v45, %v12586_v2  ;;  %v12769_v29 = vadd.f32 %v8834_v31, %v7164_v51 }
 0x488   : > { %v8839_v13 = vpop.f32.mrb[237].mxu0 }
 0x489   : > { %v8840_v39 = vadd.f32 %v8839_v13, %v8838_v55  ;;  %v8841_v49 = vpop.f32.mrb[238].mxu0  ;;  %v8726_v60 = vpop.f32.mrb[204].mxu1  ;;  %v12771_v23 = vadd.f32 %v8837_v12, %v7167_v14 }
 0x48a   : > { %v8842_v57 = vpop.f32.mrb[239].mxu0  ;;  %v8727_v9 = vpop.f32.mrb[205].mxu1 }
 0x48b   : > { %v8843_v21 = vadd.f32 %v8842_v57, %v8841_v49  ;;  %v8728_v52 = vadd.f32 %v8727_v9, %v8726_v60  ;;  %v8729_v61 = vpop.f32.mrb[206].mxu1 }
 0x48c   : > { %v8730_v15 = vpop.f32.mrb[207].mxu1 }
 0x48d   : > { %v7172_v50 = vadd.f32 %v8728_v52, %v12603_v16  ;;  %v8731_v36 = vadd.f32 %v8730_v15, %v8729_v61 }
 0x48f   : > { %v8844_v11 = vpop.f32.mrb[240].mxu0  ;;  %v7175_v2 = vadd.f32 %v8731_v36, %v12613_v54  ;;  %v12775_v7 = vadd.f32 %v8840_v39, %v7172_v50 }
 0x490   : > { %v8845_v35 = vpop.f32.mrb[241].mxu0 }
 0x491   : > { %v8846_v62 = vadd.f32 %v8845_v35, %v8844_v11  ;;  %v8847_v3 = vpop.f32.mrb[242].mxu0  ;;  %v8732_v31 = vpop.f32.mrb[208].mxu1  ;;  %v12777_v8 = vadd.f32 %v8843_v21, %v7175_v2 }
 0x492   : > { %v8848_v33 = vpop.f32.mrb[243].mxu0  ;;  %v8733_v24 = vpop.f32.mrb[209].mxu1 }
 0x493   : > { %v8849_v6 = vadd.f32 %v8848_v33, %v8847_v3  ;;  %v8734_v12 = vadd.f32 %v8733_v24, %v8732_v31  ;;  %v8735_v17 = vpop.f32.mrb[210].mxu1 }
 0x494   : > { %v8736_v63 = vpop.f32.mrb[211].mxu1 }
 0x495   : > { %v7180_v16 = vadd.f32 %v8734_v12, %v12625_v53  ;;  %v8737_v4 = vadd.f32 %v8736_v63, %v8735_v17 }
 0x497   : > { %v8850_v44 = vpop.f32.mrb[244].mxu0  ;;  %v7183_v54 = vadd.f32 %v8737_v4, %v12631_v42  ;;  %v12781_v45 = vadd.f32 %v8846_v62, %v7180_v16 }
 0x498   : > { %v8851_v51 = vpop.f32.mrb[245].mxu0 }
 0x499   : > { %v8852_v55 = vadd.f32 %v8851_v51, %v8850_v44  ;;  %v8853_v14 = vpop.f32.mrb[246].mxu0  ;;  %v8738_v39 = vpop.f32.mrb[212].mxu1  ;;  %v12783_v49 = vadd.f32 %v8849_v6, %v7183_v54 }
 0x49a   : > { %v8854_v13 = vpop.f32.mrb[247].mxu0  ;;  %v8739_v60 = vpop.f32.mrb[213].mxu1 }
 0x49b   : > { %v8855_v57 = vadd.f32 %v8854_v13, %v8853_v14  ;;  %v8740_v21 = vadd.f32 %v8739_v60, %v8738_v39  ;;  %v8741_v9 = vpop.f32.mrb[214].mxu1 }
 0x49c   : > { %v8742_v52 = vpop.f32.mrb[215].mxu1 }
 0x49d   : > { %v7188_v53 = vadd.f32 %v8740_v21, %v12643_v37  ;;  %v8743_v61 = vadd.f32 %v8742_v52, %v8741_v9 }
 0x49f   : > { %v8856_v15 = vpop.f32.mrb[248].mxu0  ;;  %v7191_v42 = vadd.f32 %v8743_v61, %v12651_v22  ;;  %v12787_v36 = vadd.f32 %v8852_v55, %v7188_v53 }
 0x4a0   : > { %v8857_v50 = vpop.f32.mrb[249].mxu0 }
 0x4a1   : > { %v8858_v11 = vadd.f32 %v8857_v50, %v8856_v15  ;;  %v8859_v2 = vpop.f32.mrb[250].mxu0  ;;  %v8744_v62 = vpop.f32.mrb[216].mxu1  ;;  %v12789_v3 = vadd.f32 %v8855_v57, %v7191_v42 }
 0x4a2   : > { %v8860_v35 = vpop.f32.mrb[251].mxu0  ;;  %v8745_v31 = vpop.f32.mrb[217].mxu1 }
 0x4a3   : > { %v8861_v33 = vadd.f32 %v8860_v35, %v8859_v2  ;;  %v8746_v6 = vadd.f32 %v8745_v31, %v8744_v62  ;;  %v8747_v24 = vpop.f32.mrb[218].mxu1 }
 0x4a4   : > { %v8748_v12 = vpop.f32.mrb[219].mxu1 }
 0x4a5   : > { %v7196_v37 = vadd.f32 %v8746_v6, %v12660_v38  ;;  %v8749_v17 = vadd.f32 %v8748_v12, %v8747_v24 }
 0x4a7   : > { %v8862_v63 = vpop.f32.mrb[252].mxu0  ;;  %v7199_v22 = vadd.f32 %v8749_v17, %v12663_v28  ;;  %v12793_v4 = vadd.f32 %v8858_v11, %v7196_v37 }
 0x4a8   : > { %v8863_v16 = vpop.f32.mrb[253].mxu0 }
 0x4a9   : > { %v8864_v44 = vadd.f32 %v8863_v16, %v8862_v63  ;;  %v8865_v54 = vpop.f32.mrb[254].mxu0  ;;  %v8750_v55 = vpop.f32.mrb[220].mxu1  ;;  %v12795_v14 = vadd.f32 %v8861_v33, %v7199_v22 }
 0x4aa   : > { %v8866_v51 = vpop.f32.mrb[255].mxu0  ;;  %v8751_v39 = vpop.f32.mrb[221].mxu1 }
 0x4ab   : > { %v8867_v13 = vadd.f32 %v8866_v51, %v8865_v54  ;;  %v8752_v57 = vadd.f32 %v8751_v39, %v8750_v55  ;;  %v8753_v60 = vpop.f32.mrb[222].mxu1 }
 0x4ac   : > { %v8754_v21 = vpop.f32.mrb[223].mxu1 }
 0x4ad   : > { %v7204_v38 = vadd.f32 %v8752_v57, %v12675_v43  ;;  %v8755_v9 = vadd.f32 %v8754_v21, %v8753_v60 }
 0x4af   : > { %v8868_v52 = vpop.f32.mrb[0].mxu0  ;;  %v7207_v28 = vadd.f32 %v8755_v9, %v12683_v34  ;;  %v12799_v61 = vadd.f32 %v8864_v44, %v7204_v38 }
 0x4b0   : > { %v8869_v53 = vpop.f32.mrb[1].mxu0 }
 0x4b1   : > { %v8870_v15 = vadd.f32 %v8869_v53, %v8868_v52  ;;  %v8871_v42 = vpop.f32.mrb[2].mxu0  ;;  %v8756_v11 = vpop.f32.mrb[224].mxu1  ;;  %v12801_v2 = vadd.f32 %v8867_v13, %v7207_v28 }
 0x4b2   : > { %v8872_v50 = vpop.f32.mrb[3].mxu0  ;;  %v8757_v62 = vpop.f32.mrb[225].mxu1 }
 0x4b3   : > { %v8873_v35 = vadd.f32 %v8872_v50, %v8871_v42  ;;  %v8758_v33 = vadd.f32 %v8757_v62, %v8756_v11  ;;  %v8759_v31 = vpop.f32.mrb[226].mxu1 }
 0x4b4   : > { %v8760_v6 = vpop.f32.mrb[227].mxu1 }
 0x4b5   : > { %v7212_v43 = vadd.f32 %v8758_v33, %v12693_v59  ;;  %v8761_v24 = vadd.f32 %v8760_v6, %v8759_v31 }
 0x4b7   : > { %v8874_v12 = vpop.f32.mrb[4].mxu0  ;;  %v7215_v34 = vadd.f32 %v8761_v24, %v12699_v41  ;;  %v12805_v17 = vadd.f32 %v8870_v15, %v7212_v43 }
 0x4b8   : > { %v8875_v37 = vpop.f32.mrb[5].mxu0 }
 0x4b9   : > { %v8876_v63 = vadd.f32 %v8875_v37, %v8874_v12  ;;  %v8877_v22 = vpop.f32.mrb[6].mxu0  ;;  %v8762_v44 = vpop.f32.mrb[228].mxu1  ;;  %v12807_v54 = vadd.f32 %v8873_v35, %v7215_v34 }
 0x4ba   : > { %v8878_v16 = vpop.f32.mrb[7].mxu0  ;;  %v8763_v55 = vpop.f32.mrb[229].mxu1 }
 0x4bb   : > { %v8879_v51 = vadd.f32 %v8878_v16, %v8877_v22  ;;  %v8764_v13 = vadd.f32 %v8763_v55, %v8762_v44  ;;  %v8765_v39 = vpop.f32.mrb[230].mxu1 }
 0x4bc   : > { %v8766_v57 = vpop.f32.mrb[231].mxu1 }
 0x4bd   : > { %v7220_v59 = vadd.f32 %v8764_v13, %v12704_v0  ;;  %v8767_v60 = vadd.f32 %v8766_v57, %v8765_v39 }
 0x4bf   : > { %v8880_v21 = vpop.f32.mrb[8].mxu0  ;;  %v7223_v41 = vadd.f32 %v8767_v60, %v12709_v32  ;;  %v12811_v9 = vadd.f32 %v8876_v63, %v7220_v59 }
 0x4c0   : > { %v8881_v38 = vpop.f32.mrb[9].mxu0 }
 0x4c1   : > { %v8882_v52 = vadd.f32 %v8881_v38, %v8880_v21  ;;  %v8883_v28 = vpop.f32.mrb[10].mxu0  ;;  %v8768_v15 = vpop.f32.mrb[232].mxu1  ;;  %v12813_v42 = vadd.f32 %v8879_v51, %v7223_v41 }
 0x4c2   : > { %v8884_v53 = vpop.f32.mrb[11].mxu0  ;;  %v8769_v11 = vpop.f32.mrb[233].mxu1 }
 0x4c3   : > { %v8885_v50 = vadd.f32 %v8884_v53, %v8883_v28  ;;  %v8770_v35 = vadd.f32 %v8769_v11, %v8768_v15  ;;  %v8771_v62 = vpop.f32.mrb[234].mxu1 }
 0x4c4   : > { %v8772_v33 = vpop.f32.mrb[235].mxu1 }
 0x4c5   : > { %v7228_v0 = vadd.f32 %v8770_v35, %v12716_v56  ;;  %v8773_v31 = vadd.f32 %v8772_v33, %v8771_v62 }
 0x4c7   : > { %v8886_v6 = vpop.f32.mrb[12].mxu0  ;;  %v7231_v32 = vadd.f32 %v8773_v31, %v12719_v25  ;;  %v12817_v24 = vadd.f32 %v8882_v52, %v7228_v0 }
 0x4c8   : > { %v8887_v43 = vpop.f32.mrb[13].mxu0 }
 0x4c9   : > { %v8888_v12 = vadd.f32 %v8887_v43, %v8886_v6  ;;  %v8889_v34 = vpop.f32.mrb[14].mxu0  ;;  %v8774_v63 = vpop.f32.mrb[236].mxu1  ;;  %v12819_v22 = vadd.f32 %v8885_v50, %v7231_v32 }
 0x4ca   : > { %v8890_v37 = vpop.f32.mrb[15].mxu0  ;;  %v8775_v44 = vpop.f32.mrb[237].mxu1 }
 0x4cb   : > { %v8891_v16 = vadd.f32 %v8890_v37, %v8889_v34  ;;  %v8776_v51 = vadd.f32 %v8775_v44, %v8774_v63  ;;  %v8777_v55 = vpop.f32.mrb[238].mxu1 }
 0x4cc   : > { %v8778_v13 = vpop.f32.mrb[239].mxu1 }
 0x4cd   : > { %v7236_v56 = vadd.f32 %v8776_v51, %v12724_v18  ;;  %v8779_v39 = vadd.f32 %v8778_v13, %v8777_v55 }
 0x4cf   : > { %v8892_v57 = vpop.f32.mrb[16].mxu0  ;;  %v7239_v25 = vadd.f32 %v8779_v39, %v12727_v19  ;;  %v12823_v60 = vadd.f32 %v8888_v12, %v7236_v56 }
 0x4d0   : > { %v8893_v59 = vpop.f32.mrb[17].mxu0 }
 0x4d1   : > { %v8894_v21 = vadd.f32 %v8893_v59, %v8892_v57  ;;  %v8895_v41 = vpop.f32.mrb[18].mxu0  ;;  %v8780_v52 = vpop.f32.mrb[240].mxu1  ;;  %v12825_v28 = vadd.f32 %v8891_v16, %v7239_v25 }
 0x4d2   : > { %v8896_v38 = vpop.f32.mrb[19].mxu0  ;;  %v8781_v15 = vpop.f32.mrb[241].mxu1 }
 0x4d3   : > { %v8897_v53 = vadd.f32 %v8896_v38, %v8895_v41  ;;  %v8782_v50 = vadd.f32 %v8781_v15, %v8780_v52  ;;  %v8783_v11 = vpop.f32.mrb[242].mxu1 }
 0x4d4   : > { %v8784_v35 = vpop.f32.mrb[243].mxu1 }
 0x4d5   : > { %v7244_v18 = vadd.f32 %v8782_v50, %v12733_v1  ;;  %v8785_v62 = vadd.f32 %v8784_v35, %v8783_v11 }
 0x4d7   : > { %v8898_v33 = vpop.f32.mrb[20].mxu0  ;;  %v7247_v19 = vadd.f32 %v8785_v62, %v12735_v26  ;;  %v12829_v31 = vadd.f32 %v8894_v21, %v7244_v18 }
 0x4d8   : > { %v8899_v0 = vpop.f32.mrb[21].mxu0 }
 0x4d9   : > { %v8900_v6 = vadd.f32 %v8899_v0, %v8898_v33  ;;  %v8901_v32 = vpop.f32.mrb[22].mxu0  ;;  %v8786_v12 = vpop.f32.mrb[244].mxu1  ;;  %v12831_v34 = vadd.f32 %v8897_v53, %v7247_v19 }
 0x4da   : > { %v8902_v43 = vpop.f32.mrb[23].mxu0  ;;  %v8787_v63 = vpop.f32.mrb[245].mxu1 }
 0x4db   : > { %v8903_v37 = vadd.f32 %v8902_v43, %v8901_v32  ;;  %v8788_v16 = vadd.f32 %v8787_v63, %v8786_v12  ;;  %v8789_v44 = vpop.f32.mrb[246].mxu1 }
 0x4dc   : > { %v8790_v51 = vpop.f32.mrb[247].mxu1 }
 0x4dd   : > { %v7252_v1 = vadd.f32 %v8788_v16, %v12739_v47  ;;  %v8791_v55 = vadd.f32 %v8790_v51, %v8789_v44 }
 0x4df   : > { %v8904_v13 = vpop.f32.mrb[24].mxu0  ;;  %v7255_v26 = vadd.f32 %v8791_v55, %v12741_v48  ;;  %v12835_v39 = vadd.f32 %v8900_v6, %v7252_v1 }
 0x4e0   : > { %v8905_v56 = vpop.f32.mrb[25].mxu0 }
 0x4e1   : > { %v8906_v57 = vadd.f32 %v8905_v56, %v8904_v13  ;;  %v8907_v25 = vpop.f32.mrb[26].mxu0  ;;  %v8792_v21 = vpop.f32.mrb[248].mxu1  ;;  %v12837_v41 = vadd.f32 %v8903_v37, %v7255_v26 }
 0x4e2   : > { %v8908_v59 = vpop.f32.mrb[27].mxu0  ;;  %v8793_v52 = vpop.f32.mrb[249].mxu1 }
 0x4e3   : > { %v8909_v38 = vadd.f32 %v8908_v59, %v8907_v25  ;;  %v8794_v53 = vadd.f32 %v8793_v52, %v8792_v21  ;;  %v8795_v15 = vpop.f32.mrb[250].mxu1  ;;  %v9257_v25 = vld [vmem:[%s9667_s6 + $0x10] sm:$0xff] }
 0x4e4   : > { %v8796_v50 = vpop.f32.mrb[251].mxu1 }
 0x4e5   : > { %v7260_v47 = vadd.f32 %v8794_v53, %v12745_v46  ;;  %v8797_v11 = vadd.f32 %v8796_v50, %v8795_v15  ;;  %v9259_v15 = vld [vmem:[%s9667_s6 + $0x18] sm:$0xff] }
 0x4e7   : > { %v8910_v35 = vpop.f32.mrb[28].mxu0  ;;  %v7263_v48 = vadd.f32 %v8797_v11, %v12747_v30  ;;  %v12841_v62 = vadd.f32 %v8906_v57, %v7260_v47 }
 0x4e8   : > { %v8911_v18 = vpop.f32.mrb[29].mxu0 }
 0x4e9   : > { %v8912_v33 = vadd.f32 %v8911_v18, %v8910_v35  ;;  %v8913_v19 = vpop.f32.mrb[30].mxu0  ;;  %v8798_v6 = vpop.f32.mrb[252].mxu1  ;;  %v12843_v32 = vadd.f32 %v8909_v38, %v7263_v48 }
 0x4ea   : > { %v8914_v0 = vpop.f32.mrb[31].mxu0  ;;  %v8799_v12 = vpop.f32.mrb[253].mxu1 }
 0x4eb   : > { %v8915_v43 = vadd.f32 %v8914_v0, %v8913_v19  ;;  %v8800_v37 = vadd.f32 %v8799_v12, %v8798_v6  ;;  %v8801_v63 = vpop.f32.mrb[254].mxu1  ;;  %v9261_v19 = vld [vmem:[%s9667_s6 + $0x30] sm:$0xff]  ;;  %v9262_v12 = vld [vmem:[%s9667_s6 + $0x20] sm:$0xff] }
 0x4ec   : > { %v8802_v46 = vpop.f32.mrb[255].mxu1 }
 0x4ed   : > { %v7268_v16 = vadd.f32 %v8800_v37, %v12751_v10  ;;  %v8803_v44 = vadd.f32 %v8802_v46, %v8801_v63  ;;  %v9263_v46 = vld [vmem:[%s9667_s6 + $0x38] sm:$0xff] }
 0x4ef   : > { %v7271_v30 = vadd.f32 %v8803_v44, %v12753_v5  ;;  %v12847_v51 = vadd.f32 %v8912_v33, %v7268_v16  ;;  %v9258_v5 = vld [vmem:[%s9667_s6] sm:$0xff] }
 0x4f1   : > { %v9006_v1 = vpop.f32.mrb[0].mxu1  ;;  %v12849_v55 = vadd.f32 %v8915_v43, %v7271_v30  ;;  %v9264_v30 = vld [vmem:[%s9667_s6 + $0x28] sm:$0xff] }
 0x4f2   : > { %v7478_v13 = vadd.f32 %v9006_v1, %v12763_v20  ;;  %v7469_v26 = vpop.f32.mrb[1].mxu1  ;;  %v9260_v20 = vld [vmem:[%s9667_s6 + $0x8] sm:$0xff] }
 0x4f3   : > { %v7470_v56 = vadd.f32 %v7469_v26, %v12757_v27  ;;  %v9007_v57 = vpop.f32.mrb[2].mxu1 }
 0x4f4   : > { %v7598_v59 = vadd.f32 %v9257_v25, %v7478_v13  ;;  %v7481_v10 = vadd.f32 %v9007_v57, %v12765_v58  ;;  %v7472_v21 = vpop.f32.mrb[3].mxu1  ;;  %v9265_v25 = vld [vmem:[%s9667_s6 + $0x50] sm:$0xff] }
 0x4f5   : > { %v7596_v38 = vadd.f32 %v9258_v5, %v7470_v56  ;;  %v7473_v52 = vadd.f32 %v7472_v21, %v12759_v40  ;;  %v9266_v5 = vld [vmem:[%s9667_s6 + $0x40] sm:$0xff] }
 0x4f6   : > { %v7630_v53 = vmax.f32 %v7598_v59, 0.0  ;;  %v7599_v50 = vadd.f32 %v9259_v15, %v7481_v10 }
 0x4f7   : > { %v7628_v47 = vmax.f32 %v7596_v38, 0.0  ;;  %v7597_v11 = vadd.f32 %v9260_v20, %v7473_v52 }
 0x4f8   : > { %7662 = vst [vmem:[%s12861_s11 + $0x10] sm:$0xff] %v7630_v53  ;;  %v7631_v27 = vmax.f32 %v7599_v50, 0.0  ;;  %v9267_v53 = vld [vmem:[%s9667_s6 + $0x58] sm:$0xff] }
 0x4f9   : > { %7660 = vst [vmem:[%s12861_s11] sm:$0xff] %v7628_v47  ;;  %v7629_v58 = vmax.f32 %v7597_v11, 0.0  ;;  %v9010_v40 = vpop.f32.mrb[4].mxu1  ;;  %v9268_v47 = vld [vmem:[%s9667_s6 + $0x48] sm:$0xff] }
 0x4fa   : > { %7663 = vst [vmem:[%s12861_s11 + $0x18] sm:$0xff] %v7631_v27  ;;  %v7494_v35 = vadd.f32 %v9010_v40, %v12775_v7  ;;  %v7485_v48 = vpop.f32.mrb[5].mxu1 }
 0x4fb   : > { %7661 = vst [vmem:[%s12861_s11 + $0x8] sm:$0xff] %v7629_v58  ;;  %v7486_v18 = vadd.f32 %v7485_v48, %v12769_v29  ;;  %v9011_v33 = vpop.f32.mrb[6].mxu1 }
 0x4fc   : > { %v7602_v0 = vadd.f32 %v9261_v19, %v7494_v35  ;;  %v7497_v6 = vadd.f32 %v9011_v33, %v12777_v8  ;;  %v7488_v43 = vpop.f32.mrb[7].mxu1  ;;  %v9269_v35 = vld [vmem:[%s9667_s6 + $0x70] sm:$0xff]  ;;  %v9270_v19 = vld [vmem:[%s9667_s6 + $0x60] sm:$0xff] }
 0x4fd   : > { %v7600_v37 = vadd.f32 %v9262_v12, %v7486_v18  ;;  %v7489_v63 = vadd.f32 %v7488_v43, %v12771_v23  ;;  %v9271_v43 = vld [vmem:[%s9667_s6 + $0x78] sm:$0xff] }
 0x4fe   : > { %v7634_v7 = vmax.f32 %v7602_v0, 0.0  ;;  %v7603_v16 = vadd.f32 %v9263_v46, %v7497_v6 }
 0x4ff   : > { %v7632_v44 = vmax.f32 %v7600_v37, 0.0  ;;  %v7601_v29 = vadd.f32 %v9264_v30, %v7489_v63  ;;  %v9272_v63 = vld [vmem:[%s9667_s6 + $0x68] sm:$0xff] }
 0x500   : > { %7666 = vst [vmem:[%s12861_s11 + $0x30] sm:$0xff] %v7634_v7  ;;  %v7635_v1 = vmax.f32 %v7603_v16, 0.0 }
 0x501   : > { %7664 = vst [vmem:[%s12861_s11 + $0x20] sm:$0xff] %v7632_v44  ;;  %v7633_v13 = vmax.f32 %v7601_v29, 0.0  ;;  %v9014_v8 = vpop.f32.mrb[8].mxu1  ;;  %v9273_v29 = vld [vmem:[%s9667_s6 + $0x90] sm:$0xff] }
 0x502   : > { %7667 = vst [vmem:[%s12861_s11 + $0x38] sm:$0xff] %v7635_v1  ;;  %v7510_v26 = vadd.f32 %v9014_v8, %v12787_v36  ;;  %v7501_v56 = vpop.f32.mrb[9].mxu1 }
 0x503   : > { %7665 = vst [vmem:[%s12861_s11 + $0x28] sm:$0xff] %v7633_v13  ;;  %v7502_v23 = vadd.f32 %v7501_v56, %v12781_v45  ;;  %v9015_v57 = vpop.f32.mrb[10].mxu1 }
 0x504   : > { %v7606_v59 = vadd.f32 %v9265_v25, %v7510_v26  ;;  %v7513_v10 = vadd.f32 %v9015_v57, %v12789_v3  ;;  %v7504_v21 = vpop.f32.mrb[11].mxu1  ;;  %v9274_v26 = vld [vmem:[%s9667_s6 + $0x80] sm:$0xff]  ;;  %v9275_v57 = vld [vmem:[%s9667_s6 + $0x98] sm:$0xff] }
 0x505   : > { %v7604_v38 = vadd.f32 %v9266_v5, %v7502_v23  ;;  %v7505_v52 = vadd.f32 %v7504_v21, %v12783_v49 }
 0x506   : > { %v7638_v36 = vmax.f32 %v7606_v59, 0.0  ;;  %v7607_v15 = vadd.f32 %v9267_v53, %v7513_v10  ;;  %v9276_v10 = vld [vmem:[%s9667_s6 + $0x88] sm:$0xff]  ;;  %v9277_v53 = vld [vmem:[%s9667_s6 + $0xb0] sm:$0xff] }
 0x507   : > { %v7636_v50 = vmax.f32 %v7604_v38, 0.0  ;;  %v7605_v45 = vadd.f32 %v9268_v47, %v7505_v52 }
 0x508   : > { %7670 = vst [vmem:[%s12861_s11 + $0x50] sm:$0xff] %v7638_v36  ;;  %v7639_v20 = vmax.f32 %v7607_v15, 0.0 }
 0x509   : > { %7668 = vst [vmem:[%s12861_s11 + $0x40] sm:$0xff] %v7636_v50  ;;  %v7637_v11 = vmax.f32 %v7605_v45, 0.0  ;;  %v9018_v3 = vpop.f32.mrb[12].mxu1  ;;  %v9278_v45 = vld [vmem:[%s9667_s6 + $0xa0] sm:$0xff] }
 0x50a   : > { %7671 = vst [vmem:[%s12861_s11 + $0x58] sm:$0xff] %v7639_v20  ;;  %v7526_v27 = vadd.f32 %v9018_v3, %v12799_v61  ;;  %v7517_v58 = vpop.f32.mrb[13].mxu1  ;;  %v9279_v3 = vld [vmem:[%s9667_s6 + $0xb8] sm:$0xff] }
 0x50b   : > { %7669 = vst [vmem:[%s12861_s11 + $0x48] sm:$0xff] %v7637_v11  ;;  %v7518_v49 = vadd.f32 %v7517_v58, %v12793_v4  ;;  %v9019_v40 = vpop.f32.mrb[14].mxu1 }
 0x50c   : > { %v7610_v48 = vadd.f32 %v9269_v35, %v7526_v27  ;;  %v7529_v18 = vadd.f32 %v9019_v40, %v12801_v2  ;;  %v7520_v33 = vpop.f32.mrb[15].mxu1 }
 0x50d   : > { %v7608_v0 = vadd.f32 %v9270_v19, %v7518_v49  ;;  %v7521_v6 = vadd.f32 %v7520_v33, %v12795_v14  ;;  %v9280_v49 = vld [vmem:[%s9667_s6 + $0xa8] sm:$0xff]  ;;  %v9281_v19 = vld [vmem:[%s9667_s6 + $0xd0] sm:$0xff] }
 0x50e   : > { %v7642_v61 = vmax.f32 %v7610_v48, 0.0  ;;  %v7611_v12 = vadd.f32 %v9271_v43, %v7529_v18  ;;  %v9282_v43 = vld [vmem:[%s9667_s6 + $0xc0] sm:$0xff] }
 0x50f   : > { %v7640_v37 = vmax.f32 %v7608_v0, 0.0  ;;  %v7609_v4 = vadd.f32 %v9272_v63, %v7521_v6  ;;  %v9283_v63 = vld [vmem:[%s9667_s6 + $0xd8] sm:$0xff] }
 0x510   : > { %7674 = vst [vmem:[%s12861_s11 + $0x70] sm:$0xff] %v7642_v61  ;;  %v7643_v7 = vmax.f32 %v7611_v12, 0.0 }
 0x511   : > { %7672 = vst [vmem:[%s12861_s11 + $0x60] sm:$0xff] %v7640_v37  ;;  %v7641_v46 = vmax.f32 %v7609_v4, 0.0  ;;  %v9022_v2 = vpop.f32.mrb[16].mxu1 }
 0x512   : > { %7675 = vst [vmem:[%s12861_s11 + $0x78] sm:$0xff] %v7643_v7  ;;  %v7542_v16 = vadd.f32 %v9022_v2, %v12811_v9  ;;  %v7533_v44 = vpop.f32.mrb[17].mxu1 }
 0x513   : > { %7673 = vst [vmem:[%s12861_s11 + $0x68] sm:$0xff] %v7641_v46  ;;  %v7534_v14 = vadd.f32 %v7533_v44, %v12805_v17  ;;  %v9023_v30 = vpop.f32.mrb[18].mxu1  ;;  %v9284_v46 = vld [vmem:[%s9667_s6 + $0xc8] sm:$0xff] }
 0x514   : > { %v7614_v1 = vadd.f32 %v9273_v29, %v7542_v16  ;;  %v7545_v13 = vadd.f32 %v9023_v30, %v12813_v42  ;;  %v7536_v8 = vpop.f32.mrb[19].mxu1  ;;  %v9285_v29 = vld [vmem:[%s9667_s6 + $0xf0] sm:$0xff] }
 0x515   : > { %v7612_v56 = vadd.f32 %v9274_v26, %v7534_v14  ;;  %v7537_v23 = vadd.f32 %v7536_v8, %v12807_v54  ;;  %v9286_v26 = vld [vmem:[%s9667_s6 + $0xe0] sm:$0xff] }
 0x516   : > { %v7646_v9 = vmax.f32 %v7614_v1, 0.0  ;;  %v7615_v25 = vadd.f32 %v9275_v57, %v7545_v13 }
 0x517   : > { %v7644_v59 = vmax.f32 %v7612_v56, 0.0  ;;  %v7613_v17 = vadd.f32 %v9276_v10, %v7537_v23 }
 0x518   : > { %7678 = vst [vmem:[%s12861_s11 + $0x90] sm:$0xff] %v7646_v9  ;;  %v7647_v21 = vmax.f32 %v7615_v25, 0.0  ;;  %v9287_v9 = vld [vmem:[%s9667_s6 + $0xf8] sm:$0xff]  ;;  %v9288_v25 = vld [vmem:[%s9667_s6 + $0xe8] sm:$0xff] }
 0x519   : > { %7676 = vst [vmem:[%s12861_s11 + $0x80] sm:$0xff] %v7644_v59  ;;  %v7645_v5 = vmax.f32 %v7613_v17, 0.0  ;;  %v9026_v42 = vpop.f32.mrb[20].mxu1 }
 0x51a   : > { %7679 = vst [vmem:[%s12861_s11 + $0x98] sm:$0xff] %v7647_v21  ;;  %v7558_v38 = vadd.f32 %v9026_v42, %v12823_v60  ;;  %v7549_v52 = vpop.f32.mrb[21].mxu1 }
 0x51b   : > { %7677 = vst [vmem:[%s12861_s11 + $0x88] sm:$0xff] %v7645_v5  ;;  %v7550_v54 = vadd.f32 %v7549_v52, %v12817_v24  ;;  %v9027_v36 = vpop.f32.mrb[22].mxu1 }
 0x51c   : > { %v7618_v15 = vadd.f32 %v9277_v53, %v7558_v38  ;;  %v7561_v50 = vadd.f32 %v9027_v36, %v12825_v28  ;;  %v7552_v47 = vpop.f32.mrb[23].mxu1 }
 0x51d   : > { %v7616_v20 = vadd.f32 %v9278_v45, %v7550_v54  ;;  %v7553_v11 = vadd.f32 %v7552_v47, %v12819_v22 }
 0x51e   : > { %v7650_v60 = vmax.f32 %v7618_v15, 0.0  ;;  %v7619_v27 = vadd.f32 %v9279_v3, %v7561_v50 }
 0x51f   : > { %v7648_v58 = vmax.f32 %v7616_v20, 0.0  ;;  %v7617_v24 = vadd.f32 %v9280_v49, %v7553_v11 }
 0x520   : > { %7682 = vst [vmem:[%s12861_s11 + $0xb0] sm:$0xff] %v7650_v60  ;;  %v7651_v40 = vmax.f32 %v7619_v27, 0.0 }
 0x521   : > { %7680 = vst [vmem:[%s12861_s11 + $0xa0] sm:$0xff] %v7648_v58  ;;  %v7649_v35 = vmax.f32 %v7617_v24, 0.0  ;;  %v9030_v28 = vpop.f32.mrb[24].mxu1 }
 0x522   : > { %7683 = vst [vmem:[%s12861_s11 + $0xb8] sm:$0xff] %v7651_v40  ;;  %v7574_v48 = vadd.f32 %v9030_v28, %v12835_v39  ;;  %v7565_v18 = vpop.f32.mrb[25].mxu1 }
 0x523   : > { %7681 = vst [vmem:[%s12861_s11 + $0xa8] sm:$0xff] %v7649_v35  ;;  %v7566_v22 = vadd.f32 %v7565_v18, %v12829_v31  ;;  %v9031_v33 = vpop.f32.mrb[26].mxu1 }
 0x524   : > { %v7622_v0 = vadd.f32 %v9281_v19, %v7574_v48  ;;  %v7577_v6 = vadd.f32 %v9031_v33, %v12837_v41  ;;  %v7568_v61 = vpop.f32.mrb[27].mxu1 }
 0x525   : > { %v7620_v12 = vadd.f32 %v9282_v43, %v7566_v22  ;;  %v7569_v37 = vadd.f32 %v7568_v61, %v12831_v34 }
 0x526   : > { %v7654_v39 = vmax.f32 %v7622_v0, 0.0  ;;  %v7623_v4 = vadd.f32 %v9283_v63, %v7577_v6 }
 0x527   : > { %v7652_v7 = vmax.f32 %v7620_v12, 0.0  ;;  %v7621_v31 = vadd.f32 %v9284_v46, %v7569_v37 }
 0x528   : > { %7686 = vst [vmem:[%s12861_s11 + $0xd0] sm:$0xff] %v7654_v39  ;;  %v7655_v2 = vmax.f32 %v7623_v4, 0.0 }
 0x529   : > { %7684 = vst [vmem:[%s12861_s11 + $0xc0] sm:$0xff] %v7652_v7  ;;  %v7653_v41 = vmax.f32 %v7621_v31, 0.0  ;;  %v9034_v16 = vpop.f32.mrb[28].mxu1 }
 0x52a   : > { %7687 = vst [vmem:[%s12861_s11 + $0xd8] sm:$0xff] %v7655_v2  ;;  %v7590_v44 = vadd.f32 %v9034_v16, %v12847_v51  ;;  %v7581_v34 = vpop.f32.mrb[29].mxu1 }
 0x52b   : > { %7685 = vst [vmem:[%s12861_s11 + $0xc8] sm:$0xff] %v7653_v41  ;;  %v7582_v14 = vadd.f32 %v7581_v34, %v12841_v62  ;;  %v9035_v30 = vpop.f32.mrb[30].mxu1 }
 0x52c   : > { %v7626_v1 = vadd.f32 %v9285_v29, %v7590_v44  ;;  %v7593_v13 = vadd.f32 %v9035_v30, %v12849_v55  ;;  %v7584_v8 = vpop.f32.mrb[31].mxu1 }
 0x52d   : > { %v7624_v56 = vadd.f32 %v9286_v26, %v7582_v14  ;;  %v7585_v23 = vadd.f32 %v7584_v8, %v12843_v32 }
 0x52e   : > { %v7658_v51 = vmax.f32 %v7626_v1, 0.0  ;;  %v7627_v62 = vadd.f32 %v9287_v9, %v7593_v13 }
 0x52f   : > { %v7656_v57 = vmax.f32 %v7624_v56, 0.0  ;;  %v7625_v59 = vadd.f32 %v9288_v25, %v7585_v23 }
 0x530   : > { %7690 = vst [vmem:[%s12861_s11 + $0xf0] sm:$0xff] %v7658_v51  ;;  %v7659_v55 = vmax.f32 %v7627_v62, 0.0 }
 0x531   : > { %7688 = vst [vmem:[%s12861_s11 + $0xe0] sm:$0xff] %v7656_v57  ;;  %v7657_v32 = vmax.f32 %v7625_v59, 0.0 }
 0x532   : > { %7691 = vst [vmem:[%s12861_s11 + $0xf8] sm:$0xff] %v7659_v55 }
 0x533   : > { %7689 = vst [vmem:[%s12861_s11 + $0xe8] sm:$0xff] %v7657_v32 }
 0x534   : > { %9388 = shalt.err (!%p9385_p2)
}
 0x535   : > { %s9389_s6 = scalar_lea.hbm %s12953_s9, 4096  ;;  %s9393_s8 = scalar_lea.hbm %s13007_s5, 8192 }
 0x536   : > { %p9390_p13 = scmp.ne.s32.totalorder %s12953_s9, %s9389_s6  ;;  %p9394_p4 = scmp.lt.u32.totalorder %s12953_s9, %s13007_s5 }
 0x537   : > { %p9395_p5 = scmp.lt.u32.totalorder %s9393_s8, %s9389_s6  ;;  %p9397_p11 = scmp.lt.u32.totalorder %s9389_s6, %s12953_s9 }
 0x538   : > { %p9391_p6 = pnand %p9390_p13, %p13596_p0 }
 0x539   : > { %p9396_p8 = por %p9395_p5, %p9394_p4 }
 0x53a   : > { %p9392_p10 = pneg %p9391_p6 }
 0x53b   : > { %p9398_p1 = por %p9397_p11, %p9396_p8 }
 0x53d   : > { %p9399_p3 = pnand %p9398_p1, %p9392_p10 }
 0x53f   : > { %9402 = shalt.err (!%p9399_p3)
}
 0x540   : > { %s9457_s28 = smov 128   ;;  %s9458_s15 = smov 8  }
 0x541   : > { %9046 = dma.vmem_to_hbm [thread:$0]  (%p13596_p0), %s12955_s30, 4096, %s12953_s9, %s7693_s22, %s9457_s28, %s9457_s28, %s9458_s15  }
 0x542 PF: > { %s7721_s16 = sand.u32 1, %s9433_s18   ;;  %p13597_p7 = scmp.ne.s32.totalorder %s13200_s25, 0 }
 0x543   : > { %p13598_p9 = scmp.ge.s32.totalorder %s9445_s21, 2  ;;  %s7722_s12 = scalar_lea.sflag [#allocation4], %s7721_s16 }
 0x545   : > { %p9060_p12 = pnand %p13598_p9, %p13597_p7 }
 0x547   : > { %9428 = dma.done.wait (!%p9060_p12), %s7722_s12, 4096  }
 0x548   : > { %9430 = vsyncadd (!%p9060_p12), %s7722_s12, 4294963200  ;;  %p19_p2 = scmp.ge.s32.totalorder %s9599_s14, 4   ;;  %s13599_s18 = smov %s9437_s19 }
 0x549   : > { %s13600_s19 = smov %s9441_s20  ;;  %s13601_s20 = smov %s9615_s27 }
 0x54a   : > { %s13602_s21 = smov %s9599_s14  ;;  %21 = sbr.rel (!%p19_p2) target bundleno = 6 (0x6), region = 93 }
 0x551   :  { %7727 = vsyncpa [#allocation3], 1 }
 0x552   :  { %7729 = vsyncpa [#allocation3 + $0x1], 1 }
 0x553   :  { %7730 = vsyncpa [#allocation6], 1 }
 0x554   :  { %7731 = vsyncpa [#allocation4], 1 }
 0x555   :  { %7733 = vsyncpa [#allocation4 + $0x1], 1 }

</bundles_post_ra>
